<compile_context>
chip_gen: v6e
topology: v6e:2x2x1
jax: 0.10.0
libtpu: 0.0.40
codegen_flags: <defaults>
</compile_context>

<pallas_src>
import jax
import jax.numpy as jnp
from jax.experimental import pallas as pl
from jax.experimental.pallas import tpu as pltpu


# bf16 operands are preferred on a real MXU, but the sandbox runs the kernel through
# the CPU DotThunk which rejects BF16xBF16=F32 -> keep matmul operands in f32 here.
MATMUL_DTYPE = jnp.float32

_LANE = 128

_W_ORDER = ("ln1w", "ln1b", "wqkv", "bqkv", "wo", "bo",
            "ln2w", "ln2b", "wfc", "bfc", "wpj", "bpj")


def _layernorm(v, w, b, eps=1e-5):
    mu = jnp.mean(v, axis=-1, keepdims=True)
    var = jnp.mean((v - mu) ** 2, axis=-1, keepdims=True)
    return (v - mu) * jax.lax.rsqrt(var + eps) * w + b


# ----------------------------- kernel --------------------------------------- #

def _make_kernel(n_head):
    """Kernel factory: one (batch_block, layer) grid step of the transformer."""

    def kernel(x_ref, mask_ref,
               ln1w_ref, ln1b_ref, wqkv_ref, bqkv_ref, wo_ref, bo_ref,
               ln2w_ref, ln2b_ref, wfc_ref, bfc_ref, wpj_ref, bpj_ref,
               o_ref):
        layer = pl.program_id(1)

        # Layer 0 of each batch block: seed the VMEM-resident hidden state.
        @pl.when(layer == 0)
        def _():
            o_ref[...] = x_ref[...]

        x = o_ref[...]                                    # [Bt, L, D] f32, resident
        Bt, L, D = x.shape
        H = n_head
        hd = D // H
        M = Bt * L

        # ---------------- attention branch (pre-LN) ---------------- #
        h = _layernorm(x, ln1w_ref[...], ln1b_ref[...]).reshape(M, D)

        # Fused QKV: one lane-dense matmul; 1/sqrt(hd) is pre-folded into the Q part.
        qkv = jnp.dot(h.astype(MATMUL_DTYPE), wqkv_ref[...],
                      preferred_element_type=jnp.float32) + bqkv_ref[...]   # [M, 3D]

        def heads(t):                                     # [M, D] -> [Bt*H, L, hd]
            return (t.reshape(Bt, L, H, hd)
                     .transpose(0, 2, 1, 3)
                     .reshape(Bt * H, L, hd))

        q = heads(qkv[:, :D])
        k = heads(qkv[:, D:2 * D])
        v = heads(qkv[:, 2 * D:])

        # Scores (batched, leading batch dim) + additive key mask broadcast.
        s = jnp.einsum('nqc,nkc->nqk', q, k,
                       preferred_element_type=jnp.float32)                  # [Bt*H, L, L]
        s = s.reshape(Bt, H, L, L) + mask_ref[...][:, :, None, :]           # [Bt,1,1,L]

        # Softmax in f32; reciprocal on the EUP slot.
        s = s - jnp.max(s, axis=-1, keepdims=True)
        p = jnp.exp(s)
        p = p * pl.reciprocal(jnp.sum(p, axis=-1, keepdims=True), approx=True)

        ctx = jnp.einsum('nqk,nkc->nqc', p.reshape(Bt * H, L, L), v,
                         preferred_element_type=jnp.float32)                # [Bt*H, L, hd]

        # Head-concat back to [M, D] and apply ONE dense output projection.
        ctx = (ctx.reshape(Bt, H, L, hd)
                  .transpose(0, 2, 1, 3)
                  .reshape(M, D))
        attn = jnp.dot(ctx.astype(MATMUL_DTYPE), wo_ref[...],
                       preferred_element_type=jnp.float32) + bo_ref[...]    # [M, D]
        x = x + attn.reshape(Bt, L, D)

        # ---------------- MLP branch (pre-LN, QuickGELU) ---------------- #
        h2 = _layernorm(x, ln2w_ref[...], ln2b_ref[...]).reshape(M, D)
        f = jnp.dot(h2.astype(MATMUL_DTYPE), wfc_ref[...],
                    preferred_element_type=jnp.float32) + bfc_ref[...]      # [M, 4D]
        f = f * jax.nn.sigmoid(1.702 * f)
        m = jnp.dot(f.astype(MATMUL_DTYPE), wpj_ref[...],
                    preferred_element_type=jnp.float32) + bpj_ref[...]      # [M, D]

        o_ref[...] = x + m.reshape(Bt, L, D)

    return kernel


# ----------------------------- wrapper -------------------------------------- #

def _weight_spec(arr):
    """Full per-layer weight block, selected by the layer grid index."""
    zeros = (0,) * (arr.ndim - 1)
    return pl.BlockSpec((None,) + tuple(arr.shape[1:]),
                        lambda b, l, _z=zeros: (l,) + _z)


def _pick_batch_tile(batch, requested=None, target=8):
    if requested is not None:
        if batch % requested:
            raise ValueError("batch_tile must divide batch")
        return requested
    bt = min(batch, target)
    while batch % bt:
        bt -= 1
    # Keep >= 2 batch blocks when possible so the "parallel" axis can feed 2 TCs (v7x).
    while bt > 1 and batch // bt < 2:
        nbt = bt - 1
        while nbt > 1 and batch % nbt:
            nbt -= 1
        bt = nbt
    return max(bt, 1)


def _vmem_limit_bytes():
    # ~75% of physical VMEM: ~48 MiB on v7x (64 MiB/TC), ~96 MiB on v5e/v6e (128 MiB).
    try:
        return int(pltpu.get_tpu_info().vmem_capacity_bytes * 3 // 4)
    except Exception:
        return 64 * 1024 * 1024


def cross_model_clip_forward(concat_input, concat_type, attention_mask, params,
                             n_head, batch_tile=None):
    """Mirrors CrossModel_Clip.forward (eval mode). Returns (hidden, pooled_output)."""
    B, L, D = concat_input.shape
    if attention_mask is None:
        attention_mask = jnp.ones((B, L), jnp.float32)
    if concat_type is None:
        concat_type = jnp.zeros((B, L), jnp.int32)

    # Embedding add + token-type gather in plain JAX (XLA fuses this trivially).
    x = (concat_input.astype(jnp.float32)
         + params["pos_emb"][:L][None]
         + jnp.take(params["tok_type_emb"], concat_type, axis=0))

    # Pad the sequence to a lane-dense multiple of 128: padded keys get the -1e6 mask,
    # padded query rows are sliced off after the kernel.
    Lp = ((L + _LANE - 1) // _LANE) * _LANE
    mask_f = attention_mask.astype(jnp.float32)
    if Lp != L:
        x = jnp.pad(x, ((0, 0), (0, Lp - L), (0, 0)))
        mask_f = jnp.pad(mask_f, ((0, 0), (0, Lp - L)))

    # build_attention_mask: key-only additive mask, kept as [B, 1, Lp] (broadcast in-kernel).
    ext = ((1.0 - mask_f) * -1000000.0)[:, None, :]

    w = params["stacked"]
    weights = [w[name] for name in _W_ORDER]
    n_layers = w["ln1w"].shape[0]
    bt = _pick_batch_tile(B, batch_tile)

    in_specs = [
        pl.BlockSpec((bt, Lp, D), lambda b, l: (b, 0, 0)),   # embedded input block
        pl.BlockSpec((bt, 1, Lp), lambda b, l: (b, 0, 0)),   # additive key mask block
    ] + [_weight_spec(a) for a in weights]

    hidden = pl.pallas_call(
        _make_kernel(n_head),
        out_shape=jax.ShapeDtypeStruct((B, Lp, D), jnp.float32),
        grid=(B // bt, n_layers),
        in_specs=in_specs,
        # Same output block across the layer axis -> hidden state stays VMEM-resident.
        out_specs=pl.BlockSpec((bt, Lp, D), lambda b, l: (b, 0, 0)),
        compiler_params=pltpu.CompilerParams(
            dimension_semantics=("parallel", "arbitrary"),
            vmem_limit_bytes=_vmem_limit_bytes()),
    )(x, ext, *weights)

    hidden = hidden[:, :L]
    return hidden, hidden[:, 0]


# --------------------- pure-JAX reference (same numerics) -------------------- #

def _ref_forward(concat_input, concat_type, attention_mask, params, n_head):
    w = params["stacked"]
    B, L, D = concat_input.shape
    H = n_head
    hd = D // H
    mask = ((1.0 - attention_mask.astype(jnp.float32)) * -1000000.0)[:, None, None, :]

    x = (concat_input.astype(jnp.float32)
         + params["pos_emb"][:L][None]
         + jnp.take(params["tok_type_emb"], concat_type, axis=0))

    for l in range(w["ln1w"].shape[0]):
        h = _layernorm(x, w["ln1w"][l], w["ln1b"][l])
        qkv = jnp.einsum('bld,de->ble', h, w["wqkv"][l]) + w["bqkv"][l]
        q = qkv[..., :D].reshape(B, L, H, hd).transpose(0, 2, 1, 3)
        k = qkv[..., D:2 * D].reshape(B, L, H, hd).transpose(0, 2, 1, 3)
        v = qkv[..., 2 * D:].reshape(B, L, H, hd).transpose(0, 2, 1, 3)
        s = jnp.einsum('bhqc,bhkc->bhqk', q, k) + mask
        p = jax.nn.softmax(s, axis=-1)
        ctx = (jnp.einsum('bhqk,bhkc->bhqc', p, v)
               .transpose(0, 2, 1, 3).reshape(B, L, D))
        x = x + jnp.einsum('bld,de->ble', ctx, w["wo"][l]) + w["bo"][l]

        h2 = _layernorm(x, w["ln2w"][l], w["ln2b"][l])
        f = jnp.einsum('bld,df->blf', h2, w["wfc"][l]) + w["bfc"][l]
        f = f * jax.nn.sigmoid(1.702 * f)
        x = x + jnp.einsum('blf,fd->bld', f, w["wpj"][l]) + w["bpj"][l]
    return x, x[:, 0]


# ----------------------------- params --------------------------------------- #

def init_params(key, max_pos, D, type_vocab, n_layers, n_head):
    hd = D // n_head
    scale = 1.0 / float(hd) ** 0.5
    keys = jax.random.split(key, 2 + n_layers)
    per = {name: [] for name in _W_ORDER}
    for i in range(n_layers):
        ks = jax.random.split(keys[2 + i], 8)
        # PyTorch param shapes: in_proj_weight [3D, D], out_proj.weight [D, D],
        # c_fc.weight [4D, D], c_proj.weight [D, 4D]; nn.Linear computes x @ W.T + b.
        inW = 0.02 * jax.random.normal(ks[0], (3 * D, D), jnp.float32)
        inB = 0.02 * jax.random.normal(ks[1], (3 * D,), jnp.float32)
        outW = 0.02 * jax.random.normal(ks[2], (D, D), jnp.float32)
        outB = 0.02 * jax.random.normal(ks[3], (D,), jnp.float32)
        fcW = 0.02 * jax.random.normal(ks[4], (4 * D, D), jnp.float32)
        fcB = 0.02 * jax.random.normal(ks[5], (4 * D,), jnp.float32)
        pjW = 0.02 * jax.random.normal(ks[6], (D, 4 * D), jnp.float32)
        pjB = 0.02 * jax.random.normal(ks[7], (D,), jnp.float32)

        # Fused, pre-transposed QKV ([Wq.T | Wk.T | Wv.T]) with the 1/sqrt(hd)
        # score scale folded into the Q columns / bias (free on the host).
        wqkv = inW.T
        bqkv = inB.reshape(1, 3 * D)
        wqkv = wqkv.at[:, :D].multiply(scale)
        bqkv = bqkv.at[:, :D].multiply(scale)

        per["ln1w"].append(jnp.ones((1, D), jnp.float32))
        per["ln1b"].append(jnp.zeros((1, D), jnp.float32))
        per["wqkv"].append(wqkv.astype(MATMUL_DTYPE))
        per["bqkv"].append(bqkv)
        per["wo"].append(outW.T.astype(MATMUL_DTYPE))
        per["bo"].append(outB.reshape(1, D))
        per["ln2w"].append(jnp.ones((1, D), jnp.float32))
        per["ln2b"].append(jnp.zeros((1, D), jnp.float32))
        per["wfc"].append(fcW.T.astype(MATMUL_DTYPE))
        per["bfc"].append(fcB.reshape(1, 4 * D))
        per["wpj"].append(pjW.T.astype(MATMUL_DTYPE))
        per["bpj"].append(pjB.reshape(1, D))

    return {
        "pos_emb": 0.02 * jax.random.normal(keys[0], (max_pos, D), jnp.float32),
        "tok_type_emb": 0.02 * jax.random.normal(keys[1], (type_vocab, D), jnp.float32),
        "stacked": {name: jnp.stack(vals) for name, vals in per.items()},
    }


# ------------------------------- main ---------------------------------------- #

if __name__ == "__main__":
    B, L, D = 2, 8, 32
    n_head, n_layers = 4, 2
    max_pos, type_vocab = 16, 2

    key = jax.random.PRNGKey(0)
    k_par, k_in, k_type = jax.random.split(key, 3)
    params = init_params(k_par, max_pos, D, type_vocab, n_layers, n_head)

    concat_input = jax.random.normal(k_in, (B, L, D), jnp.float32)
    concat_type = jax.random.randint(k_type, (B, L), 0, type_vocab, jnp.int32)
    attention_mask = jnp.ones((B, L), jnp.float32).at[1, L - 2:].set(0.0)  # ragged mask

    forward = jax.jit(cross_model_clip_forward,
                      static_argnames=("n_head", "batch_tile"))
    hidden, pooled = forward(concat_input, concat_type, attention_mask, params,
                             n_head=n_head)
    jax.block_until_ready((hidden, pooled))

    ref_hidden, ref_pooled = _ref_forward(concat_input, concat_type,
                                          attention_mask, params, n_head)
    assert hidden.shape == (B, L, D) and pooled.shape == (B, D)
    max_err = float(jnp.max(jnp.abs(hidden - ref_hidden)))
    assert jnp.allclose(hidden, ref_hidden, rtol=1e-2, atol=1e-2), max_err
    assert jnp.allclose(pooled, ref_pooled, rtol=1e-2, atol=1e-2)

    print("KERNEL_OK")
</pallas_src>

<mosaic_0001>
module attributes {stable_mosaic.version = 11 : i64} {
  func.func @kernel(%arg0: i32, %arg1: i32, %arg2: memref<1x128x32xf32, #tpu.memory_space<vmem>>, %arg3: memref<1x1x128xf32, #tpu.memory_space<vmem>>, %arg4: memref<1x1x32xf32, #tpu.memory_space<vmem>>, %arg5: memref<1x1x32xf32, #tpu.memory_space<vmem>>, %arg6: memref<1x32x96xf32, #tpu.memory_space<vmem>>, %arg7: memref<1x1x96xf32, #tpu.memory_space<vmem>>, %arg8: memref<1x32x32xf32, #tpu.memory_space<vmem>>, %arg9: memref<1x1x32xf32, #tpu.memory_space<vmem>>, %arg10: memref<1x1x32xf32, #tpu.memory_space<vmem>>, %arg11: memref<1x1x32xf32, #tpu.memory_space<vmem>>, %arg12: memref<1x32x128xf32, #tpu.memory_space<vmem>>, %arg13: memref<1x1x128xf32, #tpu.memory_space<vmem>>, %arg14: memref<1x128x32xf32, #tpu.memory_space<vmem>>, %arg15: memref<1x1x32xf32, #tpu.memory_space<vmem>>, %arg16: memref<1x128x32xf32, #tpu.memory_space<vmem>>) attributes {dimension_semantics = [#tpu.dimension_semantics<parallel>, #tpu.dimension_semantics<arbitrary>], iteration_bounds = array<i64: 2, 2>, scalar_prefetch = 0 : i64, scratch_operands = 0 : i64, tpu.core_type = #tpu.core_type<tc>, window_params = [{transform_indices = @transform_0, window_bounds = array<i64: 1, 128, 32>}, {transform_indices = @transform_1, window_bounds = array<i64: 1, 1, 128>}, {transform_indices = @transform_2, window_bounds = array<i64: 1, 1, 32>}, {transform_indices = @transform_3, window_bounds = array<i64: 1, 1, 32>}, {transform_indices = @transform_4, window_bounds = array<i64: 1, 32, 96>}, {transform_indices = @transform_5, window_bounds = array<i64: 1, 1, 96>}, {transform_indices = @transform_6, window_bounds = array<i64: 1, 32, 32>}, {transform_indices = @transform_7, window_bounds = array<i64: 1, 1, 32>}, {transform_indices = @transform_8, window_bounds = array<i64: 1, 1, 32>}, {transform_indices = @transform_9, window_bounds = array<i64: 1, 1, 32>}, {transform_indices = @transform_10, window_bounds = array<i64: 1, 32, 128>}, {transform_indices = @transform_11, window_bounds = array<i64: 1, 1, 128>}, {transform_indices = @transform_12, window_bounds = array<i64: 1, 128, 32>}, {transform_indices = @transform_13, window_bounds = array<i64: 1, 1, 32>}, {transform_indices = @transform_14, window_bounds = array<i64: 1, 128, 32>}]} {
    %c0_i32 = arith.constant 0 : i32
    %0 = arith.cmpi eq, %arg1, %c0_i32 : i32
    %1 = arith.extui %0 : i1 to i32
    %c0_i32_0 = arith.constant 0 : i32
    %2 = arith.cmpi ne, %1, %c0_i32_0 : i32
    scf.if %2 {
      %c0_64 = arith.constant 0 : index
      %c0_65 = arith.constant 0 : index
      %c0_66 = arith.constant 0 : index
      %136 = vector.load %arg2[%c0_64, %c0_65, %c0_66] : memref<1x128x32xf32, #tpu.memory_space<vmem>>, vector<1x128x32xf32>
      %c0_67 = arith.constant 0 : index
      %c0_68 = arith.constant 0 : index
      %c0_69 = arith.constant 0 : index
      %137 = vector.load %arg16[%c0_67, %c0_68, %c0_69] : memref<1x128x32xf32, #tpu.memory_space<vmem>>, vector<1x128x32xf32>
      tpu.vector_store %arg16[%c0_67, %c0_68, %c0_69], %136 {strides = array<i32>} : memref<1x128x32xf32, #tpu.memory_space<vmem>>, vector<1x128x32xf32>,
    } else {
    }
    %c0 = arith.constant 0 : index
    %c0_1 = arith.constant 0 : index
    %c0_2 = arith.constant 0 : index
    %3 = vector.load %arg16[%c0, %c0_1, %c0_2] : memref<1x128x32xf32, #tpu.memory_space<vmem>>, vector<1x128x32xf32>
    %c0_3 = arith.constant 0 : index
    %c0_4 = arith.constant 0 : index
    %c0_5 = arith.constant 0 : index
    %4 = vector.load %arg4[%c0_3, %c0_4, %c0_5] : memref<1x1x32xf32, #tpu.memory_space<vmem>>, vector<1x1x32xf32>
    %5 = vector.shape_cast %4 : vector<1x1x32xf32> to vector<1x32xf32>
    %c0_6 = arith.constant 0 : index
    %c0_7 = arith.constant 0 : index
    %c0_8 = arith.constant 0 : index
    %6 = vector.load %arg5[%c0_6, %c0_7, %c0_8] : memref<1x1x32xf32, #tpu.memory_space<vmem>>, vector<1x1x32xf32>
    %7 = vector.shape_cast %6 : vector<1x1x32xf32> to vector<1x32xf32>
    %cst = arith.constant dense<0.000000e+00> : vector<1x128xf32>
    %8 = vector.multi_reduction <add>, %3, %cst [2] : vector<1x128x32xf32> to vector<1x128xf32>
    %9 = vector.shape_cast %8 : vector<1x128xf32> to vector<1x128x1xf32>
    %cst_9 = arith.constant 3.200000e+01 : f32
    %10 = vector.broadcast %cst_9 : f32 to vector<1x128x1xf32>
    %11 = arith.divf %9, %10 : vector<1x128x1xf32>
    %12 = vector.broadcast %11 : vector<1x128x1xf32> to vector<1x128x32xf32>
    %13 = arith.subf %3, %12 : vector<1x128x32xf32>
    %14 = arith.mulf %13, %13 : vector<1x128x32xf32>
    %cst_10 = arith.constant dense<0.000000e+00> : vector<1x128xf32>
    %15 = vector.multi_reduction <add>, %14, %cst_10 [2] : vector<1x128x32xf32> to vector<1x128xf32>
    %16 = vector.shape_cast %15 : vector<1x128xf32> to vector<1x128x1xf32>
    %cst_11 = arith.constant 3.200000e+01 : f32
    %17 = vector.broadcast %cst_11 : f32 to vector<1x128x1xf32>
    %18 = arith.divf %16, %17 : vector<1x128x1xf32>
    %19 = vector.broadcast %11 : vector<1x128x1xf32> to vector<1x128x32xf32>
    %20 = arith.subf %3, %19 : vector<1x128x32xf32>
    %cst_12 = arith.constant 9.99999974E-6 : f32
    %21 = vector.broadcast %cst_12 : f32 to vector<1x128x1xf32>
    %22 = arith.addf %18, %21 : vector<1x128x1xf32>
    %23 = math.rsqrt %22 : vector<1x128x1xf32>
    %24 = vector.broadcast %23 : vector<1x128x1xf32> to vector<1x128x32xf32>
    %25 = arith.mulf %20, %24 : vector<1x128x32xf32>
    %26 = vector.shape_cast %5 : vector<1x32xf32> to vector<1x1x32xf32>
    %27 = vector.broadcast %26 : vector<1x1x32xf32> to vector<1x128x32xf32>
    %28 = arith.mulf %25, %27 : vector<1x128x32xf32>
    %29 = vector.shape_cast %7 : vector<1x32xf32> to vector<1x1x32xf32>
    %30 = vector.broadcast %29 : vector<1x1x32xf32> to vector<1x128x32xf32>
    %31 = arith.addf %28, %30 : vector<1x128x32xf32>
    %32 = vector.shape_cast %31 : vector<1x128x32xf32> to vector<128x32xf32>
    %c0_13 = arith.constant 0 : index
    %c0_14 = arith.constant 0 : index
    %c0_15 = arith.constant 0 : index
    %33 = vector.load %arg6[%c0_13, %c0_14, %c0_15] : memref<1x32x96xf32, #tpu.memory_space<vmem>>, vector<1x32x96xf32>
    %34 = vector.shape_cast %33 : vector<1x32x96xf32> to vector<32x96xf32>
    %cst_16 = arith.constant dense<0.000000e+00> : vector<128x96xf32>
    %35 = tpu.matmul %32, %34, %cst_16 {dimension_numbers = #tpu.dot_dimension_numbers<[1], [0], [0], [1], [0, 0, 1, 1], [], []>} : vector<128x32xf32>, vector<32x96xf32>, vector<128x96xf32> -> vector<128x96xf32>
    %c0_17 = arith.constant 0 : index
    %c0_18 = arith.constant 0 : index
    %c0_19 = arith.constant 0 : index
    %36 = vector.load %arg7[%c0_17, %c0_18, %c0_19] : memref<1x1x96xf32, #tpu.memory_space<vmem>>, vector<1x1x96xf32>
    %37 = vector.shape_cast %36 : vector<1x1x96xf32> to vector<1x96xf32>
    %38 = vector.broadcast %37 : vector<1x96xf32> to vector<128x96xf32>
    %39 = arith.addf %35, %38 : vector<128x96xf32>
    %40 = vector.extract_strided_slice %39 {offsets = [0, 0], sizes = [128, 32], strides = [1, 1]} : vector<128x96xf32> to vector<128x32xf32>
    %41 = vector.shape_cast %40 : vector<128x32xf32> to vector<1x128x4x8xf32>
    %42 = tpu.transpose %41, [0, 2, 1, 3] : vector<1x128x4x8xf32> -> vector<1x4x128x8xf32>
    %43 = vector.shape_cast %42 : vector<1x4x128x8xf32> to vector<4x128x8xf32>
    %44 = vector.extract_strided_slice %39 {offsets = [0, 32], sizes = [128, 32], strides = [1, 1]} : vector<128x96xf32> to vector<128x32xf32>
    %45 = vector.shape_cast %44 : vector<128x32xf32> to vector<1x128x4x8xf32>
    %46 = tpu.transpose %45, [0, 2, 1, 3] : vector<1x128x4x8xf32> -> vector<1x4x128x8xf32>
    %47 = vector.shape_cast %46 : vector<1x4x128x8xf32> to vector<4x128x8xf32>
    %48 = vector.extract_strided_slice %39 {offsets = [0, 64], sizes = [128, 32], strides = [1, 1]} : vector<128x96xf32> to vector<128x32xf32>
    %49 = vector.shape_cast %48 : vector<128x32xf32> to vector<1x128x4x8xf32>
    %50 = tpu.transpose %49, [0, 2, 1, 3] : vector<1x128x4x8xf32> -> vector<1x4x128x8xf32>
    %51 = vector.shape_cast %50 : vector<1x4x128x8xf32> to vector<4x128x8xf32>
    "tpu.trace_start"() <{level = 10 : i32, message = "nqc,nkc->nqk"}> : () -> ()
    %cst_20 = arith.constant dense<0.000000e+00> : vector<4x128x128xf32>
    %52 = tpu.matmul %43, %47, %cst_20 {dimension_numbers = #tpu.dot_dimension_numbers<[2], [2], [1], [1], [0, 0, 0, 1, 1, 1], [0], [0]>} : vector<4x128x8xf32>, vector<4x128x8xf32>, vector<4x128x128xf32> -> vector<4x128x128xf32>
    "tpu.trace_stop"() : () -> ()
    %53 = vector.shape_cast %52 : vector<4x128x128xf32> to vector<1x4x128x128xf32>
    %c0_21 = arith.constant 0 : index
    %c0_22 = arith.constant 0 : index
    %c0_23 = arith.constant 0 : index
    %54 = vector.load %arg3[%c0_21, %c0_22, %c0_23] : memref<1x1x128xf32, #tpu.memory_space<vmem>>, vector<1x1x128xf32>
    %55 = vector.shape_cast %54 : vector<1x1x128xf32> to vector<1x1x1x128xf32>
    %56 = vector.broadcast %55 : vector<1x1x1x128xf32> to vector<1x4x128x128xf32>
    %57 = arith.addf %53, %56 : vector<1x4x128x128xf32>
    %cst_24 = arith.constant dense<0xFF800000> : vector<1x4x128xf32>
    %58 = vector.multi_reduction <maximumf>, %57, %cst_24 [3] : vector<1x4x128x128xf32> to vector<1x4x128xf32>
    %59 = vector.shape_cast %58 : vector<1x4x128xf32> to vector<1x4x128x1xf32>
    %60 = vector.broadcast %59 : vector<1x4x128x1xf32> to vector<1x4x128x128xf32>
    %61 = arith.subf %57, %60 : vector<1x4x128x128xf32>
    %62 = math.exp %61 : vector<1x4x128x128xf32>
    %cst_25 = arith.constant dense<0.000000e+00> : vector<1x4x128xf32>
    %63 = vector.multi_reduction <add>, %62, %cst_25 [3] : vector<1x4x128x128xf32> to vector<1x4x128xf32>
    %64 = vector.shape_cast %63 : vector<1x4x128xf32> to vector<1x4x128x1xf32>
    %65 = tpu.reciprocal %64 {approx = true} : vector<1x4x128x1xf32> -> vector<1x4x128x1xf32>
    %66 = vector.broadcast %65 : vector<1x4x128x1xf32> to vector<1x4x128x128xf32>
    %67 = arith.mulf %62, %66 : vector<1x4x128x128xf32>
    %68 = vector.shape_cast %67 : vector<1x4x128x128xf32> to vector<4x128x128xf32>
    "tpu.trace_start"() <{level = 10 : i32, message = "nqk,nkc->nqc"}> : () -> ()
    %cst_26 = arith.constant dense<0.000000e+00> : vector<4x128x8xf32>
    %69 = tpu.matmul %68, %51, %cst_26 {dimension_numbers = #tpu.dot_dimension_numbers<[2], [1], [1], [2], [0, 0, 0, 1, 1, 2], [0], [0]>} : vector<4x128x128xf32>, vector<4x128x8xf32>, vector<4x128x8xf32> -> vector<4x128x8xf32>
    "tpu.trace_stop"() : () -> ()
    %70 = vector.shape_cast %69 : vector<4x128x8xf32> to vector<1x4x128x8xf32>
    %71 = tpu.transpose %70, [0, 2, 1, 3] : vector<1x4x128x8xf32> -> vector<1x128x4x8xf32>
    %72 = vector.shape_cast %71 : vector<1x128x4x8xf32> to vector<128x32xf32>
    %c0_27 = arith.constant 0 : index
    %c0_28 = arith.constant 0 : index
    %c0_29 = arith.constant 0 : index
    %73 = vector.load %arg8[%c0_27, %c0_28, %c0_29] : memref<1x32x32xf32, #tpu.memory_space<vmem>>, vector<1x32x32xf32>
    %74 = vector.shape_cast %73 : vector<1x32x32xf32> to vector<32x32xf32>
    %cst_30 = arith.constant dense<0.000000e+00> : vector<128x32xf32>
    %75 = tpu.matmul %72, %74, %cst_30 {dimension_numbers = #tpu.dot_dimension_numbers<[1], [0], [0], [1], [0, 0, 1, 1], [], []>} : vector<128x32xf32>, vector<32x32xf32>, vector<128x32xf32> -> vector<128x32xf32>
    %c0_31 = arith.constant 0 : index
    %c0_32 = arith.constant 0 : index
    %c0_33 = arith.constant 0 : index
    %76 = vector.load %arg9[%c0_31, %c0_32, %c0_33] : memref<1x1x32xf32, #tpu.memory_space<vmem>>, vector<1x1x32xf32>
    %77 = vector.shape_cast %76 : vector<1x1x32xf32> to vector<1x32xf32>
    %78 = vector.broadcast %77 : vector<1x32xf32> to vector<128x32xf32>
    %79 = arith.addf %75, %78 : vector<128x32xf32>
    %80 = vector.shape_cast %79 : vector<128x32xf32> to vector<1x128x32xf32>
    %81 = arith.addf %3, %80 : vector<1x128x32xf32>
    %c0_34 = arith.constant 0 : index
    %c0_35 = arith.constant 0 : index
    %c0_36 = arith.constant 0 : index
    %82 = vector.load %arg10[%c0_34, %c0_35, %c0_36] : memref<1x1x32xf32, #tpu.memory_space<vmem>>, vector<1x1x32xf32>
    %83 = vector.shape_cast %82 : vector<1x1x32xf32> to vector<1x32xf32>
    %c0_37 = arith.constant 0 : index
    %c0_38 = arith.constant 0 : index
    %c0_39 = arith.constant 0 : index
    %84 = vector.load %arg11[%c0_37, %c0_38, %c0_39] : memref<1x1x32xf32, #tpu.memory_space<vmem>>, vector<1x1x32xf32>
    %85 = vector.shape_cast %84 : vector<1x1x32xf32> to vector<1x32xf32>
    %cst_40 = arith.constant dense<0.000000e+00> : vector<1x128xf32>
    %86 = vector.multi_reduction <add>, %81, %cst_40 [2] : vector<1x128x32xf32> to vector<1x128xf32>
    %87 = vector.shape_cast %86 : vector<1x128xf32> to vector<1x128x1xf32>
    %cst_41 = arith.constant 3.200000e+01 : f32
    %88 = vector.broadcast %cst_41 : f32 to vector<1x128x1xf32>
    %89 = arith.divf %87, %88 : vector<1x128x1xf32>
    %90 = vector.broadcast %89 : vector<1x128x1xf32> to vector<1x128x32xf32>
    %91 = arith.subf %81, %90 : vector<1x128x32xf32>
    %92 = arith.mulf %91, %91 : vector<1x128x32xf32>
    %cst_42 = arith.constant dense<0.000000e+00> : vector<1x128xf32>
    %93 = vector.multi_reduction <add>, %92, %cst_42 [2] : vector<1x128x32xf32> to vector<1x128xf32>
    %94 = vector.shape_cast %93 : vector<1x128xf32> to vector<1x128x1xf32>
    %cst_43 = arith.constant 3.200000e+01 : f32
    %95 = vector.broadcast %cst_43 : f32 to vector<1x128x1xf32>
    %96 = arith.divf %94, %95 : vector<1x128x1xf32>
    %97 = vector.broadcast %89 : vector<1x128x1xf32> to vector<1x128x32xf32>
    %98 = arith.subf %81, %97 : vector<1x128x32xf32>
    %cst_44 = arith.constant 9.99999974E-6 : f32
    %99 = vector.broadcast %cst_44 : f32 to vector<1x128x1xf32>
    %100 = arith.addf %96, %99 : vector<1x128x1xf32>
    %101 = math.rsqrt %100 : vector<1x128x1xf32>
    %102 = vector.broadcast %101 : vector<1x128x1xf32> to vector<1x128x32xf32>
    %103 = arith.mulf %98, %102 : vector<1x128x32xf32>
    %104 = vector.shape_cast %83 : vector<1x32xf32> to vector<1x1x32xf32>
    %105 = vector.broadcast %104 : vector<1x1x32xf32> to vector<1x128x32xf32>
    %106 = arith.mulf %103, %105 : vector<1x128x32xf32>
    %107 = vector.shape_cast %85 : vector<1x32xf32> to vector<1x1x32xf32>
    %108 = vector.broadcast %107 : vector<1x1x32xf32> to vector<1x128x32xf32>
    %109 = arith.addf %106, %108 : vector<1x128x32xf32>
    %110 = vector.shape_cast %109 : vector<1x128x32xf32> to vector<128x32xf32>
    %c0_45 = arith.constant 0 : index
    %c0_46 = arith.constant 0 : index
    %c0_47 = arith.constant 0 : index
    %111 = vector.load %arg12[%c0_45, %c0_46, %c0_47] : memref<1x32x128xf32, #tpu.memory_space<vmem>>, vector<1x32x128xf32>
    %112 = vector.shape_cast %111 : vector<1x32x128xf32> to vector<32x128xf32>
    %cst_48 = arith.constant dense<0.000000e+00> : vector<128x128xf32>
    %113 = tpu.matmul %110, %112, %cst_48 {dimension_numbers = #tpu.dot_dimension_numbers<[1], [0], [0], [1], [0, 0, 1, 1], [], []>} : vector<128x32xf32>, vector<32x128xf32>, vector<128x128xf32> -> vector<128x128xf32>
    %c0_49 = arith.constant 0 : index
    %c0_50 = arith.constant 0 : index
    %c0_51 = arith.constant 0 : index
    %114 = vector.load %arg13[%c0_49, %c0_50, %c0_51] : memref<1x1x128xf32, #tpu.memory_space<vmem>>, vector<1x1x128xf32>
    %115 = vector.shape_cast %114 : vector<1x1x128xf32> to vector<1x128xf32>
    %116 = vector.broadcast %115 : vector<1x128xf32> to vector<128x128xf32>
    %117 = arith.addf %113, %116 : vector<128x128xf32>
    %cst_52 = arith.constant 1.702000e+00 : f32
    %118 = vector.broadcast %cst_52 : f32 to vector<128x128xf32>
    %119 = arith.mulf %118, %117 : vector<128x128xf32>
    %120 = arith.negf %119 : vector<128x128xf32>
    %121 = math.exp %120 : vector<128x128xf32>
    %cst_53 = arith.constant 1.000000e+00 : f32
    %122 = vector.broadcast %cst_53 : f32 to vector<128x128xf32>
    %123 = arith.addf %122, %121 : vector<128x128xf32>
    %124 = arith.divf %122, %123 : vector<128x128xf32>
    %125 = arith.mulf %117, %124 : vector<128x128xf32>
    %c0_54 = arith.constant 0 : index
    %c0_55 = arith.constant 0 : index
    %c0_56 = arith.constant 0 : index
    %126 = vector.load %arg14[%c0_54, %c0_55, %c0_56] : memref<1x128x32xf32, #tpu.memory_space<vmem>>, vector<1x128x32xf32>
    %127 = vector.shape_cast %126 : vector<1x128x32xf32> to vector<128x32xf32>
    %cst_57 = arith.constant dense<0.000000e+00> : vector<128x32xf32>
    %128 = tpu.matmul %125, %127, %cst_57 {dimension_numbers = #tpu.dot_dimension_numbers<[1], [0], [0], [1], [0, 0, 1, 1], [], []>} : vector<128x128xf32>, vector<128x32xf32>, vector<128x32xf32> -> vector<128x32xf32>
    %c0_58 = arith.constant 0 : index
    %c0_59 = arith.constant 0 : index
    %c0_60 = arith.constant 0 : index
    %129 = vector.load %arg15[%c0_58, %c0_59, %c0_60] : memref<1x1x32xf32, #tpu.memory_space<vmem>>, vector<1x1x32xf32>
    %130 = vector.shape_cast %129 : vector<1x1x32xf32> to vector<1x32xf32>
    %131 = vector.broadcast %130 : vector<1x32xf32> to vector<128x32xf32>
    %132 = arith.addf %128, %131 : vector<128x32xf32>
    %133 = vector.shape_cast %132 : vector<128x32xf32> to vector<1x128x32xf32>
    %134 = arith.addf %81, %133 : vector<1x128x32xf32>
    %c0_61 = arith.constant 0 : index
    %c0_62 = arith.constant 0 : index
    %c0_63 = arith.constant 0 : index
    %135 = vector.load %arg16[%c0_61, %c0_62, %c0_63] : memref<1x128x32xf32, #tpu.memory_space<vmem>>, vector<1x128x32xf32>
    tpu.vector_store %arg16[%c0_61, %c0_62, %c0_63], %134 {strides = array<i32>} : memref<1x128x32xf32, #tpu.memory_space<vmem>>, vector<1x128x32xf32>,
    return
  }
  func.func @transform_0(%arg0: i32, %arg1: i32) -> (i32, i32, i32) {
    %c0_i32 = arith.constant 0 : i32
    %c0_i32_0 = arith.constant 0 : i32
    %c0_i32_1 = arith.constant 0 : i32
    return %arg0, %c0_i32, %c0_i32_0 : i32, i32, i32
  }
  func.func @transform_1(%arg0: i32, %arg1: i32) -> (i32, i32, i32) {
    %c0_i32 = arith.constant 0 : i32
    %c0_i32_0 = arith.constant 0 : i32
    %c0_i32_1 = arith.constant 0 : i32
    return %arg0, %c0_i32, %c0_i32_0 : i32, i32, i32
  }
  func.func @transform_2(%arg0: i32, %arg1: i32) -> (i32, i32, i32) {
    %c0_i32 = arith.constant 0 : i32
    %c0_i32_0 = arith.constant 0 : i32
    %c0_i32_1 = arith.constant 0 : i32
    return %arg1, %c0_i32, %c0_i32_0 : i32, i32, i32
  }
  func.func @transform_3(%arg0: i32, %arg1: i32) -> (i32, i32, i32) {
    %c0_i32 = arith.constant 0 : i32
    %c0_i32_0 = arith.constant 0 : i32
    %c0_i32_1 = arith.constant 0 : i32
    return %arg1, %c0_i32, %c0_i32_0 : i32, i32, i32
  }
  func.func @transform_4(%arg0: i32, %arg1: i32) -> (i32, i32, i32) {
    %c0_i32 = arith.constant 0 : i32
    %c0_i32_0 = arith.constant 0 : i32
    %c0_i32_1 = arith.constant 0 : i32
    return %arg1, %c0_i32, %c0_i32_0 : i32, i32, i32
  }
  func.func @transform_5(%arg0: i32, %arg1: i32) -> (i32, i32, i32) {
    %c0_i32 = arith.constant 0 : i32
    %c0_i32_0 = arith.constant 0 : i32
    %c0_i32_1 = arith.constant 0 : i32
    return %arg1, %c0_i32, %c0_i32_0 : i32, i32, i32
  }
  func.func @transform_6(%arg0: i32, %arg1: i32) -> (i32, i32, i32) {
    %c0_i32 = arith.constant 0 : i32
    %c0_i32_0 = arith.constant 0 : i32
    %c0_i32_1 = arith.constant 0 : i32
    return %arg1, %c0_i32, %c0_i32_0 : i32, i32, i32
  }
  func.func @transform_7(%arg0: i32, %arg1: i32) -> (i32, i32, i32) {
    %c0_i32 = arith.constant 0 : i32
    %c0_i32_0 = arith.constant 0 : i32
    %c0_i32_1 = arith.constant 0 : i32
    return %arg1, %c0_i32, %c0_i32_0 : i32, i32, i32
  }
  func.func @transform_8(%arg0: i32, %arg1: i32) -> (i32, i32, i32) {
    %c0_i32 = arith.constant 0 : i32
    %c0_i32_0 = arith.constant 0 : i32
    %c0_i32_1 = arith.constant 0 : i32
    return %arg1, %c0_i32, %c0_i32_0 : i32, i32, i32
  }
  func.func @transform_9(%arg0: i32, %arg1: i32) -> (i32, i32, i32) {
    %c0_i32 = arith.constant 0 : i32
    %c0_i32_0 = arith.constant 0 : i32
    %c0_i32_1 = arith.constant 0 : i32
    return %arg1, %c0_i32, %c0_i32_0 : i32, i32, i32
  }
  func.func @transform_10(%arg0: i32, %arg1: i32) -> (i32, i32, i32) {
    %c0_i32 = arith.constant 0 : i32
    %c0_i32_0 = arith.constant 0 : i32
    %c0_i32_1 = arith.constant 0 : i32
    return %arg1, %c0_i32, %c0_i32_0 : i32, i32, i32
  }
  func.func @transform_11(%arg0: i32, %arg1: i32) -> (i32, i32, i32) {
    %c0_i32 = arith.constant 0 : i32
    %c0_i32_0 = arith.constant 0 : i32
    %c0_i32_1 = arith.constant 0 : i32
    return %arg1, %c0_i32, %c0_i32_0 : i32, i32, i32
  }
  func.func @transform_12(%arg0: i32, %arg1: i32) -> (i32, i32, i32) {
    %c0_i32 = arith.constant 0 : i32
    %c0_i32_0 = arith.constant 0 : i32
    %c0_i32_1 = arith.constant 0 : i32
    return %arg1, %c0_i32, %c0_i32_0 : i32, i32, i32
  }
  func.func @transform_13(%arg0: i32, %arg1: i32) -> (i32, i32, i32) {
    %c0_i32 = arith.constant 0 : i32
    %c0_i32_0 = arith.constant 0 : i32
    %c0_i32_1 = arith.constant 0 : i32
    return %arg1, %c0_i32, %c0_i32_0 : i32, i32, i32
  }
  func.func @transform_14(%arg0: i32, %arg1: i32) -> (i32, i32, i32) {
    %c0_i32 = arith.constant 0 : i32
    %c0_i32_0 = arith.constant 0 : i32
    %c0_i32_1 = arith.constant 0 : i32
    return %arg0, %c0_i32, %c0_i32_0 : i32, i32, i32
  }
}

</mosaic_0001>

<bundles_post_ra>
// kernel: cross_model_clip_forward.1
= control target key start
LH: loop header
LB: loop body
LE: loop exit
PB: predicated region body
PF: predicated region fallthrough
CT: control target
= control target key end

     0   :  { %s15992_s29 = smov 0   ;;  %s15994_s30 = smov 0   ;;  %s22205_s0 = inlined_call_operand.vmem [shape: f32[2,128,32], index: 0, kind: input, shape index: {}]   ;;  %s22206_s1 = inlined_call_operand.vmem [shape: f32[2,1,128], index: 1, kind: input, shape index: {}]   ;;  %s22207_s2 = inlined_call_operand.vmem [shape: f32[2,1,32], index: 2, kind: input, shape index: {}]   ;;  %s22208_s3 = inlined_call_operand.vmem [shape: f32[2,1,32], index: 3, kind: input, shape index: {}]   ;;  %s22209_s4 = inlined_call_operand.vmem [shape: f32[2,32,96], index: 4, kind: input, shape index: {}]   ;;  %s22210_s5 = inlined_call_operand.vmem [shape: f32[2,1,96], index: 5, kind: input, shape index: {}]   ;;  %s22211_s6 = inlined_call_operand.vmem [shape: f32[2,32,32], index: 6, kind: input, shape index: {}]   ;;  %s22212_s7 = inlined_call_operand.vmem [shape: f32[2,1,32], index: 7, kind: input, shape index: {}]   ;;  %s22213_s8 = inlined_call_operand.vmem [shape: f32[2,1,32], index: 8, kind: input, shape index: {}]   ;;  %s22214_s9 = inlined_call_operand.vmem [shape: f32[2,1,32], index: 9, kind: input, shape index: {}]   ;;  %s22215_s10 = inlined_call_operand.vmem [shape: f32[2,32,128], index: 10, kind: input, shape index: {}]   ;;  %s22216_s11 = inlined_call_operand.vmem [shape: f32[2,1,128], index: 11, kind: input, shape index: {}]   ;;  %s22217_s12 = inlined_call_operand.vmem [shape: f32[2,128,32], index: 12, kind: input, shape index: {}]   ;;  %s22218_s13 = inlined_call_operand.vmem [shape: f32[2,1,32], index: 13, kind: input, shape index: {}]   ;;  %s22219_s14 = inlined_call_operand.vmem [shape: f32[2,128,32], index: 14, kind: output, shape index: {}]  }
   0x1   :  { %22603 = sst [smem:[#allocation129_spill]] %s22205_s0  ;;  %s15996_s15 = smov 0  }
   0x2   :  { %22604 = sst [smem:[#allocation130_spill]] %s22206_s1  ;;  %s15998_s16 = smov 0  }
   0x3   :  { %22605 = sst [smem:[#allocation131_spill]] %s22209_s4  ;;  %s16000_s17 = smov 0  }
   0x4   :  { %22606 = sst [smem:[#allocation132_spill]] %s22211_s6 }
   0x5   :  { %22607 = sst [smem:[#allocation133_spill]] %s22212_s7 }
   0x6   :  { %22608 = sst [smem:[#allocation134_spill]] %s22213_s8 }
   0x7   :  { %22609 = sst [smem:[#allocation135_spill]] %s22217_s12 }
   0x8   :  { %22610 = sst [smem:[#allocation136_spill]] %s22218_s13 }
   0x9   :  { %22611 = sst [smem:[#allocation137_spill]] %s22219_s14 }
   0xa LB: > { %22612 = sst [smem:[#allocation2_spill]] %s15889_s29  ;;  %s33_s18 = sadd.s32 1, %s15897_s15  ;;  %s15905_s17 = sphi %s16000_s17, %s24_s17   ;;  %s15901_s16 = sphi %s15998_s16, %s23354_s16   ;;  %s15897_s15 = sphi %s15996_s15, %s23353_s15   ;;  %s15893_s30 = sphi %s15994_s30, %s23352_s30   ;;  %s15889_s29 = sphi %s15992_s29, %s23351_s29  }
   0xb   : > { %22613 = sst [smem:[#allocation3_spill]] %s15897_s15  ;;  %s36_s19 = sadd.s32 1, %s15901_s16 }
   0xc   : > { %22614 = sst [smem:[#allocation4_spill]] %s15901_s16  ;;  %p34_p0 = scmp.ge.s32.totalorder %s33_s18, 2 }
   0xd   : > { %22615 = sst [smem:[#allocation5_spill]] %s15905_s17  ;;  %p14086_p1 = scmp.ge.s32.totalorder %s15905_s17, 1 }
   0xe   : > { %p536_p2 = scmp.lt.s32.totalorder %s15905_s17, 5  ;;  %s23356_s18 = smov (%p34_p0, %s33_s18), 0 }
   0xf   : > { %22616 = sst [smem:[#allocation6_spill]] %s23356_s18  ;;  %s23358_s19 = smov (!%p34_p0, %s36_s19), %s15901_s16 }
  0x10   : > { %p537_p3 = pnand %p14086_p1, %p536_p2  ;;  %p38_p4 = scmp.ge.s32.totalorder %s23358_s19, 2 }
  0x12   : > { %s23360_s19 = smov (%p38_p4, %s23358_s19), 0  ;;  %540 = sbr.rel (%p537_p3) target bundleno = 2995 (0xbb3), region = 76 }
  0x13   : > { %22617 = sst [smem:[#allocation7_spill]] %s23360_s19 }
  0x17   : > { %p629_p5 = scmp.lt.s32.totalorder %s15893_s30, 1  ;;  %p637_p6 = scmp.lt.s32.totalorder %s15889_s29, 1 }
  0x18   : > { %s22619_s0 = sld [smem:[#allocation129_spill]] }
  0x19   : > { %s23362_s30 = smov (!%p629_p5, %s15893_s30), 1  ;;  %s22620_s4 = sld [smem:[#allocation131_spill]] }
  0x1a   : > { %s16028_s20 = scalar_select %p637_p6, %s15889_s29, 1 }
  0x1b   : > { %s14431_s21 = sshll.u32 %s23362_s30, 7  ;;  %s22621_s6 = sld [smem:[#allocation132_spill]] }
  0x1c   : > { %s14432_s29 = sshll.u32 %s16028_s20, 5  ;;  %s672_s25 = scalar_lea.vmem %s22216_s11, %s16028_s20 }
  0x1d   : > { %s16078_s23 = scalar_lea.vmem %s22215_s10, %s14432_s29  ;;  %s22624_s15 = sld [smem:[#allocation136_spill]] }
  0x1e   : > { %s16038_s27 = scalar_lea.vmem %s22619_s0, %s14431_s21  ;;  %s22625_s18 = sld [smem:[#allocation135_spill]] }
  0x1f   : > { %s16052_s13 = scalar_lea.vmem %s22620_s4, %s14432_s29  ;;  %s22626_s4 = sld [smem:[#allocation137_spill]] }
  0x21   : > { %s16061_s0 = scalar_lea.vmem %s22621_s6, %s14432_s29  ;;  %s14435_s6 = sshll.u32 %s16028_s20, 7 }
  0x22   : > { %s22627_s29 = sld [smem:[#allocation2_spill]] }
  0x23   : > { %s680_s7 = scalar_lea.vmem %s22624_s15, %s16028_s20 }
  0x24   : > { %s16092_s8 = scalar_lea.vmem %s22625_s18, %s14435_s6 }
  0x25   : > { %s16097_s1 = scalar_lea.vmem %s22626_s4, %s14431_s21 }
  0x28   : > { %p14099_p7 = scmp.ne.s32.totalorder %s22627_s29, 0 }
  0x2a   : > { %689 = sbr.rel (%p14099_p7) target bundleno = 56 (0x38), region = 80 }
  0x2f   : > { %v690_v0 = vld [vmem:[%s16038_s27] sm:$0xff]  ;;  %vm706_vm0 = vcmask 261120   ;;  %v691_v1 = vld [vmem:[%s16038_s27 + $0x8] sm:$0xff]  ;;  %v692_v2 = vld [vmem:[%s16038_s27 + $0x10] sm:$0xff] }
  0x30   : > { %707 = vst.msk [vmem:[%s16097_s1] sm:$0xff] %vm706_vm0, %v690_v0  ;;  %708 = vst.msk [vmem:[%s16097_s1 + $0x8] sm:$0xff] %vm706_vm0, %v691_v1  ;;  %v693_v3 = vld [vmem:[%s16038_s27 + $0x18] sm:$0xff]  ;;  %v694_v4 = vld [vmem:[%s16038_s27 + $0x20] sm:$0xff] }
  0x31   : > { %709 = vst.msk [vmem:[%s16097_s1 + $0x10] sm:$0xff] %vm706_vm0, %v692_v2  ;;  %v695_v5 = vld [vmem:[%s16038_s27 + $0x28] sm:$0xff]  ;;  %710 = vst.msk [vmem:[%s16097_s1 + $0x18] sm:$0xff] %vm706_vm0, %v693_v3  ;;  %v696_v6 = vld [vmem:[%s16038_s27 + $0x30] sm:$0xff] }
  0x32   : > { %711 = vst.msk [vmem:[%s16097_s1 + $0x20] sm:$0xff] %vm706_vm0, %v694_v4  ;;  %712 = vst.msk [vmem:[%s16097_s1 + $0x28] sm:$0xff] %vm706_vm0, %v695_v5  ;;  %v697_v7 = vld [vmem:[%s16038_s27 + $0x38] sm:$0xff]  ;;  %v698_v8 = vld [vmem:[%s16038_s27 + $0x40] sm:$0xff] }
  0x33   : > { %713 = vst.msk [vmem:[%s16097_s1 + $0x30] sm:$0xff] %vm706_vm0, %v696_v6  ;;  %714 = vst.msk [vmem:[%s16097_s1 + $0x38] sm:$0xff] %vm706_vm0, %v697_v7  ;;  %v699_v9 = vld [vmem:[%s16038_s27 + $0x48] sm:$0xff]  ;;  %v700_v10 = vld [vmem:[%s16038_s27 + $0x50] sm:$0xff] }
  0x34   : > { %715 = vst.msk [vmem:[%s16097_s1 + $0x40] sm:$0xff] %vm706_vm0, %v698_v8  ;;  %v701_v11 = vld [vmem:[%s16038_s27 + $0x58] sm:$0xff]  ;;  %716 = vst.msk [vmem:[%s16097_s1 + $0x48] sm:$0xff] %vm706_vm0, %v699_v9  ;;  %v702_v12 = vld [vmem:[%s16038_s27 + $0x60] sm:$0xff] }
  0x35   : > { %717 = vst.msk [vmem:[%s16097_s1 + $0x50] sm:$0xff] %vm706_vm0, %v700_v10  ;;  %718 = vst.msk [vmem:[%s16097_s1 + $0x58] sm:$0xff] %vm706_vm0, %v701_v11  ;;  %v703_v13 = vld [vmem:[%s16038_s27 + $0x68] sm:$0xff]  ;;  %v704_v14 = vld [vmem:[%s16038_s27 + $0x70] sm:$0xff] }
  0x36   : > { %719 = vst.msk [vmem:[%s16097_s1 + $0x60] sm:$0xff] %vm706_vm0, %v702_v12  ;;  %720 = vst.msk [vmem:[%s16097_s1 + $0x68] sm:$0xff] %vm706_vm0, %v703_v13  ;;  %v705_v15 = vld [vmem:[%s16038_s27 + $0x78] sm:$0xff] }
  0x37   : > { %721 = vst.msk [vmem:[%s16097_s1 + $0x70] sm:$0xff] %vm706_vm0, %v704_v14  ;;  %722 = vst.msk [vmem:[%s16097_s1 + $0x78] sm:$0xff] %vm706_vm0, %v705_v15 }
  0x38 PF: > { %v723_v16 = vld [vmem:[%s16097_s1] sm:$0xff]  ;;  %vm741_vm1 = vcmask 261120   ;;  %v725_v17 = vld [vmem:[%s16097_s1 + $0x10] sm:$0xff]  ;;  %v724_v18 = vld [vmem:[%s16097_s1 + $0x8] sm:$0xff]  ;;  %s22629_s27 = scalar_lea.vmem %s22208_s3, %s16028_s20  ;;  %s22630_s24 = scalar_lea.vmem %s22210_s5, %s16028_s20  ;;  %vm8271_vm2 = vcmask 64512   ;;  %vm12847_vm3 = vcmask 130048  }
  0x39   : > { %v742_v19 = vsel %vm741_vm1, %v723_v16, 0.0  ;;  %v748_v20 = vsel %vm741_vm1, %v725_v17, 0.0  ;;  %v726_v21 = vld [vmem:[%s16097_s1 + $0x18] sm:$0xff]  ;;  %v745_v22 = vsel %vm741_vm1, %v724_v18, 0.0  ;;  %v727_v24 = vld [vmem:[%s16097_s1 + $0x20] sm:$0xff]  ;;  %v728_v25 = vld [vmem:[%s16097_s1 + $0x28] sm:$0xff] }
  0x3a   : > { %743 = vadd.xlane.f32.xlu0 %v742_v19  ;;  %749 = vadd.xlane.f32.xlu1 %v748_v20  ;;  %v751_v23 = vsel %vm741_vm1, %v726_v21, 0.0  ;;  %v754_v26 = vsel %vm741_vm1, %v727_v24, 0.0  ;;  %v757_v27 = vsel %vm741_vm1, %v728_v25, 0.0  ;;  %v16161_v28 = vld [vmem:[%s16097_s1 + $0x30] sm:$0xff]  ;;  %v16164_v29 = vld [vmem:[%s16097_s1 + $0x38] sm:$0xff]  ;;  %s15907_s26 = smov 112  }
  0x3b   : > { %v760_v30 = vsel %vm741_vm1, %v16161_v28, 0.0  ;;  %v763_v31 = vsel %vm741_vm1, %v16164_v29, 0.0  ;;  %v16171_v32 = vld [vmem:[%s16097_s1 + $0x40] sm:$0xff]  ;;  %v16174_v33 = vld [vmem:[%s16097_s1 + $0x48] sm:$0xff]  ;;  %s15908_s19 = smov 120   ;;  %s15909_s28 = smov 104  }
  0x3c   : > { %v766_v34 = vsel %vm741_vm1, %v16171_v32, 0.0  ;;  %v769_v35 = vsel %vm741_vm1, %v16174_v33, 0.0  ;;  %v16181_v36 = vld [vmem:[%s16097_s1 + $0x50] sm:$0xff]  ;;  %v16184_v37 = vld [vmem:[%s16097_s1 + $0x58] sm:$0xff]  ;;  %s15910_s17 = smov 96   ;;  %s15913_s16 = smov 64  }
  0x3d   : > { %v772_v38 = vsel %vm741_vm1, %v16181_v36, 0.0  ;;  %v775_v39 = vsel %vm741_vm1, %v16184_v37, 0.0  ;;  %v16191_v40 = vld [vmem:[%s16097_s1 + $0x60] sm:$0xff]  ;;  %v16194_v41 = vld [vmem:[%s16097_s1 + $0x68] sm:$0xff]  ;;  %s23233_s29 = sld [smem:[#allocation130_spill]]  ;;  %s15915_s6 = smov 16  }
  0x3e   : > { %746 = vadd.xlane.f32.xlu0 %v745_v22  ;;  %752 = vadd.xlane.f32.xlu1 %v751_v23  ;;  %v778_v42 = vsel %vm741_vm1, %v16191_v40, 0.0  ;;  %v781_v43 = vsel %vm741_vm1, %v16194_v41, 0.0  ;;  %v16201_v44 = vld [vmem:[%s16097_s1 + $0x70] sm:$0xff]  ;;  %v16204_v45 = vld [vmem:[%s16097_s1 + $0x78] sm:$0xff]  ;;  %vm12864_vm4 = vcmask 195584   ;;  %s23344_s21 = sld [smem:[#allocation133_spill]] }
  0x3f   : > { %v784_v46 = vsel %vm741_vm1, %v16201_v44, 0.0  ;;  %v787_v47 = vsel %vm741_vm1, %v16204_v45, 0.0  ;;  %s23346_s22 = sld [smem:[#allocation134_spill]] }
  0x42   : > { %755 = vadd.xlane.f32.xlu0 %v754_v26  ;;  %758 = vadd.xlane.f32.xlu1 %v757_v27 }
  0x43   : > { %s23234_s4 = scalar_lea.vmem %s23233_s29, %s23362_s30  ;;  %s15914_s30 = smov 8  }
  0x46   : > { %761 = vadd.xlane.f32.xlu0 %v760_v30  ;;  %764 = vadd.xlane.f32.xlu1 %v763_v31 }
  0x4a   : > { %767 = vadd.xlane.f32.xlu0 %v766_v34  ;;  %770 = vadd.xlane.f32.xlu1 %v769_v35 }
  0x4e   : > { %773 = vadd.xlane.f32.xlu0 %v772_v38  ;;  %776 = vadd.xlane.f32.xlu1 %v775_v39 }
  0x52   : > { %779 = vadd.xlane.f32.xlu0 %v778_v42  ;;  %782 = vadd.xlane.f32.xlu1 %v781_v43 }
  0x56   : > { %785 = vadd.xlane.f32.xlu0 %v784_v46  ;;  %788 = vadd.xlane.f32.xlu1 %v787_v47 }
  0xc3   : > { %v744_v48 = vpop.xlane.xlu0 %743  ;;  %v750_v49 = vpop.xlane.xlu1 %749 }
  0xc4   : > { %v791_v50 = vmul.f32 0.03125, %v744_v48  ;;  %v793_v51 = vmul.f32 0.03125, %v750_v49 }
  0xc6   : > { %v16210_v52 = vsub.f32 %v723_v16, %v791_v50  ;;  %v16212_v53 = vsub.f32 %v725_v17, %v793_v51 }
  0xc7   : > { %v747_v54 = vpop.xlane.xlu0 %746  ;;  %v753_v55 = vpop.xlane.xlu1 %752 }
  0xc8   : > { %v792_v56 = vmul.f32 0.03125, %v747_v54  ;;  %v794_v57 = vmul.f32 0.03125, %v753_v55  ;;  %v823_v58 = vmul.f32 %v16210_v52, %v16210_v52  ;;  %v825_v59 = vmul.f32 %v16212_v53, %v16212_v53 }
  0xca   : > { %v16218_v60 = vsub.f32 %v724_v18, %v792_v56  ;;  %v16220_v61 = vsub.f32 %v726_v21, %v794_v57  ;;  %v839_v62 = vsel %vm741_vm1, %v823_v58, 0.0  ;;  %v845_v1 = vsel %vm741_vm1, %v825_v59, 0.0 }
  0xcb   : > { %840 = vadd.xlane.f32.xlu0 %v839_v62  ;;  %v756_v63 = vpop.xlane.xlu0 %755  ;;  %v759_v0 = vpop.xlane.xlu1 %758 }
  0xcc   : > { %v795_v2 = vmul.f32 0.03125, %v756_v63  ;;  %v796_v3 = vmul.f32 0.03125, %v759_v0  ;;  %v824_v4 = vmul.f32 %v16218_v60, %v16218_v60  ;;  %v826_v5 = vmul.f32 %v16220_v61, %v16220_v61 }
  0xce   : > { %v16228_v6 = vsub.f32 %v727_v24, %v795_v2  ;;  %v16230_v7 = vsub.f32 %v728_v25, %v796_v3  ;;  %v842_v8 = vsel %vm741_vm1, %v824_v4, 0.0  ;;  %v848_v11 = vsel %vm741_vm1, %v826_v5, 0.0  ;;  %v998_v4 = vld [vmem:[%s16052_s13 + $0x18] sm:$0xff]  ;;  %v997_v5 = vld [vmem:[%s16052_s13 + $0x10] sm:$0xff] }
  0xcf   : > { %846 = vadd.xlane.f32.xlu0 %v845_v1  ;;  %843 = vadd.xlane.f32.xlu1 %v842_v8  ;;  %v762_v9 = vpop.xlane.xlu0 %761  ;;  %v765_v10 = vpop.xlane.xlu1 %764  ;;  %v996_v8 = vld [vmem:[%s16052_s13 + $0x8] sm:$0xff] }
  0xd0   : > { %v797_v12 = vmul.f32 0.03125, %v762_v9  ;;  %v798_v13 = vmul.f32 0.03125, %v765_v10  ;;  %v827_v14 = vmul.f32 %v16228_v6, %v16228_v6  ;;  %v828_v15 = vmul.f32 %v16230_v7, %v16230_v7  ;;  %14785 = vmatprep.subr.mxu0 %v998_v4  ;;  %v995_v9 = vld [vmem:[%s16052_s13] sm:$0xff]  ;;  %s22628_s13 = scalar_lea.vmem %s22207_s2, %s16028_s20 }
  0xd1   : > { %14786 = vmatpush3.msra.mxu0 %v998_v4 }
  0xd2   : > { %v16239_v16 = vsub.f32 %v16161_v28, %v797_v12  ;;  %v16242_v17 = vsub.f32 %v16164_v29, %v798_v13  ;;  %v851_v18 = vsel %vm741_vm1, %v827_v14, 0.0  ;;  %v854_v21 = vsel %vm741_vm1, %v828_v15, 0.0  ;;  %14787 = vmatprep.subr.mxu0 %v997_v5 }
  0xd3   : > { %849 = vadd.xlane.f32.xlu1 %v848_v11  ;;  %852 = vadd.xlane.f32.xlu0 %v851_v18  ;;  %v768_v19 = vpop.xlane.xlu0 %767  ;;  %v771_v20 = vpop.xlane.xlu1 %770 }
  0xd4   : > { %v799_v22 = vmul.f32 0.03125, %v768_v19  ;;  %v800_v23 = vmul.f32 0.03125, %v771_v20  ;;  %v829_v24 = vmul.f32 %v16239_v16, %v16239_v16  ;;  %v830_v25 = vmul.f32 %v16242_v17, %v16242_v17  ;;  %14788 = vmatpush3.msra.mxu0 %v997_v5 }
  0xd5   : > { %14789 = vmatprep.subr.mxu0 %v996_v8 }
  0xd6   : > { %v16251_v26 = vsub.f32 %v16171_v32, %v799_v22  ;;  %v16254_v27 = vsub.f32 %v16174_v33, %v800_v23  ;;  %v857_v28 = vsel %vm741_vm1, %v829_v24, 0.0  ;;  %v860_v31 = vsel %vm741_vm1, %v830_v25, 0.0  ;;  %14790 = vmatpush3.msra.mxu0 %v996_v8 }
  0xd7   : > { %855 = vadd.xlane.f32.xlu1 %v854_v21  ;;  %858 = vadd.xlane.f32.xlu0 %v857_v28  ;;  %v774_v29 = vpop.xlane.xlu0 %773  ;;  %v777_v30 = vpop.xlane.xlu1 %776 }
  0xd8   : > { %v801_v34 = vmul.f32 0.03125, %v774_v29  ;;  %v802_v35 = vmul.f32 0.03125, %v777_v30  ;;  %v831_v38 = vmul.f32 %v16251_v26, %v16251_v26  ;;  %v832_v32 = vmul.f32 %v16254_v27, %v16254_v27  ;;  %14791 = vmatprep.subr.mxu0 %v995_v9 }
  0xd9   : > { %14792 = vmatpush3.msra.mxu0 %v995_v9 }
  0xda   : > { %v16263_v39 = vsub.f32 %v16181_v36, %v801_v34  ;;  %v16266_v33 = vsub.f32 %v16184_v37, %v802_v35  ;;  %v863_v42 = vsel %vm741_vm1, %v831_v38, 0.0  ;;  %v866_v47 = vsel %vm741_vm1, %v832_v32, 0.0 }
  0xdb   : > { %861 = vadd.xlane.f32.xlu1 %v860_v31  ;;  %864 = vadd.xlane.f32.xlu0 %v863_v42  ;;  %v780_v43 = vpop.xlane.xlu0 %779  ;;  %v783_v46 = vpop.xlane.xlu1 %782 }
  0xdc   : > { %v803_v48 = vmul.f32 0.03125, %v780_v43  ;;  %v804_v49 = vmul.f32 0.03125, %v783_v46  ;;  %v833_v50 = vmul.f32 %v16263_v39, %v16263_v39  ;;  %v834_v36 = vmul.f32 %v16266_v33, %v16266_v33 }
  0xde   : > { %v16275_v51 = vsub.f32 %v16191_v40, %v803_v48  ;;  %v16278_v37 = vsub.f32 %v16194_v41, %v804_v49  ;;  %v869_v54 = vsel %vm741_vm1, %v833_v50, 0.0  ;;  %v872_v57 = vsel %vm741_vm1, %v834_v36, 0.0  ;;  %v16309_v48 = vld [vmem:[%s22628_s13] ss:$0 sm:$0xff]  ;;  %s15916_s13 = smov 24  }
  0xdf   : > { %867 = vadd.xlane.f32.xlu1 %v866_v47  ;;  %870 = vadd.xlane.f32.xlu0 %v869_v54  ;;  %v786_v55 = vpop.xlane.xlu0 %785  ;;  %v789_v56 = vpop.xlane.xlu1 %788 }
  0xe0   : > { %v805_v58 = vmul.f32 0.03125, %v786_v55  ;;  %v806_v59 = vmul.f32 0.03125, %v789_v56  ;;  %v835_v62 = vmul.f32 %v16275_v51, %v16275_v51  ;;  %v836_v40 = vmul.f32 %v16278_v37, %v16278_v37  ;;  %v16317_v56 = vld [vmem:[%s22629_s27] ss:$0 sm:$0xff]  ;;  %s23345_s27 = scalar_lea.vmem %s23344_s21, %s16028_s20 }
  0xe2   : > { %v16287_v41 = vsub.f32 %v16201_v44, %v805_v58  ;;  %v16290_v63 = vsub.f32 %v16204_v45, %v806_v59  ;;  %v875_v0 = vsel %vm741_vm1, %v835_v62, 0.0  ;;  %v878_v1 = vsel %vm741_vm1, %v836_v40, 0.0 }
  0xe3   : > { %873 = vadd.xlane.f32.xlu1 %v872_v57  ;;  %876 = vadd.xlane.f32.xlu0 %v875_v0 }
  0xe4   : > { %v837_v2 = vmul.f32 %v16287_v41, %v16287_v41  ;;  %v838_v3 = vmul.f32 %v16290_v63, %v16290_v63 }
  0xe6   : > { %v881_v44 = vsel %vm741_vm1, %v837_v2, 0.0  ;;  %v884_v45 = vsel %vm741_vm1, %v838_v3, 0.0 }
  0xe7   : > { %879 = vadd.xlane.f32.xlu1 %v878_v1  ;;  %882 = vadd.xlane.f32.xlu0 %v881_v44 }
  0xeb   : > { %885 = vadd.xlane.f32.xlu1 %v884_v45 }
 0x154   : > { %v841_v10 = vpop.xlane.xlu0 %840 }
 0x155   : > { %v887_v11 = vmul.f32 0.03125, %v841_v10 }
 0x157   : > { %v903_v12 = vadd.f32 1e-05, %v887_v11 }
 0x158   : > { %v844_v13 = vpop.xlane.xlu1 %843  ;;  %v847_v14 = vpop.xlane.xlu0 %846 }
 0x159   : > { %15467 = vrsqrt.f32 %v903_v12  ;;  %v888_v15 = vmul.f32 0.03125, %v844_v13  ;;  %v889_v18 = vmul.f32 0.03125, %v847_v14 }
 0x15b   : > { %v904_v19 = vadd.f32 1e-05, %v888_v15  ;;  %v905_v20 = vadd.f32 1e-05, %v889_v18 }
 0x15c   : > { %v850_v21 = vpop.xlane.xlu1 %849  ;;  %v853_v22 = vpop.xlane.xlu0 %852 }
 0x15d   : > { %15469 = vrsqrt.f32 %v904_v19  ;;  %v890_v23 = vmul.f32 0.03125, %v850_v21  ;;  %v891_v24 = vmul.f32 0.03125, %v853_v22 }
 0x15e   : > { %15471 = vrsqrt.f32 %v905_v20 }
 0x15f   : > { %v906_v25 = vadd.f32 1e-05, %v890_v23  ;;  %v907_v28 = vadd.f32 1e-05, %v891_v24 }
 0x160   : > { %v856_v29 = vpop.xlane.xlu1 %855  ;;  %v859_v30 = vpop.xlane.xlu0 %858 }
 0x161   : > { %15473 = vrsqrt.f32 %v906_v25  ;;  %v892_v31 = vmul.f32 0.03125, %v856_v29  ;;  %v893_v34 = vmul.f32 0.03125, %v859_v30 }
 0x162   : > { %15475 = vrsqrt.f32 %v907_v28 }
 0x163   : > { %v908_v35 = vadd.f32 1e-05, %v892_v31  ;;  %v909_v38 = vadd.f32 1e-05, %v893_v34 }
 0x164   : > { %v862_v32 = vpop.xlane.xlu1 %861  ;;  %v865_v42 = vpop.xlane.xlu0 %864 }
 0x165   : > { %15477 = vrsqrt.f32 %v908_v35  ;;  %v894_v43 = vmul.f32 0.03125, %v862_v32  ;;  %v895_v46 = vmul.f32 0.03125, %v865_v42 }
 0x166   : > { %v15468_v47 = vpop.eup %15467  ;;  %15479 = vrsqrt.f32 %v909_v38 }
 0x167   : > { %v910_v49 = vadd.f32 1e-05, %v894_v43  ;;  %v911_v50 = vadd.f32 1e-05, %v895_v46  ;;  %v935_v36 = vmul.f32 %v15468_v47, %v16210_v52 }
 0x168   : > { %v868_v54 = vpop.xlane.xlu1 %867  ;;  %v871_v55 = vpop.xlane.xlu0 %870 }
 0x169   : > { %15481 = vrsqrt.f32 %v910_v49  ;;  %v896_v57 = vmul.f32 0.03125, %v868_v54  ;;  %v897_v58 = vmul.f32 0.03125, %v871_v55  ;;  %v957_v59 = vmul.f32 %v16309_v48, %v935_v36 }
 0x16a   : > { %v15470_v62 = vpop.eup %15469  ;;  %15483 = vrsqrt.f32 %v911_v50 }
 0x16b   : > { %v15472_v40 = vpop.eup %15471  ;;  %v912_v0 = vadd.f32 1e-05, %v896_v57  ;;  %v913_v1 = vadd.f32 1e-05, %v897_v58  ;;  %v979_v52 = vadd.f32 %v16317_v56, %v957_v59  ;;  %v936_v2 = vmul.f32 %v15470_v62, %v16218_v60 }
 0x16c   : > { %v874_v3 = vpop.xlane.xlu1 %873  ;;  %v877_v44 = vpop.xlane.xlu0 %876  ;;  %v937_v45 = vmul.f32 %v15472_v40, %v16212_v53 }
 0x16d   : > { %15485 = vrsqrt.f32 %v912_v0  ;;  %v898_v4 = vmul.f32 0.03125, %v874_v3  ;;  %v899_v5 = vmul.f32 0.03125, %v877_v44  ;;  %14793 = vmatprep.mubr.msk.f32.mxu0 %vm741_vm1, %v979_v52  ;;  %v958_v8 = vmul.f32 %v16309_v48, %v936_v2 }
 0x16e   : > { %v15474_v9 = vpop.eup %15473  ;;  %15487 = vrsqrt.f32 %v913_v1  ;;  %v959_v10 = vmul.f32 %v16309_v48, %v937_v45 }
 0x16f   : > { %v15476_v11 = vpop.eup %15475  ;;  %v914_v12 = vadd.f32 1e-05, %v898_v4  ;;  %v915_v13 = vadd.f32 1e-05, %v899_v5  ;;  %v980_v60 = vadd.f32 %v16317_v56, %v958_v8  ;;  %v938_v14 = vmul.f32 %v15474_v9, %v16220_v61 }
 0x170   : > { %v880_v15 = vpop.xlane.xlu1 %879  ;;  %v883_v53 = vpop.xlane.xlu0 %882  ;;  %v981_v18 = vadd.f32 %v16317_v56, %v959_v10  ;;  %v939_v19 = vmul.f32 %v15476_v11, %v16228_v6 }
 0x171   : > { %15489 = vrsqrt.f32 %v914_v12  ;;  %v900_v20 = vmul.f32 0.03125, %v880_v15  ;;  %v901_v21 = vmul.f32 0.03125, %v883_v53  ;;  %14794 = vmatmul.mubr.msk.f32.vlgmr.msra.gmra.mxu0 %vm741_vm1, %v980_v60  ;;  %v960_v22 = vmul.f32 %v16309_v48, %v938_v14  ;;  %v16387_v60 = vld [vmem:[%s22630_s24] ss:$0 sm:$0xff]  ;;  %s23347_s24 = scalar_lea.vmem %s23346_s22, %s16028_s20 }
 0x172   : > { %v15478_v23 = vpop.eup %15477  ;;  %15491 = vrsqrt.f32 %v915_v13  ;;  %14796 = vmatprep.mubr.msk.f32.mxu0 %vm741_vm1, %v981_v18  ;;  %v961_v24 = vmul.f32 %v16309_v48, %v939_v19 }
 0x173   : > { %v15480_v61 = vpop.eup %15479  ;;  %v916_v25 = vadd.f32 1e-05, %v900_v20  ;;  %v917_v28 = vadd.f32 1e-05, %v901_v21  ;;  %v982_v29 = vadd.f32 %v16317_v56, %v960_v22  ;;  %v940_v6 = vmul.f32 %v15478_v23, %v16230_v7 }
 0x174   : > { %v886_v30 = vpop.xlane.xlu1 %885  ;;  %v983_v31 = vadd.f32 %v16317_v56, %v961_v24  ;;  %v941_v34 = vmul.f32 %v15480_v61, %v16239_v16 }
 0x175   : > { %15493 = vrsqrt.f32 %v916_v25  ;;  %v902_v35 = vmul.f32 0.03125, %v886_v30  ;;  %14797 = vmatmul.mubr.msk.f32.gmra.mxu0 %vm741_vm1, %v982_v29  ;;  %v962_v38 = vmul.f32 %v16309_v48, %v940_v6 }
 0x176   : > { %v15482_v32 = vpop.eup %15481  ;;  %15495 = vrsqrt.f32 %v917_v28  ;;  %14799 = vmatprep.mubr.msk.f32.mxu0 %vm741_vm1, %v983_v31  ;;  %v963_v42 = vmul.f32 %v16309_v48, %v941_v34 }
 0x177   : > { %v15484_v43 = vpop.eup %15483  ;;  %v918_v46 = vadd.f32 1e-05, %v902_v35  ;;  %v984_v7 = vadd.f32 %v16317_v56, %v962_v38  ;;  %v942_v47 = vmul.f32 %v15482_v32, %v16242_v17 }
 0x178   : > { %v985_v16 = vadd.f32 %v16317_v56, %v963_v42  ;;  %v943_v49 = vmul.f32 %v15484_v43, %v16251_v26 }
 0x179   : > { %15497 = vrsqrt.f32 %v918_v46  ;;  %14800 = vmatmul.mubr.msk.f32.gmra.mxu0 %vm741_vm1, %v984_v7  ;;  %v964_v50 = vmul.f32 %v16309_v48, %v942_v47 }
 0x17a   : > { %v15486_v36 = vpop.eup %15485  ;;  %14802 = vmatprep.mubr.msk.f32.mxu0 %vm741_vm1, %v985_v16  ;;  %v965_v54 = vmul.f32 %v16309_v48, %v943_v49 }
 0x17b   : > { %v15488_v55 = vpop.eup %15487  ;;  %v986_v57 = vadd.f32 %v16317_v56, %v964_v50  ;;  %v944_v58 = vmul.f32 %v15486_v36, %v16254_v27  ;;  %v15911_v36 = vmov 1983009808  }
 0x17c   : > { %v987_v17 = vadd.f32 %v16317_v56, %v965_v54  ;;  %v945_v59 = vmul.f32 %v15488_v55, %v16263_v39  ;;  %v1362_v54 = vunpack.c.l.s4 %v15911_v36  ;;  %v1364_v55 = vlaneseq }
 0x17d   : > { %14803 = vmatmul.mubr.msk.f32.gmra.mxu0 %vm741_vm1, %v986_v57  ;;  %v966_v26 = vmul.f32 %v16309_v48, %v944_v58 }
 0x17e   : > { %v15490_v62 = vpop.eup %15489  ;;  %14805 = vmatprep.mubr.msk.f32.mxu0 %vm741_vm1, %v987_v17  ;;  %v967_v40 = vmul.f32 %v16309_v48, %v945_v59  ;;  %v1363_v17 = vunpack.c.0.s8 %v1362_v54  ;;  %v1365_v59 = vshrl.u32 %v1364_v55, 7 }
 0x17f   : > { %v15492_v0 = vpop.eup %15491  ;;  %v988_v1 = vadd.f32 %v16317_v56, %v966_v26  ;;  %v946_v52 = vmul.f32 %v15490_v62, %v16266_v33  ;;  %v15912_v26 = vmov 1934713408  }
 0x180   : > { %v989_v27 = vadd.f32 %v16317_v56, %v967_v40  ;;  %v947_v2 = vmul.f32 %v15492_v0, %v16275_v51  ;;  %v1394_v62 = vunpack.c.l.s4 %v15912_v26 }
 0x181   : > { %14806 = vmatmul.mubr.msk.f32.gmra.mxu0 %vm741_vm1, %v988_v1  ;;  %v968_v39 = vmul.f32 %v16309_v48, %v946_v52 }
 0x182   : > { %v15494_v3 = vpop.eup %15493  ;;  %14808 = vmatprep.mubr.msk.f32.mxu0 %vm741_vm1, %v989_v27  ;;  %v969_v44 = vmul.f32 %v16309_v48, %v947_v2  ;;  %v16563_v27 = vsub.s32 %v1363_v17, %v1365_v59 }
 0x183   : > { %v15496_v45 = vpop.eup %15495  ;;  %v990_v4 = vadd.f32 %v16317_v56, %v968_v39  ;;  %v948_v5 = vmul.f32 %v15494_v3, %v16278_v37  ;;  %v1395_v3 = vunpack.c.0.s8 %v1394_v62 }
 0x184   : > { %v991_v33 = vadd.f32 %v16317_v56, %v969_v44  ;;  %v949_v8 = vmul.f32 %v15496_v45, %v16287_v41  ;;  %22649 = vst [vmem:[#allocation26_spill] sm:$0xff] %v16563_v27 }
 0x185   : > { %14809 = vmatmul.mubr.msk.f32.gmra.mxu0 %vm741_vm1, %v990_v4  ;;  %v970_v51 = vmul.f32 %v16309_v48, %v948_v5 }
 0x186   : > { %v15498_v9 = vpop.eup %15497  ;;  %14811 = vmatprep.mubr.msk.f32.mxu0 %vm741_vm1, %v991_v33  ;;  %v971_v10 = vmul.f32 %v16309_v48, %v949_v8 }
 0x187   : > { %v992_v11 = vadd.f32 %v16317_v56, %v970_v51  ;;  %v950_v12 = vmul.f32 %v15498_v9, %v16290_v63 }
 0x188   : > { %v993_v37 = vadd.f32 %v16317_v56, %v971_v10 }
 0x189   : > { %14812 = vmatmul.mubr.msk.f32.gmra.mxu0 %vm741_vm1, %v992_v11  ;;  %v972_v13 = vmul.f32 %v16309_v48, %v950_v12  ;;  %v16585_v12 = vsub.s32 %v1395_v3, %v1365_v59 }
 0x18a   : > { %14814 = vmatprep.mubr.msk.f32.mxu0 %vm741_vm1, %v993_v37 }
 0x18b   : > { %v994_v41 = vadd.f32 %v16317_v56, %v972_v13  ;;  %22652 = vst [vmem:[#allocation29_spill] sm:$0xff] %v16585_v12 }
 0x18d   : > { %14815 = vmatmul.mubr.msk.f32.gmra.mxu0 %vm741_vm1, %v994_v41 }
 0x231   : > { %v14795_v14 = vpop.f32.mrf.mxu0 }
 0x232   : > { %v16390_v63 = vadd.f32 %v14795_v14, %v16387_v60 }
 0x233   : > { %v1120_v15 = vpop.f32.mrf.mxu0 }
 0x234   : > { %22631 = vst [vmem:[#allocation8_spill] sm:$0xff] %v16390_v63  ;;  %1265 = vrot.lane.b32.xlu1 %v16390_v63, %s15907_s26  ;;  %1217 = vrot.lane.b32.xlu0 %v16390_v63, %s15908_s19  ;;  %v16397_v48 = vadd.f32 %v16387_v60, %v1120_v15 }
 0x235   : > { %v14798_v56 = vpop.f32.mrf.mxu0 }
 0x236   : > { %22632 = vst [vmem:[#allocation9_spill] sm:$0xff] %v16397_v48  ;;  %v16408_v53 = vadd.f32 %v14798_v56, %v16387_v60 }
 0x237   : > { %v1130_v18 = vpop.f32.mrf.mxu0 }
 0x238   : > { %1313 = vrot.lane.b32.xlu0 %v16390_v63, %s15909_s28  ;;  %1215 = vrot.lane.b32.xlu1 %v16397_v48, %s15908_s19  ;;  %22633 = vst [vmem:[#allocation10_spill] sm:$0xff] %v16408_v53  ;;  %v16415_v19 = vadd.f32 %v16387_v60, %v1130_v18 }
 0x239   : > { %v14801_v20 = vpop.f32.mrf.mxu0 }
 0x23a   : > { %22634 = vst [vmem:[#allocation11_spill] sm:$0xff] %v16415_v19  ;;  %v16426_v21 = vadd.f32 %v14801_v20, %v16387_v60 }
 0x23b   : > { %v1140_v22 = vpop.f32.mrf.mxu0 }
 0x23c   : > { %1263 = vrot.lane.b32.xlu0 %v16397_v48, %s15907_s26  ;;  %1311 = vrot.lane.b32.xlu1 %v16397_v48, %s15909_s28  ;;  %22635 = vst [vmem:[#allocation12_spill] sm:$0xff] %v16426_v21  ;;  %v16433_v23 = vadd.f32 %v16387_v60, %v1140_v22 }
 0x23d   : > { %v14804_v24 = vpop.f32.mrf.mxu0 }
 0x23e   : > { %22636 = vst [vmem:[#allocation13_spill] sm:$0xff] %v16433_v23  ;;  %v16444_v61 = vadd.f32 %v14804_v24, %v16387_v60 }
 0x23f   : > { %v1150_v25 = vpop.f32.mrf.mxu0 }
 0x240   : > { %1269 = vrot.lane.b32.xlu1 %v16408_v53, %s15907_s26  ;;  %1221 = vrot.lane.b32.xlu0 %v16408_v53, %s15908_s19  ;;  %22637 = vst [vmem:[#allocation14_spill] sm:$0xff] %v16444_v61  ;;  %v16451_v28 = vadd.f32 %v16387_v60, %v1150_v25 }
 0x241   : > { %v14807_v29 = vpop.f32.mrf.mxu0 }
 0x242   : > { %v16462_v6 = vadd.f32 %v14807_v29, %v16387_v60 }
 0x243   : > { %v1160_v30 = vpop.f32.mrf.mxu0 }
 0x244   : > { %1317 = vrot.lane.b32.xlu0 %v16408_v53, %s15909_s28  ;;  %1219 = vrot.lane.b32.xlu1 %v16415_v19, %s15908_s19  ;;  %22638 = vst [vmem:[#allocation15_spill] sm:$0xff] %v16462_v6  ;;  %v16469_v31 = vadd.f32 %v16387_v60, %v1160_v30 }
 0x245   : > { %v14810_v34 = vpop.f32.mrf.mxu0 }
 0x246   : > { %22639 = vst [vmem:[#allocation16_spill] sm:$0xff] %v16469_v31  ;;  %v16480_v35 = vadd.f32 %v14810_v34, %v16387_v60 }
 0x247   : > { %v1170_v38 = vpop.f32.mrf.mxu0 }
 0x248   : > { %1267 = vrot.lane.b32.xlu0 %v16415_v19, %s15907_s26  ;;  %1315 = vrot.lane.b32.xlu1 %v16415_v19, %s15909_s28  ;;  %22640 = vst [vmem:[#allocation17_spill] sm:$0xff] %v16480_v35  ;;  %v16487_v32 = vadd.f32 %v16387_v60, %v1170_v38 }
 0x249   : > { %v14813_v42 = vpop.f32.mrf.mxu0 }
 0x24a   : > { %22641 = vst [vmem:[#allocation18_spill] sm:$0xff] %v16487_v32  ;;  %v16498_v43 = vadd.f32 %v14813_v42, %v16387_v60 }
 0x24b   : > { %v1180_v46 = vpop.f32.mrf.mxu0 }
 0x24c   : > { %1273 = vrot.lane.b32.xlu1 %v16426_v21, %s15907_s26  ;;  %1225 = vrot.lane.b32.xlu0 %v16426_v21, %s15908_s19  ;;  %22642 = vst [vmem:[#allocation19_spill] sm:$0xff] %v16498_v43  ;;  %v16505_v7 = vadd.f32 %v16387_v60, %v1180_v46 }
 0x24d   : > { %v14816_v47 = vpop.f32.mrf.mxu0 }
 0x24e   : > { %22643 = vst [vmem:[#allocation20_spill] sm:$0xff] %v16505_v7  ;;  %v16516_v16 = vadd.f32 %v14816_v47, %v16387_v60 }
 0x24f   : > { %v1190_v49 = vpop.f32.mrf.mxu0 }
 0x250   : > { %1321 = vrot.lane.b32.xlu0 %v16426_v21, %s15909_s28  ;;  %1223 = vrot.lane.b32.xlu1 %v16433_v23, %s15908_s19  ;;  %22644 = vst [vmem:[#allocation21_spill] sm:$0xff] %v16516_v16  ;;  %v16531_v50 = vadd.f32 %v16387_v60, %v1190_v49 }
 0x254   : > { %1271 = vrot.lane.b32.xlu0 %v16433_v23, %s15907_s26  ;;  %1319 = vrot.lane.b32.xlu1 %v16433_v23, %s15909_s28 }
 0x258   : > { %1277 = vrot.lane.b32.xlu1 %v16444_v61, %s15907_s26  ;;  %1229 = vrot.lane.b32.xlu0 %v16444_v61, %s15908_s19 }
 0x25c   : > { %1325 = vrot.lane.b32.xlu0 %v16444_v61, %s15909_s28  ;;  %1227 = vrot.lane.b32.xlu1 %v16451_v28, %s15908_s19 }
 0x260   : > { %1275 = vrot.lane.b32.xlu0 %v16451_v28, %s15907_s26  ;;  %1323 = vrot.lane.b32.xlu1 %v16451_v28, %s15909_s28 }
 0x264   : > { %1281 = vrot.lane.b32.xlu1 %v16462_v6, %s15907_s26  ;;  %1233 = vrot.lane.b32.xlu0 %v16462_v6, %s15908_s19 }
 0x268   : > { %1329 = vrot.lane.b32.xlu0 %v16462_v6, %s15909_s28  ;;  %1231 = vrot.lane.b32.xlu1 %v16469_v31, %s15908_s19 }
 0x26c   : > { %1279 = vrot.lane.b32.xlu0 %v16469_v31, %s15907_s26  ;;  %1327 = vrot.lane.b32.xlu1 %v16469_v31, %s15909_s28 }
 0x270   : > { %1285 = vrot.lane.b32.xlu1 %v16480_v35, %s15907_s26  ;;  %1237 = vrot.lane.b32.xlu0 %v16480_v35, %s15908_s19 }
 0x274   : > { %1333 = vrot.lane.b32.xlu0 %v16480_v35, %s15909_s28  ;;  %1235 = vrot.lane.b32.xlu1 %v16487_v32, %s15908_s19 }
 0x278   : > { %3557 = vrot.lane.b32.xlu0 %v16480_v35, %s15910_s17  ;;  %1331 = vrot.lane.b32.xlu1 %v16487_v32, %s15909_s28 }
 0x27c   : > { %1283 = vrot.lane.b32.xlu0 %v16487_v32, %s15907_s26  ;;  %1289 = vrot.lane.b32.xlu1 %v16498_v43, %s15907_s26 }
 0x280   : > { %1241 = vrot.lane.b32.xlu0 %v16498_v43, %s15908_s19  ;;  %1239 = vrot.lane.b32.xlu1 %v16505_v7, %s15908_s19 }
 0x284   : > { %1337 = vrot.lane.b32.xlu0 %v16498_v43, %s15909_s28  ;;  %1335 = vrot.lane.b32.xlu1 %v16505_v7, %s15909_s28 }
 0x288   : > { %3561 = vrot.lane.b32.xlu0 %v16498_v43, %s15910_s17  ;;  %1293 = vrot.lane.b32.xlu1 %v16516_v16, %s15907_s26 }
 0x28c   : > { %1287 = vrot.lane.b32.xlu0 %v16505_v7, %s15907_s26  ;;  %1341 = vrot.lane.b32.xlu1 %v16516_v16, %s15909_s28 }
 0x290   : > { %3559 = vrot.lane.b32.xlu0 %v16505_v7, %s15910_s17  ;;  %3565 = vrot.lane.b32.xlu1 %v16516_v16, %s15910_s17 }
 0x294   : > { %1245 = vrot.lane.b32.xlu0 %v16516_v16, %s15908_s19  ;;  %1243 = vrot.lane.b32.xlu1 %v16531_v50, %s15908_s19 }
 0x298   : > { %1291 = vrot.lane.b32.xlu0 %v16531_v50, %s15907_s26  ;;  %1339 = vrot.lane.b32.xlu1 %v16531_v50, %s15909_s28  ;;  %s23348_s28 = scalar_lea.vmem %s22214_s9, %s16028_s20 }
 0x29c   : > { %3555 = vrot.lane.b32.xlu0 %v16487_v32, %s15910_s17 }
 0x2a0   : > { %3553 = vrot.lane.b32.xlu0 %v16462_v6, %s15910_s17 }
 0x2a4   : > { %3551 = vrot.lane.b32.xlu0 %v16469_v31, %s15910_s17 }
 0x2a6   : > { %v16547_v57 = vpop.permute.xlu1 %1265  ;;  %v16549_v58 = vpop.permute.xlu0 %1217 }
 0x2a7   : > { %22645 = vst [vmem:[#allocation22_spill] sm:$0xff] %v16547_v57  ;;  %22646 = vst [vmem:[#allocation23_spill] sm:$0xff] %v16549_v58  ;;  %v1427_v2 = vcombine.low %v16390_v63, %v16547_v57  ;;  %v1428_v39 = vcombine.high %v16390_v63, %v16547_v57 }
 0x2a8   : > { %3549 = vrot.lane.b32.xlu0 %v16444_v61, %s15910_s17 }
 0x2a9   : > { %v1435_v10 = vrot.slane %v1427_v2, %v16563_v27  ;;  %v1442_v11 = vrot.slane %v1428_v39, %v16563_v27 }
 0x2aa   : > { %v16553_v40 = vpop.permute.xlu1 %1215  ;;  %v16555_v0 = vpop.permute.xlu0 %1313 }
 0x2ab   : > { %22647 = vst [vmem:[#allocation24_spill] sm:$0xff] %v16553_v40  ;;  %22648 = vst [vmem:[#allocation25_spill] sm:$0xff] %v16555_v0  ;;  %v1443_v1 = vcombine.low %v16549_v58, %v16555_v0  ;;  %v1444_v52 = vcombine.high %v16549_v58, %v16555_v0 }
 0x2ac   : > { %3563 = vrot.lane.b32.xlu0 %v16531_v50, %s15910_s17 }
 0x2ad   : > { %v1451_v4 = vrot.slane %v1443_v1, %v16563_v27  ;;  %v1458_v5 = vrot.slane %v1444_v52, %v16563_v27 }
 0x2ae   : > { %v16569_v44 = vpop.permute.xlu1 %1311  ;;  %v16571_v45 = vpop.permute.xlu0 %1263 }
 0x2af   : > { %22650 = vst [vmem:[#allocation27_spill] sm:$0xff] %v16569_v44  ;;  %22651 = vst [vmem:[#allocation28_spill] sm:$0xff] %v16571_v45  ;;  %v1375_v33 = vcombine.low %v16553_v40, %v16569_v44  ;;  %v1376_v8 = vcombine.high %v16553_v40, %v16569_v44  ;;  %v1359_v51 = vcombine.low %v16397_v48, %v16571_v45 }
 0x2b0   : > { %v1360_v9 = vcombine.high %v16397_v48, %v16571_v45  ;;  %v1459_v56 = vcombine.low %v1435_v10, %v1451_v4  ;;  %v1460_v18 = vcombine.high %v1435_v10, %v1451_v4  ;;  %v1475_v20 = vcombine.low %v1442_v11, %v1458_v5 }
 0x2b1   : > { %v1383_v37 = vrot.slane %v1375_v33, %v16563_v27  ;;  %v1390_v13 = vrot.slane %v1376_v8, %v16563_v27  ;;  %v1367_v41 = vrot.slane %v1359_v51, %v16563_v27  ;;  %v1476_v22 = vcombine.high %v1442_v11, %v1458_v5 }
 0x2b2   : > { %v1374_v60 = vrot.slane %v1360_v9, %v16563_v27  ;;  %v16591_v14 = vpop.permute.xlu1 %1269  ;;  %v16593_v15 = vpop.permute.xlu0 %1221  ;;  %v1467_v36 = vrot.slane %v1459_v56, %v16585_v12  ;;  %v1474_v54 = vrot.slane %v1460_v18, %v16585_v12  ;;  %v1483_v55 = vrot.slane %v1475_v20, %v16585_v12 }
 0x2b3   : > { %22653 = vst [vmem:[#allocation30_spill] sm:$0xff] %v16591_v14  ;;  %22654 = vst [vmem:[#allocation31_spill] sm:$0xff] %v16593_v15  ;;  %v1391_v24 = vcombine.low %v1367_v41, %v1383_v37  ;;  %v1392_v25 = vcombine.high %v1367_v41, %v1383_v37  ;;  %v1490_v17 = vrot.slane %v1476_v22, %v16585_v12 }
 0x2b4   : > { %v1407_v29 = vcombine.low %v1374_v60, %v1390_v13  ;;  %v1408_v30 = vcombine.high %v1374_v60, %v1390_v13  ;;  %v2515_v4 = vcombine.low %v1467_v36, %v1474_v54  ;;  %v14121_v5 = vcombine.high %v1467_v36, %v1474_v54 }
 0x2b5   : > { %v1399_v42 = vrot.slane %v1391_v24, %v16585_v12  ;;  %v1406_v46 = vrot.slane %v1392_v25, %v16585_v12  ;;  %v2531_v33 = vcombine.low %v1483_v55, %v1490_v17  ;;  %v14122_v8 = vcombine.high %v1483_v55, %v1490_v17 }
 0x2b6   : > { %v16595_v34 = vpop.permute.xlu1 %1219  ;;  %v16597_v38 = vpop.permute.xlu0 %1317  ;;  %v1415_v47 = vrot.slane %v1407_v29, %v16585_v12  ;;  %v1422_v49 = vrot.slane %v1408_v30, %v16585_v12  ;;  %v16632_v41 = vrot.slane %v2515_v4, %v16563_v27  ;;  %v16635_v60 = vrot.slane %v14121_v5, %v16563_v27 }
 0x2b7   : > { %22655 = vst [vmem:[#allocation32_spill] sm:$0xff] %v16595_v34  ;;  %22656 = vst [vmem:[#allocation33_spill] sm:$0xff] %v16597_v38  ;;  %v2447_v59 = vcombine.low %v1399_v42, %v1406_v46  ;;  %v14119_v26 = vcombine.high %v1399_v42, %v1406_v46  ;;  %v16638_v56 = vrot.slane %v2531_v33, %v16563_v27 }
 0x2b8   : > { %v2463_v62 = vcombine.low %v1415_v47, %v1422_v49  ;;  %v14120_v1 = vcombine.high %v1415_v47, %v1422_v49  ;;  %v16641_v18 = vrot.slane %v14122_v8, %v16563_v27  ;;  %v1579_v20 = vcombine.low %v16593_v15, %v16597_v38 }
 0x2b9   : > { %v16612_v39 = vrot.slane %v2447_v59, %v16563_v27  ;;  %v16615_v3 = vrot.slane %v14119_v26, %v16563_v27  ;;  %v1580_v25 = vcombine.high %v16593_v15, %v16597_v38  ;;  %v1563_v42 = vcombine.low %v16408_v53, %v16591_v14 }
 0x2ba   : > { %v16607_v52 = vpop.permute.xlu1 %1315  ;;  %v16609_v2 = vpop.permute.xlu0 %1267  ;;  %v16618_v51 = vrot.slane %v2463_v62, %v16563_v27  ;;  %v16621_v9 = vrot.slane %v14120_v1, %v16563_v27  ;;  %v1564_v49 = vcombine.high %v16408_v53, %v16591_v14  ;;  %v1587_v55 = vrot.slane %v1579_v20, %v16563_v27 }
 0x2bb   : > { %22657 = vst [vmem:[#allocation34_spill] sm:$0xff] %v16607_v52  ;;  %22658 = vst [vmem:[#allocation35_spill] sm:$0xff] %v16609_v2  ;;  %v2479_v37 = vcombine.low %v16612_v39, %v16615_v3  ;;  %v1594_v26 = vrot.slane %v1580_v25, %v16563_v27  ;;  %v1511_v62 = vcombine.low %v16595_v34, %v16607_v52 }
 0x2bc   : > { %22659 = vst [vmem:[#allocation36_spill] sm:$0xff] %v16612_v39  ;;  %22660 = vst [vmem:[#allocation37_spill] sm:$0xff] %v16615_v3  ;;  %v2495_v24 = vcombine.low %v16618_v51, %v16621_v9  ;;  %v1495_v1 = vcombine.low %v16415_v19, %v16609_v2  ;;  %v1571_v33 = vrot.slane %v1563_v42, %v16563_v27 }
 0x2bd   : > { %22661 = vst [vmem:[#allocation38_spill] sm:$0xff] %v16618_v51  ;;  %22662 = vst [vmem:[#allocation39_spill] sm:$0xff] %v16621_v9  ;;  %v2487_v22 = vrot.slane %v2479_v37, %v16585_v12  ;;  %v1512_v8 = vcombine.high %v16595_v34, %v16607_v52  ;;  %v1496_v37 = vcombine.high %v16415_v19, %v16609_v2 }
 0x2be   : > { %v16623_v10 = vpop.permute.xlu1 %1273  ;;  %v16625_v11 = vpop.permute.xlu0 %1225  ;;  %v2503_v47 = vrot.slane %v2495_v24, %v16585_v12  ;;  %v1578_v20 = vrot.slane %v1564_v49, %v16563_v27  ;;  %v1596_v24 = vcombine.high %v1571_v33, %v1587_v55  ;;  %v1519_v42 = vrot.slane %v1511_v62, %v16563_v27 }
 0x2bf   : > { %22663 = vst [vmem:[#allocation40_spill] sm:$0xff] %v16623_v10  ;;  %22664 = vst [vmem:[#allocation41_spill] sm:$0xff] %v16625_v11  ;;  %v1503_v46 = vrot.slane %v1495_v1, %v16563_v27  ;;  %v1510_v49 = vrot.slane %v1496_v37, %v16563_v27  ;;  %v1700_v62 = vcombine.high %v16426_v21, %v16623_v10 }
 0x2c0   : > { %v2511_v17 = vcombine.low %v2487_v22, %v2503_v47  ;;  %v2512_v59 = vcombine.high %v2487_v22, %v2503_v47  ;;  %v1595_v22 = vcombine.low %v1571_v33, %v1587_v55  ;;  %v1611_v47 = vcombine.low %v1578_v20, %v1594_v26 }
 0x2c1   : > { %v1699_v55 = vcombine.low %v16426_v21, %v16623_v10  ;;  %v16707_v33 = vrot.slane %v1596_v24, %v16585_v12  ;;  %v1527_v45 = vcombine.low %v1503_v46, %v1519_v42  ;;  %v1528_v44 = vcombine.high %v1503_v46, %v1519_v42 }
 0x2c2   : > { %v16650_v29 = vpop.permute.xlu1 %1223  ;;  %v16652_v30 = vpop.permute.xlu0 %1321  ;;  %14849 = vmatprep.mubr.msk.f32.mxu1 %vm8271_vm2, %v2511_v17  ;;  %14905 = vmatprep.mubr.msk.f32.mxu0 %vm8271_vm2, %v2512_v59  ;;  %v1526_v59 = vrot.slane %v1512_v8, %v16563_v27  ;;  %v16704_v1 = vrot.slane %v1595_v22, %v16585_v12  ;;  %v1612_v8 = vcombine.high %v1578_v20, %v1594_v26 }
 0x2c3   : > { %22665 = vst [vmem:[#allocation42_spill] sm:$0xff] %v16650_v29  ;;  %22666 = vst [vmem:[#allocation43_spill] sm:$0xff] %v16652_v30  ;;  %v1715_v25 = vcombine.low %v16625_v11, %v16652_v30  ;;  %v1716_v13 = vcombine.high %v16625_v11, %v16652_v30  ;;  %v16711_v36 = vrot.slane %v1611_v47, %v16585_v12 }
 0x2c4   : > { %v1543_v0 = vcombine.low %v1510_v49, %v1526_v59  ;;  %v1707_v22 = vrot.slane %v1699_v55, %v16563_v27  ;;  %v1544_v20 = vcombine.high %v1510_v49, %v1526_v59  ;;  %v1714_v46 = vrot.slane %v1700_v62, %v16563_v27 }
 0x2c5   : > { %v1723_v37 = vrot.slane %v1715_v25, %v16563_v27  ;;  %v1730_v48 = vrot.slane %v1716_v13, %v16563_v27  ;;  %v2547_v13 = vcombine.low %v16632_v41, %v16635_v60  ;;  %v2563_v25 = vcombine.low %v16638_v56, %v16641_v18 }
 0x2c6   : > { %v16671_v4 = vpop.permute.xlu1 %1319  ;;  %v16673_v5 = vpop.permute.xlu0 %1271  ;;  %v16731_v47 = vrot.slane %v1612_v8, %v16585_v12  ;;  %v1535_v59 = vrot.slane %v1527_v45, %v16585_v12  ;;  %v1542_v19 = vrot.slane %v1528_v44, %v16585_v12  ;;  %v1551_v8 = vrot.slane %v1543_v0, %v16585_v12 }
 0x2c7   : > { %22667 = vst [vmem:[#allocation44_spill] sm:$0xff] %v16671_v4  ;;  %22668 = vst [vmem:[#allocation45_spill] sm:$0xff] %v16673_v5  ;;  %v1647_v24 = vcombine.low %v16650_v29, %v16671_v4  ;;  %v1631_v26 = vcombine.low %v16433_v23, %v16673_v5  ;;  %v1731_v42 = vcombine.low %v1707_v22, %v1723_v37 }
 0x2c8   : > { %v1648_v55 = vcombine.high %v16650_v29, %v16671_v4  ;;  %v1632_v63 = vcombine.high %v16433_v23, %v16673_v5  ;;  %v1732_v49 = vcombine.high %v1707_v22, %v1723_v37  ;;  %v1747_v62 = vcombine.low %v1714_v46, %v1730_v48 }
 0x2c9   : > { %v1748_v58 = vcombine.high %v1714_v46, %v1730_v48  ;;  %v1655_v34 = vrot.slane %v1647_v24, %v16563_v27  ;;  %v1639_v14 = vrot.slane %v1631_v26, %v16563_v27  ;;  %v1558_v38 = vrot.slane %v1544_v20, %v16585_v12 }
 0x2ca   : > { %v16689_v54 = vpop.permute.xlu1 %1277  ;;  %v16691_v17 = vpop.permute.xlu0 %1229  ;;  %v16748_v53 = vrot.slane %v2547_v13, %v16585_v12  ;;  %v22676_v48 = vcombine.high %v16632_v41, %v16635_v60  ;;  %v16757_v37 = vrot.slane %v2563_v25, %v16585_v12  ;;  %v16760_v0 = vrot.slane %v1731_v42, %v16585_v12 }
 0x2cb   : > { %22669 = vst [vmem:[#allocation46_spill] sm:$0xff] %v16689_v54  ;;  %22670 = vst [vmem:[#allocation47_spill] sm:$0xff] %v16691_v17  ;;  %3613 = vrot.lane.b32.xlu0 %v16689_v54, %s15910_s17  ;;  %3581 = vrot.lane.b32.xlu1 %v16691_v17, %s15910_s17  ;;  %v1662_v44 = vrot.slane %v1648_v55, %v16563_v27  ;;  %v1646_v22 = vrot.slane %v1632_v63, %v16563_v27 }
 0x2cc   : > { %22675 = vst [vmem:[#allocation52_spill] sm:$0xff] %v16748_v53  ;;  %v16754_v45 = vrot.slane %v22676_v48, %v16585_v12  ;;  %22678 = vst [vmem:[#allocation54_spill] sm:$0xff] %v16757_v37  ;;  %v22679_v24 = vcombine.high %v16638_v56, %v16641_v18  ;;  %v16771_v41 = vrot.slane %v1732_v49, %v16585_v12 }
 0x2cd   : > { %v16774_v60 = vrot.slane %v1747_v62, %v16585_v12  ;;  %v16777_v20 = vrot.slane %v1748_v58, %v16585_v12  ;;  %v1835_v46 = vcombine.low %v16444_v61, %v16689_v54  ;;  %v1663_v25 = vcombine.low %v1639_v14, %v1655_v34 }
 0x2ce   : > { %v16714_v40 = vpop.permute.xlu1 %1227  ;;  %v16716_v57 = vpop.permute.xlu0 %1325  ;;  %22677 = vst [vmem:[#allocation53_spill] sm:$0xff] %v16754_v45  ;;  %v16768_v26 = vrot.slane %v22679_v24, %v16585_v12  ;;  %v1836_v56 = vcombine.high %v16444_v61, %v16689_v54  ;;  %v1664_v58 = vcombine.high %v1639_v14, %v1655_v34  ;;  %v2583_v55 = vcombine.low %v1535_v59, %v1542_v19 }
 0x2cf   : > { %22671 = vst [vmem:[#allocation48_spill] sm:$0xff] %v16714_v40  ;;  %22672 = vst [vmem:[#allocation49_spill] sm:$0xff] %v16716_v57  ;;  %3645 = vrot.lane.b32.xlu1 %v16716_v57, %s15910_s17  ;;  %v1851_v18 = vcombine.low %v16691_v17, %v16716_v57  ;;  %v1852_v42 = vcombine.high %v16691_v17, %v16716_v57  ;;  %v14123_v49 = vcombine.high %v1535_v59, %v1542_v19 }
 0x2d0   : > { %22680 = vst [vmem:[#allocation55_spill] sm:$0xff] %v16768_v26  ;;  %v1679_v62 = vcombine.low %v1646_v22, %v1662_v44  ;;  %v1680_v48 = vcombine.high %v1646_v22, %v1662_v44  ;;  %v2599_v57 = vcombine.low %v1551_v8, %v1558_v38  ;;  %v14124_v19 = vcombine.high %v1551_v8, %v1558_v38 }
 0x2d1   : > { %v1843_v59 = vrot.slane %v1835_v46, %v16563_v27  ;;  %v1859_v44 = vrot.slane %v1851_v18, %v16563_v27  ;;  %v1850_v24 = vrot.slane %v1836_v56, %v16563_v27  ;;  %v1866_v37 = vrot.slane %v1852_v42, %v16563_v27 }
 0x2d2   : > { %v16738_v2 = vpop.permute.xlu1 %1323  ;;  %v16740_v52 = vpop.permute.xlu0 %1275  ;;  %v16818_v53 = vrot.slane %v2583_v55, %v16563_v27  ;;  %v16821_v38 = vrot.slane %v14123_v49, %v16563_v27  ;;  %v16824_v8 = vrot.slane %v1663_v25, %v16585_v12  ;;  %v16827_v46 = vrot.slane %v1664_v58, %v16585_v12 }
 0x2d3   : > { %22673 = vst [vmem:[#allocation50_spill] sm:$0xff] %v16738_v2  ;;  %22674 = vst [vmem:[#allocation51_spill] sm:$0xff] %v16740_v52  ;;  %v1783_v61 = vcombine.low %v16714_v40, %v16738_v2  ;;  %v1767_v15 = vcombine.low %v16451_v28, %v16740_v52  ;;  %v1784_v22 = vcombine.high %v16714_v40, %v16738_v2 }
 0x2d4   : > { %v1768_v54 = vcombine.high %v16451_v28, %v16740_v52  ;;  %22685 = vst [vmem:[#allocation60_spill] sm:$0xff] %v16818_v53  ;;  %22686 = vst [vmem:[#allocation61_spill] sm:$0xff] %v16821_v38  ;;  %v16830_v18 = vrot.slane %v1679_v62, %v16585_v12  ;;  %v16833_v17 = vrot.slane %v1680_v48, %v16585_v12 }
 0x2d5   : > { %v1791_v56 = vrot.slane %v1783_v61, %v16563_v27  ;;  %v1775_v42 = vrot.slane %v1767_v15, %v16563_v27  ;;  %v16842_v25 = vrot.slane %v2599_v57, %v16563_v27  ;;  %v16845_v58 = vrot.slane %v14124_v19, %v16563_v27 }
 0x2d6   : > { %v16781_v13 = vpop.permute.xlu1 %1281  ;;  %v16783_v63 = vpop.permute.xlu0 %1233  ;;  %v1867_v5 = vcombine.low %v1843_v59, %v1859_v44  ;;  %v1868_v62 = vcombine.high %v1843_v59, %v1859_v44  ;;  %v1798_v4 = vrot.slane %v1784_v22, %v16563_v27  ;;  %v1782_v48 = vrot.slane %v1768_v54, %v16563_v27 }
 0x2d7   : > { %22681 = vst [vmem:[#allocation56_spill] sm:$0xff] %v16781_v13  ;;  %22682 = vst [vmem:[#allocation57_spill] sm:$0xff] %v16783_v63  ;;  %3617 = vrot.lane.b32.xlu0 %v16781_v13, %s15910_s17  ;;  %3585 = vrot.lane.b32.xlu1 %v16783_v63, %s15910_s17  ;;  %v1883_v61 = vcombine.low %v1850_v24, %v1866_v37  ;;  %v1884_v15 = vcombine.high %v1850_v24, %v1866_v37 }
 0x2d8   : > { %22689 = vst [vmem:[#allocation64_spill] sm:$0xff] %v16842_v25  ;;  %22690 = vst [vmem:[#allocation65_spill] sm:$0xff] %v16845_v58  ;;  %v2615_v57 = vcombine.low %v16818_v53, %v16821_v38  ;;  %v1971_v19 = vcombine.low %v16462_v6, %v16781_v13  ;;  %v1972_v54 = vcombine.high %v16462_v6, %v16781_v13 }
 0x2d9   : > { %v2651_v59 = vcombine.low %v16704_v1, %v16707_v33  ;;  %v14125_v37 = vcombine.high %v16704_v1, %v16707_v33  ;;  %v1799_v24 = vcombine.low %v1775_v42, %v1791_v56  ;;  %v1800_v44 = vcombine.high %v1775_v42, %v1791_v56 }
 0x2da   : > { %v16803_v14 = vpop.permute.xlu1 %1231  ;;  %v16805_v34 = vpop.permute.xlu0 %1329  ;;  %v2631_v38 = vcombine.low %v16842_v25, %v16845_v58  ;;  %v16874_v13 = vrot.slane %v1867_v5, %v16585_v12  ;;  %v16877_v6 = vrot.slane %v1868_v62, %v16585_v12  ;;  %v1815_v9 = vcombine.low %v1782_v48, %v1798_v4 }
 0x2db   : > { %22683 = vst [vmem:[#allocation58_spill] sm:$0xff] %v16803_v14  ;;  %22684 = vst [vmem:[#allocation59_spill] sm:$0xff] %v16805_v34  ;;  %3649 = vrot.lane.b32.xlu1 %v16805_v34, %s15910_s17  ;;  %v1987_v45 = vcombine.low %v16783_v63, %v16805_v34  ;;  %v1988_v22 = vcombine.high %v16783_v63, %v16805_v34  ;;  %v2667_v1 = vcombine.low %v16711_v36, %v16731_v47 }
 0x2dc   : > { %v16884_v33 = vrot.slane %v1883_v61, %v16585_v12  ;;  %v16887_v56 = vrot.slane %v1884_v15, %v16585_v12  ;;  %v16893_v5 = vrot.slane %v2615_v57, %v16585_v12  ;;  %v1816_v62 = vcombine.high %v1782_v48, %v1798_v4 }
 0x2dd   : > { %v1995_v42 = vrot.slane %v1987_v45, %v16563_v27  ;;  %v1979_v34 = vrot.slane %v1971_v19, %v16563_v27  ;;  %v1986_v63 = vrot.slane %v1972_v54, %v16563_v27  ;;  %v16898_v25 = vrot.slane %v2651_v59, %v16563_v27 }
 0x2de   : > { %v16837_v55 = vpop.permute.xlu1 %1327  ;;  %v16839_v49 = vpop.permute.xlu0 %1279  ;;  %22693 = vst [vmem:[#allocation68_spill] sm:$0xff] %v16893_v5  ;;  %v16901_v61 = vrot.slane %v1799_v24, %v16585_v12  ;;  %v16904_v15 = vrot.slane %v1800_v44, %v16585_v12  ;;  %v2002_v45 = vrot.slane %v1988_v22, %v16563_v27  ;;  %v16912_v4 = vrot.slane %v2631_v38, %v16585_v12 }
 0x2df   : > { %22687 = vst [vmem:[#allocation62_spill] sm:$0xff] %v16837_v55  ;;  %22688 = vst [vmem:[#allocation63_spill] sm:$0xff] %v16839_v49  ;;  %3583 = vrot.lane.b32.xlu1 %v16803_v14, %s15910_s17  ;;  %3615 = vrot.lane.b32.xlu0 %v16839_v49, %s15910_s17  ;;  %v16915_v48 = vrot.slane %v1815_v9, %v16585_v12  ;;  %v16920_v19 = vrot.slane %v14125_v37, %v16563_v27 }
 0x2e0   : > { %22694 = vst [vmem:[#allocation69_spill] sm:$0xff] %v16898_v25  ;;  %22697 = vst [vmem:[#allocation72_spill] sm:$0xff] %v16912_v4  ;;  %v14126_v54 = vcombine.high %v16711_v36, %v16731_v47  ;;  %v2719_v59 = vcombine.low %v16824_v8, %v16827_v46  ;;  %v2003_v24 = vcombine.low %v1979_v34, %v1995_v42 }
 0x2e1   : > { %22698 = vst [vmem:[#allocation73_spill] sm:$0xff] %v16920_v19  ;;  %v1919_v38 = vcombine.low %v16803_v14, %v16837_v55  ;;  %v1903_v9 = vcombine.low %v16469_v31, %v16839_v49  ;;  %v14127_v44 = vcombine.high %v16824_v8, %v16827_v46  ;;  %v16933_v22 = vrot.slane %v1816_v62, %v16585_v12 }
 0x2e2   : > { %v16867_v26 = vpop.permute.xlu1 %1285  ;;  %v16869_v53 = vpop.permute.xlu0 %1237  ;;  %v1920_v37 = vcombine.high %v16803_v14, %v16837_v55  ;;  %v1904_v36 = vcombine.high %v16469_v31, %v16839_v49  ;;  %v16940_v47 = vrot.slane %v2667_v1, %v16563_v27  ;;  %v2004_v51 = vcombine.high %v1979_v34, %v1995_v42 }
 0x2e3   : > { %22691 = vst [vmem:[#allocation66_spill] sm:$0xff] %v16867_v26  ;;  %22692 = vst [vmem:[#allocation67_spill] sm:$0xff] %v16869_v53  ;;  %3647 = vrot.lane.b32.xlu1 %v16837_v55, %s15910_s17  ;;  %3621 = vrot.lane.b32.xlu0 %v16867_v26, %s15910_s17  ;;  %v2019_v3 = vcombine.low %v1986_v63, %v2002_v45  ;;  %v2020_v39 = vcombine.high %v1986_v63, %v2002_v45 }
 0x2e4   : > { %22699 = vst [vmem:[#allocation74_spill] sm:$0xff] %v16940_v47  ;;  %v16953_v62 = vrot.slane %v14126_v54, %v16563_v27  ;;  %v2683_v34 = vcombine.low %v16898_v25, %v16920_v19  ;;  %v16958_v63 = vrot.slane %v2719_v59, %v16563_v27  ;;  %v16961_v1 = vrot.slane %v2003_v24, %v16585_v12 }
 0x2e5   : > { %v1927_v42 = vrot.slane %v1919_v38, %v16563_v27  ;;  %v1911_v45 = vrot.slane %v1903_v9, %v16563_v27  ;;  %v16966_v8 = vrot.slane %v14127_v44, %v16563_v27  ;;  %v1934_v46 = vrot.slane %v1920_v37, %v16563_v27 }
 0x2e6   : > { %v16907_v58 = vpop.permute.xlu1 %1235  ;;  %v16909_v57 = vpop.permute.xlu0 %1333  ;;  %22702 = vst [vmem:[#allocation77_spill] sm:$0xff] %v16953_v62  ;;  %22703 = vst [vmem:[#allocation78_spill] sm:$0xff] %v16958_v63  ;;  %v1918_v54 = vrot.slane %v1904_v36, %v16563_v27  ;;  %v2107_v4 = vcombine.low %v16480_v35, %v16867_v26  ;;  %v16975_v24 = vrot.slane %v2004_v51, %v16585_v12 }
 0x2e7   : > { %22695 = vst [vmem:[#allocation70_spill] sm:$0xff] %v16907_v58  ;;  %22696 = vst [vmem:[#allocation71_spill] sm:$0xff] %v16909_v57  ;;  %3589 = vrot.lane.b32.xlu1 %v16869_v53, %s15910_s17  ;;  %v2123_v59 = vcombine.low %v16869_v53, %v16909_v57  ;;  %v16978_v38 = vrot.slane %v2019_v3, %v16585_v12  ;;  %v16981_v9 = vrot.slane %v2020_v39, %v16585_v12 }
 0x2e8   : > { %22704 = vst [vmem:[#allocation79_spill] sm:$0xff] %v16966_v8  ;;  %v2124_v44 = vcombine.high %v16869_v53, %v16909_v57  ;;  %v2108_v5 = vcombine.high %v16480_v35, %v16867_v26  ;;  %v2699_v3 = vcombine.low %v16940_v47, %v16953_v62  ;;  %v2735_v39 = vcombine.low %v16830_v18, %v16833_v17 }
 0x2e9   : > { %v14128_v51 = vcombine.high %v16830_v18, %v16833_v17  ;;  %v1935_v55 = vcombine.low %v1911_v45, %v1927_v42  ;;  %v1936_v49 = vcombine.high %v1911_v45, %v1927_v42  ;;  %v17002_v14 = vrot.slane %v2683_v34, %v16585_v12 }
 0x2ea   : > { %v16942_v23 = vpop.permute.xlu1 %1331  ;;  %v16944_v29 = vpop.permute.xlu0 %3557  ;;  %v2787_v31 = vcombine.low %v16760_v0, %v16771_v41  ;;  %v1952_v26 = vcombine.high %v1918_v54, %v1934_v46  ;;  %v2115_v53 = vrot.slane %v2107_v4, %v16563_v27  ;;  %v2131_v35 = vrot.slane %v2123_v59, %v16563_v27 }
 0x2eb   : > { %22700 = vst [vmem:[#allocation75_spill] sm:$0xff] %v16942_v23  ;;  %22701 = vst [vmem:[#allocation76_spill] sm:$0xff] %v16944_v29  ;;  %3653 = vrot.lane.b32.xlu1 %v16909_v57, %s15910_s17  ;;  %v1951_v57 = vcombine.low %v1918_v54, %v1934_v46  ;;  %v2138_v29 = vrot.slane %v2124_v44, %v16563_v27  ;;  %v14129_v42 = vcombine.high %v16760_v0, %v16771_v41 }
 0x2ec   : > { %22707 = vst [vmem:[#allocation82_spill] sm:$0xff] %v17002_v14  ;;  %v2803_v34 = vcombine.low %v16774_v60, %v16777_v20  ;;  %v14130_v45 = vcombine.high %v16774_v60, %v16777_v20  ;;  %v2122_v46 = vrot.slane %v2108_v5, %v16563_v27  ;;  %v17023_v4 = vrot.slane %v2699_v3, %v16585_v12 }
 0x2ed   : > { %v17026_v54 = vrot.slane %v2735_v39, %v16563_v27  ;;  %v17029_v59 = vrot.slane %v14128_v51, %v16563_v27  ;;  %v17032_v0 = vrot.slane %v1935_v55, %v16585_v12  ;;  %v17035_v41 = vrot.slane %v1936_v49, %v16585_v12 }
 0x2ee   : > { %v16985_v37 = vpop.permute.xlu1 %1289  ;;  %v16987_v36 = vpop.permute.xlu0 %1283  ;;  %22710 = vst [vmem:[#allocation85_spill] sm:$0xff] %v17023_v4  ;;  %v2751_v60 = vcombine.low %v16958_v63, %v16966_v8  ;;  %v17042_v20 = vrot.slane %v2787_v31, %v16563_v27  ;;  %v2139_v5 = vcombine.low %v2115_v53, %v2131_v35  ;;  %v2140_v44 = vcombine.high %v2115_v53, %v2131_v35 }
 0x2ef   : > { %22705 = vst [vmem:[#allocation80_spill] sm:$0xff] %v16985_v37  ;;  %22706 = vst [vmem:[#allocation81_spill] sm:$0xff] %v16987_v36  ;;  %3587 = vrot.lane.b32.xlu1 %v16907_v58, %s15910_s17  ;;  %3619 = vrot.lane.b32.xlu0 %v16987_v36, %s15910_s17  ;;  %v2039_v3 = vcombine.low %v16487_v32, %v16987_v36  ;;  %v2040_v55 = vcombine.high %v16487_v32, %v16987_v36 }
 0x2f0   : > { %v2155_v39 = vcombine.low %v2122_v46, %v2138_v29  ;;  %v17053_v47 = vrot.slane %v14129_v42, %v16563_v27  ;;  %v17056_v63 = vrot.slane %v2803_v34, %v16563_v27  ;;  %v17059_v31 = vrot.slane %v14130_v45, %v16563_v27 }
 0x2f1   : > { %v17062_v53 = vrot.slane %v1951_v57, %v16585_v12  ;;  %v2055_v35 = vcombine.low %v16907_v58, %v16942_v23  ;;  %v2056_v36 = vcombine.high %v16907_v58, %v16942_v23  ;;  %v2767_v42 = vcombine.low %v17026_v54, %v17029_v59 }
 0x2f2   : > { %v17009_v17 = vpop.permute.xlu1 %1239  ;;  %v17011_v18 = vpop.permute.xlu0 %1241  ;;  %22713 = vst [vmem:[#allocation88_spill] sm:$0xff] %v17056_v63  ;;  %22714 = vst [vmem:[#allocation89_spill] sm:$0xff] %v17059_v31  ;;  %v17073_v34 = vrot.slane %v1952_v26, %v16585_v12  ;;  %v2156_v45 = vcombine.high %v2122_v46, %v2138_v29  ;;  %v17080_v8 = vrot.slane %v2139_v5, %v16585_v12 }
 0x2f3   : > { %22708 = vst [vmem:[#allocation83_spill] sm:$0xff] %v17009_v17  ;;  %22709 = vst [vmem:[#allocation84_spill] sm:$0xff] %v17011_v18  ;;  %3651 = vrot.lane.b32.xlu1 %v16942_v23, %s15910_s17  ;;  %3625 = vrot.lane.b32.xlu0 %v16985_v37, %s15910_s17  ;;  %v2047_v23 = vrot.slane %v2039_v3, %v16563_v27  ;;  %v2054_v58 = vrot.slane %v2040_v55, %v16563_v27 }
 0x2f4   : > { %v17085_v62 = vrot.slane %v2751_v60, %v16585_v12  ;;  %v17088_v26 = vrot.slane %v2140_v44, %v16585_v12  ;;  %v17091_v29 = vrot.slane %v2155_v39, %v16585_v12  ;;  %v2819_v5 = vcombine.low %v17042_v20, %v17053_v47 }
 0x2f5   : > { %v2835_v3 = vcombine.low %v17056_v63, %v17059_v31  ;;  %v2063_v55 = vrot.slane %v2055_v35, %v16563_v27  ;;  %v2070_v60 = vrot.slane %v2056_v36, %v16563_v27  ;;  %v2243_v44 = vcombine.low %v16498_v43, %v16985_v37 }
 0x2f6   : > { %v17048_v49 = vpop.permute.xlu1 %1335  ;;  %v17050_v51 = vpop.permute.xlu0 %1337  ;;  %22715 = vst [vmem:[#allocation90_spill] sm:$0xff] %v17085_v62  ;;  %v17108_v39 = vrot.slane %v2767_v42, %v16585_v12  ;;  %v17111_v32 = vrot.slane %v2156_v45, %v16585_v12  ;;  %v2244_v4 = vcombine.high %v16498_v43, %v16985_v37  ;;  %v2855_v35 = vcombine.low %v16901_v61, %v16904_v15 }
 0x2f7   : > { %22711 = vst [vmem:[#allocation86_spill] sm:$0xff] %v17048_v49  ;;  %22712 = vst [vmem:[#allocation87_spill] sm:$0xff] %v17050_v51  ;;  %3593 = vrot.lane.b32.xlu1 %v17011_v18, %s15910_s17  ;;  %v14131_v36 = vcombine.high %v16901_v61, %v16904_v15  ;;  %v2071_v14 = vcombine.low %v2047_v23, %v2063_v55  ;;  %v2087_v25 = vcombine.low %v2054_v58, %v2070_v60 }
 0x2f8   : > { %22718 = vst [vmem:[#allocation93_spill] sm:$0xff] %v17108_v39  ;;  %v2088_v19 = vcombine.high %v2054_v58, %v2070_v60  ;;  %v17124_v45 = vrot.slane %v2819_v5, %v16585_v12  ;;  %v17127_v31 = vrot.slane %v2835_v3, %v16585_v12  ;;  %v2871_v37 = vcombine.low %v16915_v48, %v16933_v22 }
 0x2f9   : > { %v14132_v61 = vcombine.high %v16915_v48, %v16933_v22  ;;  %v17145_v5 = vrot.slane %v2244_v4, %v16563_v27  ;;  %v2259_v48 = vcombine.low %v17011_v18, %v17050_v51  ;;  %v17150_v22 = vrot.slane %v2855_v35, %v16563_v27 }
 0x2fa   : > { %v17093_v46 = vpop.permute.xlu1 %1293  ;;  %v17095_v57 = vpop.permute.xlu0 %3561  ;;  %22721 = vst [vmem:[#allocation96_spill] sm:$0xff] %v17124_v45  ;;  %22722 = vst [vmem:[#allocation97_spill] sm:$0xff] %v17127_v31  ;;  %v17153_v3 = vrot.slane %v14131_v36, %v16563_v27  ;;  %v17165_v4 = vrot.slane %v2088_v19, %v16585_v12  ;;  %v2260_v15 = vcombine.high %v17011_v18, %v17050_v51 }
 0x2fb   : > { %22716 = vst [vmem:[#allocation91_spill] sm:$0xff] %v17093_v46  ;;  %22717 = vst [vmem:[#allocation92_spill] sm:$0xff] %v17095_v57  ;;  %3657 = vrot.lane.b32.xlu1 %v17050_v51, %s15910_s17  ;;  %v2072_v57 = vcombine.high %v2047_v23, %v2063_v55  ;;  %v17134_v23 = vrot.slane %v2243_v44, %v16563_v27  ;;  %v17156_v55 = vrot.slane %v2071_v14, %v16585_v12 }
 0x2fc   : > { %v17162_v44 = vrot.slane %v2087_v25, %v16585_v12  ;;  %v17176_v36 = vrot.slane %v2871_v37, %v16563_v27  ;;  %v2191_v25 = vcombine.low %v17009_v17, %v17048_v49  ;;  %v2923_v39 = vcombine.low %v16874_v13, %v16877_v6 }
 0x2fd   : > { %v17159_v60 = vrot.slane %v2072_v57, %v16585_v12  ;;  %v17179_v57 = vrot.slane %v14132_v61, %v16563_v27  ;;  %v14133_v14 = vcombine.high %v16874_v13, %v16877_v6  ;;  %v2192_v37 = vcombine.high %v17009_v17, %v17048_v49 }
 0x2fe   : > { %v17119_v63 = vpop.permute.xlu1 %1341  ;;  %v17121_v42 = vpop.permute.xlu0 %1287  ;;  %v2267_v61 = vrot.slane %v2259_v48, %v16563_v27  ;;  %v2939_v62 = vcombine.low %v16884_v33, %v16887_v56  ;;  %v2991_v19 = vcombine.low %v17032_v0, %v17035_v41  ;;  %v14135_v31 = vcombine.high %v17032_v0, %v17035_v41 }
 0x2ff   : > { %22719 = vst [vmem:[#allocation94_spill] sm:$0xff] %v17119_v63  ;;  %22720 = vst [vmem:[#allocation95_spill] sm:$0xff] %v17121_v42  ;;  %3591 = vrot.lane.b32.xlu1 %v17009_v17, %s15910_s17  ;;  %3623 = vrot.lane.b32.xlu0 %v17121_v42, %s15910_s17  ;;  %v3007_v6 = vcombine.low %v17062_v53, %v17073_v34  ;;  %v14136_v13 = vcombine.high %v17062_v53, %v17073_v34 }
 0x300   : > { %v2274_v48 = vrot.slane %v2260_v15, %v16563_v27  ;;  %v2175_v45 = vcombine.low %v16505_v7, %v17121_v42  ;;  %v2176_v0 = vcombine.high %v16505_v7, %v17121_v42  ;;  %v17222_v41 = vrot.slane %v2923_v39, %v16563_v27 }
 0x301   : > { %v17225_v53 = vrot.slane %v14133_v14, %v16563_v27  ;;  %v2275_v34 = vcombine.low %v17134_v23, %v2267_v61  ;;  %v2276_v15 = vcombine.high %v17134_v23, %v2267_v61  ;;  %v17232_v42 = vrot.slane %v2939_v62, %v16563_v27 }
 0x302   : > { %v17169_v35 = vpop.permute.xlu1 %3565  ;;  %v17171_v58 = vpop.permute.xlu0 %3559  ;;  %v17238_v7 = vrot.slane %v2991_v19, %v16563_v27  ;;  %v17241_v39 = vrot.slane %v14135_v31, %v16563_v27  ;;  %v17244_v14 = vrot.slane %v3007_v6, %v16563_v27  ;;  %v17247_v51 = vrot.slane %v14136_v13, %v16563_v27 }
 0x303   : > { %22723 = vst [vmem:[#allocation98_spill] sm:$0xff] %v17169_v35  ;;  %22724 = vst [vmem:[#allocation99_spill] sm:$0xff] %v17171_v58  ;;  %3655 = vrot.lane.b32.xlu1 %v17048_v49, %s15910_s17  ;;  %v14134_v35 = vcombine.high %v16884_v33, %v16887_v56  ;;  %v2887_v33 = vcombine.low %v17150_v22, %v17153_v3  ;;  %v2903_v56 = vcombine.low %v17176_v36, %v17179_v57 }
 0x304   : > { %22727 = vst [vmem:[#allocation102_spill] sm:$0xff] %v17232_v42  ;;  %22729 = vst [vmem:[#allocation104_spill] sm:$0xff] %v17238_v7  ;;  %v2199_v23 = vrot.slane %v2191_v25, %v16563_v27  ;;  %v2291_v62 = vcombine.low %v17145_v5, %v2274_v48  ;;  %v2292_v61 = vcombine.high %v17145_v5, %v2274_v48 }
 0x305   : > { %v17235_v17 = vrot.slane %v14134_v35, %v16563_v27  ;;  %22730 = vst [vmem:[#allocation105_spill] sm:$0xff] %v17241_v39  ;;  %22731 = vst [vmem:[#allocation106_spill] sm:$0xff] %v17244_v14  ;;  %v2183_v35 = vrot.slane %v2175_v45, %v16563_v27  ;;  %v2206_v19 = vrot.slane %v2192_v37, %v16563_v27 }
 0x306   : > { %v17209_v58 = vpop.permute.xlu0 %1245  ;;  %v17229_v49 = vpop.permute.xlu1 %1243  ;;  %v2379_v31 = vcombine.low %v16516_v16, %v17093_v46  ;;  %v2190_v18 = vrot.slane %v2176_v0, %v16563_v27  ;;  %v17260_v6 = vrot.slane %v2887_v33, %v16585_v12  ;;  %v2380_v25 = vcombine.high %v16516_v16, %v17093_v46 }
 0x307   : > { %22725 = vst [vmem:[#allocation100_spill] sm:$0xff] %v17209_v58  ;;  %3629 = vrot.lane.b32.xlu1 %v17093_v46, %s15910_s17  ;;  %3597 = vrot.lane.b32.xlu0 %v17209_v58, %s15910_s17  ;;  %22726 = vst [vmem:[#allocation101_spill] sm:$0xff] %v17229_v49  ;;  %v17267_v45 = vrot.slane %v2903_v56, %v16585_v12  ;;  %v2955_v5 = vcombine.low %v17222_v41, %v17225_v53 }
 0x308   : > { %22728 = vst [vmem:[#allocation103_spill] sm:$0xff] %v17235_v17  ;;  %22732 = vst [vmem:[#allocation107_spill] sm:$0xff] %v17260_v6  ;;  %v2971_v37 = vcombine.low %v17232_v42, %v17235_v17  ;;  %v17274_v13 = vrot.slane %v2275_v34, %v16585_v12  ;;  %v17277_v48 = vrot.slane %v2276_v15, %v16585_v12 }
 0x309   : > { %22733 = vst [vmem:[#allocation108_spill] sm:$0xff] %v17267_v45  ;;  %v3023_v33 = vcombine.low %v17238_v7, %v17241_v39  ;;  %v3039_v0 = vcombine.low %v17244_v14, %v17247_v51  ;;  %v17284_v56 = vrot.slane %v2291_v62, %v16585_v12  ;;  %v17287_v43 = vrot.slane %v2292_v61, %v16585_v12 }
 0x30a   : > { %v2207_v46 = vcombine.low %v2183_v35, %v2199_v23  ;;  %v2395_v34 = vcombine.low %v17209_v58, %v17119_v63  ;;  %v17291_v16 = vpop.permute.xlu1 %1339  ;;  %v17294_v15 = vrot.slane %v2379_v31, %v16563_v27  ;;  %v2208_v42 = vcombine.high %v2183_v35, %v2199_v23  ;;  %v17296_v17 = vpop.permute.xlu0 %1291 }
 0x30b   : > { %3595 = vrot.lane.b32.xlu1 %v17229_v49, %s15910_s17  ;;  %3661 = vrot.lane.b32.xlu0 %v17119_v63, %s15910_s17  ;;  %22734 = vst [vmem:[#allocation109_spill] sm:$0xff] %v17291_v16  ;;  %v2223_v7 = vcombine.low %v2190_v18, %v2206_v19  ;;  %v2224_v39 = vcombine.high %v2190_v18, %v2206_v19  ;;  %22735 = vst [vmem:[#allocation110_spill] sm:$0xff] %v17296_v17 }
 0x30c   : > { %v17301_v62 = vrot.slane %v2380_v25, %v16563_v27  ;;  %v17306_v61 = vrot.slane %v2955_v5, %v16585_v12  ;;  %v17309_v31 = vrot.slane %v2971_v37, %v16585_v12  ;;  %v3059_v18 = vcombine.low %v16961_v1, %v16975_v24 }
 0x30d   : > { %v2396_v23 = vcombine.high %v17209_v58, %v17119_v63  ;;  %v17316_v35 = vrot.slane %v3023_v33, %v16585_v12  ;;  %v17319_v19 = vrot.slane %v3039_v0, %v16585_v12  ;;  %v14137_v25 = vcombine.high %v16961_v1, %v16975_v24 }
 0x30e   : > { %22736 = vst [vmem:[#allocation111_spill] sm:$0xff] %v17306_v61  ;;  %22737 = vst [vmem:[#allocation112_spill] sm:$0xff] %v17309_v31  ;;  %v17324_v5 = vrot.slane %v2207_v46, %v16585_v12  ;;  %v2403_v37 = vrot.slane %v2395_v34, %v16563_v27  ;;  %v17332_v33 = vrot.slane %v2208_v42, %v16585_v12 }
 0x30f   : > { %3659 = vrot.lane.b32.xlu1 %v17291_v16, %s15910_s17  ;;  %3627 = vrot.lane.b32.xlu0 %v17296_v17, %s15910_s17  ;;  %22738 = vst [vmem:[#allocation113_spill] sm:$0xff] %v17316_v35  ;;  %22739 = vst [vmem:[#allocation114_spill] sm:$0xff] %v17319_v19  ;;  %v17335_v0 = vrot.slane %v2223_v7, %v16585_v12  ;;  %v17338_v58 = vrot.slane %v2224_v39, %v16585_v12 }
 0x310   : > { %v3075_v1 = vcombine.low %v16978_v38, %v16981_v9  ;;  %v17351_v7 = vrot.slane %v3059_v18, %v16563_v27  ;;  %v14138_v42 = vcombine.high %v16978_v38, %v16981_v9  ;;  %v2410_v39 = vrot.slane %v2396_v23, %v16563_v27 }
 0x311   : > { %v17361_v14 = vrot.slane %v14137_v25, %v16563_v27  ;;  %v2411_v24 = vcombine.low %v17294_v15, %v2403_v37  ;;  %v2327_v18 = vcombine.low %v17229_v49, %v17291_v16  ;;  %v2311_v46 = vcombine.low %v16531_v50, %v17296_v17 }
 0x312   : > { %v3127_v38 = vcombine.low %v17156_v55, %v17159_v60  ;;  %v2412_v9 = vcombine.high %v17294_v15, %v2403_v37  ;;  %v2328_v23 = vcombine.high %v17229_v49, %v17291_v16  ;;  %v2312_v25 = vcombine.high %v16531_v50, %v17296_v17 }
 0x313   : > { %3579 = vrot.lane.b32.xlu1 %v16714_v40, %s15910_s17  ;;  %3547 = vrot.lane.b32.xlu0 %v16451_v28, %s15910_s17  ;;  %v17378_v63 = vrot.slane %v3075_v1, %v16563_v27  ;;  %v17383_v34 = vrot.slane %v14138_v42, %v16563_v27  ;;  %v14139_v15 = vcombine.high %v17156_v55, %v17159_v60 }
 0x314   : > { %v3143_v37 = vcombine.low %v17162_v44, %v17165_v4  ;;  %v14140_v19 = vcombine.high %v17162_v44, %v17165_v4  ;;  %v2427_v35 = vcombine.low %v17301_v62, %v2410_v39  ;;  %v2428_v1 = vcombine.high %v17301_v62, %v2410_v39 }
 0x315   : > { %v3195_v31 = vcombine.low %v17080_v8, %v17088_v26  ;;  %v14141_v42 = vcombine.high %v17080_v8, %v17088_v26  ;;  %v2335_v61 = vrot.slane %v2327_v18, %v16563_v27  ;;  %v2319_v55 = vrot.slane %v2311_v46, %v16563_v27 }
 0x316   : > { %v3211_v60 = vcombine.low %v17091_v29, %v17111_v32  ;;  %v14142_v44 = vcombine.high %v17091_v29, %v17111_v32  ;;  %v2342_v4 = vrot.slane %v2328_v23, %v16563_v27  ;;  %v2326_v62 = vrot.slane %v2312_v25, %v16563_v27 }
 0x317   : > { %3643 = vrot.lane.b32.xlu1 %v16738_v2, %s15910_s17  ;;  %3611 = vrot.lane.b32.xlu0 %v16740_v52, %s15910_s17  ;;  %v3091_v8 = vcombine.low %v17351_v7, %v17361_v14  ;;  %v17410_v26 = vrot.slane %v3127_v38, %v16563_v27  ;;  %v3107_v46 = vcombine.low %v17378_v63, %v17383_v34  ;;  %v22758_v52 = vld [vmem:[#allocation44_spill] sm:$0xff] }
 0x318   : > { %v17417_v32 = vrot.slane %v14139_v15, %v16563_v27  ;;  %v17420_v29 = vrot.slane %v3143_v37, %v16563_v27  ;;  %v17423_v39 = vrot.slane %v14140_v19, %v16563_v27  ;;  %v17426_v18 = vrot.slane %v2411_v24, %v16585_v12 }
 0x319   : > { %v17429_v38 = vrot.slane %v2412_v9, %v16585_v12  ;;  %v17432_v23 = vrot.slane %v3195_v31, %v16563_v27  ;;  %v17435_v25 = vrot.slane %v14141_v42, %v16563_v27  ;;  %v2343_v15 = vcombine.low %v2319_v55, %v2335_v61 }
 0x31a   : > { %v2344_v45 = vcombine.high %v2319_v55, %v2335_v61  ;;  %v17438_v37 = vrot.slane %v3211_v60, %v16563_v27  ;;  %v17441_v19 = vrot.slane %v14142_v44, %v16563_v27  ;;  %v2359_v6 = vcombine.low %v2326_v62, %v2342_v4 }
 0x31b   : > { %3577 = vrot.lane.b32.xlu1 %v16625_v11, %s15910_s17  ;;  %3545 = vrot.lane.b32.xlu0 %v16426_v21, %s15910_s17  ;;  %v2360_v24 = vcombine.high %v2326_v62, %v2342_v4  ;;  %v3263_v31 = vcombine.low %v17324_v5, %v17332_v33  ;;  %v14143_v9 = vcombine.high %v17324_v5, %v17332_v33  ;;  %v17464_v4 = vpop.permute.xlu0 %3555  ;;  %v22752_v11 = vld [vmem:[#allocation38_spill] sm:$0xff] }
 0x31c   : > { %v17452_v61 = vrot.slane %v3091_v8, %v16585_v12  ;;  %v17455_v42 = vrot.slane %v3107_v46, %v16585_v12  ;;  %v3159_v55 = vcombine.low %v17410_v26, %v17417_v32  ;;  %v3175_v60 = vcombine.low %v17420_v29, %v17423_v39 }
 0x31d   : > { %v17462_v44 = vrot.slane %v2427_v35, %v16585_v12  ;;  %v3227_v5 = vcombine.low %v17432_v23, %v17435_v25  ;;  %v3279_v33 = vcombine.low %v17335_v0, %v17338_v58  ;;  %v14144_v62 = vcombine.high %v17335_v0, %v17338_v58 }
 0x31e   : > { %22740 = vst [vmem:[#allocation115_spill] sm:$0xff] %v17452_v61  ;;  %22741 = vst [vmem:[#allocation116_spill] sm:$0xff] %v17455_v42  ;;  %v2442_v8 = vrot.slane %v2428_v1, %v16585_v12  ;;  %v2351_v46 = vrot.slane %v2343_v15, %v16585_v12  ;;  %v2358_v16 = vrot.slane %v2344_v45, %v16585_v12  ;;  %v22743_v45 = vld [vmem:[#allocation13_spill] sm:$0xff] }
 0x31f   : > { %3641 = vrot.lane.b32.xlu1 %v16652_v30, %s15910_s17  ;;  %3609 = vrot.lane.b32.xlu0 %v16623_v10, %s15910_s17  ;;  %v3243_v35 = vcombine.low %v17438_v37, %v17441_v19  ;;  %v17478_v49 = vrot.slane %v2359_v6, %v16585_v12  ;;  %v17481_v17 = vrot.slane %v2360_v24, %v16585_v12  ;;  %v22742_v30 = vld [vmem:[#allocation42_spill] sm:$0xff]  ;;  %v22746_v24 = vld [vmem:[#allocation36_spill] sm:$0xff] }
 0x320   : > { %v17486_v58 = vrot.slane %v3263_v31, %v16563_v27  ;;  %v17489_v0 = vrot.slane %v14143_v9, %v16563_v27  ;;  %v17496_v6 = vrot.slane %v3159_v55, %v16585_v12  ;;  %v17499_v15 = vrot.slane %v3175_v60, %v16585_v12 }
 0x321   : > { %v17508_v9 = vrot.slane %v3227_v5, %v16585_v12  ;;  %v17514_v1 = vrot.slane %v14144_v62, %v16563_v27  ;;  %v3331_v55 = vcombine.low %v17274_v13, %v17277_v48  ;;  %v17519_v60 = vrot.slane %v3243_v35, %v16585_v12  ;;  %v17531_v62 = vpop.permute.xlu0 %3553 }
 0x322   : > { %22744 = vst [vmem:[#allocation117_spill] sm:$0xff] %v17496_v6  ;;  %22745 = vst [vmem:[#allocation118_spill] sm:$0xff] %v17499_v15  ;;  %v3295_v35 = vcombine.low %v17486_v58, %v17489_v0  ;;  %v14145_v40 = vcombine.high %v17274_v13, %v17277_v48  ;;  %v14147_v2 = vcombine.high %v2351_v46, %v2358_v16  ;;  %v22760_v13 = vld [vmem:[#allocation31_spill] sm:$0xff] }
 0x323   : > { %3575 = vrot.lane.b32.xlu1 %v22742_v30, %s15910_s17  ;;  %3543 = vrot.lane.b32.xlu0 %v22743_v45, %s15910_s17  ;;  %v22747_v30 = vld [vmem:[#allocation37_spill] sm:$0xff]  ;;  %v17511_v45 = vrot.slane %v3279_v33, %v16563_v27  ;;  %22751 = vst [vmem:[#allocation119_spill] sm:$0xff] %v17519_v60  ;;  %v3399_v33 = vcombine.low %v2351_v46, %v2358_v16 }
 0x324   : > { %v22748_v31 = vcombine.high %v22746_v24, %v22747_v30  ;;  %22750 = vst [vmem:[#allocation37_spill] sm:$0xff] %v17508_v9  ;;  %v22753_v30 = vld [vmem:[#allocation39_spill] sm:$0xff]  ;;  %v17552_v48 = vrot.slane %v3331_v55, %v16563_v27  ;;  %v3483_v16 = vcombine.low %v17462_v44, %v2442_v8  ;;  %v14150_v46 = vcombine.high %v17462_v44, %v2442_v8  ;;  %v22762_v44 = vld [vmem:[#allocation10_spill] sm:$0xff] }
 0x325   : > { %v22754_v24 = vcombine.high %v22752_v11, %v22753_v30  ;;  %v3347_v11 = vcombine.low %v17284_v56, %v17287_v43  ;;  %v14146_v30 = vcombine.high %v17284_v56, %v17287_v43  ;;  %v3467_v43 = vcombine.low %v17426_v18, %v17429_v38 }
 0x326   : > { %v17505_v10 = vrot.slane %v22748_v31, %v16585_v12  ;;  %v14149_v56 = vcombine.high %v17426_v18, %v17429_v38  ;;  %v2820_v21 = vcombine.high %v17042_v20, %v17053_v47  ;;  %v17567_v55 = vrot.slane %v3295_v35, %v16585_v12  ;;  %v17590_v35 = vpop.permute.xlu0 %3551  ;;  %v22764_v38 = vld [vmem:[#allocation89_spill] sm:$0xff] }
 0x327   : > { %v17525_v31 = vrot.slane %v22754_v24, %v16585_v12  ;;  %3639 = vrot.lane.b32.xlu1 %v22758_v52, %s15910_s17  ;;  %v22759_v24 = vld [vmem:[#allocation45_spill] sm:$0xff]  ;;  %v17573_v18 = vrot.slane %v3347_v11, %v16563_v27  ;;  %v17580_v47 = vrot.slane %v14146_v30, %v16563_v27  ;;  %v17583_v20 = vrot.slane %v3399_v33, %v16563_v27  ;;  %v22765_v33 = vld [vmem:[#allocation88_spill] sm:$0xff] }
 0x328   : > { %22749 = vst [vmem:[#allocation36_spill] sm:$0xff] %v17505_v10  ;;  %3607 = vrot.lane.b32.xlu0 %v22759_v24, %s15910_s17  ;;  %22761 = vst [vmem:[#allocation39_spill] sm:$0xff] %v17567_v55  ;;  %v17586_v8 = vrot.slane %v14147_v2, %v16563_v27  ;;  %v17593_v11 = vrot.slane %v3467_v43, %v16563_v27  ;;  %v17596_v5 = vrot.slane %v14149_v56, %v16563_v27  ;;  %v22766_v56 = vld [vmem:[#allocation33_spill] sm:$0xff]  ;;  %v22771_v52 = vld [vmem:[#allocation104_spill] sm:$0xff] }
 0x329   : > { %22755 = vst [vmem:[#allocation38_spill] sm:$0xff] %v17525_v31  ;;  %v17570_v31 = vrot.slane %v14145_v40, %v16563_v27  ;;  %v17599_v30 = vrot.slane %v2820_v21, %v16585_v12  ;;  %v2836_v10 = vcombine.high %v22765_v33, %v22764_v38  ;;  %v17604_v2 = vrot.slane %v3483_v16, %v16563_v27  ;;  %v22768_v16 = vld [vmem:[#allocation103_spill] sm:$0xff]  ;;  %v22769_v33 = vld [vmem:[#allocation102_spill] sm:$0xff] }
 0x32a   : > { %v2888_v40 = vcombine.high %v17150_v22, %v17153_v3  ;;  %v2904_v43 = vcombine.high %v17176_v36, %v17179_v57  ;;  %v2956_v38 = vcombine.high %v17222_v41, %v17225_v53  ;;  %v22772_v22 = vld [vmem:[#allocation30_spill] sm:$0xff]  ;;  %v3092_v41 = vcombine.high %v17351_v7, %v17361_v14 }
 0x32b   : > { %3573 = vrot.lane.b32.xlu1 %v22760_v13, %s15910_s17  ;;  %22763 = vst [vmem:[#allocation120_spill] sm:$0xff] %v17599_v30  ;;  %v17607_v13 = vrot.slane %v14150_v46, %v16563_v27  ;;  %v17616_v21 = vrot.slane %v2836_v10, %v16585_v12  ;;  %v22770_v46 = vld [vmem:[#allocation105_spill] sm:$0xff]  ;;  %v22775_v10 = vld [vmem:[#allocation106_spill] sm:$0xff]  ;;  %v3500_v53 = vcombine.high %v17593_v11, %v17596_v5 }
 0x32c   : > { %3541 = vrot.lane.b32.xlu0 %v22762_v44, %s15910_s17  ;;  %v2972_v44 = vcombine.high %v22769_v33, %v22768_v16  ;;  %v3024_v24 = vcombine.high %v22771_v52, %v22770_v46  ;;  %v17627_v3 = vrot.slane %v2888_v40, %v16585_v12  ;;  %v17630_v36 = vrot.slane %v2904_v43, %v16585_v12  ;;  %v17656_v33 = vpop.permute.xlu0 %3549 }
 0x32d   : > { %22767 = vst [vmem:[#allocation89_spill] sm:$0xff] %v17616_v21  ;;  %v3040_v57 = vcombine.high %v22775_v10, %v17247_v51  ;;  %v17641_v16 = vrot.slane %v2956_v38, %v16585_v12  ;;  %v22780_v38 = vld [vmem:[#allocation32_spill] sm:$0xff]  ;;  %v17665_v10 = vrot.slane %v3092_v41, %v16585_v12  ;;  %v3176_v46 = vcombine.high %v17420_v29, %v17423_v39  ;;  %v22786_v39 = vld [vmem:[#allocation34_spill] sm:$0xff] }
 0x32e   : > { %22773 = vst [vmem:[#allocation88_spill] sm:$0xff] %v17627_v3  ;;  %22774 = vst [vmem:[#allocation33_spill] sm:$0xff] %v17630_v36  ;;  %v17644_v40 = vrot.slane %v2972_v44, %v16585_v12  ;;  %v17651_v14 = vrot.slane %v3024_v24, %v16585_v12  ;;  %v3108_v24 = vcombine.high %v17378_v63, %v17383_v34  ;;  %v22827_v36 = vld [vmem:[#allocation79_spill] sm:$0xff]  ;;  %v22840_v21 = vld [vmem:[#allocation94_spill] sm:$0xff] }
 0x32f   : > { %3637 = vrot.lane.b32.xlu1 %v22766_v56, %s15910_s17  ;;  %22776 = vst [vmem:[#allocation103_spill] sm:$0xff] %v17641_v16  ;;  %v17654_v7 = vrot.slane %v3040_v57, %v16585_v12  ;;  %22781 = vst [vmem:[#allocation30_spill] sm:$0xff] %v17665_v10  ;;  %v22782_v57 = vld [vmem:[#allocation11_spill] sm:$0xff]  ;;  %v3160_v44 = vcombine.high %v17410_v26, %v17417_v32  ;;  %v3228_v63 = vcombine.high %v17432_v23, %v17435_v25 }
 0x330   : > { %3605 = vrot.lane.b32.xlu0 %v22772_v22, %s15910_s17  ;;  %22777 = vst [vmem:[#allocation102_spill] sm:$0xff] %v17644_v40  ;;  %22778 = vst [vmem:[#allocation105_spill] sm:$0xff] %v17651_v14  ;;  %v17680_v41 = vrot.slane %v3108_v24, %v16585_v12  ;;  %v3244_v34 = vcombine.high %v17438_v37, %v17441_v19  ;;  %v3296_v51 = vcombine.high %v17486_v58, %v17489_v0  ;;  %v22789_v58 = vld [vmem:[#allocation35_spill] sm:$0xff]  ;;  %v22799_v0 = vld [vmem:[#allocation8_spill] sm:$0xff] }
 0x331   : > { %22779 = vst [vmem:[#allocation104_spill] sm:$0xff] %v17654_v7  ;;  %v17689_v43 = vrot.slane %v3160_v44, %v16585_v12  ;;  %v17692_v26 = vrot.slane %v3176_v46, %v16585_v12  ;;  %v3312_v32 = vcombine.high %v17511_v45, %v17514_v1  ;;  %v3364_v29 = vcombine.high %v17552_v48, %v17570_v31  ;;  %v22793_v25 = vld [vmem:[#allocation23_spill] sm:$0xff] }
 0x332   : > { %22783 = vst [vmem:[#allocation106_spill] sm:$0xff] %v17680_v41  ;;  %v17705_v37 = vrot.slane %v3228_v63, %v16585_v12  ;;  %v17708_v19 = vrot.slane %v3244_v34, %v16585_v12  ;;  %v17717_v46 = vrot.slane %v3296_v51, %v16585_v12  ;;  %v17722_v63 = vpop.permute.xlu0 %3563  ;;  %v3380_v44 = vcombine.high %v17573_v18, %v17580_v47 }
 0x333   : > { %3571 = vrot.lane.b32.xlu1 %v22780_v38, %s15910_s17  ;;  %22784 = vst [vmem:[#allocation32_spill] sm:$0xff] %v17689_v43  ;;  %22785 = vst [vmem:[#allocation11_spill] sm:$0xff] %v17692_v26  ;;  %v17720_v24 = vrot.slane %v3312_v32, %v16585_v12  ;;  %v17729_v23 = vrot.slane %v3364_v29, %v16585_v12  ;;  %v3363_v51 = vcombine.low %v17552_v48, %v17570_v31 }
 0x334   : > { %3539 = vrot.lane.b32.xlu0 %v22782_v57, %s15910_s17  ;;  %22787 = vst [vmem:[#allocation34_spill] sm:$0xff] %v17705_v37  ;;  %22788 = vst [vmem:[#allocation121_spill] sm:$0xff] %v17708_v19  ;;  %v3379_v32 = vcombine.low %v17573_v18, %v17580_v47  ;;  %v22794_v29 = vcombine.low %v17511_v45, %v17514_v1  ;;  %v22796_v31 = vcombine.low %v17478_v49, %v17481_v17  ;;  %v22807_v19 = vld [vmem:[#allocation24_spill] sm:$0xff] }
 0x335   : > { %22790 = vst [vmem:[#allocation35_spill] sm:$0xff] %v17717_v46  ;;  %22791 = vst [vmem:[#allocation122_spill] sm:$0xff] %v17720_v24  ;;  %v22797_v18 = vcombine.high %v17478_v49, %v17481_v17  ;;  %v17758_v34 = vrot.slane %v3380_v44, %v16585_v12  ;;  %v3516_v1 = vcombine.high %v17604_v2, %v17607_v13 }
 0x336   : > { %22792 = vst [vmem:[#allocation123_spill] sm:$0xff] %v17729_v23  ;;  %v17747_v52 = vrot.slane %v22794_v29, %v16585_v12  ;;  %v3422_v48 = vrot.slane %v22796_v31, %v16563_v27  ;;  %v3431_v31 = vcombine.low %v17583_v20, %v17586_v8  ;;  %v17783_v24 = vrot.slane %v3363_v51, %v16585_v12 }
 0x337   : > { %3635 = vrot.lane.b32.xlu1 %v22786_v39, %s15910_s17  ;;  %v3430_v47 = vrot.slane %v22797_v18, %v16563_v27  ;;  %22798 = vst [vmem:[#allocation124_spill] sm:$0xff] %v17758_v34  ;;  %v17786_v44 = vrot.slane %v3379_v32, %v16585_v12  ;;  %v22802_v18 = vld [vmem:[#allocation25_spill] sm:$0xff]  ;;  %v17793_v46 = vrot.slane %v3500_v53, %v16585_v12  ;;  %v22805_v32 = vld [vmem:[#allocation22_spill] sm:$0xff] }
 0x338   : > { %3603 = vrot.lane.b32.xlu0 %v22789_v58, %s15910_s17  ;;  %22795 = vst [vmem:[#allocation23_spill] sm:$0xff] %v17747_v52  ;;  %22800 = vst [vmem:[#allocation8_spill] sm:$0xff] %v17783_v24  ;;  %v17796_v29 = vrot.slane %v3516_v1, %v16585_v12  ;;  %v17805_v37 = vrot.slane %v3431_v31, %v16585_v12  ;;  %v3432_v53 = vcombine.high %v17583_v20, %v17586_v8 }
 0x339   : > { %22801 = vst [vmem:[#allocation125_spill] sm:$0xff] %v17786_v44  ;;  %v3447_v23 = vcombine.low %v3422_v48, %v3430_v47  ;;  %22803 = vst [vmem:[#allocation25_spill] sm:$0xff] %v17793_v46  ;;  %v3448_v26 = vcombine.high %v3422_v48, %v3430_v47  ;;  %v3499_v8 = vcombine.low %v17593_v11, %v17596_v5  ;;  %v22812_v11 = vld [vmem:[#allocation61_spill] sm:$0xff] }
 0x33a   : > { %22804 = vst [vmem:[#allocation126_spill] sm:$0xff] %v17796_v29  ;;  %22806 = vst [vmem:[#allocation22_spill] sm:$0xff] %v17805_v37  ;;  %v17825_v48 = vrot.slane %v3432_v53, %v16585_v12  ;;  %v3515_v5 = vcombine.low %v17604_v2, %v17607_v13  ;;  %v22813_v53 = vld [vmem:[#allocation60_spill] sm:$0xff] }
 0x33b   : > { %3569 = vrot.lane.b32.xlu1 %v22793_v25, %s15910_s17  ;;  %v17820_v20 = vrot.slane %v3447_v23, %v16585_v12  ;;  %v22811_v23 = vld [vmem:[#allocation9_spill] sm:$0xff]  ;;  %v2616_v31 = vcombine.high %v22813_v53, %v22812_v11  ;;  %v17851_v2 = vrot.slane %v3499_v8, %v16585_v12  ;;  %v22817_v53 = vld [vmem:[#allocation64_spill] sm:$0xff] }
 0x33c   : > { %3537 = vrot.lane.b32.xlu0 %v22799_v0, %s15910_s17  ;;  %22809 = vst [vmem:[#allocation127_spill] sm:$0xff] %v17825_v48  ;;  %v22816_v11 = vld [vmem:[#allocation65_spill] sm:$0xff]  ;;  %v17862_v13 = vrot.slane %v3515_v5, %v16585_v12  ;;  %v22825_v5 = vld [vmem:[#allocation100_spill] sm:$0xff] }
 0x33d   : > { %v3582_v17 = vpop.permute.xlu1 %3581  ;;  %v3614_v49 = vpop.permute.xlu0 %3613  ;;  %22808 = vst [vmem:[#allocation24_spill] sm:$0xff] %v17820_v20  ;;  %22815 = vst [vmem:[#allocation9_spill] sm:$0xff] %v17851_v2  ;;  %v17865_v8 = vrot.slane %v2616_v31, %v16585_v12  ;;  %v22823_v48 = vld [vmem:[#allocation77_spill] sm:$0xff] }
 0x33e   : > { %v4203_v45 = vcombine.low %v17656_v33, %v3614_v49  ;;  %v4204_v51 = vcombine.high %v17656_v33, %v3614_v49  ;;  %22819 = vst [vmem:[#allocation61_spill] sm:$0xff] %v17862_v13 }
 0x33f   : > { %3633 = vrot.lane.b32.xlu1 %v22802_v18, %s15910_s17  ;;  %22820 = vst [vmem:[#allocation60_spill] sm:$0xff] %v17865_v8 }
 0x340   : > { %3601 = vrot.lane.b32.xlu0 %v22805_v32, %s15910_s17  ;;  %v4211_v47 = vrot.slane %v4203_v45, %v16563_v27 }
 0x341   : > { %v3646_v34 = vpop.permute.xlu1 %3645 }
 0x342   : > { %v4219_v49 = vcombine.low %v3582_v17, %v3646_v34  ;;  %v4220_v43 = vcombine.high %v3582_v17, %v3646_v34  ;;  %v17828_v34 = vrot.slane %v3448_v26, %v16585_v12  ;;  %v4218_v17 = vrot.slane %v4204_v51, %v16563_v27 }
 0x343   : > { %3567 = vrot.lane.b32.xlu1 %v22807_v19, %s15910_s17  ;;  %v2632_v26 = vcombine.high %v22817_v53, %v22816_v11  ;;  %v22821_v11 = vld [vmem:[#allocation73_spill] sm:$0xff] }
 0x344   : > { %22810 = vst [vmem:[#allocation128_spill] sm:$0xff] %v17828_v34  ;;  %v4227_v33 = vrot.slane %v4219_v49, %v16563_v27  ;;  %v4234_v1 = vrot.slane %v4220_v43, %v16563_v27  ;;  %3535 = vrot.lane.b32.xlu0 %v22811_v23, %s15910_s17  ;;  %v22814_v43 = vld [vmem:[#allocation27_spill] sm:$0xff]  ;;  %v22822_v53 = vld [vmem:[#allocation69_spill] sm:$0xff] }
 0x345   : > { %v17876_v31 = vrot.slane %v2632_v26, %v16585_v12 }
 0x346   : > { %v4235_v51 = vcombine.low %v4211_v47, %v4227_v33  ;;  %v4236_v41 = vcombine.high %v4211_v47, %v4227_v33  ;;  %v4251_v49 = vcombine.low %v4218_v17, %v4234_v1  ;;  %v4252_v29 = vcombine.high %v4218_v17, %v4234_v1  ;;  %v22818_v17 = vld [vmem:[#allocation28_spill] sm:$0xff] }
 0x347   : > { %3631 = vrot.lane.b32.xlu1 %v22814_v43, %s15910_s17  ;;  %22826 = vst [vmem:[#allocation27_spill] sm:$0xff] %v17876_v31 }
 0x348   : > { %v4243_v45 = vrot.slane %v4235_v51, %v16585_v12  ;;  %v4250_v33 = vrot.slane %v4236_v41, %v16585_v12  ;;  %v4259_v1 = vrot.slane %v4251_v49, %v16585_v12  ;;  %v4266_v47 = vrot.slane %v4252_v29, %v16585_v12  ;;  %3599 = vrot.lane.b32.xlu0 %v22818_v17, %s15910_s17  ;;  %v22824_v41 = vld [vmem:[#allocation74_spill] sm:$0xff] }
 0x349   : > { %v3586_v46 = vpop.permute.xlu1 %3585  ;;  %v3618_v34 = vpop.permute.xlu0 %3617  ;;  %v2684_v51 = vcombine.high %v22822_v53, %v22821_v11  ;;  %v2700_v10 = vcombine.high %v22824_v41, %v22823_v48  ;;  %v22828_v11 = vld [vmem:[#allocation78_spill] sm:$0xff]  ;;  %v22829_v48 = vld [vmem:[#allocation21_spill] sm:$0xff] }
 0x34a   : > { %v5291_v49 = vcombine.low %v4243_v45, %v4250_v33  ;;  %v14165_v7 = vcombine.high %v4243_v45, %v4250_v33  ;;  %v5307_v29 = vcombine.low %v4259_v1, %v4266_v47  ;;  %v14166_v14 = vcombine.high %v4259_v1, %v4266_v47 }
 0x34b   : > { %v4339_v40 = vcombine.low %v17531_v62, %v3618_v34  ;;  %v4340_v16 = vcombine.high %v17531_v62, %v3618_v34  ;;  %5965 = vrot.lane.b32.xlu1 %v22825_v5, %s15913_s16  ;;  %v2752_v53 = vcombine.high %v22828_v11, %v22827_v36  ;;  %v17899_v47 = vrot.slane %v2684_v51, %v16585_v12  ;;  %v22836_v5 = vld [vmem:[#allocation91_spill] sm:$0xff] }
 0x34c   : > { %5933 = vrot.lane.b32.xlu0 %v22829_v48, %s15913_s16  ;;  %v17883_v45 = vrot.slane %v5291_v49, %v16563_v27  ;;  %v17886_v33 = vrot.slane %v14165_v7, %v16563_v27  ;;  %v17889_v62 = vrot.slane %v5307_v29, %v16563_v27  ;;  %v17892_v34 = vrot.slane %v14166_v14, %v16563_v27 }
 0x34d   : > { %v3650_v26 = vpop.permute.xlu1 %3649  ;;  %22834 = vst [vmem:[#allocation69_spill] sm:$0xff] %v17899_v47  ;;  %v17902_v41 = vrot.slane %v2700_v10, %v16585_v12  ;;  %v17915_v10 = vrot.slane %v2752_v53, %v16585_v12  ;;  %v4354_v36 = vrot.slane %v4340_v16, %v16563_v27 }
 0x34e   : > { %22830 = vst [vmem:[#allocation65_spill] sm:$0xff] %v17883_v45  ;;  %22831 = vst [vmem:[#allocation64_spill] sm:$0xff] %v17886_v33  ;;  %v4355_v7 = vcombine.low %v3586_v46, %v3650_v26  ;;  %v4356_v49 = vcombine.high %v3586_v46, %v3650_v26  ;;  %v5323_v29 = vcombine.low %v17883_v45, %v17886_v33 }
 0x34f   : > { %22832 = vst [vmem:[#allocation28_spill] sm:$0xff] %v17889_v62  ;;  %22833 = vst [vmem:[#allocation73_spill] sm:$0xff] %v17892_v34  ;;  %v5339_v14 = vcombine.low %v17889_v62, %v17892_v34  ;;  %5997 = vrot.lane.b32.xlu1 %v22836_v5, %s15913_s16  ;;  %v22838_v46 = vcombine.high %v17026_v54, %v17029_v59  ;;  %v4347_v26 = vrot.slane %v4339_v40, %v16563_v27 }
 0x350   : > { %22835 = vst [vmem:[#allocation77_spill] sm:$0xff] %v17902_v41  ;;  %22837 = vst [vmem:[#allocation74_spill] sm:$0xff] %v17915_v10  ;;  %v4363_v5 = vrot.slane %v4355_v7, %v16563_v27  ;;  %v4370_v11 = vrot.slane %v4356_v49, %v16563_v27  ;;  %5931 = vrot.lane.b32.xlu0 %v16531_v50, %s15913_s16  ;;  %v5331_v53 = vrot.slane %v5323_v29, %v16585_v12 }
 0x351   : > { %v17921_v48 = vrot.slane %v22838_v46, %v16585_v12  ;;  %v3584_v51 = vpop.permute.xlu1 %3583  ;;  %v5347_v1 = vrot.slane %v5339_v14, %v16585_v12  ;;  %v3616_v3 = vpop.permute.xlu0 %3615 }
 0x352   : > { %v4371_v40 = vcombine.low %v4347_v26, %v4363_v5  ;;  %v4372_v16 = vcombine.high %v4347_v26, %v4363_v5  ;;  %v4387_v46 = vcombine.low %v4354_v36, %v4370_v11  ;;  %v4388_v7 = vcombine.high %v4354_v36, %v4370_v11  ;;  %v22841_v5 = vld [vmem:[#allocation19_spill] sm:$0xff] }
 0x353   : > { %22839 = vst [vmem:[#allocation100_spill] sm:$0xff] %v17921_v48  ;;  %v4271_v49 = vcombine.low %v17590_v35, %v3616_v3  ;;  %v4272_v50 = vcombine.high %v17590_v35, %v3616_v3  ;;  %6029 = vrot.lane.b32.xlu1 %v22840_v21, %s15913_s16  ;;  %v17951_v29 = vcombine.low %v5331_v53, %v5347_v1 }
 0x354   : > { %v4379_v59 = vrot.slane %v4371_v40, %v16585_v12  ;;  %v4386_v26 = vrot.slane %v4372_v16, %v16585_v12  ;;  %v4395_v36 = vrot.slane %v4387_v46, %v16585_v12  ;;  %v4402_v11 = vrot.slane %v4388_v7, %v16585_v12  ;;  %5929 = vrot.lane.b32.xlu0 %v22841_v5, %s15913_s16  ;;  %v22842_v7 = vld [vmem:[#allocation76_spill] sm:$0xff] }
 0x355   : > { %v4279_v35 = vrot.slane %v4271_v49, %v16563_v27  ;;  %v4286_v21 = vrot.slane %v4272_v50, %v16563_v27  ;;  %v3648_v3 = vpop.permute.xlu1 %3647  ;;  %v17953_v54 = vcombine.high %v5331_v53, %v5347_v1  ;;  %v3622_v48 = vpop.permute.xlu0 %3621  ;;  %v22843_v49 = vld [vmem:[#allocation84_spill] sm:$0xff] }
 0x356   : > { %v5427_v14 = vcombine.low %v4379_v59, %v4386_v26  ;;  %v14169_v40 = vcombine.high %v4379_v59, %v4386_v26  ;;  %v5443_v30 = vcombine.low %v4395_v36, %v4402_v11  ;;  %v14170_v16 = vcombine.high %v4395_v36, %v4402_v11  ;;  %v22844_v50 = vld [vmem:[#allocation80_spill] sm:$0xff] }
 0x357   : > { %v4287_v46 = vcombine.low %v3584_v51, %v3648_v3  ;;  %v4288_v10 = vcombine.high %v3584_v51, %v3648_v3  ;;  %v4475_v41 = vcombine.low %v22842_v7, %v3622_v48  ;;  %v4476_v5 = vcombine.high %v22842_v7, %v3622_v48  ;;  %5961 = vrot.lane.b32.xlu1 %v22843_v49, %s15913_s16 }
 0x358   : > { %5993 = vrot.lane.b32.xlu0 %v22844_v50, %s15913_s16  ;;  %v5434_v1 = vrot.slane %v5427_v14, %v16563_v27  ;;  %v5442_v53 = vrot.slane %v14169_v40, %v16563_v27  ;;  %v5450_v59 = vrot.slane %v5443_v30, %v16563_v27  ;;  %v5458_v26 = vrot.slane %v14170_v16, %v16563_v27  ;;  %v22845_v30 = vld [vmem:[#allocation87_spill] sm:$0xff]  ;;  %v22846_v16 = vld [vmem:[#allocation20_spill] sm:$0xff] }
 0x359   : > { %v4295_v51 = vrot.slane %v4287_v46, %v16563_v27  ;;  %v4302_v36 = vrot.slane %v4288_v10, %v16563_v27  ;;  %v4483_v48 = vrot.slane %v4475_v41, %v16563_v27  ;;  %v4490_v11 = vrot.slane %v4476_v5, %v16563_v27  ;;  %v3590_v3 = vpop.permute.xlu1 %3589 }
 0x35a   : > { %v5459_v7 = vcombine.low %v5434_v1, %v5442_v53  ;;  %v5475_v49 = vcombine.low %v5450_v59, %v5458_v26  ;;  %v5460_v50 = vcombine.high %v5434_v1, %v5442_v53  ;;  %v5476_v47 = vcombine.high %v5450_v59, %v5458_v26 }
 0x35b   : > { %v4303_v14 = vcombine.low %v4279_v35, %v4295_v51  ;;  %v4304_v31 = vcombine.high %v4279_v35, %v4295_v51  ;;  %v4319_v40 = vcombine.low %v4286_v21, %v4302_v36  ;;  %v4320_v8 = vcombine.high %v4286_v21, %v4302_v36  ;;  %6025 = vrot.lane.b32.xlu1 %v22845_v30, %s15913_s16 }
 0x35c   : > { %5927 = vrot.lane.b32.xlu0 %v22846_v16, %s15913_s16  ;;  %v5467_v10 = vrot.slane %v5459_v7, %v16585_v12  ;;  %v5483_v41 = vrot.slane %v5475_v49, %v16585_v12  ;;  %v5474_v46 = vrot.slane %v5460_v50, %v16585_v12  ;;  %v5490_v5 = vrot.slane %v5476_v47, %v16585_v12  ;;  %v22847_v47 = vld [vmem:[#allocation83_spill] sm:$0xff] }
 0x35d   : > { %v4311_v1 = vrot.slane %v4303_v14, %v16585_v12  ;;  %v4318_v35 = vrot.slane %v4304_v31, %v16585_v12  ;;  %v4327_v21 = vrot.slane %v4319_v40, %v16585_v12  ;;  %v4334_v53 = vrot.slane %v4320_v8, %v16585_v12  ;;  %v3654_v59 = vpop.permute.xlu1 %3653  ;;  %v22848_v8 = vld [vmem:[#allocation95_spill] sm:$0xff] }
 0x35e   : > { %v4491_v26 = vcombine.low %v3590_v3, %v3654_v59  ;;  %v4492_v51 = vcombine.high %v3590_v3, %v3654_v59  ;;  %v17981_v36 = vcombine.low %v5467_v10, %v5483_v41  ;;  %v17983_v7 = vcombine.high %v5467_v10, %v5483_v41 }
 0x35f   : > { %v5359_v49 = vcombine.low %v4311_v1, %v4318_v35  ;;  %v14167_v30 = vcombine.high %v4311_v1, %v4318_v35  ;;  %v5375_v50 = vcombine.low %v4327_v21, %v4334_v53  ;;  %v14168_v16 = vcombine.high %v4327_v21, %v4334_v53  ;;  %5959 = vrot.lane.b32.xlu1 %v22847_v47, %s15913_s16 }
 0x360   : > { %v4499_v31 = vrot.slane %v4491_v26, %v16563_v27  ;;  %v4506_v14 = vrot.slane %v4492_v51, %v16563_v27  ;;  %5991 = vrot.lane.b32.xlu0 %v22848_v8, %s15913_s16  ;;  %v17991_v40 = vcombine.low %v5474_v46, %v5490_v5  ;;  %v17993_v3 = vcombine.high %v5474_v46, %v5490_v5 }
 0x361   : > { %v3588_v10 = vpop.permute.xlu1 %3587  ;;  %v17996_v41 = vrot.slane %v5359_v49, %v16563_v27  ;;  %v17999_v1 = vrot.slane %v14167_v30, %v16563_v27  ;;  %v18002_v35 = vrot.slane %v5375_v50, %v16563_v27  ;;  %v18005_v21 = vrot.slane %v14168_v16, %v16563_v27  ;;  %v3620_v47 = vpop.permute.xlu0 %3619  ;;  %v22855_v49 = vld [vmem:[#allocation86_spill] sm:$0xff] }
 0x362   : > { %22849 = vst [vmem:[#allocation79_spill] sm:$0xff] %v17991_v40  ;;  %22850 = vst [vmem:[#allocation78_spill] sm:$0xff] %v17993_v3  ;;  %v4507_v53 = vcombine.low %v4483_v48, %v4499_v31  ;;  %v4508_v59 = vcombine.high %v4483_v48, %v4499_v31  ;;  %v4523_v26 = vcombine.low %v4490_v11, %v4506_v14 }
 0x363   : > { %22851 = vst [vmem:[#allocation21_spill] sm:$0xff] %v17996_v41  ;;  %22852 = vst [vmem:[#allocation91_spill] sm:$0xff] %v17999_v1  ;;  %v4524_v51 = vcombine.high %v4490_v11, %v4506_v14  ;;  %v4407_v46 = vcombine.low %v17464_v4, %v3620_v47  ;;  %v4408_v5 = vcombine.high %v17464_v4, %v3620_v47  ;;  %6023 = vrot.lane.b32.xlu1 %v22855_v49, %s15913_s16  ;;  %v22856_v14 = vld [vmem:[#allocation17_spill] sm:$0xff] }
 0x364   : > { %22853 = vst [vmem:[#allocation94_spill] sm:$0xff] %v18002_v35  ;;  %22854 = vst [vmem:[#allocation19_spill] sm:$0xff] %v18005_v21  ;;  %v5391_v30 = vcombine.low %v17996_v41, %v17999_v1  ;;  %v5407_v50 = vcombine.low %v18002_v35, %v18005_v21  ;;  %v4515_v16 = vrot.slane %v4507_v53, %v16585_v12  ;;  %5925 = vrot.lane.b32.xlu0 %v22856_v14, %s15913_s16 }
 0x365   : > { %v4522_v48 = vrot.slane %v4508_v59, %v16585_v12  ;;  %v4531_v11 = vrot.slane %v4523_v26, %v16585_v12  ;;  %v4538_v31 = vrot.slane %v4524_v51, %v16585_v12  ;;  %v4415_v4 = vrot.slane %v4407_v46, %v16563_v27  ;;  %v3652_v47 = vpop.permute.xlu1 %3651  ;;  %v3626_v34 = vpop.permute.xlu0 %3625  ;;  %v22857_v51 = vld [vmem:[#allocation92_spill] sm:$0xff]  ;;  %v22858_v46 = vld [vmem:[#allocation67_spill] sm:$0xff] }
 0x366   : > { %v4422_v8 = vrot.slane %v4408_v5, %v16563_v27  ;;  %v5399_v49 = vrot.slane %v5391_v30, %v16585_v12  ;;  %v5415_v13 = vrot.slane %v5407_v50, %v16585_v12  ;;  %v4423_v26 = vcombine.low %v3588_v10, %v3652_v47  ;;  %v22859_v5 = vld [vmem:[#allocation66_spill] sm:$0xff] }
 0x367   : > { %v5563_v2 = vcombine.low %v4515_v16, %v4522_v48  ;;  %v14173_v53 = vcombine.high %v4515_v16, %v4522_v48  ;;  %v5579_v62 = vcombine.low %v4531_v11, %v4538_v31  ;;  %v14174_v59 = vcombine.high %v4531_v11, %v4538_v31  ;;  %5957 = vrot.lane.b32.xlu1 %v22858_v46, %s15913_s16 }
 0x368   : > { %v4424_v45 = vcombine.high %v3588_v10, %v3652_v47  ;;  %v4611_v33 = vcombine.low %v22857_v51, %v3626_v34  ;;  %v4612_v14 = vcombine.high %v22857_v51, %v3626_v34  ;;  %5989 = vrot.lane.b32.xlu0 %v22859_v5, %s15913_s16  ;;  %v4431_v10 = vrot.slane %v4423_v26, %v16563_v27 }
 0x369   : > { %v5570_v30 = vrot.slane %v5563_v2, %v16563_v27  ;;  %v5578_v50 = vrot.slane %v14173_v53, %v16563_v27  ;;  %v5586_v16 = vrot.slane %v5579_v62, %v16563_v27  ;;  %v5594_v48 = vrot.slane %v14174_v59, %v16563_v27  ;;  %v3594_v47 = vpop.permute.xlu1 %3593  ;;  %v22860_v59 = vld [vmem:[#allocation71_spill] sm:$0xff] }
 0x36a   : > { %v4438_v11 = vrot.slane %v4424_v45, %v16563_v27  ;;  %v4619_v34 = vrot.slane %v4611_v33, %v16563_v27  ;;  %v4626_v31 = vrot.slane %v4612_v14, %v16563_v27  ;;  %v18039_v5 = vcombine.low %v5399_v49, %v5415_v13  ;;  %v22861_v45 = vld [vmem:[#allocation18_spill] sm:$0xff] }
 0x36b   : > { %v5595_v51 = vcombine.low %v5570_v30, %v5578_v50  ;;  %v5611_v46 = vcombine.low %v5586_v16, %v5594_v48  ;;  %v18041_v2 = vcombine.high %v5399_v49, %v5415_v13  ;;  %v4439_v53 = vcombine.low %v4415_v4, %v4431_v10  ;;  %6021 = vrot.lane.b32.xlu1 %v22860_v59, %s15913_s16 }
 0x36c   : > { %v4440_v20 = vcombine.high %v4415_v4, %v4431_v10  ;;  %v4455_v62 = vcombine.low %v4422_v8, %v4438_v11  ;;  %v4456_v37 = vcombine.high %v4422_v8, %v4438_v11  ;;  %5923 = vrot.lane.b32.xlu0 %v22861_v45, %s15913_s16  ;;  %v5596_v14 = vcombine.high %v5570_v30, %v5578_v50  ;;  %v22862_v50 = vld [vmem:[#allocation70_spill] sm:$0xff] }
 0x36d   : > { %v5603_v33 = vrot.slane %v5595_v51, %v16585_v12  ;;  %v5619_v26 = vrot.slane %v5611_v46, %v16585_v12  ;;  %v5612_v44 = vcombine.high %v5586_v16, %v5594_v48  ;;  %v4447_v24 = vrot.slane %v4439_v53, %v16585_v12  ;;  %v3658_v49 = vpop.permute.xlu1 %3657 }
 0x36e   : > { %v4454_v13 = vrot.slane %v4440_v20, %v16585_v12  ;;  %v4463_v4 = vrot.slane %v4455_v62, %v16585_v12  ;;  %v4470_v8 = vrot.slane %v4456_v37, %v16585_v12  ;;  %v4627_v10 = vcombine.low %v3594_v47, %v3658_v49  ;;  %v22863_v37 = vld [vmem:[#allocation81_spill] sm:$0xff] }
 0x36f   : > { %v4628_v11 = vcombine.high %v3594_v47, %v3658_v49  ;;  %v18053_v59 = vcombine.low %v5603_v33, %v5619_v26  ;;  %v18055_v45 = vcombine.high %v5603_v33, %v5619_v26  ;;  %5955 = vrot.lane.b32.xlu1 %v22862_v50, %s15913_s16  ;;  %v5610_v48 = vrot.slane %v5596_v14, %v16585_v12 }
 0x370   : > { %v5495_v51 = vcombine.low %v4447_v24, %v4454_v13  ;;  %v14171_v3 = vcombine.high %v4447_v24, %v4454_v13  ;;  %v5511_v46 = vcombine.low %v4463_v4, %v4470_v8  ;;  %v14172_v30 = vcombine.high %v4463_v4, %v4470_v8  ;;  %5987 = vrot.lane.b32.xlu0 %v22863_v37, %s15913_s16 }
 0x371   : > { %v4635_v20 = vrot.slane %v4627_v10, %v16563_v27  ;;  %v4642_v16 = vrot.slane %v4628_v11, %v16563_v27  ;;  %v5626_v47 = vrot.slane %v5612_v44, %v16585_v12  ;;  %v3592_v53 = vpop.permute.xlu1 %3591  ;;  %v3624_v62 = vpop.permute.xlu0 %3623  ;;  %v22868_v10 = vld [vmem:[#allocation99_spill] sm:$0xff] }
 0x372   : > { %v18066_v24 = vrot.slane %v5495_v51, %v16563_v27  ;;  %v18069_v33 = vrot.slane %v14171_v3, %v16563_v27  ;;  %v18072_v26 = vrot.slane %v5511_v46, %v16563_v27  ;;  %v18075_v13 = vrot.slane %v14172_v30, %v16563_v27  ;;  %v22869_v51 = vld [vmem:[#allocation75_spill] sm:$0xff] }
 0x373   : > { %v4643_v4 = vcombine.low %v4619_v34, %v4635_v20  ;;  %v4644_v8 = vcombine.high %v4619_v34, %v4635_v20  ;;  %v4659_v49 = vcombine.low %v4626_v31, %v4642_v16  ;;  %v4660_v14 = vcombine.high %v4626_v31, %v4642_v16  ;;  %6019 = vrot.lane.b32.xlu1 %v22869_v51, %s15913_s16  ;;  %v22870_v20 = vld [vmem:[#allocation15_spill] sm:$0xff] }
 0x374   : > { %22864 = vst [vmem:[#allocation76_spill] sm:$0xff] %v18066_v24  ;;  %22865 = vst [vmem:[#allocation84_spill] sm:$0xff] %v18069_v33  ;;  %v4543_v44 = vcombine.low %v22868_v10, %v3624_v62  ;;  %v4544_v11 = vcombine.high %v22868_v10, %v3624_v62  ;;  %v5527_v3 = vcombine.low %v18066_v24, %v18069_v33  ;;  %5921 = vrot.lane.b32.xlu0 %v22870_v20, %s15913_s16  ;;  %v22895_v33 = vld [vmem:[#allocation50_spill] sm:$0xff] }
 0x375   : > { %22866 = vst [vmem:[#allocation80_spill] sm:$0xff] %v18072_v26  ;;  %22867 = vst [vmem:[#allocation87_spill] sm:$0xff] %v18075_v13  ;;  %v5543_v46 = vcombine.low %v18072_v26, %v18075_v13  ;;  %v4651_v30 = vrot.slane %v4643_v4, %v16585_v12  ;;  %v4658_v50 = vrot.slane %v4644_v8, %v16585_v12  ;;  %v3656_v62 = vpop.permute.xlu1 %3655 }
 0x376   : > { %v4667_v34 = vrot.slane %v4659_v49, %v16585_v12  ;;  %v4674_v31 = vrot.slane %v4660_v14, %v16585_v12  ;;  %v4551_v16 = vrot.slane %v4543_v44, %v16563_v27  ;;  %v4558_v37 = vrot.slane %v4544_v11, %v16563_v27  ;;  %v22871_v14 = vld [vmem:[#allocation57_spill] sm:$0xff]  ;;  %v22872_v44 = vld [vmem:[#allocation56_spill] sm:$0xff] }
 0x377   : > { %v5535_v10 = vrot.slane %v5527_v3, %v16585_v12  ;;  %v5551_v51 = vrot.slane %v5543_v46, %v16585_v12  ;;  %v5699_v40 = vcombine.low %v4651_v30, %v4658_v50  ;;  %v14177_v4 = vcombine.high %v4651_v30, %v4658_v50  ;;  %5953 = vrot.lane.b32.xlu1 %v22871_v14, %s15913_s16 }
 0x378   : > { %v5715_v52 = vcombine.low %v4667_v34, %v4674_v31  ;;  %v14178_v8 = vcombine.high %v4667_v34, %v4674_v31  ;;  %v4559_v55 = vcombine.low %v3592_v53, %v3656_v62  ;;  %v4560_v49 = vcombine.high %v3592_v53, %v3656_v62  ;;  %5985 = vrot.lane.b32.xlu0 %v22872_v44, %s15913_s16 }
 0x379   : > { %v18097_v35 = vcombine.low %v5535_v10, %v5551_v51  ;;  %v18099_v20 = vcombine.high %v5535_v10, %v5551_v51  ;;  %v5706_v11 = vrot.slane %v5699_v40, %v16563_v27  ;;  %v5714_v3 = vrot.slane %v14177_v4, %v16563_v27  ;;  %v3630_v34 = vpop.permute.xlu1 %3629  ;;  %v3598_v31 = vpop.permute.xlu0 %3597  ;;  %v22875_v51 = vld [vmem:[#allocation98_spill] sm:$0xff] }
 0x37a   : > { %v5722_v46 = vrot.slane %v5715_v52, %v16563_v27  ;;  %v5730_v30 = vrot.slane %v14178_v8, %v16563_v27  ;;  %v4567_v53 = vrot.slane %v4559_v55, %v16563_v27  ;;  %v4574_v50 = vrot.slane %v4560_v49, %v16563_v27  ;;  %v22876_v55 = vld [vmem:[#allocation59_spill] sm:$0xff] }
 0x37b   : > { %v18109_v62 = vcombine.low %v5610_v48, %v5626_v47  ;;  %v18111_v10 = vcombine.high %v5610_v48, %v5626_v47  ;;  %v4747_v14 = vcombine.low %v22875_v51, %v3630_v34  ;;  %v4748_v40 = vcombine.high %v22875_v51, %v3630_v34  ;;  %6017 = vrot.lane.b32.xlu1 %v22876_v55, %s15913_s16  ;;  %v22877_v48 = vld [vmem:[#allocation16_spill] sm:$0xff] }
 0x37c   : > { %v5731_v44 = vcombine.low %v5706_v11, %v5714_v3  ;;  %v5747_v4 = vcombine.low %v5722_v46, %v5730_v30  ;;  %v4575_v21 = vcombine.low %v4551_v16, %v4567_v53  ;;  %v4576_v52 = vcombine.high %v4551_v16, %v4567_v53  ;;  %5919 = vrot.lane.b32.xlu0 %v22877_v48, %s15913_s16 }
 0x37d   : > { %22873 = vst [vmem:[#allocation20_spill] sm:$0xff] %v18109_v62  ;;  %22874 = vst [vmem:[#allocation83_spill] sm:$0xff] %v18111_v10  ;;  %v4591_v60 = vcombine.low %v4558_v37, %v4574_v50  ;;  %v4592_v8 = vcombine.high %v4558_v37, %v4574_v50  ;;  %v4755_v49 = vrot.slane %v4747_v14, %v16563_v27  ;;  %v3596_v50 = vpop.permute.xlu1 %3595  ;;  %v3662_v55 = vpop.permute.xlu0 %3661 }
 0x37e   : > { %v4762_v9 = vrot.slane %v4748_v40, %v16563_v27  ;;  %v5739_v47 = vrot.slane %v5731_v44, %v16585_v12  ;;  %v5755_v34 = vrot.slane %v5747_v4, %v16585_v12  ;;  %v4583_v51 = vrot.slane %v4575_v21, %v16585_v12  ;;  %v22878_v21 = vld [vmem:[#allocation58_spill] sm:$0xff] }
 0x37f   : > { %v4590_v16 = vrot.slane %v4576_v52, %v16585_v12  ;;  %v4599_v37 = vrot.slane %v4591_v60, %v16585_v12  ;;  %v4606_v53 = vrot.slane %v4592_v8, %v16585_v12  ;;  %v5732_v41 = vcombine.high %v5706_v11, %v5714_v3  ;;  %5951 = vrot.lane.b32.xlu1 %v22878_v21, %s15913_s16  ;;  %v22879_v60 = vld [vmem:[#allocation63_spill] sm:$0xff] }
 0x380   : > { %v18127_v14 = vcombine.low %v5739_v47, %v5755_v34  ;;  %v18129_v40 = vcombine.high %v5739_v47, %v5755_v34  ;;  %v5748_v48 = vcombine.high %v5722_v46, %v5730_v30  ;;  %v4763_v52 = vcombine.low %v3598_v31, %v3662_v55  ;;  %5983 = vrot.lane.b32.xlu0 %v22879_v60, %s15913_s16 }
 0x381   : > { %v5631_v1 = vcombine.low %v4583_v51, %v4590_v16  ;;  %v14175_v44 = vcombine.high %v4583_v51, %v4590_v16  ;;  %v5647_v15 = vcombine.low %v4599_v37, %v4606_v53  ;;  %v14176_v4 = vcombine.high %v4599_v37, %v4606_v53  ;;  %v3660_v11 = vpop.permute.xlu1 %3659  ;;  %v3628_v37 = vpop.permute.xlu0 %3627 }
 0x382   : > { %v4764_v6 = vcombine.high %v3598_v31, %v3662_v55  ;;  %v18136_v8 = vrot.slane %v5732_v41, %v16585_v12  ;;  %v18139_v47 = vrot.slane %v5748_v48, %v16585_v12  ;;  %v4771_v34 = vrot.slane %v4763_v52, %v16563_v27  ;;  %v22886_v55 = vld [vmem:[#allocation62_spill] sm:$0xff] }
 0x383   : > { %v18142_v3 = vrot.slane %v5631_v1, %v16563_v27  ;;  %v18145_v46 = vrot.slane %v14175_v44, %v16563_v27  ;;  %v18148_v30 = vrot.slane %v5647_v15, %v16563_v27  ;;  %v18151_v31 = vrot.slane %v14176_v4, %v16563_v27  ;;  %6015 = vrot.lane.b32.xlu1 %v22886_v55, %s15913_s16 }
 0x384   : > { %22880 = vst [vmem:[#allocation95_spill] sm:$0xff] %v18136_v8  ;;  %22881 = vst [vmem:[#allocation86_spill] sm:$0xff] %v18139_v47  ;;  %v4778_v41 = vrot.slane %v4764_v6, %v16563_v27  ;;  %v4695_v51 = vcombine.low %v3596_v50, %v3660_v11  ;;  %v4696_v16 = vcombine.high %v3596_v50, %v3660_v11  ;;  %v22887_v50 = vld [vmem:[#allocation14_spill] sm:$0xff] }
 0x385   : > { %22882 = vst [vmem:[#allocation17_spill] sm:$0xff] %v18142_v3  ;;  %22883 = vst [vmem:[#allocation92_spill] sm:$0xff] %v18145_v46  ;;  %v4679_v53 = vcombine.low %v17722_v63, %v3628_v37  ;;  %v4680_v1 = vcombine.high %v17722_v63, %v3628_v37  ;;  %v4779_v44 = vcombine.low %v4755_v49, %v4771_v34  ;;  %5917 = vrot.lane.b32.xlu0 %v22887_v50, %s15913_s16  ;;  %v3580_v37 = vpop.permute.xlu1 %3579 }
 0x386   : > { %22884 = vst [vmem:[#allocation67_spill] sm:$0xff] %v18148_v30  ;;  %22885 = vst [vmem:[#allocation66_spill] sm:$0xff] %v18151_v31  ;;  %v4780_v4 = vcombine.high %v4755_v49, %v4771_v34  ;;  %v4795_v21 = vcombine.low %v4762_v9, %v4778_v41  ;;  %v4796_v6 = vcombine.high %v4762_v9, %v4778_v41  ;;  %v3548_v34 = vpop.permute.xlu0 %3547 }
 0x387   : > { %v4703_v52 = vrot.slane %v4695_v51, %v16563_v27  ;;  %v4710_v63 = vrot.slane %v4696_v16, %v16563_v27  ;;  %v4687_v60 = vrot.slane %v4679_v53, %v16563_v27  ;;  %v4694_v11 = vrot.slane %v4680_v1, %v16563_v27  ;;  %v22888_v16 = vld [vmem:[#allocation47_spill] sm:$0xff]  ;;  %v22889_v53 = vld [vmem:[#allocation46_spill] sm:$0xff] }
 0x388   : > { %v4787_v55 = vrot.slane %v4779_v44, %v16585_v12  ;;  %v4794_v48 = vrot.slane %v4780_v4, %v16585_v12  ;;  %v4803_v49 = vrot.slane %v4795_v21, %v16585_v12  ;;  %v4810_v9 = vrot.slane %v4796_v6, %v16585_v12  ;;  %5949 = vrot.lane.b32.xlu1 %v22888_v16, %s15913_s16 }
 0x389   : > { %v4711_v41 = vcombine.low %v4687_v60, %v4703_v52  ;;  %v4712_v50 = vcombine.high %v4687_v60, %v4703_v52  ;;  %v4727_v15 = vcombine.low %v4694_v11, %v4710_v63  ;;  %v4728_v51 = vcombine.high %v4694_v11, %v4710_v63  ;;  %5981 = vrot.lane.b32.xlu0 %v22889_v53, %s15913_s16  ;;  %v3644_v60 = vpop.permute.xlu1 %3643 }
 0x38a   : > { %v5835_v1 = vcombine.low %v4787_v55, %v4794_v48  ;;  %v14181_v42 = vcombine.high %v4787_v55, %v4794_v48  ;;  %v5851_v44 = vcombine.low %v4803_v49, %v4810_v9  ;;  %v14182_v61 = vcombine.high %v4803_v49, %v4810_v9  ;;  %v3612_v10 = vpop.permute.xlu0 %3611 }
 0x38b   : > { %v4719_v4 = vrot.slane %v4711_v41, %v16585_v12  ;;  %v4726_v21 = vrot.slane %v4712_v50, %v16585_v12  ;;  %v4735_v6 = vrot.slane %v4727_v15, %v16585_v12  ;;  %v4742_v52 = vrot.slane %v4728_v51, %v16585_v12  ;;  %v22890_v41 = vld [vmem:[#allocation49_spill] sm:$0xff] }
 0x38c   : > { %v4151_v63 = vcombine.low %v3580_v37, %v3644_v60  ;;  %v4152_v11 = vcombine.high %v3580_v37, %v3644_v60  ;;  %v18182_v16 = vrot.slane %v5835_v1, %v16563_v27  ;;  %v18185_v53 = vrot.slane %v14181_v42, %v16563_v27  ;;  %6013 = vrot.lane.b32.xlu1 %v22890_v41, %s15913_s16 }
 0x38d   : > { %v5767_v48 = vcombine.low %v4719_v4, %v4726_v21  ;;  %v14179_v55 = vcombine.high %v4719_v4, %v4726_v21  ;;  %v5783_v49 = vcombine.low %v4735_v6, %v4742_v52  ;;  %v14180_v9 = vcombine.high %v4735_v6, %v4742_v52  ;;  %5915 = vrot.lane.b32.xlu0 %v16451_v28, %s15913_s16  ;;  %v3578_v1 = vpop.permute.xlu1 %3577 }
 0x38e   : > { %v4159_v15 = vrot.slane %v4151_v63, %v16563_v27  ;;  %v4166_v50 = vrot.slane %v4152_v11, %v16563_v27  ;;  %v4135_v51 = vcombine.low %v3548_v34, %v3612_v10  ;;  %v4136_v37 = vcombine.high %v3548_v34, %v3612_v10  ;;  %v3546_v34 = vpop.permute.xlu0 %3545 }
 0x38f   : > { %v18194_v42 = vrot.slane %v5851_v44, %v16563_v27  ;;  %v18197_v4 = vrot.slane %v14182_v61, %v16563_v27  ;;  %v5867_v21 = vcombine.low %v18182_v16, %v18185_v53  ;;  %v18206_v28 = vrot.slane %v5767_v48, %v16563_v27  ;;  %v22891_v61 = vld [vmem:[#allocation48_spill] sm:$0xff] }
 0x390   : > { %v4143_v52 = vrot.slane %v4135_v51, %v16563_v27  ;;  %v4150_v10 = vrot.slane %v4136_v37, %v16563_v27  ;;  %v18209_v44 = vrot.slane %v14179_v55, %v16563_v27  ;;  %5947 = vrot.lane.b32.xlu1 %v22891_v61, %s15913_s16  ;;  %v18219_v41 = vrot.slane %v5783_v49, %v16563_v27  ;;  %v22893_v55 = vld [vmem:[#allocation51_spill] sm:$0xff] }
 0x391   : > { %v5875_v60 = vrot.slane %v5867_v21, %v16585_v12  ;;  %v5883_v63 = vcombine.low %v18194_v42, %v18197_v4  ;;  %5979 = vrot.lane.b32.xlu0 %v22893_v55, %s15913_s16  ;;  %v3642_v62 = vpop.permute.xlu1 %3641  ;;  %v18225_v21 = vrot.slane %v14180_v9, %v16563_v27  ;;  %v22894_v49 = vcombine.low %v18142_v3, %v18145_v46 }
 0x392   : > { %22892 = vst [vmem:[#allocation71_spill] sm:$0xff] %v18219_v41  ;;  %v4167_v51 = vcombine.low %v4143_v52, %v4159_v15  ;;  %v4168_v48 = vcombine.high %v4143_v52, %v4159_v15  ;;  %v4183_v37 = vcombine.low %v4150_v10, %v4166_v50  ;;  %v4184_v6 = vcombine.high %v4150_v10, %v4166_v50 }
 0x393   : > { %v5891_v61 = vrot.slane %v5883_v63, %v16585_v12  ;;  %v5799_v26 = vcombine.low %v18206_v28, %v18209_v44  ;;  %v5671_v11 = vrot.slane %v22894_v49, %v16585_v12  ;;  %v3610_v63 = vpop.permute.xlu0 %3609  ;;  %v4083_v13 = vcombine.low %v3578_v1, %v3642_v62 }
 0x394   : > { %v4175_v15 = vrot.slane %v4167_v51, %v16585_v12  ;;  %v4182_v50 = vrot.slane %v4168_v48, %v16585_v12  ;;  %v4191_v52 = vrot.slane %v4183_v37, %v16585_v12  ;;  %v4198_v10 = vrot.slane %v4184_v6, %v16585_v12  ;;  %6011 = vrot.lane.b32.xlu1 %v22895_v33, %s15913_s16  ;;  %v22896_v51 = vld [vmem:[#allocation12_spill] sm:$0xff] }
 0x395   : > { %v5899_v55 = vcombine.low %v5875_v60, %v5891_v61  ;;  %v5900_v9 = vcombine.high %v5875_v60, %v5891_v61  ;;  %v4084_v24 = vcombine.high %v3578_v1, %v3642_v62  ;;  %5913 = vrot.lane.b32.xlu0 %v22896_v51, %s15913_s16  ;;  %v4091_v6 = vrot.slane %v4083_v13, %v16563_v27  ;;  %v3576_v62 = vpop.permute.xlu1 %3575 }
 0x396   : > { %v5223_v8 = vcombine.low %v4175_v15, %v4182_v50  ;;  %v14163_v47 = vcombine.high %v4175_v15, %v4182_v50  ;;  %v5239_v3 = vcombine.low %v4191_v52, %v4198_v10  ;;  %v14164_v49 = vcombine.high %v4191_v52, %v4198_v10  ;;  %v22897_v50 = vld [vmem:[#allocation41_spill] sm:$0xff] }
 0x397   : > { %14817 = vmatprep.subr.msk.mxu1 %vm8271_vm2, %v5899_v55  ;;  %14873 = vmatprep.subr.msk.mxu0 %vm8271_vm2, %v5900_v9  ;;  %v4098_v60 = vrot.slane %v4084_v24, %v16563_v27  ;;  %v4067_v48 = vcombine.low %v3546_v34, %v3610_v63  ;;  %v4068_v33 = vcombine.high %v3546_v34, %v3610_v63  ;;  %v3544_v61 = vpop.permute.xlu0 %3543  ;;  %v22899_v63 = vld [vmem:[#allocation40_spill] sm:$0xff] }
 0x398   : > { %14818 = vmatpush3.xpose.msk.msra.mxu1 %vm8271_vm2, %v5899_v55  ;;  %14874 = vmatpush3.xpose.msk.msra.mxu0 %vm8271_vm2, %v5900_v9  ;;  %v5807_v1 = vrot.slane %v5799_v26, %v16585_v12  ;;  %v5815_v37 = vcombine.low %v18219_v41, %v18225_v21  ;;  %v22898_v24 = vcombine.low %v18148_v30, %v18151_v31 }
 0x399   : > { %v4075_v15 = vrot.slane %v4067_v48, %v16563_v27  ;;  %5945 = vrot.lane.b32.xlu1 %v22897_v50, %s15913_s16  ;;  %v18258_v52 = vrot.slane %v5223_v8, %v16563_v27  ;;  %v18261_v34 = vrot.slane %v14163_v47, %v16563_v27  ;;  %v4082_v26 = vrot.slane %v4068_v33, %v16563_v27  ;;  %v3640_v8 = vpop.permute.xlu1 %3639 }
 0x39a   : > { %v5687_v13 = vrot.slane %v22898_v24, %v16585_v12  ;;  %v5823_v10 = vrot.slane %v5815_v37, %v16585_v12  ;;  %5977 = vrot.lane.b32.xlu0 %v22899_v63, %s15913_s16  ;;  %v18268_v55 = vrot.slane %v5239_v3, %v16563_v27  ;;  %v18271_v9 = vrot.slane %v14164_v49, %v16563_v27  ;;  %v22900_v49 = vld [vmem:[#allocation43_spill] sm:$0xff] }
 0x39b   : > { %v4099_v51 = vcombine.low %v4075_v15, %v4091_v6  ;;  %v4100_v48 = vcombine.high %v4075_v15, %v4091_v6  ;;  %v4115_v24 = vcombine.low %v4082_v26, %v4098_v60  ;;  %v4116_v33 = vcombine.high %v4082_v26, %v4098_v60  ;;  %v3608_v31 = vpop.permute.xlu0 %3607 }
 0x39c   : > { %v18273_v50 = vcombine.low %v5671_v11, %v5687_v13  ;;  %v18275_v47 = vcombine.high %v5671_v11, %v5687_v13  ;;  %v5831_v30 = vcombine.low %v5807_v1, %v5823_v10  ;;  %v5832_v37 = vcombine.high %v5807_v1, %v5823_v10 }
 0x39d   : > { %v4107_v63 = vrot.slane %v4099_v51, %v16585_v12  ;;  %v4114_v3 = vrot.slane %v4100_v48, %v16585_v12  ;;  %v4015_v46 = vcombine.low %v3576_v62, %v3640_v8  ;;  %v4016_v41 = vcombine.high %v3576_v62, %v3640_v8  ;;  %6009 = vrot.lane.b32.xlu1 %v22900_v49, %s15913_s16  ;;  %v3574_v13 = vpop.permute.xlu1 %3573 }
 0x39e   : > { %v18282_v6 = vrot.slane %v4115_v24, %v16585_v12  ;;  %v18285_v11 = vrot.slane %v4116_v33, %v16585_v12  ;;  %14819 = vmatprep.subr.msk.mxu1 %vm8271_vm2, %v5831_v30  ;;  %14875 = vmatprep.subr.msk.mxu0 %vm8271_vm2, %v5832_v37  ;;  %v3999_v60 = vcombine.low %v3544_v61, %v3608_v31  ;;  %v22902_v24 = vld [vmem:[#allocation42_spill] sm:$0xff] }
 0x39f   : > { %v5155_v1 = vcombine.low %v4107_v63, %v4114_v3  ;;  %v14161_v15 = vcombine.high %v4107_v63, %v4114_v3  ;;  %14820 = vmatpush3.xpose.msk.msra.mxu1 %vm8271_vm2, %v5831_v30  ;;  %14876 = vmatpush3.xpose.msk.msra.mxu0 %vm8271_vm2, %v5832_v37  ;;  %v4023_v62 = vrot.slane %v4015_v46, %v16563_v27  ;;  %v3542_v30 = vpop.permute.xlu0 %3541  ;;  %v22901_v46 = vld [vmem:[#allocation13_spill] sm:$0xff] }
 0x3a0   : > { %v5171_v26 = vcombine.low %v18282_v6, %v18285_v11  ;;  %v14162_v10 = vcombine.high %v18282_v6, %v18285_v11  ;;  %14821 = vmatprep.subr.msk.mxu1 %vm8271_vm2, %v18127_v14  ;;  %14877 = vmatprep.subr.msk.mxu0 %vm8271_vm2, %v18129_v40  ;;  %v4030_v51 = vrot.slane %v4016_v41, %v16563_v27 }
 0x3a1   : > { %v4000_v48 = vcombine.high %v3544_v61, %v3608_v31  ;;  %v4007_v8 = vrot.slane %v3999_v60, %v16563_v27  ;;  %5911 = vrot.lane.b32.xlu0 %v22901_v46, %s15913_s16  ;;  %5943 = vrot.lane.b32.xlu1 %v22902_v24, %s15913_s16  ;;  %v5255_v33 = vcombine.low %v18258_v52, %v18261_v34  ;;  %v3638_v6 = vpop.permute.xlu1 %3637 }
 0x3a2   : > { %v5271_v37 = vcombine.low %v18268_v55, %v18271_v9  ;;  %v18311_v63 = vrot.slane %v5155_v1, %v16563_v27  ;;  %v18314_v41 = vrot.slane %v14161_v15, %v16563_v27  ;;  %v18317_v31 = vrot.slane %v5171_v26, %v16563_v27 }
 0x3a3   : > { %14822 = vmatpush3.xpose.msk.msra.mxu1 %vm8271_vm2, %v18127_v14  ;;  %14878 = vmatpush3.xpose.msk.msra.mxu0 %vm8271_vm2, %v18129_v40  ;;  %v4014_v61 = vrot.slane %v4000_v48, %v16563_v27  ;;  %v4031_v3 = vcombine.low %v4007_v8, %v4023_v62  ;;  %v4032_v49 = vcombine.high %v4007_v8, %v4023_v62  ;;  %v3606_v1 = vpop.permute.xlu0 %3605  ;;  %v22904_v48 = vld [vmem:[#allocation45_spill] sm:$0xff] }
 0x3a4   : > { %22903 = vst [vmem:[#allocation18_spill] sm:$0xff] %v18317_v31  ;;  %14823 = vmatprep.subr.msk.mxu1 %vm8271_vm2, %v18273_v50  ;;  %14879 = vmatprep.subr.msk.mxu0 %vm8271_vm2, %v18275_v47  ;;  %v3947_v11 = vcombine.low %v3574_v13, %v3638_v6  ;;  %v3948_v60 = vcombine.high %v3574_v13, %v3638_v6  ;;  %v22905_v6 = vld [vmem:[#allocation44_spill] sm:$0xff] }
 0x3a5   : > { %v5263_v15 = vrot.slane %v5255_v33, %v16585_v12  ;;  %v18330_v14 = vrot.slane %v4031_v3, %v16585_v12  ;;  %v18333_v40 = vrot.slane %v4032_v49, %v16585_v12  ;;  %v4047_v26 = vcombine.low %v4014_v61, %v4030_v51  ;;  %5975 = vrot.lane.b32.xlu0 %v22904_v48, %s15913_s16  ;;  %v3572_v49 = vpop.permute.xlu1 %3571 }
 0x3a6   : > { %v4048_v62 = vcombine.high %v4014_v61, %v4030_v51  ;;  %v3955_v8 = vrot.slane %v3947_v11, %v16563_v27  ;;  %v3962_v46 = vrot.slane %v3948_v60, %v16563_v27  ;;  %v3931_v24 = vcombine.low %v3542_v30, %v3606_v1  ;;  %6007 = vrot.lane.b32.xlu1 %v22905_v6, %s15913_s16 }
 0x3a7   : > { %v3932_v13 = vcombine.high %v3542_v30, %v3606_v1  ;;  %v18342_v33 = vrot.slane %v4047_v26, %v16585_v12  ;;  %v5087_v51 = vcombine.low %v18330_v14, %v18333_v40  ;;  %v14159_v61 = vcombine.high %v18330_v14, %v18333_v40  ;;  %14824 = vmatpush3.xpose.msk.msra.mxu1 %vm8271_vm2, %v18273_v50  ;;  %v3540_v60 = vpop.permute.xlu0 %3539 }
 0x3a8   : > { %v18345_v3 = vrot.slane %v4048_v62, %v16585_v12  ;;  %14880 = vmatpush3.xpose.msk.msra.mxu0 %vm8271_vm2, %v18275_v47  ;;  %14825 = vmatprep.subr.msk.mxu1 %vm8271_vm2, %v18053_v59  ;;  %v3939_v30 = vrot.slane %v3931_v24, %v16563_v27  ;;  %v5279_v1 = vrot.slane %v5271_v37, %v16585_v12  ;;  %v22906_v47 = vld [vmem:[#allocation10_spill] sm:$0xff]  ;;  %v22907_v37 = vld [vmem:[#allocation31_spill] sm:$0xff] }
 0x3a9   : > { %v3946_v11 = vrot.slane %v3932_v13, %v16563_v27  ;;  %14881 = vmatprep.subr.msk.mxu0 %vm8271_vm2, %v18055_v45  ;;  %5909 = vrot.lane.b32.xlu0 %v22906_v47, %s15913_s16  ;;  %v18369_v40 = vrot.slane %v14162_v10, %v16563_v27  ;;  %v3636_v13 = vpop.permute.xlu1 %3635  ;;  %v5187_v47 = vcombine.low %v18311_v63, %v18314_v41 }
 0x3aa   : > { %v5103_v14 = vcombine.low %v18342_v33, %v18345_v3  ;;  %v3963_v26 = vcombine.low %v3939_v30, %v3955_v8  ;;  %v3964_v62 = vcombine.high %v3939_v30, %v3955_v8  ;;  %5941 = vrot.lane.b32.xlu1 %v22907_v37, %s15913_s16  ;;  %v18375_v6 = vcombine.low %v5263_v15, %v5279_v1 }
 0x3ab   : > { %v3979_v48 = vcombine.low %v3946_v11, %v3962_v46  ;;  %v3980_v24 = vcombine.high %v3946_v11, %v3962_v46  ;;  %14826 = vmatpush3.xpose.msk.msra.mxu1 %vm8271_vm2, %v18053_v59  ;;  %v18377_v50 = vcombine.high %v5263_v15, %v5279_v1  ;;  %v5203_v10 = vcombine.low %v18317_v31, %v18369_v40  ;;  %v3604_v30 = vpop.permute.xlu0 %3603 }
 0x3ac   : > { %14882 = vmatpush3.xpose.msk.msra.mxu0 %vm8271_vm2, %v18055_v45  ;;  %v18386_v8 = vrot.slane %v3963_v26, %v16585_v12  ;;  %v18389_v46 = vrot.slane %v3964_v62, %v16585_v12  ;;  %14827 = vmatprep.subr.msk.mxu1 %vm8271_vm2, %v18097_v35  ;;  %v3879_v45 = vcombine.low %v3572_v49, %v3636_v13 }
 0x3ad   : > { %v18392_v59 = vrot.slane %v3979_v48, %v16585_v12  ;;  %v18395_v15 = vrot.slane %v3980_v24, %v16585_v12  ;;  %14883 = vmatprep.subr.msk.mxu0 %vm8271_vm2, %v18099_v20  ;;  %v3880_v11 = vcombine.high %v3572_v49, %v3636_v13  ;;  %v3863_v1 = vcombine.low %v3540_v60, %v3604_v30  ;;  %v3570_v62 = vpop.permute.xlu1 %3569 }
 0x3ae   : > { %v5019_v26 = vcombine.low %v18386_v8, %v18389_v46  ;;  %5973 = vrot.lane.b32.xlu0 %v22772_v22, %s15913_s16  ;;  %v3887_v49 = vrot.slane %v3879_v45, %v16563_v27  ;;  %v3864_v13 = vcombine.high %v3540_v60, %v3604_v30  ;;  %v5195_v22 = vrot.slane %v5187_v47, %v16585_v12 }
 0x3af   : > { %14828 = vmatpush3.xpose.msk.msra.mxu1 %vm8271_vm2, %v18097_v35  ;;  %v3894_v37 = vrot.slane %v3880_v11, %v16563_v27  ;;  %v3871_v31 = vrot.slane %v3863_v1, %v16563_v27  ;;  %v3538_v24 = vpop.permute.xlu0 %3537  ;;  %v5211_v48 = vrot.slane %v5203_v10, %v16585_v12  ;;  %v18423_v35 = vrot.slane %v5087_v51, %v16563_v27 }
 0x3b0   : > { %14884 = vmatpush3.xpose.msk.msra.mxu0 %vm8271_vm2, %v18099_v20  ;;  %14829 = vmatprep.subr.msk.mxu1 %vm8271_vm2, %v17981_v36  ;;  %v3878_v60 = vrot.slane %v3864_v13, %v16563_v27  ;;  %v18437_v51 = vrot.slane %v14159_v61, %v16563_v27  ;;  %v18440_v10 = vrot.slane %v5103_v14, %v16563_v27 }
 0x3b1   : > { %14885 = vmatprep.subr.msk.mxu0 %vm8271_vm2, %v17983_v7  ;;  %v3895_v30 = vcombine.low %v3871_v31, %v3887_v49  ;;  %v3896_v45 = vcombine.high %v3871_v31, %v3887_v49  ;;  %6005 = vrot.lane.b32.xlu1 %v22766_v56, %s15913_s16  ;;  %v18432_v20 = vcombine.low %v5195_v22, %v5211_v48  ;;  %v3634_v1 = vpop.permute.xlu1 %3633 }
 0x3b2   : > { %5907 = vrot.lane.b32.xlu0 %v22782_v57, %s15913_s16  ;;  %v18434_v47 = vcombine.high %v5195_v22, %v5211_v48  ;;  %v3911_v57 = vcombine.low %v3878_v60, %v3894_v37  ;;  %v3912_v11 = vcombine.high %v3878_v60, %v3894_v37  ;;  %v3811_v61 = vcombine.low %v3570_v62, %v3634_v1 }
 0x3b3   : > { %14830 = vmatpush3.xpose.msk.msra.mxu1 %vm8271_vm2, %v17981_v36  ;;  %v18445_v31 = vrot.slane %v3895_v30, %v16585_v12  ;;  %v18448_v56 = vrot.slane %v3896_v45, %v16585_v12  ;;  %v3812_v14 = vcombine.high %v3570_v62, %v3634_v1  ;;  %v3602_v48 = vpop.permute.xlu0 %3601  ;;  %v22908_v36 = vcombine.high %v18342_v33, %v18345_v3 }
 0x3b4   : > { %14886 = vmatpush3.xpose.msk.msra.mxu0 %vm8271_vm2, %v17983_v7  ;;  %14831 = vmatprep.subr.msk.mxu1 %vm8271_vm2, %v18039_v5  ;;  %v18461_v13 = vrot.slane %v3911_v57, %v16585_v12  ;;  %v18464_v37 = vrot.slane %v3912_v11, %v16585_v12  ;;  %v3819_v33 = vrot.slane %v3811_v61, %v16563_v27 }
 0x3b5   : > { %v18458_v49 = vrot.slane %v22908_v36, %v16563_v27  ;;  %v4951_v7 = vcombine.low %v18445_v31, %v18448_v56  ;;  %v14155_v22 = vcombine.high %v18445_v31, %v18448_v56  ;;  %14887 = vmatprep.subr.msk.mxu0 %vm8271_vm2, %v18041_v2  ;;  %5939 = vrot.lane.b32.xlu1 %v22780_v38, %s15913_s16  ;;  %v3568_v57 = vpop.permute.xlu1 %3567 }
 0x3b6   : > { %5971 = vrot.lane.b32.xlu0 %v22789_v58, %s15913_s16  ;;  %v3826_v3 = vrot.slane %v3812_v14, %v16563_v27  ;;  %v3795_v62 = vcombine.low %v3538_v24, %v3602_v48  ;;  %v4967_v60 = vcombine.low %v18461_v13, %v18464_v37  ;;  %v14156_v30 = vcombine.high %v18461_v13, %v18464_v37 }
 0x3b7   : > { %14832 = vmatpush3.xpose.msk.msra.mxu1 %vm8271_vm2, %v18039_v5  ;;  %v3796_v45 = vcombine.high %v3538_v24, %v3602_v48  ;;  %v5119_v38 = vcombine.low %v18423_v35, %v18437_v51  ;;  %v3536_v11 = vpop.permute.xlu0 %3535  ;;  %v5135_v1 = vcombine.low %v18440_v10, %v18458_v49  ;;  %v18494_v61 = vrot.slane %v5019_v26, %v16563_v27 }
 0x3b8   : > { %14888 = vmatpush3.xpose.msk.msra.mxu0 %vm8271_vm2, %v18041_v2  ;;  %14833 = vmatprep.subr.msk.mxu1 %vm8271_vm2, %v17951_v29  ;;  %v3803_v58 = vrot.slane %v3795_v62, %v16563_v27  ;;  %v22909_v2 = vcombine.high %v18386_v8, %v18389_v46  ;;  %v22910_v48 = vcombine.low %v18392_v59, %v18395_v15 }
 0x3b9   : > { %14889 = vmatprep.subr.msk.mxu0 %vm8271_vm2, %v17953_v54  ;;  %v3810_v5 = vrot.slane %v3796_v45, %v16563_v27  ;;  %v5127_v24 = vrot.slane %v5119_v38, %v16585_v12  ;;  %6003 = vrot.lane.b32.xlu1 %v22786_v39, %s15913_s16  ;;  %v5143_v45 = vrot.slane %v5135_v1, %v16585_v12  ;;  %v3632_v38 = vpop.permute.xlu1 %3631 }
 0x3ba   : > { %v18504_v14 = vrot.slane %v22909_v2, %v16563_v27  ;;  %v18510_v36 = vrot.slane %v22910_v48, %v16563_v27  ;;  %v3827_v26 = vcombine.low %v3803_v58, %v3819_v33  ;;  %v3828_v62 = vcombine.high %v3803_v58, %v3819_v33  ;;  %5905 = vrot.lane.b32.xlu0 %v22799_v0, %s15913_s16 }
 0x3bb   : > { %14834 = vmatpush3.xpose.msk.msra.mxu1 %vm8271_vm2, %v17951_v29  ;;  %v3843_v8 = vcombine.low %v3810_v5, %v3826_v3  ;;  %v3844_v46 = vcombine.high %v3810_v5, %v3826_v3  ;;  %v22911_v2 = vcombine.high %v18392_v59, %v18395_v15  ;;  %v3743_v33 = vcombine.low %v3568_v57, %v3632_v38  ;;  %v3600_v3 = vpop.permute.xlu0 %3599 }
 0x3bc   : > { %v5051_v39 = vcombine.low %v18494_v61, %v18504_v14  ;;  %14890 = vmatpush3.xpose.msk.msra.mxu0 %vm8271_vm2, %v17953_v54  ;;  %v18530_v0 = vrot.slane %v3827_v26, %v16585_v12  ;;  %v18533_v29 = vrot.slane %v3828_v62, %v16585_v12  ;;  %14835 = vmatprep.subr.msk.mxu1 %vm8271_vm2, %v18375_v6 }
 0x3bd   : > { %v18523_v48 = vrot.slane %v22911_v2, %v16563_v27  ;;  %v18538_v59 = vrot.slane %v3843_v8, %v16585_v12  ;;  %v18541_v15 = vrot.slane %v3844_v46, %v16585_v12  ;;  %14891 = vmatprep.subr.msk.mxu0 %vm8271_vm2, %v18377_v50  ;;  %v3744_v54 = vcombine.high %v3568_v57, %v3632_v38  ;;  %v18561_v38 = vpop.permute.xlu1 %5965 }
 0x3be   : > { %v3727_v58 = vcombine.low %v3536_v11, %v3600_v3  ;;  %v4883_v1 = vcombine.low %v18530_v0, %v18533_v29  ;;  %v14153_v5 = vcombine.high %v18530_v0, %v18533_v29  ;;  %5937 = vrot.lane.b32.xlu1 %v22793_v25, %s15913_s16  ;;  %5969 = vrot.lane.b32.xlu0 %v22805_v32, %s15913_s16 }
 0x3bf   : > { %v3751_v26 = vrot.slane %v3743_v33, %v16563_v27  ;;  %v4899_v62 = vcombine.low %v18538_v59, %v18541_v15  ;;  %v14154_v57 = vcombine.high %v18538_v59, %v18541_v15  ;;  %14836 = vmatpush3.xpose.msk.msra.mxu1 %vm8271_vm2, %v18375_v6  ;;  %v3758_v8 = vrot.slane %v3744_v54, %v16563_v27  ;;  %v5934_v33 = vpop.permute.xlu0 %5933 }
 0x3c0   : > { %v3728_v46 = vcombine.high %v3536_v11, %v3600_v3  ;;  %14892 = vmatpush3.xpose.msk.msra.mxu0 %vm8271_vm2, %v18377_v50  ;;  %14837 = vmatprep.subr.msk.mxu1 %vm8271_vm2, %v18432_v20  ;;  %v3735_v25 = vrot.slane %v3727_v58, %v16563_v27  ;;  %v5151_v32 = vcombine.low %v5127_v24, %v5143_v45 }
 0x3c1   : > { %v5152_v2 = vcombine.high %v5127_v24, %v5143_v45  ;;  %14893 = vmatprep.subr.msk.mxu0 %vm8271_vm2, %v18434_v47  ;;  %v5059_v11 = vrot.slane %v5051_v39, %v16585_v12  ;;  %v5067_v3 = vcombine.low %v18510_v36, %v18523_v48  ;;  %v18578_v50 = vrot.slane %v4951_v7, %v16563_v27 }
 0x3c2   : > { %v3742_v6 = vrot.slane %v3728_v46, %v16563_v27  ;;  %v3759_v54 = vcombine.low %v3735_v25, %v3751_v26  ;;  %v3760_v58 = vcombine.high %v3735_v25, %v3751_v26  ;;  %6001 = vrot.lane.b32.xlu1 %v22802_v18, %s15913_s16  ;;  %5903 = vrot.lane.b32.xlu0 %v22811_v23, %s15913_s16  ;;  %v5998_v26 = vpop.permute.xlu1 %5997 }
 0x3c3   : > { %v18588_v24 = vrot.slane %v14155_v22, %v16563_v27  ;;  %14838 = vmatpush3.xpose.msk.msra.mxu1 %vm8271_vm2, %v18432_v20  ;;  %v5075_v39 = vrot.slane %v5067_v3, %v16585_v12  ;;  %v18597_v18 = vrot.slane %v4967_v60, %v16563_v27  ;;  %v7115_v20 = vcombine.low %v5934_v33, %v5998_v26  ;;  %v18604_v56 = vpop.permute.xlu0 %5931 }
 0x3c4   : > { %v3775_v45 = vcombine.low %v3742_v6, %v3758_v8  ;;  %v3776_v7 = vcombine.high %v3742_v6, %v3758_v8  ;;  %14894 = vmatpush3.xpose.msk.msra.mxu0 %vm8271_vm2, %v18434_v47  ;;  %v3767_v23 = vrot.slane %v3759_v54, %v16585_v12  ;;  %v3774_v31 = vrot.slane %v3760_v58, %v16585_v12 }
 0x3c5   : > { %14839 = vmatprep.subr.msk.mxu1 %vm8271_vm2, %v5151_v32  ;;  %22912 = vst [vmem:[#allocation70_spill] sm:$0xff] %v18604_v56  ;;  %14895 = vmatprep.subr.msk.mxu0 %vm8271_vm2, %v5152_v2  ;;  %v5083_v60 = vcombine.low %v5059_v11, %v5075_v39  ;;  %v5084_v46 = vcombine.high %v5059_v11, %v5075_v39  ;;  %v22913_v39 = vld [vmem:[#allocation110_spill] sm:$0xff] }
 0x3c6   : > { %v18607_v22 = vrot.slane %v3775_v45, %v16585_v12  ;;  %v18610_v8 = vrot.slane %v3776_v7, %v16585_v12  ;;  %v4815_v47 = vcombine.low %v3767_v23, %v3774_v31  ;;  %v14151_v25 = vcombine.high %v3767_v23, %v3774_v31  ;;  %5935 = vrot.lane.b32.xlu1 %v22807_v19, %s15913_s16  ;;  %v6030_v19 = vpop.permute.xlu1 %6029 }
 0x3c7   : > { %5967 = vrot.lane.b32.xlu0 %v22818_v17, %s15913_s16  ;;  %v7116_v6 = vcombine.high %v5934_v33, %v5998_v26  ;;  %14840 = vmatpush3.xpose.msk.msra.mxu1 %vm8271_vm2, %v5151_v32  ;;  %v7123_v58 = vrot.slane %v7115_v20, %v16563_v27  ;;  %v18627_v11 = vrot.slane %v14156_v30, %v16563_v27  ;;  %v5930_v45 = vpop.permute.xlu0 %5929 }
 0x3c8   : > { %v4831_v3 = vcombine.low %v18607_v22, %v18610_v8  ;;  %v14152_v54 = vcombine.high %v18607_v22, %v18610_v8  ;;  %14896 = vmatpush3.xpose.msk.msra.mxu0 %vm8271_vm2, %v5152_v2  ;;  %14841 = vmatprep.subr.msk.mxu1 %vm8271_vm2, %v5083_v60  ;;  %v4983_v33 = vcombine.low %v18578_v50, %v18588_v24 }
 0x3c9   : > { %v7130_v17 = vrot.slane %v7116_v6, %v16563_v27  ;;  %v7131_v32 = vcombine.low %v18561_v38, %v6030_v19  ;;  %14897 = vmatprep.subr.msk.mxu0 %vm8271_vm2, %v5084_v46  ;;  %v4999_v13 = vcombine.low %v18597_v18, %v18627_v11  ;;  %v7132_v37 = vcombine.high %v18561_v38, %v6030_v19 }
 0x3ca   : > { %v18643_v30 = vrot.slane %v4883_v1, %v16563_v27  ;;  %v18649_v2 = vrot.slane %v14153_v5, %v16563_v27  ;;  %v4991_v7 = vrot.slane %v4983_v33, %v16585_v12  ;;  %5999 = vrot.lane.b32.xlu1 %v22814_v43, %s15913_s16  ;;  %v18661_v1 = vrot.slane %v4899_v62, %v16563_v27  ;;  %v5962_v26 = vpop.permute.xlu1 %5961 }
 0x3cb   : > { %5995 = vrot.lane.b32.xlu0 %v22913_v39, %s15913_s16  ;;  %v7139_v38 = vrot.slane %v7131_v32, %v16563_v27  ;;  %14842 = vmatpush3.xpose.msk.msra.mxu1 %vm8271_vm2, %v5083_v60  ;;  %v5007_v0 = vrot.slane %v4999_v13, %v16585_v12  ;;  %v7146_v29 = vrot.slane %v7132_v37, %v16563_v27  ;;  %v5994_v31 = vpop.permute.xlu0 %5993 }
 0x3cc   : > { %v18670_v43 = vrot.slane %v14154_v57, %v16563_v27  ;;  %v4915_v5 = vcombine.low %v18643_v30, %v18649_v2  ;;  %14898 = vmatpush3.xpose.msk.msra.mxu0 %vm8271_vm2, %v5084_v46  ;;  %v18676_v20 = vrot.slane %v4815_v47, %v16563_v27  ;;  %v18679_v22 = vrot.slane %v14151_v25, %v16563_v27  ;;  %v22914_v47 = vld [vmem:[#allocation101_spill] sm:$0xff] }
 0x3cd   : > { %v7147_v62 = vcombine.low %v7123_v58, %v7139_v38  ;;  %v7148_v23 = vcombine.high %v7123_v58, %v7139_v38  ;;  %v5015_v8 = vcombine.low %v4991_v7, %v5007_v0  ;;  %v5016_v60 = vcombine.high %v4991_v7, %v5007_v0 }
 0x3ce   : > { %v7163_v59 = vcombine.low %v7130_v17, %v7146_v29  ;;  %v7164_v15 = vcombine.high %v7130_v17, %v7146_v29  ;;  %v4923_v46 = vrot.slane %v4915_v5, %v16585_v12  ;;  %v4931_v58 = vcombine.low %v18661_v1, %v18670_v43  ;;  %5963 = vrot.lane.b32.xlu1 %v22914_v47, %s15913_s16  ;;  %v6026_v33 = vpop.permute.xlu1 %6025 }
 0x3cf   : > { %v18682_v57 = vrot.slane %v7147_v62, %v16585_v12  ;;  %v18685_v6 = vrot.slane %v7148_v23, %v16585_v12  ;;  %14843 = vmatprep.subr.msk.mxu1 %vm8271_vm2, %v5015_v8  ;;  %14899 = vmatprep.subr.msk.mxu0 %vm8271_vm2, %v5016_v60  ;;  %v6979_v17 = vcombine.low %v5930_v45, %v5994_v31  ;;  %v5928_v7 = vpop.permute.xlu0 %5927  ;;  %v22915_v23 = vld [vmem:[#allocation109_spill] sm:$0xff] }
 0x3d0   : > { %v18695_v25 = vrot.slane %v7163_v59, %v16585_v12  ;;  %v18698_v19 = vrot.slane %v7164_v15, %v16585_v12  ;;  %14844 = vmatpush3.xpose.msk.msra.mxu1 %vm8271_vm2, %v5015_v8  ;;  %14900 = vmatpush3.xpose.msk.msra.mxu0 %vm8271_vm2, %v5016_v60  ;;  %v4939_v37 = vrot.slane %v4931_v58, %v16585_v12 }
 0x3d1   : > { %v6980_v0 = vcombine.high %v5930_v45, %v5994_v31  ;;  %v6987_v29 = vrot.slane %v6979_v17, %v16563_v27  ;;  %v18715_v8 = vrot.slane %v4831_v3, %v16563_v27  ;;  %v18718_v60 = vrot.slane %v14152_v54, %v16563_v27 }
 0x3d2   : > { %v4947_v5 = vcombine.low %v4923_v46, %v4939_v37  ;;  %v4948_v62 = vcombine.high %v4923_v46, %v4939_v37  ;;  %6027 = vrot.lane.b32.xlu1 %v22915_v23, %s15913_s16  ;;  %v4847_v15 = vcombine.low %v18676_v20, %v18679_v22  ;;  %v6995_v58 = vcombine.low %v5962_v26, %v6026_v33  ;;  %v5960_v31 = vpop.permute.xlu1 %5959 }
 0x3d3   : > { %v6994_v59 = vrot.slane %v6980_v0, %v16563_v27  ;;  %v6996_v45 = vcombine.high %v5962_v26, %v6026_v33  ;;  %v4863_v46 = vcombine.low %v18715_v8, %v18718_v60  ;;  %v22916_v3 = vcombine.high %v18182_v16, %v18185_v53  ;;  %v5992_v37 = vpop.permute.xlu0 %5991 }
 0x3d4   : > { %14845 = vmatprep.subr.msk.mxu1 %vm8271_vm2, %v4947_v5  ;;  %14901 = vmatprep.subr.msk.mxu0 %vm8271_vm2, %v4948_v62  ;;  %v22917_v47 = vcombine.high %v18194_v42, %v18197_v4  ;;  %v4855_v26 = vrot.slane %v4847_v15, %v16585_v12  ;;  %v7003_v33 = vrot.slane %v6995_v58, %v16563_v27 }
 0x3d5   : > { %v5882_v54 = vrot.slane %v22916_v3, %v16585_v12  ;;  %14846 = vmatpush3.xpose.msk.msra.mxu1 %vm8271_vm2, %v4947_v5  ;;  %14902 = vmatpush3.xpose.msk.msra.mxu0 %vm8271_vm2, %v4948_v62  ;;  %v7010_v0 = vrot.slane %v6996_v45, %v16563_v27  ;;  %v4871_v23 = vrot.slane %v4863_v46, %v16585_v12 }
 0x3d6   : > { %v5898_v17 = vrot.slane %v22917_v47, %v16585_v12  ;;  %v6911_v3 = vcombine.low %v5928_v7, %v5992_v37  ;;  %v7011_v38 = vcombine.low %v6987_v29, %v7003_v33  ;;  %v7012_v39 = vcombine.high %v6987_v29, %v7003_v33  ;;  %v6024_v47 = vpop.permute.xlu1 %6023 }
 0x3d7   : > { %v7027_v42 = vcombine.low %v6994_v59, %v7010_v0  ;;  %v7028_v4 = vcombine.high %v6994_v59, %v7010_v0  ;;  %v4879_v13 = vcombine.low %v4855_v26, %v4871_v23  ;;  %v4880_v5 = vcombine.high %v4855_v26, %v4871_v23  ;;  %v5926_v15 = vpop.permute.xlu0 %5925  ;;  %v22920_v23 = vld [vmem:[#allocation86_spill] sm:$0xff] }
 0x3d8   : > { %v5901_v16 = vcombine.low %v5882_v54, %v5898_v17  ;;  %v5902_v53 = vcombine.high %v5882_v54, %v5898_v17  ;;  %v6912_v32 = vcombine.high %v5928_v7, %v5992_v37  ;;  %v6919_v62 = vrot.slane %v6911_v3, %v16563_v27  ;;  %v22921_v3 = vld [vmem:[#allocation95_spill] sm:$0xff] }
 0x3d9   : > { %v18743_v58 = vrot.slane %v7011_v38, %v16585_v12  ;;  %v18746_v45 = vrot.slane %v7012_v39, %v16585_v12  ;;  %v18749_v46 = vrot.slane %v7027_v42, %v16585_v12  ;;  %v18752_v29 = vrot.slane %v7028_v4, %v16585_v12  ;;  %14847 = vmatprep.subr.msk.mxu1 %vm8271_vm2, %v4879_v13  ;;  %v22919_v38 = vld [vmem:[#allocation71_spill] sm:$0xff]  ;;  %v22927_v39 = vld [vmem:[#allocation72_spill] sm:$0xff] }
 0x3da   : > { %14903 = vmatprep.subr.msk.mxu0 %vm8271_vm2, %v4880_v5  ;;  %v6926_v7 = vrot.slane %v6912_v32, %v16563_v27  ;;  %v5800_v59 = vcombine.high %v18206_v28, %v18209_v44  ;;  %v5816_v54 = vcombine.high %v22919_v38, %v18225_v21  ;;  %14848 = vmatpush3.xpose.msk.msra.mxu1 %vm8271_vm2, %v4879_v13  ;;  %v18770_v32 = vpop.permute.xlu1 %5957  ;;  %v22923_v38 = vld [vmem:[#allocation54_spill] sm:$0xff] }
 0x3db   : > { %22918 = vst [vmem:[#allocation81_spill] sm:$0xff] %v18752_v29  ;;  %14904 = vmatpush3.xpose.msk.msra.mxu0 %vm8271_vm2, %v4880_v5  ;;  %14929 = vmatprep.subr.msk.mxu1 %vm8271_vm2, %v5901_v16  ;;  %v6927_v21 = vcombine.low %v5960_v31, %v6024_v47  ;;  %v5990_v33 = vpop.permute.xlu0 %5989  ;;  %v6928_v0 = vcombine.high %v5960_v31, %v6024_v47  ;;  %v22922_v5 = vld [vmem:[#allocation52_spill] sm:$0xff]  ;;  %v22930_v29 = vld [vmem:[#allocation17_spill] sm:$0xff] }
 0x3dc   : > { %v5814_v28 = vrot.slane %v5800_v59, %v16585_v12  ;;  %v5830_v44 = vrot.slane %v5816_v54, %v16585_v12  ;;  %14985 = vmatprep.subr.msk.mxu0 %vm8271_vm2, %v5902_v53  ;;  %v5765_v42 = vcombine.low %v22921_v3, %v22920_v23  ;;  %v18781_v13 = vcombine.high %v22921_v3, %v22920_v23  ;;  %v22926_v47 = vld [vmem:[#allocation68_spill] sm:$0xff] }
 0x3dd   : > { %v6843_v4 = vcombine.low %v5926_v15, %v5990_v33  ;;  %v22924_v26 = vcombine.low %v22922_v5, %v22923_v38  ;;  %v6935_v37 = vrot.slane %v6927_v21, %v16563_v27  ;;  %v6844_v17 = vcombine.high %v5926_v15, %v5990_v33 }
 0x3de   : > { %v5833_v59 = vcombine.low %v5814_v28, %v5830_v44  ;;  %v5834_v54 = vcombine.high %v5814_v28, %v5830_v44  ;;  %v22925_v31 = vcombine.high %v22922_v5, %v22923_v38  ;;  %v22928_v23 = vcombine.low %v22926_v47, %v22927_v39  ;;  %v6022_v44 = vpop.permute.xlu1 %6021 }
 0x3df   : > { %14850 = vmatmul.mubr.msk.f32.vlgmr.msra.gmra.mxu1 %vm8271_vm2, %v22924_v26  ;;  %v6942_v3 = vrot.slane %v6928_v0, %v16563_v27  ;;  %v6851_v56 = vrot.slane %v6843_v4, %v16563_v27  ;;  %v22929_v26 = vld [vmem:[#allocation92_spill] sm:$0xff]  ;;  %v22931_v15 = vcombine.high %v22926_v47, %v22927_v39  ;;  %v6943_v21 = vcombine.low %v6919_v62, %v6935_v37  ;;  %v5924_v38 = vpop.permute.xlu0 %5923  ;;  %v22932_v39 = vld [vmem:[#allocation82_spill] sm:$0xff] }
 0x3e0   : > { %14906 = vmatmul.mubr.msk.f32.vlgmr.msra.gmra.mxu0 %vm8271_vm2, %v22925_v31  ;;  %14852 = vmatprep.mubr.msk.f32.mxu1 %vm8271_vm2, %v22928_v23  ;;  %v5664_v28 = vcombine.high %v22930_v29, %v22929_v26  ;;  %v6944_v33 = vcombine.high %v6919_v62, %v6935_v37  ;;  %v6858_v5 = vrot.slane %v6844_v17, %v16563_v27  ;;  %v22933_v31 = vld [vmem:[#allocation85_spill] sm:$0xff]  ;;  %v22936_v17 = vld [vmem:[#allocation67_spill] sm:$0xff]  ;;  %v22940_v26 = vld [vmem:[#allocation90_spill] sm:$0xff] }
 0x3e1   : > { %14908 = vmatprep.mubr.msk.f32.mxu0 %vm8271_vm2, %v22931_v15  ;;  %14930 = vmatpush3.xpose.msk.msra.mxu1 %vm8271_vm2, %v5901_v16  ;;  %v6959_v0 = vcombine.low %v6926_v7, %v6942_v3  ;;  %v6960_v4 = vcombine.high %v6926_v7, %v6942_v3  ;;  %v22934_v47 = vcombine.low %v22932_v39, %v22933_v31 }
 0x3e2   : > { %14986 = vmatpush3.xpose.msk.msra.mxu0 %vm8271_vm2, %v5902_v53  ;;  %14931 = vmatprep.subr.msk.mxu1 %vm8271_vm2, %v5833_v59  ;;  %v5678_v29 = vrot.slane %v5664_v28, %v16585_v12  ;;  %v18815_v16 = vrot.slane %v6943_v21, %v16585_v12  ;;  %v18818_v62 = vrot.slane %v6944_v33, %v16585_v12  ;;  %v22935_v53 = vld [vmem:[#allocation66_spill] sm:$0xff]  ;;  %v22941_v28 = vld [vmem:[#allocation93_spill] sm:$0xff]  ;;  %v18837_v33 = vpop.permute.xlu1 %5955 }
 0x3e3   : > { %14987 = vmatprep.subr.msk.mxu0 %vm8271_vm2, %v5834_v54  ;;  %14853 = vmatmul.mubr.msk.f32.gmra.mxu1 %vm8271_vm2, %v22934_v47  ;;  %v5680_v37 = vcombine.high %v22936_v17, %v22935_v53  ;;  %v22937_v7 = vcombine.high %v22932_v39, %v22933_v31  ;;  %v18827_v23 = vrot.slane %v6959_v0, %v16585_v12  ;;  %v5988_v47 = vpop.permute.xlu0 %5987  ;;  %v22949_v53 = vld [vmem:[#allocation108_spill] sm:$0xff] }
 0x3e4   : > { %v18830_v3 = vrot.slane %v6960_v4, %v16585_v12  ;;  %v22942_v15 = vcombine.low %v22940_v26, %v22941_v28  ;;  %v6859_v21 = vcombine.low %v18770_v32, %v6022_v44  ;;  %v22943_v0 = vcombine.high %v22940_v26, %v22941_v28  ;;  %v22944_v26 = vld [vmem:[#allocation96_spill] sm:$0xff] }
 0x3e5   : > { %14909 = vmatmul.mubr.msk.f32.gmra.mxu0 %vm8271_vm2, %v22937_v7  ;;  %22938 = vst [vmem:[#allocation99_spill] sm:$0xff] %v18827_v23  ;;  %14932 = vmatpush3.xpose.msk.msra.mxu1 %vm8271_vm2, %v5833_v59  ;;  %v5694_v4 = vrot.slane %v5680_v37, %v16585_v12  ;;  %v6860_v7 = vcombine.high %v18770_v32, %v6022_v44  ;;  %v22945_v59 = vld [vmem:[#allocation97_spill] sm:$0xff] }
 0x3e6   : > { %22939 = vst [vmem:[#allocation75_spill] sm:$0xff] %v18830_v3  ;;  %14855 = vmatprep.mubr.msk.f32.mxu1 %vm8271_vm2, %v22942_v15  ;;  %14911 = vmatprep.mubr.msk.f32.mxu0 %vm8271_vm2, %v22943_v0  ;;  %v22946_v28 = vcombine.low %v22944_v26, %v22945_v59  ;;  %v6867_v0 = vrot.slane %v6859_v21, %v16563_v27  ;;  %v6020_v3 = vpop.permute.xlu1 %6019 }
 0x3e7   : > { %14988 = vmatpush3.xpose.msk.msra.mxu0 %vm8271_vm2, %v5834_v54  ;;  %14933 = vmatprep.subr.msk.mxu1 %vm8271_vm2, %v5765_v42  ;;  %v5697_v37 = vcombine.low %v5678_v29, %v5694_v4  ;;  %v5698_v15 = vcombine.high %v5678_v29, %v5694_v4  ;;  %v22947_v17 = vcombine.high %v22944_v26, %v22945_v59  ;;  %v22948_v54 = vld [vmem:[#allocation107_spill] sm:$0xff]  ;;  %v22953_v26 = vld [vmem:[#allocation76_spill] sm:$0xff] }
 0x3e8   : > { %14989 = vmatprep.subr.msk.mxu0 %vm8271_vm2, %v18781_v13  ;;  %14856 = vmatmul.mubr.msk.f32.gmra.mxu1 %vm8271_vm2, %v22946_v28  ;;  %v22950_v32 = vcombine.low %v22948_v54, %v22949_v53  ;;  %v6874_v44 = vrot.slane %v6860_v7, %v16563_v27  ;;  %v6775_v31 = vcombine.low %v5924_v38, %v5988_v47  ;;  %v5922_v28 = vpop.permute.xlu0 %5921 }
 0x3e9   : > { %14912 = vmatmul.mubr.msk.f32.gmra.mxu0 %vm8271_vm2, %v22947_v17  ;;  %v6776_v39 = vcombine.high %v5924_v38, %v5988_v47  ;;  %v22951_v29 = vcombine.high %v22948_v54, %v22949_v53  ;;  %14934 = vmatpush3.xpose.msk.msra.mxu1 %vm8271_vm2, %v5765_v42  ;;  %v6875_v21 = vcombine.low %v6851_v56, %v6867_v0  ;;  %v22952_v17 = vld [vmem:[#allocation84_spill] sm:$0xff]  ;;  %v22954_v53 = vld [vmem:[#allocation111_spill] sm:$0xff] }
 0x3ea   : > { %14858 = vmatprep.mubr.msk.f32.mxu1 %vm8271_vm2, %v22950_v32  ;;  %v6876_v4 = vcombine.high %v6851_v56, %v6867_v0  ;;  %v5528_v59 = vcombine.high %v22953_v26, %v22952_v17  ;;  %14935 = vmatprep.subr.msk.mxu1 %vm8271_vm2, %v5697_v37  ;;  %v6891_v38 = vcombine.low %v6858_v5, %v6874_v44  ;;  %v22955_v54 = vld [vmem:[#allocation112_spill] sm:$0xff]  ;;  %v18910_v17 = vpop.permute.xlu1 %5953  ;;  %v22974_v26 = vld [vmem:[#allocation117_spill] sm:$0xff] }
 0x3eb   : > { %14914 = vmatprep.mubr.msk.f32.mxu0 %vm8271_vm2, %v22951_v29  ;;  %14990 = vmatpush3.xpose.msk.msra.mxu0 %vm8271_vm2, %v18781_v13  ;;  %v6892_v47 = vcombine.high %v6858_v5, %v6874_v44  ;;  %v6783_v7 = vrot.slane %v6775_v31, %v16563_v27  ;;  %v22956_v42 = vcombine.low %v22954_v53, %v22955_v54  ;;  %v22962_v44 = vld [vmem:[#allocation113_spill] sm:$0xff]  ;;  %v22963_v29 = vld [vmem:[#allocation114_spill] sm:$0xff] }
 0x3ec   : > { %14991 = vmatprep.subr.msk.mxu0 %vm8271_vm2, %v5698_v15  ;;  %v18889_v56 = vrot.slane %v6875_v21, %v16585_v12  ;;  %v18892_v0 = vrot.slane %v6876_v4, %v16585_v12  ;;  %v6790_v13 = vrot.slane %v6776_v39, %v16563_v27  ;;  %v22959_v5 = vcombine.high %v22954_v53, %v22955_v54  ;;  %v22967_v53 = vld [vmem:[#allocation80_spill] sm:$0xff]  ;;  %v22975_v39 = vld [vmem:[#allocation118_spill] sm:$0xff] }
 0x3ed   : > { %14859 = vmatmul.mubr.msk.f32.gmra.mxu1 %vm8271_vm2, %v22956_v42  ;;  %v18900_v31 = vrot.slane %v6891_v38, %v16585_v12  ;;  %v18903_v32 = vrot.slane %v6892_v47, %v16585_v12  ;;  %v22964_v21 = vcombine.low %v22962_v44, %v22963_v29  ;;  %v5542_v4 = vrot.slane %v5528_v59, %v16585_v12  ;;  %v22966_v47 = vld [vmem:[#allocation87_spill] sm:$0xff]  ;;  %v5986_v42 = vpop.permute.xlu0 %5985 }
 0x3ee   : > { %22957 = vst [vmem:[#allocation15_spill] sm:$0xff] %v18889_v56  ;;  %22958 = vst [vmem:[#allocation57_spill] sm:$0xff] %v18892_v0  ;;  %14915 = vmatmul.mubr.msk.f32.gmra.mxu0 %vm8271_vm2, %v22959_v5  ;;  %v22965_v38 = vcombine.high %v22962_v44, %v22963_v29  ;;  %14936 = vmatpush3.xpose.msk.msra.mxu1 %vm8271_vm2, %v5697_v37  ;;  %v5544_v54 = vcombine.high %v22967_v53, %v22966_v47  ;;  %v22969_v29 = vld [vmem:[#allocation83_spill] sm:$0xff] }
 0x3ef   : > { %22960 = vst [vmem:[#allocation56_spill] sm:$0xff] %v18900_v31  ;;  %22961 = vst [vmem:[#allocation98_spill] sm:$0xff] %v18903_v32  ;;  %14861 = vmatprep.mubr.msk.f32.mxu1 %vm8271_vm2, %v22964_v21  ;;  %14992 = vmatpush3.xpose.msk.msra.mxu0 %vm8271_vm2, %v5698_v15  ;;  %v22968_v21 = vld [vmem:[#allocation20_spill] sm:$0xff]  ;;  %v6791_v44 = vcombine.low %v18837_v33, %v6020_v3  ;;  %v22970_v37 = vld [vmem:[#allocation115_spill] sm:$0xff]  ;;  %v6792_v59 = vcombine.high %v18837_v33, %v6020_v3 }
 0x3f0   : > { %14917 = vmatprep.mubr.msk.f32.mxu0 %vm8271_vm2, %v22965_v38  ;;  %14937 = vmatprep.subr.msk.mxu1 %vm8271_vm2, %v22968_v21  ;;  %v22971_v38 = vld [vmem:[#allocation116_spill] sm:$0xff]  ;;  %v5558_v53 = vrot.slane %v5544_v54, %v16585_v12  ;;  %v6707_v5 = vcombine.low %v5922_v28, %v5986_v42  ;;  %v22976_v32 = vcombine.low %v22974_v26, %v22975_v39  ;;  %v22977_v56 = vld [vmem:[#allocation91_spill] sm:$0xff]  ;;  %v6018_v54 = vpop.permute.xlu1 %6017 }
 0x3f1   : > { %14993 = vmatprep.subr.msk.mxu0 %vm8271_vm2, %v22969_v29  ;;  %v22972_v47 = vcombine.low %v22970_v37, %v22971_v38  ;;  %v22973_v15 = vcombine.high %v22970_v37, %v22971_v38  ;;  %v6799_v31 = vrot.slane %v6791_v44, %v16563_v27  ;;  %v6708_v0 = vcombine.high %v5922_v28, %v5986_v42  ;;  %v22981_v44 = vld [vmem:[#allocation119_spill] sm:$0xff] }
 0x3f2   : > { %v22979_v3 = vcombine.high %v22974_v26, %v22975_v39  ;;  %14938 = vmatpush3.xpose.msk.msra.mxu1 %vm8271_vm2, %v22968_v21  ;;  %v5561_v33 = vcombine.low %v5542_v4, %v5558_v53  ;;  %v5562_v37 = vcombine.high %v5542_v4, %v5558_v53  ;;  %v6806_v38 = vrot.slane %v6792_v59, %v16563_v27  ;;  %v22980_v59 = vld [vmem:[#allocation37_spill] sm:$0xff] }
 0x3f3   : > { %14862 = vmatmul.mubr.msk.f32.gmra.mxu1 %vm8271_vm2, %v22972_v47  ;;  %14918 = vmatmul.mubr.msk.f32.gmra.mxu0 %vm8271_vm2, %v22973_v15  ;;  %v22978_v47 = vld [vmem:[#allocation21_spill] sm:$0xff]  ;;  %v6807_v28 = vcombine.low %v6783_v7, %v6799_v31  ;;  %v6715_v42 = vrot.slane %v6707_v5, %v16563_v27  ;;  %v6722_v39 = vrot.slane %v6708_v0, %v16563_v27  ;;  %v22984_v5 = vld [vmem:[#allocation19_spill] sm:$0xff] }
 0x3f4   : > { %14864 = vmatprep.mubr.msk.f32.mxu1 %vm8271_vm2, %v22976_v32  ;;  %v5392_v23 = vcombine.high %v22978_v47, %v22977_v56  ;;  %14920 = vmatprep.mubr.msk.f32.mxu0 %vm8271_vm2, %v22979_v3  ;;  %v18957_v32 = vpop.permute.xlu0 %5919  ;;  %v6808_v56 = vcombine.high %v6783_v7, %v6799_v31  ;;  %v6823_v26 = vcombine.low %v6790_v13, %v6806_v38  ;;  %v22988_v3 = vld [vmem:[#allocation39_spill] sm:$0xff] }
 0x3f5   : > { %14994 = vmatpush3.xpose.msk.msra.mxu0 %vm8271_vm2, %v22969_v29  ;;  %14939 = vmatprep.subr.msk.mxu1 %vm8271_vm2, %v5561_v33  ;;  %v6824_v21 = vcombine.high %v6790_v13, %v6806_v38  ;;  %v22982_v53 = vcombine.low %v22980_v59, %v22981_v44  ;;  %v22983_v7 = vcombine.high %v22980_v59, %v22981_v44  ;;  %v22985_v13 = vld [vmem:[#allocation94_spill] sm:$0xff]  ;;  %v22989_v38 = vld [vmem:[#allocation23_spill] sm:$0xff] }
 0x3f6   : > { %14995 = vmatprep.subr.msk.mxu0 %vm8271_vm2, %v5562_v37  ;;  %v5406_v4 = vrot.slane %v5392_v23, %v16585_v12  ;;  %v18975_v0 = vrot.slane %v6807_v28, %v16585_v12  ;;  %v18978_v31 = vrot.slane %v6808_v56, %v16585_v12  ;;  %v5408_v29 = vcombine.high %v22985_v13, %v22984_v5  ;;  %v18982_v23 = vpop.permute.xlu1 %5951  ;;  %v22992_v13 = vld [vmem:[#allocation79_spill] sm:$0xff] }
 0x3f7   : > { %14865 = vmatmul.mubr.msk.f32.gmra.mxu1 %vm8271_vm2, %v22982_v53  ;;  %14921 = vmatmul.mubr.msk.f32.gmra.mxu0 %vm8271_vm2, %v22983_v7  ;;  %v18985_v15 = vrot.slane %v6823_v26, %v16585_v12  ;;  %v18988_v47 = vrot.slane %v6824_v21, %v16585_v12  ;;  %v22990_v59 = vcombine.low %v22988_v3, %v22989_v38  ;;  %v22998_v26 = vld [vmem:[#allocation22_spill] sm:$0xff] }
 0x3f8   : > { %v22991_v28 = vcombine.high %v22988_v3, %v22989_v38  ;;  %v6723_v56 = vcombine.low %v18910_v17, %v6018_v54  ;;  %v5984_v44 = vpop.permute.xlu0 %5983  ;;  %14940 = vmatpush3.xpose.msk.msra.mxu1 %vm8271_vm2, %v5561_v33  ;;  %v5422_v53 = vrot.slane %v5408_v29, %v16585_v12  ;;  %v22993_v3 = vld [vmem:[#allocation78_spill] sm:$0xff]  ;;  %v6724_v38 = vcombine.high %v18910_v17, %v6018_v54  ;;  %v22995_v33 = vld [vmem:[#allocation125_spill] sm:$0xff] }
 0x3f9   : > { %22986 = vst [vmem:[#allocation59_spill] sm:$0xff] %v18985_v15  ;;  %22987 = vst [vmem:[#allocation16_spill] sm:$0xff] %v18988_v47  ;;  %14867 = vmatprep.mubr.msk.f32.mxu1 %vm8271_vm2, %v22990_v59  ;;  %14996 = vmatpush3.xpose.msk.msra.mxu0 %vm8271_vm2, %v5562_v37  ;;  %v22994_v59 = vld [vmem:[#allocation8_spill] sm:$0xff] }
 0x3fa   : > { %14923 = vmatprep.mubr.msk.f32.mxu0 %vm8271_vm2, %v22991_v28  ;;  %14941 = vmatprep.subr.msk.mxu1 %vm8271_vm2, %v22992_v13  ;;  %v22996_v28 = vcombine.low %v22994_v59, %v22995_v33  ;;  %v22997_v37 = vcombine.high %v22994_v59, %v22995_v33  ;;  %v5425_v29 = vcombine.low %v5406_v4, %v5422_v53  ;;  %v6016_v21 = vpop.permute.xlu1 %6015  ;;  %v22999_v47 = vld [vmem:[#allocation24_spill] sm:$0xff]  ;;  %v23003_v33 = vld [vmem:[#allocation65_spill] sm:$0xff] }
 0x3fb   : > { %14997 = vmatprep.subr.msk.mxu0 %vm8271_vm2, %v22993_v3  ;;  %v5426_v5 = vcombine.high %v5406_v4, %v5422_v53  ;;  %v6731_v7 = vrot.slane %v6723_v56, %v16563_v27  ;;  %v23000_v15 = vcombine.low %v22998_v26, %v22999_v47  ;;  %v23001_v17 = vcombine.high %v22998_v26, %v22999_v47  ;;  %v23002_v59 = vld [vmem:[#allocation64_spill] sm:$0xff] }
 0x3fc   : > { %14868 = vmatmul.mubr.msk.f32.gmra.mxu1 %vm8271_vm2, %v22996_v28  ;;  %14924 = vmatmul.mubr.msk.f32.gmra.mxu0 %vm8271_vm2, %v22997_v37  ;;  %v6738_v54 = vrot.slane %v6724_v38, %v16563_v27  ;;  %v5324_v28 = vcombine.high %v23003_v33, %v23002_v59  ;;  %v23004_v37 = vld [vmem:[#allocation73_spill] sm:$0xff]  ;;  %v23005_v4 = vld [vmem:[#allocation28_spill] sm:$0xff]  ;;  %v19037_v56 = vpop.permute.xlu0 %5917  ;;  %v6639_v26 = vcombine.low %v18957_v32, %v5984_v44 }
 0x3fd   : > { %14870 = vmatprep.mubr.msk.f32.mxu1 %vm8271_vm2, %v23000_v15  ;;  %14926 = vmatprep.mubr.msk.f32.mxu0 %vm8271_vm2, %v23001_v17  ;;  %v5340_v53 = vcombine.high %v23005_v4, %v23004_v37  ;;  %v6739_v15 = vcombine.low %v6715_v42, %v6731_v7  ;;  %v6740_v47 = vcombine.high %v6715_v42, %v6731_v7  ;;  %v23006_v33 = vld [vmem:[#allocation9_spill] sm:$0xff] }
 0x3fe   : > { %14942 = vmatpush3.xpose.msk.msra.mxu1 %vm8271_vm2, %v22992_v13  ;;  %14998 = vmatpush3.xpose.msk.msra.mxu0 %vm8271_vm2, %v22993_v3  ;;  %v6755_v38 = vcombine.low %v6722_v39, %v6738_v54  ;;  %v6756_v17 = vcombine.high %v6722_v39, %v6738_v54  ;;  %v5338_v59 = vrot.slane %v5324_v28, %v16585_v12  ;;  %v23007_v37 = vld [vmem:[#allocation61_spill] sm:$0xff]  ;;  %v19062_v3 = vpop.permute.xlu1 %5949 }
 0x3ff   : > { %14943 = vmatprep.subr.msk.mxu1 %vm8271_vm2, %v5425_v29  ;;  %14999 = vmatprep.subr.msk.mxu0 %vm8271_vm2, %v5426_v5  ;;  %v23008_v4 = vcombine.low %v23006_v33, %v23007_v37  ;;  %v23009_v13 = vcombine.high %v23006_v33, %v23007_v37  ;;  %v19056_v42 = vrot.slane %v6739_v15, %v16585_v12  ;;  %v23013_v33 = vld [vmem:[#allocation38_spill] sm:$0xff] }
 0x400   : > { %v19059_v7 = vrot.slane %v6740_v47, %v16585_v12  ;;  %v5354_v39 = vrot.slane %v5340_v53, %v16585_v12  ;;  %v19065_v54 = vrot.slane %v6755_v38, %v16585_v12  ;;  %v19068_v28 = vrot.slane %v6756_v17, %v16585_v12  ;;  %v5982_v47 = vpop.permute.xlu0 %5981 }
 0x401   : > { %14871 = vmatmul.mubr.msk.f32.gmra.mxu1 %vm8271_vm2, %v23008_v4  ;;  %14927 = vmatmul.mubr.msk.f32.gmra.mxu0 %vm8271_vm2, %v23009_v13  ;;  %v23012_v4 = vld [vmem:[#allocation36_spill] sm:$0xff]  ;;  %v6640_v53 = vcombine.high %v18957_v32, %v5984_v44  ;;  %v6647_v32 = vrot.slane %v6639_v26, %v16563_v27  ;;  %v5188_v26 = vcombine.high %v18311_v63, %v18314_v41 }
 0x402   : > { %23010 = vst [vmem:[#allocation58_spill] sm:$0xff] %v19065_v54  ;;  %23011 = vst [vmem:[#allocation63_spill] sm:$0xff] %v19068_v28  ;;  %v23014_v37 = vcombine.low %v23012_v4, %v23013_v33  ;;  %v23015_v15 = vcombine.high %v23012_v4, %v23013_v33  ;;  %14944 = vmatpush3.xpose.msk.msra.mxu1 %vm8271_vm2, %v5425_v29  ;;  %15000 = vmatpush3.xpose.msk.msra.mxu0 %vm8271_vm2, %v5426_v5  ;;  %v6014_v17 = vpop.permute.xlu1 %6013 }
 0x403   : > { %v5357_v13 = vcombine.low %v5338_v59, %v5354_v39  ;;  %v5358_v33 = vcombine.high %v5338_v59, %v5354_v39  ;;  %v6654_v44 = vrot.slane %v6640_v53, %v16563_v27  ;;  %v5272_v5 = vcombine.high %v18268_v55, %v18271_v9  ;;  %v23016_v59 = vld [vmem:[#allocation18_spill] sm:$0xff] }
 0x404   : > { %14961 = vmatprep.mubr.msk.f32.mxu1 %vm8271_vm2, %v23014_v37  ;;  %15017 = vmatprep.mubr.msk.f32.mxu0 %vm8271_vm2, %v23015_v15  ;;  %v5256_v15 = vcombine.high %v18258_v52, %v18261_v34  ;;  %v6655_v29 = vcombine.low %v18982_v23, %v6016_v21  ;;  %v6656_v4 = vcombine.high %v18982_v23, %v6016_v21  ;;  %v19104_v37 = vpop.permute.xlu0 %5915 }
 0x405   : > { %14945 = vmatprep.subr.msk.mxu1 %vm8271_vm2, %v5357_v13  ;;  %15001 = vmatprep.subr.msk.mxu0 %vm8271_vm2, %v5358_v33  ;;  %v5204_v39 = vcombine.high %v23016_v59, %v18369_v40  ;;  %v6571_v53 = vcombine.low %v19037_v56, %v5982_v47  ;;  %v5286_v34 = vrot.slane %v5272_v5, %v16585_v12 }
 0x406   : > { %14946 = vmatpush3.xpose.msk.msra.mxu1 %vm8271_vm2, %v5357_v13  ;;  %15002 = vmatpush3.xpose.msk.msra.mxu0 %vm8271_vm2, %v5358_v33  ;;  %v5270_v52 = vrot.slane %v5256_v15, %v16585_v12  ;;  %v6663_v55 = vrot.slane %v6655_v29, %v16563_v27  ;;  %v6670_v9 = vrot.slane %v6656_v4, %v16563_v27  ;;  %v19115_v38 = vpop.permute.xlu1 %5947 }
 0x407   : > { %v5202_v63 = vrot.slane %v5188_v26, %v16585_v12  ;;  %v5218_v41 = vrot.slane %v5204_v39, %v16585_v12  ;;  %v6572_v40 = vcombine.high %v19037_v56, %v5982_v47  ;;  %v6579_v47 = vrot.slane %v6571_v53, %v16563_v27  ;;  %v23081_v39 = vld [vmem:[#allocation122_spill] sm:$0xff] }
 0x408   : > { %v5289_v23 = vcombine.low %v5270_v52, %v5286_v34  ;;  %v5290_v21 = vcombine.high %v5270_v52, %v5286_v34  ;;  %v6671_v59 = vcombine.low %v6647_v32, %v6663_v55  ;;  %v6672_v13 = vcombine.high %v6647_v32, %v6663_v55  ;;  %v5980_v54 = vpop.permute.xlu0 %5979  ;;  %v23080_v34 = vld [vmem:[#allocation35_spill] sm:$0xff] }
 0x409   : > { %v6687_v33 = vcombine.low %v6654_v44, %v6670_v9  ;;  %v6688_v15 = vcombine.high %v6654_v44, %v6670_v9  ;;  %v5221_v28 = vcombine.low %v5202_v63, %v5218_v41  ;;  %v5222_v5 = vcombine.high %v5202_v63, %v5218_v41 }
 0x40a   : > { %14947 = vmatprep.subr.msk.mxu1 %vm8271_vm2, %v5289_v23  ;;  %15003 = vmatprep.subr.msk.mxu0 %vm8271_vm2, %v5290_v21  ;;  %v19120_v4 = vrot.slane %v6671_v59, %v16585_v12  ;;  %v19123_v56 = vrot.slane %v6672_v13, %v16585_v12  ;;  %v6586_v29 = vrot.slane %v6572_v40, %v16563_v27  ;;  %v6012_v52 = vpop.permute.xlu1 %6011 }
 0x40b   : > { %v19127_v32 = vrot.slane %v6687_v33, %v16585_v12  ;;  %v19130_v44 = vrot.slane %v6688_v15, %v16585_v12  ;;  %14948 = vmatpush3.xpose.msk.msra.mxu1 %vm8271_vm2, %v5289_v23  ;;  %15004 = vmatpush3.xpose.msk.msra.mxu0 %vm8271_vm2, %v5290_v21  ;;  %v5120_v53 = vcombine.high %v18423_v35, %v18437_v51 }
 0x40c   : > { %14949 = vmatprep.subr.msk.mxu1 %vm8271_vm2, %v5221_v28  ;;  %15005 = vmatprep.subr.msk.mxu0 %vm8271_vm2, %v5222_v5  ;;  %v5136_v9 = vcombine.high %v18440_v10, %v18458_v49  ;;  %v6587_v63 = vcombine.low %v19062_v3, %v6014_v17  ;;  %v19150_v41 = vpop.permute.xlu0 %5913  ;;  %v6588_v23 = vcombine.high %v19062_v3, %v6014_v17 }
 0x40d   : > { %v5134_v40 = vrot.slane %v5120_v53, %v16585_v12  ;;  %v5052_v35 = vcombine.high %v18494_v61, %v18504_v14  ;;  %v5068_v51 = vcombine.high %v18510_v36, %v18523_v48  ;;  %v6503_v21 = vcombine.low %v19104_v37, %v5980_v54 }
 0x40e   : > { %v5150_v10 = vrot.slane %v5136_v9, %v16585_v12  ;;  %v6595_v49 = vrot.slane %v6587_v63, %v16563_v27  ;;  %v6602_v59 = vrot.slane %v6588_v23, %v16563_v27  ;;  %v6504_v61 = vcombine.high %v19104_v37, %v5980_v54  ;;  %v19167_v14 = vpop.permute.xlu1 %5945 }
 0x40f   : > { %14950 = vmatpush3.xpose.msk.msra.mxu1 %vm8271_vm2, %v5221_v28  ;;  %15006 = vmatpush3.xpose.msk.msra.mxu0 %vm8271_vm2, %v5222_v5  ;;  %v5066_v3 = vrot.slane %v5052_v35, %v16585_v12  ;;  %v5082_v17 = vrot.slane %v5068_v51, %v16585_v12  ;;  %v6511_v37 = vrot.slane %v6503_v21, %v16563_v27 }
 0x410   : > { %v5153_v36 = vcombine.low %v5134_v40, %v5150_v10  ;;  %v5154_v48 = vcombine.high %v5134_v40, %v5150_v10  ;;  %v6603_v28 = vcombine.low %v6579_v47, %v6595_v49  ;;  %v6604_v13 = vcombine.high %v6579_v47, %v6595_v49  ;;  %v5978_v9 = vpop.permute.xlu0 %5977 }
 0x411   : > { %v6619_v33 = vcombine.low %v6586_v29, %v6602_v59  ;;  %v6620_v15 = vcombine.high %v6586_v29, %v6602_v59  ;;  %v5085_v5 = vcombine.low %v5066_v3, %v5082_v17  ;;  %v5086_v53 = vcombine.high %v5066_v3, %v5082_v17 }
 0x412   : > { %14951 = vmatprep.subr.msk.mxu1 %vm8271_vm2, %v5153_v36  ;;  %15007 = vmatprep.subr.msk.mxu0 %vm8271_vm2, %v5154_v48  ;;  %v19172_v63 = vrot.slane %v6603_v28, %v16585_v12  ;;  %v19175_v54 = vrot.slane %v6604_v13, %v16585_v12  ;;  %v6518_v29 = vrot.slane %v6504_v61, %v16563_v27  ;;  %v19187_v23 = vpop.permute.xlu1 %6009 }
 0x413   : > { %v19179_v40 = vrot.slane %v6619_v33, %v16585_v12  ;;  %v19182_v47 = vrot.slane %v6620_v15, %v16585_v12  ;;  %14952 = vmatpush3.xpose.msk.msra.mxu1 %vm8271_vm2, %v5153_v36  ;;  %15008 = vmatpush3.xpose.msk.msra.mxu0 %vm8271_vm2, %v5154_v48  ;;  %v4984_v10 = vcombine.high %v18578_v50, %v18588_v24 }
 0x414   : > { %14953 = vmatprep.subr.msk.mxu1 %vm8271_vm2, %v5085_v5  ;;  %15009 = vmatprep.subr.msk.mxu0 %vm8271_vm2, %v5086_v53  ;;  %v5000_v59 = vcombine.high %v18597_v18, %v18627_v11  ;;  %v6519_v3 = vcombine.low %v19115_v38, %v6012_v52  ;;  %v6520_v61 = vcombine.high %v19115_v38, %v6012_v52  ;;  %v19215_v48 = vpop.permute.xlu0 %5911 }
 0x415   : > { %v4998_v17 = vrot.slane %v4984_v10, %v16585_v12  ;;  %v4916_v36 = vcombine.high %v18643_v30, %v18649_v2  ;;  %v4932_v50 = vcombine.high %v18661_v1, %v18670_v43  ;;  %v6435_v11 = vcombine.low %v19150_v41, %v5978_v9 }
 0x416   : > { %v5014_v24 = vrot.slane %v5000_v59, %v16585_v12  ;;  %v6527_v18 = vrot.slane %v6519_v3, %v16563_v27  ;;  %v19217_v28 = vpop.permute.xlu1 %5943  ;;  %v6534_v38 = vrot.slane %v6520_v61, %v16563_v27  ;;  %v6436_v1 = vcombine.high %v19150_v41, %v5978_v9 }
 0x417   : > { %14954 = vmatpush3.xpose.msk.msra.mxu1 %vm8271_vm2, %v5085_v5  ;;  %15010 = vmatpush3.xpose.msk.msra.mxu0 %vm8271_vm2, %v5086_v53  ;;  %v4930_v30 = vrot.slane %v4916_v36, %v16585_v12  ;;  %v4946_v2 = vrot.slane %v4932_v50, %v16585_v12  ;;  %v6443_v41 = vrot.slane %v6435_v11, %v16563_v27  ;;  %v23029_v11 = vld [vmem:[#allocation60_spill] sm:$0xff]  ;;  %v23050_v50 = vld [vmem:[#allocation102_spill] sm:$0xff] }
 0x418   : > { %v5017_v43 = vcombine.low %v4998_v17, %v5014_v24  ;;  %v5018_v52 = vcombine.high %v4998_v17, %v5014_v24  ;;  %v6535_v13 = vcombine.low %v6511_v37, %v6527_v18  ;;  %v6536_v33 = vcombine.high %v6511_v37, %v6527_v18  ;;  %v5976_v9 = vpop.permute.xlu0 %5975  ;;  %v23056_v36 = vld [vmem:[#allocation104_spill] sm:$0xff] }
 0x419   : > { %v6551_v15 = vcombine.low %v6518_v29, %v6534_v38  ;;  %v6552_v5 = vcombine.high %v6518_v29, %v6534_v38  ;;  %v4949_v53 = vcombine.low %v4930_v30, %v4946_v2  ;;  %v4950_v10 = vcombine.high %v4930_v30, %v4946_v2 }
 0x41a   : > { %14955 = vmatprep.subr.msk.mxu1 %vm8271_vm2, %v5017_v43  ;;  %15011 = vmatprep.subr.msk.mxu0 %vm8271_vm2, %v5018_v52  ;;  %v19226_v59 = vrot.slane %v6535_v13, %v16585_v12  ;;  %v19229_v3 = vrot.slane %v6536_v33, %v16585_v12  ;;  %v6450_v29 = vrot.slane %v6436_v1, %v16563_v27  ;;  %v19241_v61 = vpop.permute.xlu1 %6007 }
 0x41b   : > { %v19233_v17 = vrot.slane %v6551_v15, %v16585_v12  ;;  %v19236_v37 = vrot.slane %v6552_v5, %v16585_v12  ;;  %14956 = vmatpush3.xpose.msk.msra.mxu1 %vm8271_vm2, %v5017_v43  ;;  %15012 = vmatpush3.xpose.msk.msra.mxu0 %vm8271_vm2, %v5018_v52  ;;  %v4848_v24 = vcombine.high %v18676_v20, %v18679_v22 }
 0x41c   : > { %14957 = vmatprep.subr.msk.mxu1 %vm8271_vm2, %v4949_v53  ;;  %15013 = vmatprep.subr.msk.mxu0 %vm8271_vm2, %v4950_v10  ;;  %v4864_v38 = vcombine.high %v18715_v8, %v18718_v60  ;;  %v6451_v30 = vcombine.low %v19167_v14, %v19187_v23  ;;  %v6452_v1 = vcombine.high %v19167_v14, %v19187_v23  ;;  %v5910_v8 = vpop.permute.xlu0 %5909 }
 0x41d   : > { %v4862_v2 = vrot.slane %v4848_v24, %v16585_v12  ;;  %v23017_v20 = vcombine.low %v18682_v57, %v18685_v6  ;;  %v23019_v43 = vcombine.high %v18682_v57, %v18685_v6  ;;  %v23021_v23 = vcombine.low %v18695_v25, %v18698_v19 }
 0x41e   : > { %v4878_v60 = vrot.slane %v4864_v38, %v16585_v12  ;;  %v6459_v14 = vrot.slane %v6451_v30, %v16563_v27  ;;  %v6466_v33 = vrot.slane %v6452_v1, %v16563_v27  ;;  %v23023_v57 = vcombine.high %v18695_v25, %v18698_v19 }
 0x41f   : > { %v19266_v22 = vrot.slane %v23017_v20, %v16563_v27  ;;  %v19272_v52 = vrot.slane %v23019_v43, %v16563_v27  ;;  %14958 = vmatpush3.xpose.msk.msra.mxu1 %vm8271_vm2, %v4949_v53  ;;  %15014 = vmatpush3.xpose.msk.msra.mxu0 %vm8271_vm2, %v4950_v10  ;;  %v19282_v13 = vrot.slane %v23021_v23, %v16563_v27  ;;  %v5942_v53 = vpop.permute.xlu1 %5941 }
 0x420   : > { %v19289_v6 = vrot.slane %v23023_v57, %v16563_v27  ;;  %v6367_v5 = vcombine.low %v19215_v48, %v5976_v9  ;;  %v4881_v10 = vcombine.low %v4862_v2, %v4878_v60  ;;  %v4882_v24 = vcombine.high %v4862_v2, %v4878_v60 }
 0x421   : > { %23018 = vst [vmem:[#allocation62_spill] sm:$0xff] %v19266_v22  ;;  %23020 = vst [vmem:[#allocation14_spill] sm:$0xff] %v19272_v52  ;;  %v8235_v15 = vcombine.low %v19266_v22, %v19272_v52  ;;  %v6467_v38 = vcombine.low %v6443_v41, %v6459_v14  ;;  %v6468_v30 = vcombine.high %v6443_v41, %v6459_v14  ;;  %v5974_v41 = vpop.permute.xlu0 %5973 }
 0x422   : > { %23022 = vst [vmem:[#allocation47_spill] sm:$0xff] %v19282_v13  ;;  %23024 = vst [vmem:[#allocation46_spill] sm:$0xff] %v19289_v6  ;;  %v6483_v20 = vcombine.low %v6450_v29, %v6466_v33  ;;  %v6484_v43 = vcombine.high %v6450_v29, %v6466_v33  ;;  %v8251_v23 = vcombine.low %v19282_v13, %v19289_v6  ;;  %14959 = vmatprep.subr.msk.mxu1 %vm8271_vm2, %v4881_v10  ;;  %v23100_v6 = vld [vmem:[#allocation75_spill] sm:$0xff] }
 0x423   : > { %v8243_v1 = vrot.slane %v8235_v15, %v16585_v12  ;;  %15015 = vmatprep.subr.msk.mxu0 %vm8271_vm2, %v4882_v24  ;;  %v19300_v25 = vrot.slane %v6467_v38, %v16585_v12  ;;  %v19303_v19 = vrot.slane %v6468_v30, %v16585_v12  ;;  %v6368_v2 = vcombine.high %v19215_v48, %v5976_v9  ;;  %v6006_v30 = vpop.permute.xlu1 %6005 }
 0x424   : > { %v19307_v29 = vrot.slane %v6483_v20, %v16585_v12  ;;  %v19310_v60 = vrot.slane %v6484_v43, %v16585_v12  ;;  %14960 = vmatpush3.xpose.msk.msra.mxu1 %vm8271_vm2, %v4881_v10  ;;  %15016 = vmatpush3.xpose.msk.msra.mxu0 %vm8271_vm2, %v4882_v24  ;;  %v8259_v14 = vrot.slane %v8251_v23, %v16585_v12  ;;  %v23025_v20 = vld [vmem:[#allocation53_spill] sm:$0xff]  ;;  %v23026_v43 = vld [vmem:[#allocation55_spill] sm:$0xff] }
 0x425   : > { %v6375_v48 = vrot.slane %v6367_v5, %v16563_v27  ;;  %v6382_v9 = vrot.slane %v6368_v2, %v16563_v27  ;;  %v23027_v23 = vcombine.low %v23025_v20, %v23026_v43  ;;  %v23028_v57 = vcombine.high %v23025_v20, %v23026_v43  ;;  %v5908_v15 = vpop.permute.xlu0 %5907 }
 0x426   : > { %v8267_v38 = vcombine.low %v8243_v1, %v8259_v14  ;;  %v8268_v24 = vcombine.high %v8243_v1, %v8259_v14  ;;  %v6383_v5 = vcombine.low %v19217_v28, %v19241_v61  ;;  %v6384_v2 = vcombine.high %v19217_v28, %v19241_v61 }
 0x427   : > { %14962 = vmatmul.mubr.msk.f32.vlgmr.msra.gmra.mxu1 %vm8271_vm2, %v23027_v23  ;;  %15018 = vmatmul.mubr.msk.f32.vlgmr.msra.gmra.mxu0 %vm8271_vm2, %v23028_v57  ;;  %v6299_v10 = vcombine.low %v5910_v8, %v5974_v41  ;;  %v6300_v1 = vcombine.high %v5910_v8, %v5974_v41  ;;  %v6315_v14 = vcombine.low %v5942_v53, %v6006_v30  ;;  %v23030_v23 = vld [vmem:[#allocation27_spill] sm:$0xff] }
 0x428   : > { %15041 = vmatprep.subr.mxu1 %v8267_v38  ;;  %15097 = vmatprep.subr.mxu0 %v8268_v24  ;;  %v6316_v33 = vcombine.high %v5942_v53, %v6006_v30  ;;  %v23031_v18 = vcombine.low %v23029_v11, %v23030_v23  ;;  %v23032_v57 = vcombine.high %v23029_v11, %v23030_v23  ;;  %v23034_v30 = vld [vmem:[#allocation77_spill] sm:$0xff]  ;;  %v23037_v23 = vld [vmem:[#allocation74_spill] sm:$0xff] }
 0x429   : > { %v6391_v20 = vrot.slane %v6383_v5, %v16563_v27  ;;  %v6398_v28 = vrot.slane %v6384_v2, %v16563_v27  ;;  %v6307_v61 = vrot.slane %v6299_v10, %v16563_v27  ;;  %15042 = vmatpush3.msra.mxu1 %v8267_v38  ;;  %15098 = vmatpush3.msra.mxu0 %v8268_v24  ;;  %v5940_v24 = vpop.permute.xlu1 %5939  ;;  %v5972_v2 = vpop.permute.xlu0 %5971 }
 0x42a   : > { %14964 = vmatprep.mubr.msk.f32.mxu1 %vm8271_vm2, %v23031_v18  ;;  %15020 = vmatprep.mubr.msk.f32.mxu0 %vm8271_vm2, %v23032_v57  ;;  %v6314_v8 = vrot.slane %v6300_v1, %v16563_v27  ;;  %v6323_v53 = vrot.slane %v6315_v14, %v16563_v27  ;;  %v6330_v41 = vrot.slane %v6316_v33, %v16563_v27  ;;  %v23033_v18 = vld [vmem:[#allocation69_spill] sm:$0xff]  ;;  %v23038_v14 = vld [vmem:[#allocation100_spill] sm:$0xff] }
 0x42b   : > { %v23035_v43 = vcombine.low %v23033_v18, %v23034_v30  ;;  %v23036_v11 = vcombine.high %v23033_v18, %v23034_v30  ;;  %v6399_v5 = vcombine.low %v6375_v48, %v6391_v20  ;;  %v6400_v10 = vcombine.high %v6375_v48, %v6391_v20 }
 0x42c   : > { %v6415_v38 = vcombine.low %v6382_v9, %v6398_v28  ;;  %v6416_v1 = vcombine.high %v6382_v9, %v6398_v28  ;;  %v23039_v57 = vcombine.low %v23037_v23, %v23038_v14  ;;  %v23040_v33 = vcombine.high %v23037_v23, %v23038_v14 }
 0x42d   : > { %14965 = vmatmul.mubr.msk.f32.gmra.mxu1 %vm8271_vm2, %v23035_v43  ;;  %15021 = vmatmul.mubr.msk.f32.gmra.mxu0 %vm8271_vm2, %v23036_v11  ;;  %v6331_v43 = vcombine.low %v6307_v61, %v6323_v53  ;;  %v6332_v18 = vcombine.high %v6307_v61, %v6323_v53  ;;  %v19368_v30 = vrot.slane %v6399_v5, %v16585_v12  ;;  %v23046_v5 = vld [vmem:[#allocation33_spill] sm:$0xff] }
 0x42e   : > { %14967 = vmatprep.mubr.msk.f32.mxu1 %vm8271_vm2, %v23039_v57  ;;  %15023 = vmatprep.mubr.msk.f32.mxu0 %vm8271_vm2, %v23040_v33  ;;  %v19371_v48 = vrot.slane %v6400_v10, %v16585_v12  ;;  %v19374_v9 = vrot.slane %v6415_v38, %v16585_v12  ;;  %v6347_v20 = vcombine.low %v6314_v8, %v6330_v41  ;;  %v23041_v10 = vld [vmem:[#allocation120_spill] sm:$0xff]  ;;  %v23042_v38 = vld [vmem:[#allocation89_spill] sm:$0xff] }
 0x42f   : > { %v19377_v28 = vrot.slane %v6416_v1, %v16585_v12  ;;  %v19380_v11 = vrot.slane %v6331_v43, %v16585_v12  ;;  %v19383_v23 = vrot.slane %v6332_v18, %v16585_v12  ;;  %v6348_v61 = vcombine.high %v6314_v8, %v6330_v41  ;;  %v6004_v8 = vpop.permute.xlu1 %6003  ;;  %v5906_v41 = vpop.permute.xlu0 %5905  ;;  %v23045_v18 = vld [vmem:[#allocation88_spill] sm:$0xff] }
 0x430   : > { %v23043_v14 = vcombine.low %v23041_v10, %v23042_v38  ;;  %v23044_v1 = vcombine.high %v23041_v10, %v23042_v38  ;;  %v19398_v57 = vrot.slane %v6347_v20, %v16585_v12  ;;  %v23047_v53 = vcombine.low %v23045_v18, %v23046_v5 }
 0x431   : > { %v23048_v10 = vcombine.high %v23045_v18, %v23046_v5  ;;  %v19413_v20 = vrot.slane %v6348_v61, %v16585_v12  ;;  %v6232_v43 = vcombine.high %v5908_v15, %v5972_v2  ;;  %v6247_v5 = vcombine.low %v5940_v24, %v6004_v8 }
 0x432   : > { %14968 = vmatmul.mubr.msk.f32.gmra.mxu1 %vm8271_vm2, %v23043_v14  ;;  %15024 = vmatmul.mubr.msk.f32.gmra.mxu0 %vm8271_vm2, %v23044_v1  ;;  %v6231_v1 = vcombine.low %v5908_v15, %v5972_v2  ;;  %v6248_v18 = vcombine.high %v5940_v24, %v6004_v8  ;;  %v23053_v24 = vcombine.low %v18743_v58, %v18746_v45 }
 0x433   : > { %14970 = vmatprep.mubr.msk.f32.mxu1 %vm8271_vm2, %v23047_v53  ;;  %15026 = vmatprep.mubr.msk.f32.mxu0 %vm8271_vm2, %v23048_v10  ;;  %v23049_v10 = vld [vmem:[#allocation103_spill] sm:$0xff]  ;;  %v6246_v2 = vrot.slane %v6232_v43, %v16563_v27  ;;  %v5938_v33 = vpop.permute.xlu1 %5937  ;;  %v5970_v14 = vpop.permute.xlu0 %5969  ;;  %v23055_v53 = vld [vmem:[#allocation105_spill] sm:$0xff]  ;;  %v6255_v43 = vrot.slane %v6247_v5, %v16563_v27  ;;  %v23082_v26 = vcombine.low %v23080_v34, %v23081_v39 }
 0x434   : > { %v23051_v61 = vcombine.low %v23049_v10, %v23050_v50  ;;  %v23052_v38 = vcombine.high %v23049_v10, %v23050_v50  ;;  %v6239_v15 = vrot.slane %v6231_v1, %v16563_v27  ;;  %v19437_v8 = vrot.slane %v23053_v24, %v16563_v27 }
 0x435   : > { %v23058_v50 = vcombine.high %v23055_v53, %v23056_v36  ;;  %v6163_v1 = vcombine.low %v5906_v41, %v5970_v14  ;;  %v6164_v10 = vcombine.high %v5906_v41, %v5970_v14  ;;  %v23059_v24 = vcombine.high %v18743_v58, %v18746_v45  ;;  %v23067_v58 = vld [vmem:[#allocation106_spill] sm:$0xff] }
 0x436   : > { %14971 = vmatmul.mubr.msk.f32.gmra.mxu1 %vm8271_vm2, %v23051_v61  ;;  %15027 = vmatmul.mubr.msk.f32.gmra.mxu0 %vm8271_vm2, %v23052_v38  ;;  %23054 = vst [vmem:[#allocation49_spill] sm:$0xff] %v19437_v8  ;;  %v23057_v61 = vcombine.low %v23055_v53, %v23056_v36  ;;  %v6262_v38 = vrot.slane %v6248_v18, %v16563_v27 }
 0x437   : > { %15029 = vmatprep.mubr.msk.f32.mxu0 %vm8271_vm2, %v23058_v50  ;;  %v19453_v21 = vrot.slane %v23059_v24, %v16563_v27  ;;  %v6263_v5 = vcombine.low %v6239_v15, %v6255_v43  ;;  %v6264_v41 = vcombine.high %v6239_v15, %v6255_v43  ;;  %v23066_v50 = vld [vmem:[#allocation30_spill] sm:$0xff]  ;;  %v23071_v43 = vld [vmem:[#allocation11_spill] sm:$0xff] }
 0x438   : > { %14973 = vmatprep.mubr.msk.f32.mxu1 %vm8271_vm2, %v23057_v61  ;;  %v23061_v61 = vld [vmem:[#allocation81_spill] sm:$0xff]  ;;  %v6279_v14 = vcombine.low %v6246_v2, %v6262_v38  ;;  %v6280_v18 = vcombine.high %v6246_v2, %v6262_v38  ;;  %v23068_v45 = vcombine.low %v23066_v50, %v23067_v58  ;;  %v23069_v24 = vcombine.high %v23066_v50, %v23067_v58  ;;  %v23070_v2 = vld [vmem:[#allocation32_spill] sm:$0xff] }
 0x439   : > { %23060 = vst [vmem:[#allocation48_spill] sm:$0xff] %v19453_v21  ;;  %v23062_v49 = vcombine.low %v18749_v46, %v23061_v61  ;;  %v23064_v36 = vcombine.high %v18749_v46, %v23061_v61  ;;  %v6178_v46 = vrot.slane %v6164_v10, %v16563_v27  ;;  %v6002_v61 = vpop.permute.xlu1 %6001  ;;  %v8099_v15 = vcombine.low %v19437_v8, %v19453_v21 }
 0x43a   : > { %14974 = vmatmul.mubr.msk.f32.gmra.mxu1 %vm8271_vm2, %v23068_v45  ;;  %15030 = vmatmul.mubr.msk.f32.gmra.mxu0 %vm8271_vm2, %v23069_v24  ;;  %v23072_v38 = vcombine.low %v23070_v2, %v23071_v43  ;;  %v23073_v45 = vcombine.high %v23070_v2, %v23071_v43  ;;  %v19488_v50 = vrot.slane %v6263_v5, %v16585_v12 }
 0x43b   : > { %v19459_v51 = vrot.slane %v23062_v49, %v16563_v27  ;;  %v19465_v53 = vrot.slane %v23064_v36, %v16563_v27  ;;  %v6171_v49 = vrot.slane %v6163_v1, %v16563_v27  ;;  %v5904_v36 = vpop.permute.xlu0 %5903  ;;  %v19491_v1 = vrot.slane %v6264_v41, %v16585_v12 }
 0x43c   : > { %14976 = vmatprep.mubr.msk.f32.mxu1 %vm8271_vm2, %v23072_v38  ;;  %15032 = vmatprep.mubr.msk.f32.mxu0 %vm8271_vm2, %v23073_v45  ;;  %v19494_v10 = vrot.slane %v6279_v14, %v16585_v12  ;;  %v19497_v58 = vrot.slane %v6280_v18, %v16585_v12  ;;  %v6179_v24 = vcombine.low %v5938_v33, %v6002_v61  ;;  %v23076_v18 = vld [vmem:[#allocation34_spill] sm:$0xff]  ;;  %v23077_v45 = vld [vmem:[#allocation121_spill] sm:$0xff] }
 0x43d   : > { %23063 = vst [vmem:[#allocation51_spill] sm:$0xff] %v19459_v51  ;;  %23065 = vst [vmem:[#allocation50_spill] sm:$0xff] %v19465_v53  ;;  %v6180_v35 = vcombine.high %v5938_v33, %v6002_v61  ;;  %v8107_v38 = vrot.slane %v8099_v15, %v16585_v12  ;;  %v8115_v41 = vcombine.low %v19459_v51, %v19465_v53 }
 0x43e   : > { %v23074_v14 = vcombine.low %v18815_v16, %v18818_v62  ;;  %v23078_v33 = vcombine.low %v23076_v18, %v23077_v45  ;;  %v23079_v61 = vcombine.high %v23076_v18, %v23077_v45  ;;  %v6187_v2 = vrot.slane %v6179_v24, %v16563_v27 }
 0x43f   : > { %v5968_v55 = vpop.permute.xlu0 %5967  ;;  %v23083_v18 = vcombine.high %v23080_v34, %v23081_v39  ;;  %v6194_v45 = vrot.slane %v6180_v35, %v16563_v27  ;;  %v8123_v24 = vrot.slane %v8115_v41, %v16585_v12  ;;  %v23084_v51 = vcombine.high %v18815_v16, %v18818_v62  ;;  %v23087_v35 = vld [vmem:[#allocation124_spill] sm:$0xff] }
 0x440   : > { %v19510_v43 = vrot.slane %v23074_v14, %v16563_v27  ;;  %14977 = vmatmul.mubr.msk.f32.gmra.mxu1 %vm8271_vm2, %v23078_v33  ;;  %15033 = vmatmul.mubr.msk.f32.gmra.mxu0 %vm8271_vm2, %v23079_v61  ;;  %v5936_v14 = vpop.permute.xlu1 %5935  ;;  %v6095_v33 = vcombine.low %v5904_v36, %v5968_v55  ;;  %v6096_v61 = vcombine.high %v5904_v36, %v5968_v55  ;;  %v23090_v36 = vld [vmem:[#allocation127_spill] sm:$0xff] }
 0x441   : > { %14979 = vmatprep.mubr.msk.f32.mxu1 %vm8271_vm2, %v23082_v26  ;;  %15035 = vmatprep.mubr.msk.f32.mxu0 %vm8271_vm2, %v23083_v18  ;;  %v6195_v15 = vcombine.low %v6171_v49, %v6187_v2  ;;  %v6196_v5 = vcombine.high %v6171_v49, %v6187_v2  ;;  %v19539_v53 = vrot.slane %v23084_v51, %v16563_v27  ;;  %v23086_v18 = vld [vmem:[#allocation123_spill] sm:$0xff]  ;;  %v23091_v2 = vld [vmem:[#allocation128_spill] sm:$0xff] }
 0x442   : > { %23075 = vst [vmem:[#allocation12_spill] sm:$0xff] %v19510_v43  ;;  %v6211_v26 = vcombine.low %v6178_v46, %v6194_v45  ;;  %v6212_v8 = vcombine.high %v6178_v46, %v6194_v45  ;;  %v6103_v39 = vrot.slane %v6095_v33, %v16563_v27  ;;  %v6110_v34 = vrot.slane %v6096_v61, %v16563_v27 }
 0x443   : > { %23085 = vst [vmem:[#allocation41_spill] sm:$0xff] %v19539_v53  ;;  %v23088_v21 = vcombine.low %v23086_v18, %v23087_v35  ;;  %v23089_v55 = vcombine.high %v23086_v18, %v23087_v35  ;;  %v19552_v16 = vrot.slane %v6195_v15, %v16585_v12  ;;  %v19555_v62 = vrot.slane %v6196_v5, %v16585_v12  ;;  %v5996_v49 = vpop.permute.xlu0 %5995  ;;  %v23094_v35 = vld [vmem:[#allocation70_spill] sm:$0xff] }
 0x444   : > { %v6000_v51 = vpop.permute.xlu1 %5999  ;;  %v19557_v46 = vcombine.low %v8107_v38, %v8123_v24  ;;  %v23092_v41 = vcombine.low %v23090_v36, %v23091_v2  ;;  %v19568_v15 = vrot.slane %v6211_v26, %v16585_v12  ;;  %v19571_v5 = vrot.slane %v6212_v8, %v16585_v12 }
 0x445   : > { %14980 = vmatmul.mubr.msk.f32.gmra.mxu1 %vm8271_vm2, %v23088_v21  ;;  %15036 = vmatmul.mubr.msk.f32.gmra.mxu0 %vm8271_vm2, %v23089_v55  ;;  %v23093_v21 = vcombine.high %v23090_v36, %v23091_v2  ;;  %v6111_v45 = vcombine.low %v5936_v14, %v6000_v51  ;;  %v6112_v18 = vcombine.high %v5936_v14, %v6000_v51 }
 0x446   : > { %14982 = vmatprep.mubr.msk.f32.mxu1 %vm8271_vm2, %v23092_v41  ;;  %v7047_v55 = vcombine.low %v23094_v35, %v5996_v49  ;;  %v7048_v8 = vcombine.high %v23094_v35, %v5996_v49  ;;  %v23095_v41 = vld [vmem:[#allocation25_spill] sm:$0xff]  ;;  %v19594_v26 = vcombine.high %v8107_v38, %v8123_v24  ;;  %v23099_v35 = vld [vmem:[#allocation99_spill] sm:$0xff]  ;;  %v8031_v38 = vcombine.low %v19510_v43, %v19539_v53  ;;  %v23114_v53 = vld [vmem:[#allocation98_spill] sm:$0xff] }
 0x447   : > { %15038 = vmatprep.mubr.msk.f32.mxu0 %vm8271_vm2, %v23093_v21  ;;  %v6119_v2 = vrot.slane %v6111_v45, %v16563_v27  ;;  %v23096_v21 = vld [vmem:[#allocation126_spill] sm:$0xff]  ;;  %v6126_v51 = vrot.slane %v6112_v18, %v16563_v27  ;;  %v23103_v18 = vcombine.high %v23099_v35, %v23100_v6 }
 0x448   : > { %v23097_v13 = vcombine.low %v23095_v41, %v23096_v21  ;;  %v23098_v14 = vcombine.high %v23095_v41, %v23096_v21  ;;  %v7055_v36 = vrot.slane %v7047_v55, %v16563_v27  ;;  %v5964_v61 = vpop.permute.xlu1 %5963  ;;  %v7062_v49 = vrot.slane %v7048_v8, %v16563_v27  ;;  %v23106_v8 = vld [vmem:[#allocation57_spill] sm:$0xff] }
 0x449   : > { %v6127_v45 = vcombine.low %v6103_v39, %v6119_v2  ;;  %v6128_v33 = vcombine.high %v6103_v39, %v6119_v2  ;;  %v6143_v41 = vcombine.low %v6110_v34, %v6126_v51  ;;  %v6144_v21 = vcombine.high %v6110_v34, %v6126_v51  ;;  %v23105_v2 = vld [vmem:[#allocation15_spill] sm:$0xff] }
 0x44a   : > { %14983 = vmatmul.mubr.msk.f32.gmra.mxu1 %vm8271_vm2, %v23097_v13  ;;  %15039 = vmatmul.mubr.msk.f32.gmra.mxu0 %vm8271_vm2, %v23098_v14  ;;  %v23101_v13 = vcombine.low %v23099_v35, %v23100_v6  ;;  %v19607_v55 = vrot.slane %v23103_v18, %v16563_v27  ;;  %v23107_v14 = vcombine.low %v23105_v2, %v23106_v8 }
 0x44b   : > { %v19612_v24 = vrot.slane %v6127_v45, %v16585_v12  ;;  %v19615_v39 = vrot.slane %v6128_v33, %v16585_v12  ;;  %v23109_v6 = vcombine.high %v23105_v2, %v23106_v8  ;;  %v19630_v35 = vrot.slane %v6143_v41, %v16585_v12 }
 0x44c   : > { %v19601_v22 = vrot.slane %v23101_v13, %v16563_v27  ;;  %23104 = vst [vmem:[#allocation43_spill] sm:$0xff] %v19607_v55  ;;  %v19621_v34 = vrot.slane %v23107_v14, %v16563_v27  ;;  %v19633_v45 = vrot.slane %v6144_v21, %v16585_v12  ;;  %v6028_v33 = vpop.permute.xlu1 %6027  ;;  %v8039_v13 = vrot.slane %v8031_v38, %v16585_v12  ;;  %v23113_v38 = vld [vmem:[#allocation56_spill] sm:$0xff] }
 0x44d   : > { %v19627_v51 = vrot.slane %v23109_v6, %v16563_v27  ;;  %23111 = vst [vmem:[#allocation45_spill] sm:$0xff] %v19630_v35  ;;  %v7063_v8 = vcombine.low %v5964_v61, %v6028_v33  ;;  %v7064_v6 = vcombine.high %v5964_v61, %v6028_v33  ;;  %v23117_v61 = vcombine.high %v23113_v38, %v23114_v53 }
 0x44e   : > { %23102 = vst [vmem:[#allocation40_spill] sm:$0xff] %v19601_v22  ;;  %23108 = vst [vmem:[#allocation13_spill] sm:$0xff] %v19621_v34  ;;  %v8047_v18 = vcombine.low %v19601_v22, %v19607_v55  ;;  %v23115_v22 = vcombine.low %v23113_v38, %v23114_v53 }
 0x44f   : > { %23110 = vst [vmem:[#allocation42_spill] sm:$0xff] %v19627_v51  ;;  %23112 = vst [vmem:[#allocation44_spill] sm:$0xff] %v19633_v45  ;;  %v7071_v14 = vrot.slane %v7063_v8, %v16563_v27  ;;  %v7078_v2 = vrot.slane %v7064_v6, %v16563_v27  ;;  %v19659_v33 = vrot.slane %v23117_v61, %v16563_v27  ;;  %v23122_v45 = vld [vmem:[#allocation16_spill] sm:$0xff] }
 0x450   : > { %v8055_v43 = vrot.slane %v8047_v18, %v16585_v12  ;;  %v19651_v55 = vrot.slane %v23115_v22, %v16563_v27  ;;  %v7963_v21 = vcombine.low %v19621_v34, %v19627_v51  ;;  %v23118_v22 = vcombine.low %v18975_v0, %v18978_v31 }
 0x451   : > { %v23120_v6 = vcombine.high %v18975_v0, %v18978_v31  ;;  %v7079_v38 = vcombine.low %v7055_v36, %v7071_v14  ;;  %v7080_v61 = vcombine.high %v7055_v36, %v7071_v14  ;;  %v7095_v52 = vcombine.low %v7062_v49, %v7078_v2 }
 0x452   : > { %23116 = vst [vmem:[#allocation10_spill] sm:$0xff] %v19651_v55  ;;  %v19663_v18 = vcombine.low %v8039_v13, %v8055_v43  ;;  %v19665_v41 = vcombine.high %v8039_v13, %v8055_v43  ;;  %v19671_v8 = vrot.slane %v23118_v22, %v16563_v27  ;;  %v7096_v34 = vcombine.high %v7062_v49, %v7078_v2  ;;  %v23121_v13 = vld [vmem:[#allocation59_spill] sm:$0xff] }
 0x453   : > { %v19677_v53 = vrot.slane %v23120_v6, %v16563_v27  ;;  %v7971_v51 = vrot.slane %v7963_v21, %v16585_v12  ;;  %v7979_v43 = vcombine.low %v19651_v55, %v19659_v33  ;;  %v23123_v22 = vcombine.low %v23121_v13, %v23122_v45 }
 0x454   : > { %23119 = vst [vmem:[#allocation31_spill] sm:$0xff] %v19671_v8  ;;  %v23125_v0 = vcombine.high %v23121_v13, %v23122_v45  ;;  %v7087_v36 = vrot.slane %v7079_v38, %v16585_v12  ;;  %v7094_v49 = vrot.slane %v7080_v61, %v16585_v12  ;;  %v7103_v14 = vrot.slane %v7095_v52, %v16585_v12 }
 0x455   : > { %v19686_v35 = vrot.slane %v23123_v22, %v16563_v27  ;;  %v7110_v2 = vrot.slane %v7096_v34, %v16585_v12  ;;  %v7987_v21 = vrot.slane %v7979_v43, %v16585_v12  ;;  %v7895_v6 = vcombine.low %v19671_v8, %v19677_v53 }
 0x456   : > { %v19692_v31 = vrot.slane %v23125_v0, %v16563_v27  ;;  %v23127_v45 = vcombine.low %v19056_v42, %v19059_v7  ;;  %v8135_v38 = vcombine.low %v7087_v36, %v7094_v49  ;;  %v14211_v61 = vcombine.high %v7087_v36, %v7094_v49 }
 0x457   : > { %23124 = vst [vmem:[#allocation110_spill] sm:$0xff] %v19686_v35  ;;  %v8151_v0 = vcombine.low %v7103_v14, %v7110_v2  ;;  %v14212_v52 = vcombine.high %v7103_v14, %v7110_v2  ;;  %v19709_v55 = vcombine.low %v7971_v51, %v7987_v21  ;;  %v19711_v34 = vcombine.high %v7971_v51, %v7987_v21  ;;  %v23131_v21 = vld [vmem:[#allocation58_spill] sm:$0xff] }
 0x458   : > { %23126 = vst [vmem:[#allocation101_spill] sm:$0xff] %v19692_v31  ;;  %v7911_v22 = vcombine.low %v19686_v35, %v19692_v31  ;;  %v19707_v13 = vrot.slane %v23127_v45, %v16563_v27  ;;  %v7903_v43 = vrot.slane %v7895_v6, %v16585_v12  ;;  %v19716_v35 = vrot.slane %v8135_v38, %v16563_v27  ;;  %v23132_v6 = vld [vmem:[#allocation63_spill] sm:$0xff] }
 0x459   : > { %v19719_v31 = vrot.slane %v14211_v61, %v16563_v27  ;;  %v19722_v45 = vrot.slane %v8151_v0, %v16563_v27  ;;  %v19725_v36 = vrot.slane %v14212_v52, %v16563_v27  ;;  %v23129_v14 = vcombine.high %v19056_v42, %v19059_v7 }
 0x45a   : > { %23128 = vst [vmem:[#allocation109_spill] sm:$0xff] %v19707_v13  ;;  %v7919_v8 = vrot.slane %v7911_v22, %v16585_v12  ;;  %v23133_v22 = vcombine.low %v23131_v21, %v23132_v6  ;;  %v23137_v42 = vcombine.low %v19120_v4, %v19123_v56 }
 0x45b   : > { %v19735_v2 = vrot.slane %v23129_v14, %v16563_v27  ;;  %v8167_v61 = vcombine.low %v19716_v35, %v19719_v31  ;;  %v8183_v0 = vcombine.low %v19722_v45, %v19725_v36  ;;  %v23139_v14 = vcombine.high %v19120_v4, %v19123_v56 }
 0x45c   : > { %v19727_v49 = vcombine.low %v7903_v43, %v7919_v8  ;;  %v19729_v51 = vcombine.high %v7903_v43, %v7919_v8  ;;  %v19741_v38 = vrot.slane %v23133_v22, %v16563_v27  ;;  %v23135_v8 = vcombine.high %v23131_v21, %v23132_v6 }
 0x45d   : > { %23130 = vst [vmem:[#allocation71_spill] sm:$0xff] %v19735_v2  ;;  %v19757_v7 = vrot.slane %v23137_v42, %v16563_v27  ;;  %v7827_v43 = vcombine.low %v19707_v13, %v19735_v2  ;;  %v19765_v22 = vrot.slane %v23139_v14, %v16563_v27  ;;  %v23140_v21 = vcombine.low %v19127_v32, %v19130_v44 }
 0x45e   : > { %23134 = vst [vmem:[#allocation86_spill] sm:$0xff] %v19741_v38  ;;  %v19751_v52 = vrot.slane %v23135_v8, %v16563_v27  ;;  %v23142_v8 = vcombine.high %v19127_v32, %v19130_v44  ;;  %v8175_v13 = vrot.slane %v8167_v61, %v16585_v12  ;;  %v8191_v2 = vrot.slane %v8183_v0, %v16585_v12 }
 0x45f   : > { %23138 = vst [vmem:[#allocation52_spill] sm:$0xff] %v19757_v7  ;;  %v19771_v6 = vrot.slane %v23140_v21, %v16563_v27  ;;  %v23143_v56 = vcombine.low %v19172_v63, %v19175_v54  ;;  %v7835_v21 = vrot.slane %v7827_v43, %v16585_v12  ;;  %v7759_v32 = vcombine.low %v19757_v7, %v19765_v22 }
 0x460   : > { %23136 = vst [vmem:[#allocation95_spill] sm:$0xff] %v19751_v52  ;;  %v19777_v42 = vrot.slane %v23142_v8, %v16563_v27  ;;  %v7843_v4 = vcombine.low %v19741_v38, %v19751_v52  ;;  %v23144_v61 = vcombine.high %v19172_v63, %v19175_v54  ;;  %v8199_v8 = vcombine.low %v8175_v13, %v8191_v2 }
 0x461   : > { %23141 = vst [vmem:[#allocation54_spill] sm:$0xff] %v19771_v6  ;;  %v19787_v14 = vrot.slane %v23143_v56, %v16563_v27  ;;  %v8200_v38 = vcombine.high %v8175_v13, %v8191_v2  ;;  %v23145_v43 = vcombine.low %v19179_v40, %v19182_v47  ;;  %v7767_v7 = vrot.slane %v7759_v32, %v16585_v12 }
 0x462   : > { %v7775_v44 = vcombine.low %v19771_v6, %v19777_v42  ;;  %v19798_v0 = vrot.slane %v23144_v61, %v16563_v27  ;;  %v7851_v52 = vrot.slane %v7843_v4, %v16585_v12  ;;  %v23146_v63 = vcombine.high %v19179_v40, %v19182_v47  ;;  %15043 = vmatprep.subr.mxu1 %v8199_v8 }
 0x463   : > { %v19805_v56 = vrot.slane %v23145_v43, %v16563_v27  ;;  %15099 = vmatprep.subr.mxu0 %v8200_v38  ;;  %v23147_v61 = vcombine.low %v19226_v59, %v19229_v3  ;;  %15044 = vmatpush3.msra.mxu1 %v8199_v8 }
 0x464   : > { %v7783_v6 = vrot.slane %v7775_v44, %v16585_v12  ;;  %v19813_v54 = vrot.slane %v23146_v63, %v16563_v27  ;;  %v7691_v13 = vcombine.low %v19787_v14, %v19798_v0  ;;  %v7859_v2 = vcombine.low %v7835_v21, %v7851_v52  ;;  %15100 = vmatpush3.msra.mxu0 %v8200_v38 }
 0x465   : > { %v7860_v4 = vcombine.high %v7835_v21, %v7851_v52  ;;  %v19821_v32 = vrot.slane %v23147_v61, %v16563_v27  ;;  %15045 = vmatprep.subr.mxu1 %v19557_v46  ;;  %15101 = vmatprep.subr.mxu0 %v19594_v26  ;;  %v23148_v52 = vcombine.high %v19226_v59, %v19229_v3 }
 0x466   : > { %v7791_v44 = vcombine.low %v7767_v7, %v7783_v6  ;;  %v7792_v43 = vcombine.high %v7767_v7, %v7783_v6  ;;  %v7699_v40 = vrot.slane %v7691_v13, %v16585_v12  ;;  %v7707_v47 = vcombine.low %v19805_v56, %v19813_v54  ;;  %15046 = vmatpush3.msra.mxu1 %v19557_v46 }
 0x467   : > { %v19832_v21 = vrot.slane %v23148_v52, %v16563_v27  ;;  %v23149_v38 = vcombine.low %v19233_v17, %v19236_v37  ;;  %15102 = vmatpush3.msra.mxu0 %v19594_v26  ;;  %v23150_v6 = vcombine.high %v19233_v17, %v19236_v37  ;;  %v23151_v59 = vcombine.low %v19300_v25, %v19303_v19 }
 0x468   : > { %v23152_v63 = vcombine.high %v19300_v25, %v19303_v19  ;;  %15047 = vmatprep.subr.mxu1 %v19663_v18  ;;  %15103 = vmatprep.subr.mxu0 %v19665_v41  ;;  %v7715_v17 = vrot.slane %v7707_v47, %v16585_v12  ;;  %v23153_v46 = vcombine.low %v19307_v29, %v19310_v60 }
 0x469   : > { %v19838_v7 = vrot.slane %v23149_v38, %v16563_v27  ;;  %v19846_v8 = vrot.slane %v23150_v6, %v16563_v27  ;;  %v19852_v3 = vrot.slane %v23151_v59, %v16563_v27  ;;  %v7623_v37 = vcombine.low %v19821_v32, %v19832_v21  ;;  %15048 = vmatpush3.msra.mxu1 %v19663_v18 }
 0x46a   : > { %v19858_v13 = vrot.slane %v23152_v63, %v16563_v27  ;;  %v19869_v26 = vrot.slane %v23153_v46, %v16563_v27  ;;  %15104 = vmatpush3.msra.mxu0 %v19665_v41  ;;  %v23154_v19 = vcombine.high %v19307_v29, %v19310_v60  ;;  %15049 = vmatprep.subr.mxu1 %v19709_v55 }
 0x46b   : > { %v7639_v25 = vcombine.low %v19838_v7, %v19846_v8  ;;  %15105 = vmatprep.subr.mxu0 %v19711_v34  ;;  %v7723_v52 = vcombine.low %v7699_v40, %v7715_v17  ;;  %v7724_v18 = vcombine.high %v7699_v40, %v7715_v17  ;;  %v7631_v41 = vrot.slane %v7623_v37, %v16585_v12 }
 0x46c   : > { %v19879_v61 = vrot.slane %v23154_v19, %v16563_v27  ;;  %v7555_v47 = vcombine.low %v19852_v3, %v19858_v13  ;;  %15050 = vmatpush3.msra.mxu1 %v19709_v55  ;;  %15106 = vmatpush3.msra.mxu0 %v19711_v34  ;;  %v23155_v40 = vcombine.low %v19368_v30, %v19371_v48 }
 0x46d   : > { %v7647_v38 = vrot.slane %v7639_v25, %v16585_v12  ;;  %15051 = vmatprep.subr.mxu1 %v19727_v49  ;;  %15107 = vmatprep.subr.mxu0 %v19729_v51  ;;  %v23156_v55 = vcombine.high %v19368_v30, %v19371_v48  ;;  %v23157_v59 = vcombine.low %v19374_v9, %v19377_v28 }
 0x46e   : > { %v7563_v29 = vrot.slane %v7555_v47, %v16585_v12  ;;  %v7571_v60 = vcombine.low %v19869_v26, %v19879_v61  ;;  %v19898_v6 = vrot.slane %v23155_v40, %v16563_v27  ;;  %15052 = vmatpush3.msra.mxu1 %v19727_v49  ;;  %15108 = vmatpush3.msra.mxu0 %v19729_v51 }
 0x46f   : > { %v19904_v34 = vrot.slane %v23156_v55, %v16563_v27  ;;  %v19910_v63 = vrot.slane %v23157_v59, %v16563_v27  ;;  %v7655_v17 = vcombine.low %v7631_v41, %v7647_v38  ;;  %v7656_v37 = vcombine.high %v7631_v41, %v7647_v38  ;;  %15053 = vmatprep.subr.mxu1 %v7859_v2 }
 0x470   : > { %v7579_v46 = vrot.slane %v7571_v60, %v16585_v12  ;;  %15109 = vmatprep.subr.mxu0 %v7860_v4  ;;  %v23158_v30 = vcombine.high %v19374_v9, %v19377_v28  ;;  %v23159_v49 = vcombine.low %v19380_v11, %v19383_v23  ;;  %15054 = vmatpush3.msra.mxu1 %v7859_v2 }
 0x471   : > { %v7487_v25 = vcombine.low %v19898_v6, %v19904_v34  ;;  %15110 = vmatpush3.msra.mxu0 %v7860_v4  ;;  %v23160_v41 = vcombine.high %v19380_v11, %v19383_v23  ;;  %15055 = vmatprep.subr.mxu1 %v7791_v44  ;;  %v23161_v2 = vcombine.low %v19398_v57, %v19413_v20 }
 0x472   : > { %v19919_v48 = vrot.slane %v23158_v30, %v16563_v27  ;;  %v19927_v51 = vrot.slane %v23159_v49, %v16563_v27  ;;  %v7587_v19 = vcombine.low %v7563_v29, %v7579_v46  ;;  %v7588_v47 = vcombine.high %v7563_v29, %v7579_v46  ;;  %15111 = vmatprep.subr.mxu0 %v7792_v43 }
 0x473   : > { %v19933_v9 = vrot.slane %v23160_v41, %v16563_v27  ;;  %v7495_v28 = vrot.slane %v7487_v25, %v16585_v12  ;;  %v19942_v4 = vrot.slane %v23161_v2, %v16563_v27  ;;  %15056 = vmatpush3.msra.mxu1 %v7791_v44  ;;  %15112 = vmatpush3.msra.mxu0 %v7792_v43 }
 0x474   : > { %v7503_v38 = vcombine.low %v19910_v63, %v19919_v48  ;;  %v23162_v11 = vcombine.high %v19398_v57, %v19413_v20  ;;  %v23163_v60 = vcombine.low %v19488_v50, %v19491_v1  ;;  %15057 = vmatprep.subr.mxu1 %v7723_v52  ;;  %15113 = vmatprep.subr.mxu0 %v7724_v18 }
 0x475   : > { %v7419_v29 = vcombine.low %v19927_v51, %v19933_v9  ;;  %v23164_v43 = vcombine.high %v19488_v50, %v19491_v1  ;;  %v23165_v20 = vcombine.low %v19494_v10, %v19497_v58  ;;  %15058 = vmatpush3.msra.mxu1 %v7723_v52  ;;  %15114 = vmatpush3.msra.mxu0 %v7724_v18 }
 0x476   : > { %v19948_v23 = vrot.slane %v23162_v11, %v16563_v27  ;;  %v19956_v40 = vrot.slane %v23163_v60, %v16563_v27  ;;  %v7511_v44 = vrot.slane %v7503_v38, %v16585_v12  ;;  %v23166_v30 = vcombine.high %v19494_v10, %v19497_v58  ;;  %15059 = vmatprep.subr.mxu1 %v7655_v17 }
 0x477   : > { %v19963_v57 = vrot.slane %v23164_v43, %v16563_v27  ;;  %v19969_v55 = vrot.slane %v23165_v20, %v16563_v27  ;;  %v7427_v59 = vrot.slane %v7419_v29, %v16585_v12  ;;  %15115 = vmatprep.subr.mxu0 %v7656_v37  ;;  %15060 = vmatpush3.msra.mxu1 %v7655_v17 }
 0x478   : > { %v7435_v46 = vcombine.low %v19942_v4, %v19948_v23  ;;  %v19978_v50 = vrot.slane %v23166_v30, %v16563_v27  ;;  %v7519_v1 = vcombine.low %v7495_v28, %v7511_v44  ;;  %v7520_v25 = vcombine.high %v7495_v28, %v7511_v44  ;;  %15116 = vmatpush3.msra.mxu0 %v7656_v37  ;;  %v23174_v30 = vld [vmem:[#allocation44_spill] sm:$0xff] }
 0x479   : > { %v7351_v49 = vcombine.low %v19956_v40, %v19963_v57  ;;  %v23167_v10 = vcombine.low %v19552_v16, %v19555_v62  ;;  %15061 = vmatprep.subr.mxu1 %v7587_v19  ;;  %15117 = vmatprep.subr.mxu0 %v7588_v47  ;;  %v23168_v17 = vcombine.high %v19552_v16, %v19555_v62 }
 0x47a   : > { %v7443_v52 = vrot.slane %v7435_v46, %v16585_v12  ;;  %v7367_v18 = vcombine.low %v19969_v55, %v19978_v50  ;;  %v23169_v28 = vcombine.low %v19568_v15, %v19571_v5  ;;  %15062 = vmatpush3.msra.mxu1 %v7587_v19  ;;  %15118 = vmatpush3.msra.mxu0 %v7588_v47  ;;  %v23173_v46 = vld [vmem:[#allocation45_spill] sm:$0xff] }
 0x47b   : > { %v19989_v58 = vrot.slane %v23167_v10, %v16563_v27  ;;  %v7359_v41 = vrot.slane %v7351_v49, %v16585_v12  ;;  %v19996_v37 = vrot.slane %v23168_v17, %v16563_v27  ;;  %15063 = vmatprep.subr.mxu1 %v7519_v1  ;;  %15119 = vmatprep.subr.mxu0 %v7520_v25  ;;  %v23179_v17 = vld [vmem:[#allocation46_spill] sm:$0xff] }
 0x47c   : > { %v20002_v38 = vrot.slane %v23169_v28, %v16563_v27  ;;  %v7451_v2 = vcombine.low %v7427_v59, %v7443_v52  ;;  %v7452_v11 = vcombine.high %v7427_v59, %v7443_v52  ;;  %v7375_v29 = vrot.slane %v7367_v18, %v16585_v12  ;;  %15064 = vmatpush3.msra.mxu1 %v7519_v1  ;;  %v23177_v52 = vld [vmem:[#allocation14_spill] sm:$0xff]  ;;  %v23180_v28 = vld [vmem:[#allocation47_spill] sm:$0xff] }
 0x47d   : > { %v23170_v16 = vcombine.high %v19568_v15, %v19571_v5  ;;  %v7283_v60 = vcombine.low %v19989_v58, %v19996_v37  ;;  %v23171_v19 = vcombine.low %v19612_v24, %v19615_v39  ;;  %15120 = vmatpush3.msra.mxu0 %v7520_v25  ;;  %v23172_v20 = vcombine.high %v19612_v24, %v19615_v39  ;;  %v23178_v18 = vld [vmem:[#allocation62_spill] sm:$0xff] }
 0x47e   : > { %v7383_v44 = vcombine.low %v7359_v41, %v7375_v29  ;;  %v7384_v43 = vcombine.high %v7359_v41, %v7375_v29  ;;  %15065 = vmatprep.subr.mxu1 %v7451_v2  ;;  %15121 = vmatprep.subr.mxu0 %v7452_v11  ;;  %v23175_v1 = vcombine.low %v23173_v46, %v23174_v30  ;;  %v23182_v29 = vld [vmem:[#allocation49_spill] sm:$0xff] }
 0x47f   : > { %v20009_v62 = vrot.slane %v23170_v16, %v16563_v27  ;;  %v20017_v47 = vrot.slane %v23171_v19, %v16563_v27  ;;  %v20023_v15 = vrot.slane %v23172_v20, %v16563_v27  ;;  %v7291_v5 = vrot.slane %v7283_v60, %v16585_v12  ;;  %15066 = vmatpush3.msra.mxu1 %v7451_v2 }
 0x480   : > { %v20032_v25 = vrot.slane %v23175_v1, %v16563_v27  ;;  %15122 = vmatpush3.msra.mxu0 %v7452_v11  ;;  %v23176_v24 = vcombine.high %v23173_v46, %v23174_v30  ;;  %v8236_v10 = vcombine.high %v23178_v18, %v23177_v52  ;;  %15067 = vmatprep.subr.mxu1 %v7383_v44  ;;  %v23181_v11 = vld [vmem:[#allocation48_spill] sm:$0xff]  ;;  %v23183_v52 = vld [vmem:[#allocation50_spill] sm:$0xff]  ;;  %v23184_v18 = vld [vmem:[#allocation51_spill] sm:$0xff] }
 0x481   : > { %v7299_v59 = vcombine.low %v20002_v38, %v20009_v62  ;;  %v7215_v49 = vcombine.low %v20017_v47, %v20023_v15  ;;  %15123 = vmatprep.subr.mxu0 %v7384_v43  ;;  %v8252_v2 = vcombine.high %v23180_v28, %v23179_v17  ;;  %v8100_v16 = vcombine.high %v23182_v29, %v23181_v11  ;;  %v23188_v11 = vld [vmem:[#allocation40_spill] sm:$0xff] }
 0x482   : > { %v20038_v39 = vrot.slane %v23176_v24, %v16563_v27  ;;  %15068 = vmatpush3.msra.mxu1 %v7383_v44  ;;  %15124 = vmatpush3.msra.mxu0 %v7384_v43  ;;  %v8250_v20 = vrot.slane %v8236_v10, %v16585_v12  ;;  %v8116_v17 = vcombine.high %v23184_v18, %v23183_v52  ;;  %v23185_v44 = vld [vmem:[#allocation41_spill] sm:$0xff]  ;;  %v23186_v43 = vld [vmem:[#allocation12_spill] sm:$0xff] }
 0x483   : > { %v7307_v41 = vrot.slane %v7299_v59, %v16585_v12  ;;  %v7223_v60 = vrot.slane %v7215_v49, %v16585_v12  ;;  %v8266_v1 = vrot.slane %v8252_v2, %v16585_v12  ;;  %v8114_v59 = vrot.slane %v8100_v16, %v16585_v12  ;;  %v23187_v49 = vld [vmem:[#allocation43_spill] sm:$0xff]  ;;  %v23192_v2 = vld [vmem:[#allocation13_spill] sm:$0xff] }
 0x484   : > { %v7231_v19 = vcombine.low %v20032_v25, %v20038_v39  ;;  %v8032_v28 = vcombine.high %v23186_v43, %v23185_v44  ;;  %v8048_v29 = vcombine.high %v23188_v11, %v23187_v49  ;;  %v8130_v52 = vrot.slane %v8116_v17, %v16585_v12  ;;  %v23193_v49 = vld [vmem:[#allocation10_spill] sm:$0xff] }
 0x485   : > { %v7315_v46 = vcombine.low %v7291_v5, %v7307_v41  ;;  %v7316_v30 = vcombine.high %v7291_v5, %v7307_v41  ;;  %v20062_v10 = vcombine.low %v8250_v20, %v8266_v1  ;;  %v20064_v5 = vcombine.high %v8250_v20, %v8266_v1  ;;  %v23191_v41 = vld [vmem:[#allocation42_spill] sm:$0xff] }
 0x486   : > { %v7239_v24 = vrot.slane %v7231_v19, %v16585_v12  ;;  %v7964_v16 = vcombine.high %v23192_v2, %v23191_v41  ;;  %v8046_v18 = vrot.slane %v8032_v28, %v16585_v12  ;;  %v8062_v44 = vrot.slane %v8048_v29, %v16585_v12  ;;  %v23201_v28 = vld [vmem:[#allocation71_spill] sm:$0xff]  ;;  %v23202_v29 = vld [vmem:[#allocation109_spill] sm:$0xff] }
 0x487   : > { %15069 = vmatprep.subr.mxu1 %v7315_v46  ;;  %15125 = vmatprep.subr.mxu0 %v7316_v30  ;;  %23189 = vst [vmem:[#allocation68_spill] sm:$0xff] %v20062_v10  ;;  %23190 = vst [vmem:[#allocation72_spill] sm:$0xff] %v20064_v5  ;;  %v7980_v11 = vcombine.high %v23193_v49, %v19659_v33  ;;  %v8168_v20 = vcombine.high %v19716_v35, %v19719_v31  ;;  %v23203_v2 = vld [vmem:[#allocation95_spill] sm:$0xff] }
 0x488   : > { %15070 = vmatpush3.msra.mxu1 %v7315_v46  ;;  %15126 = vmatpush3.msra.mxu0 %v7316_v30  ;;  %v7247_v19 = vcombine.low %v7223_v60, %v7239_v24  ;;  %v7248_v27 = vcombine.high %v7223_v60, %v7239_v24  ;;  %v7978_v43 = vrot.slane %v7964_v16, %v16585_v12  ;;  %v23204_v16 = vld [vmem:[#allocation86_spill] sm:$0xff] }
 0x489   : > { %v8184_v46 = vcombine.high %v19722_v45, %v19725_v36  ;;  %v20078_v60 = vcombine.low %v8114_v59, %v8130_v52  ;;  %v20080_v30 = vcombine.high %v8114_v59, %v8130_v52  ;;  %v20082_v1 = vcombine.low %v8046_v18, %v8062_v44  ;;  %v23198_v45 = vld [vmem:[#allocation31_spill] sm:$0xff]  ;;  %v23200_v59 = vld [vmem:[#allocation110_spill] sm:$0xff] }
 0x48a   : > { %15071 = vmatprep.subr.mxu1 %v7247_v19  ;;  %15127 = vmatprep.subr.mxu0 %v7248_v27  ;;  %v20084_v24 = vcombine.high %v8046_v18, %v8062_v44  ;;  %v8182_v33 = vrot.slane %v8168_v20, %v16585_v12  ;;  %v7994_v31 = vrot.slane %v7980_v11, %v16585_v12 }
 0x48b   : > { %23194 = vst [vmem:[#allocation92_spill] sm:$0xff] %v20078_v60  ;;  %15072 = vmatpush3.msra.mxu1 %v7247_v19  ;;  %15128 = vmatpush3.msra.mxu0 %v7248_v27  ;;  %23195 = vst [vmem:[#allocation17_spill] sm:$0xff] %v20080_v30  ;;  %v8198_v35 = vrot.slane %v8184_v46, %v16585_v12  ;;  %v7896_v36 = vcombine.high %v23198_v45, %v19677_v53  ;;  %v23199_v27 = vld [vmem:[#allocation101_spill] sm:$0xff]  ;;  %v23209_v45 = vld [vmem:[#allocation52_spill] sm:$0xff] }
 0x48c   : > { %23196 = vst [vmem:[#allocation82_spill] sm:$0xff] %v20082_v1  ;;  %23197 = vst [vmem:[#allocation85_spill] sm:$0xff] %v20084_v24  ;;  %15153 = vmatprep.subr.mxu1 %v20062_v10  ;;  %15209 = vmatprep.subr.mxu0 %v20064_v5  ;;  %v7912_v17 = vcombine.high %v23200_v59, %v23199_v27  ;;  %v7828_v41 = vcombine.high %v23202_v29, %v23201_v28  ;;  %v23210_v59 = vld [vmem:[#allocation54_spill] sm:$0xff] }
 0x48d   : > { %v7844_v19 = vcombine.high %v23204_v16, %v23203_v2  ;;  %v20099_v52 = vcombine.low %v8182_v33, %v8198_v35  ;;  %v20101_v18 = vcombine.high %v8182_v33, %v8198_v35  ;;  %v20103_v44 = vcombine.low %v7978_v43, %v7994_v31 }
 0x48e   : > { %v20105_v49 = vcombine.high %v7978_v43, %v7994_v31  ;;  %v7910_v11 = vrot.slane %v7896_v36, %v16585_v12  ;;  %v7926_v53 = vrot.slane %v7912_v17, %v16585_v12  ;;  %v7842_v20 = vrot.slane %v7828_v41, %v16585_v12 }
 0x48f   : > { %23205 = vst [vmem:[#allocation66_spill] sm:$0xff] %v20099_v52  ;;  %23206 = vst [vmem:[#allocation67_spill] sm:$0xff] %v20101_v18  ;;  %v7858_v46 = vrot.slane %v7844_v19, %v16585_v12  ;;  %v7760_v27 = vcombine.high %v23209_v45, %v19765_v22  ;;  %v7776_v28 = vcombine.high %v23210_v59, %v19777_v42 }
 0x490   : > { %23207 = vst [vmem:[#allocation90_spill] sm:$0xff] %v20103_v44  ;;  %23208 = vst [vmem:[#allocation93_spill] sm:$0xff] %v20105_v49  ;;  %v7692_v33 = vcombine.high %v19787_v14, %v19798_v0  ;;  %v7708_v43 = vcombine.high %v19805_v56, %v19813_v54  ;;  %v20119_v35 = vcombine.low %v7910_v11, %v7926_v53 }
 0x491   : > { %v20121_v31 = vcombine.high %v7910_v11, %v7926_v53  ;;  %v20123_v36 = vcombine.low %v7842_v20, %v7858_v46  ;;  %v20125_v17 = vcombine.high %v7842_v20, %v7858_v46  ;;  %v7774_v29 = vrot.slane %v7760_v27, %v16585_v12 }
 0x492   : > { %23211 = vst [vmem:[#allocation96_spill] sm:$0xff] %v20119_v35  ;;  %v7790_v22 = vrot.slane %v7776_v28, %v16585_v12  ;;  %v7706_v42 = vrot.slane %v7692_v33, %v16585_v12  ;;  %v7722_v41 = vrot.slane %v7708_v43, %v16585_v12  ;;  %v7624_v14 = vcombine.high %v19821_v32, %v19832_v21 }
 0x493   : > { %23212 = vst [vmem:[#allocation97_spill] sm:$0xff] %v20121_v31  ;;  %23213 = vst [vmem:[#allocation107_spill] sm:$0xff] %v20123_v36  ;;  %v7640_v0 = vcombine.high %v19838_v7, %v19846_v8  ;;  %v7556_v56 = vcombine.high %v19852_v3, %v19858_v13  ;;  %v7572_v54 = vcombine.high %v19869_v26, %v19879_v61 }
 0x494   : > { %23214 = vst [vmem:[#allocation108_spill] sm:$0xff] %v20125_v17  ;;  %v20139_v2 = vcombine.low %v7774_v29, %v7790_v22  ;;  %v20141_v16 = vcombine.high %v7774_v29, %v7790_v22  ;;  %v20143_v19 = vcombine.low %v7706_v42, %v7722_v41  ;;  %v20145_v11 = vcombine.high %v7706_v42, %v7722_v41 }
 0x495   : > { %v7638_v53 = vrot.slane %v7624_v14, %v16585_v12  ;;  %v7654_v32 = vrot.slane %v7640_v0, %v16585_v12  ;;  %v7570_v21 = vrot.slane %v7556_v56, %v16585_v12  ;;  %v7586_v7 = vrot.slane %v7572_v54, %v16585_v12 }
 0x496   : > { %23215 = vst [vmem:[#allocation84_spill] sm:$0xff] %v20139_v2  ;;  %23216 = vst [vmem:[#allocation76_spill] sm:$0xff] %v20141_v16  ;;  %v7488_v8 = vcombine.high %v19898_v6, %v19904_v34  ;;  %v7504_v3 = vcombine.high %v19910_v63, %v19919_v48  ;;  %v7420_v13 = vcombine.high %v19927_v51, %v19933_v9 }
 0x497   : > { %23217 = vst [vmem:[#allocation111_spill] sm:$0xff] %v20143_v19  ;;  %23218 = vst [vmem:[#allocation112_spill] sm:$0xff] %v20145_v11  ;;  %v7436_v26 = vcombine.high %v19942_v4, %v19948_v23  ;;  %v20159_v61 = vcombine.low %v7638_v53, %v7654_v32  ;;  %v20161_v20 = vcombine.high %v7638_v53, %v7654_v32 }
 0x498   : > { %v20163_v46 = vcombine.low %v7570_v21, %v7586_v7  ;;  %v20165_v45 = vcombine.high %v7570_v21, %v7586_v7  ;;  %v7502_v27 = vrot.slane %v7488_v8, %v16585_v12  ;;  %v7518_v6 = vrot.slane %v7504_v3, %v16585_v12 }
 0x499   : > { %23219 = vst [vmem:[#allocation113_spill] sm:$0xff] %v20159_v61  ;;  %23220 = vst [vmem:[#allocation114_spill] sm:$0xff] %v20161_v20  ;;  %v7434_v34 = vrot.slane %v7420_v13, %v16585_v12  ;;  %v7450_v63 = vrot.slane %v7436_v26, %v16585_v12  ;;  %v7352_v48 = vcombine.high %v19956_v40, %v19963_v57 }
 0x49a   : > { %23221 = vst [vmem:[#allocation87_spill] sm:$0xff] %v20163_v46  ;;  %23222 = vst [vmem:[#allocation80_spill] sm:$0xff] %v20165_v45  ;;  %v7368_v51 = vcombine.high %v19969_v55, %v19978_v50  ;;  %v7284_v9 = vcombine.high %v19989_v58, %v19996_v37  ;;  %v7300_v4 = vcombine.high %v20002_v38, %v20009_v62 }
 0x49b   : > { %v20179_v23 = vcombine.low %v7502_v27, %v7518_v6  ;;  %v20181_v59 = vcombine.high %v7502_v27, %v7518_v6  ;;  %v20183_v28 = vcombine.low %v7434_v34, %v7450_v63  ;;  %v20185_v33 = vcombine.high %v7434_v34, %v7450_v63 }
 0x49c   : > { %v7366_v40 = vrot.slane %v7352_v48, %v16585_v12  ;;  %v7382_v57 = vrot.slane %v7368_v51, %v16585_v12  ;;  %v7298_v55 = vrot.slane %v7284_v9, %v16585_v12  ;;  %v7314_v50 = vrot.slane %v7300_v4, %v16585_v12 }
 0x49d   : > { %23223 = vst [vmem:[#allocation20_spill] sm:$0xff] %v20179_v23  ;;  %23224 = vst [vmem:[#allocation83_spill] sm:$0xff] %v20181_v59  ;;  %v7216_v58 = vcombine.high %v20017_v47, %v20023_v15  ;;  %v7232_v37 = vcombine.high %v20032_v25, %v20038_v39  ;;  %v20214_v47 = vld [vmem:[%s23234_s4] ss:$0 sm:$0xff] }
 0x49e   : > { %23225 = vst [vmem:[#allocation115_spill] sm:$0xff] %v20183_v28  ;;  %23226 = vst [vmem:[#allocation116_spill] sm:$0xff] %v20185_v33  ;;  %v20195_v38 = vcombine.low %v7366_v40, %v7382_v57  ;;  %v20197_v62 = vcombine.high %v7366_v40, %v7382_v57  ;;  %v20199_v43 = vcombine.low %v7298_v55, %v7314_v50 }
 0x49f   : > { %v20201_v29 = vcombine.high %v7298_v55, %v7314_v50  ;;  %v7230_v22 = vrot.slane %v7216_v58, %v16585_v12  ;;  %v7246_v42 = vrot.slane %v7232_v37, %v16585_v12  ;;  %v14851_v15 = vpop.f32.mrf.mxu1 }
 0x4a0   : > { %23227 = vst [vmem:[#allocation117_spill] sm:$0xff] %v20195_v38  ;;  %23228 = vst [vmem:[#allocation118_spill] sm:$0xff] %v20197_v62  ;;  %v20217_v25 = vadd.f32 %v14851_v15, %v20214_v47  ;;  %v14907_v39 = vpop.f32.mrf.mxu0 }
 0x4a1   : > { %23229 = vst [vmem:[#allocation91_spill] sm:$0xff] %v20199_v43  ;;  %23230 = vst [vmem:[#allocation21_spill] sm:$0xff] %v20201_v29  ;;  %v20205_v41 = vcombine.low %v7230_v22, %v7246_v42  ;;  %v20207_v14 = vcombine.high %v7230_v22, %v7246_v42  ;;  %v20224_v54 = vadd.f32 %v14907_v39, %v20214_v47  ;;  %v8434_v32 = vpop.f32.mrf.mxu1 }
 0x4a2   : > { %v8675_v0 = vpop.f32.mrf.mxu0  ;;  %9309 = vmax.xlane.f32.xlu0 %v20217_v25  ;;  %v20232_v7 = vadd.f32 %v20214_v47, %v8434_v32 }
 0x4a3   : > { %23231 = vst [vmem:[#allocation37_spill] sm:$0xff] %v20205_v41  ;;  %23232 = vst [vmem:[#allocation119_spill] sm:$0xff] %v20207_v14  ;;  %v20221_v56 = vadd.f32 %v20214_v47, %v8675_v0  ;;  %v14854_v3 = vpop.f32.mrf.mxu1 }
 0x4a4   : > { %v20240_v26 = vadd.f32 %v14854_v3, %v20214_v47 }
 0x4a5   : > { %v14910_v53 = vpop.f32.mrf.mxu0  ;;  %9339 = vmax.xlane.f32.xlu1 %v20221_v56  ;;  %v8444_v6 = vpop.f32.mrf.mxu1 }
 0x4a6   : > { %9341 = vmax.xlane.f32.xlu0 %v20224_v54  ;;  %v20229_v21 = vadd.f32 %v14910_v53, %v20214_v47  ;;  %v20248_v63 = vadd.f32 %v20214_v47, %v8444_v6 }
 0x4a7   : > { %v8685_v8 = vpop.f32.mrf.mxu0 }
 0x4a8   : > { %v20237_v13 = vadd.f32 %v20214_v47, %v8685_v8  ;;  %v14857_v51 = vpop.f32.mrf.mxu1 }
 0x4a9   : > { %9345 = vmax.xlane.f32.xlu1 %v20229_v21  ;;  %v14913_v27 = vpop.f32.mrf.mxu0  ;;  %v20256_v4 = vadd.f32 %v14857_v51, %v20214_v47 }
 0x4aa   : > { %9307 = vmax.xlane.f32.xlu0 %v20232_v7  ;;  %v20245_v34 = vadd.f32 %v14913_v27, %v20214_v47  ;;  %v8454_v57 = vpop.f32.mrf.mxu1 }
 0x4ab   : > { %v8695_v48 = vpop.f32.mrf.mxu0  ;;  %v20264_v50 = vadd.f32 %v20214_v47, %v8454_v57 }
 0x4ac   : > { %v20253_v9 = vadd.f32 %v20214_v47, %v8695_v48 }
 0x4ad   : > { %9343 = vmax.xlane.f32.xlu1 %v20237_v13  ;;  %v14860_v37 = vpop.f32.mrf.mxu1 }
 0x4ae   : > { %9313 = vmax.xlane.f32.xlu0 %v20240_v26  ;;  %v14916_v40 = vpop.f32.mrf.mxu0  ;;  %v20272_v42 = vadd.f32 %v14860_v37, %v20214_v47 }
 0x4af   : > { %v20261_v55 = vadd.f32 %v14916_v40, %v20214_v47  ;;  %v8464_v39 = vpop.f32.mrf.mxu1 }
 0x4b0   : > { %v8705_v58 = vpop.f32.mrf.mxu0  ;;  %v20280_v53 = vadd.f32 %v20214_v47, %v8464_v39 }
 0x4b1   : > { %9349 = vmax.xlane.f32.xlu1 %v20245_v34  ;;  %v20269_v22 = vadd.f32 %v20214_v47, %v8705_v58 }
 0x4b2   : > { %9311 = vmax.xlane.f32.xlu0 %v20248_v63 }
 0x4b3   : > { %v14919_v15 = vpop.f32.mrf.mxu0  ;;  %v14863_v8 = vpop.f32.mrf.mxu1 }
 0x4b4   : > { %v20277_v0 = vadd.f32 %v14919_v15, %v20214_v47  ;;  %v20288_v27 = vadd.f32 %v14863_v8, %v20214_v47 }
 0x4b5   : > { %9347 = vmax.xlane.f32.xlu1 %v20253_v9  ;;  %v8715_v32 = vpop.f32.mrf.mxu0  ;;  %v8474_v48 = vpop.f32.mrf.mxu1 }
 0x4b6   : > { %9317 = vmax.xlane.f32.xlu0 %v20256_v4  ;;  %v20285_v3 = vadd.f32 %v20214_v47, %v8715_v32  ;;  %v20296_v40 = vadd.f32 %v20214_v47, %v8474_v48 }
 0x4b7   : > { %v14922_v6 = vpop.f32.mrf.mxu0  ;;  %v14866_v58 = vpop.f32.mrf.mxu1 }
 0x4b8   : > { %v20293_v51 = vadd.f32 %v14922_v6, %v20214_v47  ;;  %v20304_v15 = vadd.f32 %v14866_v58, %v20214_v47 }
 0x4b9   : > { %9353 = vmax.xlane.f32.xlu1 %v20261_v55  ;;  %v8725_v57 = vpop.f32.mrf.mxu0  ;;  %v8484_v32 = vpop.f32.mrf.mxu1 }
 0x4ba   : > { %9315 = vmax.xlane.f32.xlu0 %v20264_v50  ;;  %v20301_v37 = vadd.f32 %v20214_v47, %v8725_v57  ;;  %v20312_v6 = vadd.f32 %v20214_v47, %v8484_v32 }
 0x4bc   : > { %v14925_v39 = vpop.f32.mrf.mxu0  ;;  %v14869_v12 = vpop.f32.mrf.mxu1 }
 0x4bd   : > { %9351 = vmax.xlane.f32.xlu1 %v20269_v22  ;;  %v20309_v8 = vadd.f32 %v14925_v39, %v20214_v47  ;;  %v20320_v58 = vadd.f32 %v14869_v12, %v20214_v47 }
 0x4be   : > { %9321 = vmax.xlane.f32.xlu0 %v20272_v42  ;;  %v8735_v48 = vpop.f32.mrf.mxu0  ;;  %v8494_v41 = vpop.f32.mrf.mxu1 }
 0x4bf   : > { %v20317_v57 = vadd.f32 %v20214_v47, %v8735_v48  ;;  %v20328_v32 = vadd.f32 %v20214_v47, %v8494_v41 }
 0x4c1   : > { %9357 = vmax.xlane.f32.xlu1 %v20277_v0  ;;  %v14928_v14 = vpop.f32.mrf.mxu0  ;;  %v14872_v43 = vpop.f32.mrf.mxu1 }
 0x4c2   : > { %9319 = vmax.xlane.f32.xlu0 %v20280_v53  ;;  %v20325_v39 = vadd.f32 %v14928_v14, %v20214_v47  ;;  %v20336_v48 = vadd.f32 %v14872_v43, %v20214_v47 }
 0x4c3   : > { %v8745_v29 = vpop.f32.mrf.mxu0  ;;  %v8504_v38 = vpop.f32.mrf.mxu1 }
 0x4c4   : > { %v20333_v12 = vadd.f32 %v20214_v47, %v8745_v29  ;;  %v20341_v41 = vadd.f32 %v20214_v47, %v8504_v38 }
 0x4c5   : > { %9355 = vmax.xlane.f32.xlu1 %v20285_v3 }
 0x4c6   : > { %9325 = vmax.xlane.f32.xlu0 %v20288_v27 }
 0x4c9   : > { %9361 = vmax.xlane.f32.xlu1 %v20293_v51 }
 0x4ca   : > { %9323 = vmax.xlane.f32.xlu0 %v20296_v40 }
 0x4cd   : > { %9359 = vmax.xlane.f32.xlu1 %v20301_v37 }
 0x4ce   : > { %9329 = vmax.xlane.f32.xlu0 %v20304_v15 }
 0x4d1   : > { %9365 = vmax.xlane.f32.xlu1 %v20309_v8 }
 0x4d2   : > { %9327 = vmax.xlane.f32.xlu0 %v20312_v6 }
 0x4d5   : > { %9363 = vmax.xlane.f32.xlu1 %v20317_v57 }
 0x4d6   : > { %9333 = vmax.xlane.f32.xlu0 %v20320_v58 }
 0x4d9   : > { %9369 = vmax.xlane.f32.xlu1 %v20325_v39 }
 0x4da   : > { %9331 = vmax.xlane.f32.xlu0 %v20328_v32 }
 0x4dd   : > { %9367 = vmax.xlane.f32.xlu1 %v20333_v12 }
 0x4de   : > { %9337 = vmax.xlane.f32.xlu0 %v20336_v48 }
 0x4e2   : > { %9335 = vmax.xlane.f32.xlu0 %v20341_v41 }
 0x4e7   : > { %v14963_v14 = vpop.f32.mrf.mxu1  ;;  %v15019_v62 = vpop.f32.mrf.mxu0 }
 0x4e8   : > { %v20345_v33 = vadd.f32 %v14963_v14, %v20214_v47  ;;  %v20348_v29 = vadd.f32 %v15019_v62, %v20214_v47 }
 0x4e9   : > { %v8916_v43 = vpop.f32.mrf.mxu1  ;;  %v9157_v28 = vpop.f32.mrf.mxu0 }
 0x4ea   : > { %9405 = vmax.xlane.f32.xlu1 %v20348_v29  ;;  %9373 = vmax.xlane.f32.xlu0 %v20345_v33  ;;  %v20353_v59 = vadd.f32 %v20214_v47, %v8916_v43  ;;  %v20356_v38 = vadd.f32 %v20214_v47, %v9157_v28 }
 0x4ed   : > { %v14966_v23 = vpop.f32.mrf.mxu1  ;;  %v15022_v45 = vpop.f32.mrf.mxu0 }
 0x4ee   : > { %9403 = vmax.xlane.f32.xlu1 %v20356_v38  ;;  %9371 = vmax.xlane.f32.xlu0 %v20353_v59  ;;  %v20361_v62 = vadd.f32 %v14966_v23, %v20214_v47  ;;  %v20364_v14 = vadd.f32 %v15022_v45, %v20214_v47 }
 0x4ef   : > { %v8926_v46 = vpop.f32.mrf.mxu1  ;;  %v9167_v20 = vpop.f32.mrf.mxu0 }
 0x4f0   : > { %v20369_v28 = vadd.f32 %v20214_v47, %v8926_v46  ;;  %v20372_v43 = vadd.f32 %v20214_v47, %v9167_v20 }
 0x4f2   : > { %9409 = vmax.xlane.f32.xlu1 %v20364_v14  ;;  %9377 = vmax.xlane.f32.xlu0 %v20361_v62  ;;  %v14969_v61 = vpop.f32.mrf.mxu1  ;;  %v15025_v11 = vpop.f32.mrf.mxu0 }
 0x4f3   : > { %v20377_v45 = vadd.f32 %v14969_v61, %v20214_v47  ;;  %v20380_v23 = vadd.f32 %v15025_v11, %v20214_v47 }
 0x4f4   : > { %v8936_v19 = vpop.f32.mrf.mxu1  ;;  %v9177_v16 = vpop.f32.mrf.mxu0 }
 0x4f5   : > { %v20385_v20 = vadd.f32 %v20214_v47, %v8936_v19  ;;  %v20388_v46 = vadd.f32 %v20214_v47, %v9177_v16 }
 0x4f6   : > { %9407 = vmax.xlane.f32.xlu1 %v20372_v43  ;;  %9375 = vmax.xlane.f32.xlu0 %v20369_v28  ;;  %v14972_v2 = vpop.f32.mrf.mxu1  ;;  %v15028_v17 = vpop.f32.mrf.mxu0 }
 0x4f7   : > { %v20393_v11 = vadd.f32 %v14972_v2, %v20214_v47  ;;  %v20396_v61 = vadd.f32 %v15028_v17, %v20214_v47 }
 0x4f8   : > { %v8946_v36 = vpop.f32.mrf.mxu1  ;;  %v9187_v31 = vpop.f32.mrf.mxu0 }
 0x4f9   : > { %v20401_v16 = vadd.f32 %v20214_v47, %v8946_v36  ;;  %v20404_v19 = vadd.f32 %v20214_v47, %v9187_v31 }
 0x4fa   : > { %9413 = vmax.xlane.f32.xlu1 %v20380_v23  ;;  %9381 = vmax.xlane.f32.xlu0 %v20377_v45  ;;  %v14975_v35 = vpop.f32.mrf.mxu1  ;;  %v15031_v49 = vpop.f32.mrf.mxu0 }
 0x4fb   : > { %v20409_v17 = vadd.f32 %v14975_v35, %v20214_v47  ;;  %v20412_v2 = vadd.f32 %v15031_v49, %v20214_v47 }
 0x4fc   : > { %v8956_v44 = vpop.f32.mrf.mxu1  ;;  %v9197_v1 = vpop.f32.mrf.mxu0 }
 0x4fd   : > { %23235 = vst [vmem:[#allocation19_spill] sm:$0xff] %v20409_v17  ;;  %v20417_v31 = vadd.f32 %v20214_v47, %v8956_v44  ;;  %v20420_v36 = vadd.f32 %v20214_v47, %v9197_v1 }
 0x4fe   : > { %9411 = vmax.xlane.f32.xlu1 %v20388_v46  ;;  %9379 = vmax.xlane.f32.xlu0 %v20385_v20 }
 0x4ff   : > { %23236 = vst [vmem:[#allocation94_spill] sm:$0xff] %v20417_v31  ;;  %23237 = vst [vmem:[#allocation39_spill] sm:$0xff] %v20420_v36 }
 0x500   : > { %v14978_v24 = vpop.f32.mrf.mxu1  ;;  %v15034_v60 = vpop.f32.mrf.mxu0 }
 0x501   : > { %v20425_v49 = vadd.f32 %v14978_v24, %v20214_v47  ;;  %v20428_v35 = vadd.f32 %v15034_v60, %v20214_v47 }
 0x502   : > { %9417 = vmax.xlane.f32.xlu1 %v20396_v61  ;;  %9385 = vmax.xlane.f32.xlu0 %v20393_v11  ;;  %v8966_v30 = vpop.f32.mrf.mxu1  ;;  %v9207_v52 = vpop.f32.mrf.mxu0 }
 0x503   : > { %23238 = vst [vmem:[#allocation23_spill] sm:$0xff] %v20425_v49  ;;  %23239 = vst [vmem:[#allocation79_spill] sm:$0xff] %v20428_v35  ;;  %v20433_v1 = vadd.f32 %v20214_v47, %v8966_v30  ;;  %v20436_v44 = vadd.f32 %v20214_v47, %v9207_v52 }
 0x505   : > { %23240 = vst [vmem:[#allocation78_spill] sm:$0xff] %v20433_v1  ;;  %23241 = vst [vmem:[#allocation8_spill] sm:$0xff] %v20436_v44  ;;  %v14981_v18 = vpop.f32.mrf.mxu1  ;;  %v15037_v10 = vpop.f32.mrf.mxu0 }
 0x506   : > { %9415 = vmax.xlane.f32.xlu1 %v20404_v19  ;;  %9383 = vmax.xlane.f32.xlu0 %v20401_v16  ;;  %v20441_v60 = vadd.f32 %v14981_v18, %v20214_v47  ;;  %v20444_v24 = vadd.f32 %v15037_v10, %v20214_v47 }
 0x507   : > { %v8976_v5 = vpop.f32.mrf.mxu1 }
 0x508   : > { %23242 = vst [vmem:[#allocation125_spill] sm:$0xff] %v20441_v60  ;;  %23243 = vst [vmem:[#allocation22_spill] sm:$0xff] %v20444_v24  ;;  %v20449_v30 = vadd.f32 %v20214_v47, %v8976_v5 }
 0x50a   : > { %9421 = vmax.xlane.f32.xlu1 %v20412_v2  ;;  %9389 = vmax.xlane.f32.xlu0 %v20409_v17  ;;  %23244 = vst [vmem:[#allocation24_spill] sm:$0xff] %v20449_v30 }
 0x50e   : > { %9419 = vmax.xlane.f32.xlu1 %v20420_v36  ;;  %9387 = vmax.xlane.f32.xlu0 %v20417_v31 }
 0x512   : > { %9425 = vmax.xlane.f32.xlu1 %v20428_v35  ;;  %9393 = vmax.xlane.f32.xlu0 %v20425_v49  ;;  %v9217_v49 = vpop.f32.mrf.mxu0 }
 0x513   : > { %v20452_v52 = vadd.f32 %v20214_v47, %v9217_v49 }
 0x515   : > { %23245 = vst [vmem:[#allocation64_spill] sm:$0xff] %v20452_v52 }
 0x516   : > { %9423 = vmax.xlane.f32.xlu1 %v20436_v44  ;;  %9391 = vmax.xlane.f32.xlu0 %v20433_v1  ;;  %v14984_v44 = vpop.f32.mrf.mxu1  ;;  %v15040_v1 = vpop.f32.mrf.mxu0 }
 0x517   : > { %v20457_v10 = vadd.f32 %v14984_v44, %v20214_v47  ;;  %v20460_v18 = vadd.f32 %v15040_v1, %v20214_v47 }
 0x519   : > { %23246 = vst [vmem:[#allocation65_spill] sm:$0xff] %v20457_v10  ;;  %23247 = vst [vmem:[#allocation73_spill] sm:$0xff] %v20460_v18 }
 0x51a   : > { %9429 = vmax.xlane.f32.xlu1 %v20444_v24  ;;  %9397 = vmax.xlane.f32.xlu0 %v20441_v60  ;;  %v8986_v24 = vpop.f32.mrf.mxu1  ;;  %v9227_v60 = vpop.f32.mrf.mxu0 }
 0x51b   : > { %v20465_v5 = vadd.f32 %v20214_v47, %v8986_v24  ;;  %v20468_v49 = vadd.f32 %v20214_v47, %v9227_v60 }
 0x51d   : > { %23248 = vst [vmem:[#allocation28_spill] sm:$0xff] %v20465_v5  ;;  %23249 = vst [vmem:[#allocation9_spill] sm:$0xff] %v20468_v49 }
 0x51e   : > { %9427 = vmax.xlane.f32.xlu1 %v20452_v52  ;;  %9395 = vmax.xlane.f32.xlu0 %v20449_v30 }
 0x522   : > { %9433 = vmax.xlane.f32.xlu1 %v20460_v18  ;;  %9401 = vmax.xlane.f32.xlu0 %v20457_v10 }
 0x526   : > { %9431 = vmax.xlane.f32.xlu1 %v20468_v49  ;;  %9399 = vmax.xlane.f32.xlu0 %v20465_v5 }
 0x52b   : > { %v9310_v44 = vpop.xlane.xlu0 %9309 }
 0x52c   : > { %v9436_v1 = vsub.f32 %v20217_v25, %v9310_v44 }
 0x52e   : > { %v9501_v30 = vmul.f32 1.442695, %v9436_v1  ;;  %v9340_v52 = vpop.xlane.xlu1 %9339 }
 0x52f   : > { %v9451_v35 = vsub.f32 %v20221_v56, %v9340_v52  ;;  %v9342_v18 = vpop.xlane.xlu0 %9341 }
 0x530   : > { %15499 = vpow2.f32 %v9501_v30  ;;  %v9452_v10 = vsub.f32 %v20224_v54, %v9342_v18 }
 0x531   : > { %v9531_v36 = vmul.f32 1.442695, %v9451_v35 }
 0x532   : > { %v9533_v24 = vmul.f32 1.442695, %v9452_v10  ;;  %v9346_v31 = vpop.xlane.xlu1 %9345 }
 0x533   : > { %v9454_v47 = vsub.f32 %v20229_v21, %v9346_v31  ;;  %v9308_v60 = vpop.xlane.xlu0 %9307 }
 0x534   : > { %15501 = vpow2.f32 %v9533_v24  ;;  %v9435_v5 = vsub.f32 %v20232_v7, %v9308_v60 }
 0x535   : > { %15503 = vpow2.f32 %v9531_v36  ;;  %v9537_v25 = vmul.f32 1.442695, %v9454_v47 }
 0x536   : > { %v9499_v49 = vmul.f32 1.442695, %v9435_v5  ;;  %v9344_v17 = vpop.xlane.xlu1 %9343 }
 0x537   : > { %v9453_v44 = vsub.f32 %v20237_v13, %v9344_v17  ;;  %v9314_v56 = vpop.xlane.xlu0 %9313 }
 0x538   : > { %15505 = vpow2.f32 %v9499_v49  ;;  %v9438_v30 = vsub.f32 %v20240_v26, %v9314_v56 }
 0x539   : > { %15507 = vpow2.f32 %v9537_v25  ;;  %v9535_v35 = vmul.f32 1.442695, %v9453_v44 }
 0x53a   : > { %v9505_v54 = vmul.f32 1.442695, %v9438_v30  ;;  %v9350_v52 = vpop.xlane.xlu1 %9349 }
 0x53b   : > { %v9456_v21 = vsub.f32 %v20245_v34, %v9350_v52  ;;  %v9312_v31 = vpop.xlane.xlu0 %9311 }
 0x53c   : > { %15509 = vpow2.f32 %v9505_v54  ;;  %v9437_v7 = vsub.f32 %v20248_v63, %v9312_v31 }
 0x53d   : > { %v20481_v10 = vpop.eup %15499  ;;  %15511 = vpow2.f32 %v9535_v35  ;;  %v9541_v13 = vmul.f32 1.442695, %v9456_v21 }
 0x53e   : > { %v9503_v36 = vmul.f32 1.442695, %v9437_v7  ;;  %v9348_v18 = vpop.xlane.xlu1 %9347  ;;  %9629 = vadd.xlane.f32.xlu0 %v20481_v10 }
 0x53f   : > { %v9455_v26 = vsub.f32 %v20253_v9, %v9348_v18  ;;  %v9318_v17 = vpop.xlane.xlu0 %9317 }
 0x540   : > { %15513 = vpow2.f32 %v9503_v36  ;;  %v9440_v5 = vsub.f32 %v20256_v4, %v9318_v17 }
 0x541   : > { %v20486_v49 = vpop.eup %15501  ;;  %15515 = vpow2.f32 %v9541_v13  ;;  %v9539_v63 = vmul.f32 1.442695, %v9455_v26 }
 0x542   : > { %v9509_v34 = vmul.f32 1.442695, %v9440_v5  ;;  %v9354_v1 = vpop.xlane.xlu1 %9353  ;;  %9661 = vadd.xlane.f32.xlu1 %v20486_v49  ;;  %v20490_v60 = vpop.eup %15503 }
 0x543   : > { %v9458_v24 = vsub.f32 %v20261_v55, %v9354_v1  ;;  %v9316_v47 = vpop.xlane.xlu0 %9315 }
 0x544   : > { %15517 = vpow2.f32 %v9509_v34  ;;  %v9439_v9 = vsub.f32 %v20264_v50, %v9316_v47 }
 0x545   : > { %v20493_v25 = vpop.eup %15505  ;;  %15519 = vpow2.f32 %v9539_v63  ;;  %v9545_v56 = vmul.f32 1.442695, %v9458_v24 }
 0x546   : > { %v9507_v44 = vmul.f32 1.442695, %v9439_v9  ;;  %v9352_v4 = vpop.xlane.xlu1 %9351  ;;  %9659 = vadd.xlane.f32.xlu1 %v20490_v60  ;;  %9627 = vadd.xlane.f32.xlu0 %v20493_v25  ;;  %v20497_v54 = vpop.eup %15507 }
 0x547   : > { %v9322_v30 = vpop.xlane.xlu0 %9321  ;;  %v9457_v21 = vsub.f32 %v20269_v22, %v9352_v4 }
 0x548   : > { %15521 = vpow2.f32 %v9507_v44  ;;  %v9442_v55 = vsub.f32 %v20272_v42, %v9322_v30 }
 0x549   : > { %v20500_v52 = vpop.eup %15509  ;;  %15523 = vpow2.f32 %v9545_v56  ;;  %v9543_v5 = vmul.f32 1.442695, %v9457_v21 }
 0x54a   : > { %v9513_v35 = vmul.f32 1.442695, %v9442_v55  ;;  %v9358_v50 = vpop.xlane.xlu1 %9357  ;;  %9665 = vadd.xlane.f32.xlu1 %v20497_v54  ;;  %9633 = vadd.xlane.f32.xlu0 %v20500_v52  ;;  %v20506_v36 = vpop.eup %15511 }
 0x54b   : > { %v9460_v31 = vsub.f32 %v20277_v0, %v9358_v50  ;;  %v9320_v7 = vpop.xlane.xlu0 %9319 }
 0x54c   : > { %15525 = vpow2.f32 %v9513_v35  ;;  %v9441_v18 = vsub.f32 %v20280_v53, %v9320_v7 }
 0x54d   : > { %v20509_v42 = vpop.eup %15513  ;;  %v9549_v13 = vmul.f32 1.442695, %v9460_v31 }
 0x54e   : > { %v9511_v26 = vmul.f32 1.442695, %v9441_v18  ;;  %v9356_v17 = vpop.xlane.xlu1 %9355  ;;  %9663 = vadd.xlane.f32.xlu1 %v20506_v36  ;;  %9631 = vadd.xlane.f32.xlu0 %v20509_v42  ;;  %v20514_v34 = vpop.eup %15515 }
 0x54f   : > { %15527 = vpow2.f32 %v9549_v13  ;;  %v9459_v22 = vsub.f32 %v20285_v3, %v9356_v17  ;;  %v9326_v0 = vpop.xlane.xlu0 %9325 }
 0x550   : > { %15529 = vpow2.f32 %v9511_v26  ;;  %v9444_v1 = vsub.f32 %v20288_v27, %v9326_v0 }
 0x551   : > { %v20517_v53 = vpop.eup %15517  ;;  %v9547_v63 = vmul.f32 1.442695, %v9459_v22  ;;  %15531 = vpow2.f32 %v9543_v5 }
 0x552   : > { %v9362_v24 = vpop.xlane.xlu1 %9361  ;;  %9669 = vadd.xlane.f32.xlu1 %v20514_v34  ;;  %9637 = vadd.xlane.f32.xlu0 %v20517_v53  ;;  %v9517_v47 = vmul.f32 1.442695, %v9444_v1  ;;  %v20522_v3 = vpop.eup %15519 }
 0x553   : > { %v9462_v9 = vsub.f32 %v20293_v51, %v9362_v24  ;;  %v9324_v44 = vpop.xlane.xlu0 %9323  ;;  %15533 = vpow2.f32 %v9547_v63 }
 0x554   : > { %v9443_v4 = vsub.f32 %v20296_v40, %v9324_v44  ;;  %15535 = vpow2.f32 %v9517_v47 }
 0x555   : > { %v20525_v56 = vpop.eup %15521  ;;  %v9553_v27 = vmul.f32 1.442695, %v9462_v9 }
 0x556   : > { %v9360_v30 = vpop.xlane.xlu1 %9359  ;;  %9667 = vadd.xlane.f32.xlu1 %v20522_v3  ;;  %9635 = vadd.xlane.f32.xlu0 %v20525_v56  ;;  %v9515_v55 = vmul.f32 1.442695, %v9443_v4  ;;  %v20530_v51 = vpop.eup %15523 }
 0x557   : > { %v9461_v35 = vsub.f32 %v20301_v37, %v9360_v30  ;;  %v9330_v50 = vpop.xlane.xlu0 %9329  ;;  %15537 = vpow2.f32 %v9553_v27 }
 0x558   : > { %v9446_v21 = vsub.f32 %v20304_v15, %v9330_v50  ;;  %15539 = vpow2.f32 %v9515_v55 }
 0x559   : > { %v20533_v31 = vpop.eup %15525  ;;  %v9551_v40 = vmul.f32 1.442695, %v9461_v35 }
 0x55a   : > { %v9366_v7 = vpop.xlane.xlu1 %9365  ;;  %9673 = vadd.xlane.f32.xlu1 %v20530_v51  ;;  %9641 = vadd.xlane.f32.xlu0 %v20533_v31  ;;  %v9521_v18 = vmul.f32 1.442695, %v9446_v21 }
 0x55b   : > { %v9464_v13 = vsub.f32 %v20309_v8, %v9366_v7  ;;  %v9328_v26 = vpop.xlane.xlu0 %9327  ;;  %15541 = vpow2.f32 %v9551_v40 }
 0x55c   : > { %v20538_v37 = vpop.eup %15527  ;;  %v9445_v17 = vsub.f32 %v20312_v6, %v9328_v26  ;;  %15543 = vpow2.f32 %v9521_v18 }
 0x55d   : > { %v20541_v5 = vpop.eup %15529  ;;  %v9557_v15 = vmul.f32 1.442695, %v9464_v13 }
 0x55e   : > { %v9364_v22 = vpop.xlane.xlu1 %9363  ;;  %9677 = vadd.xlane.f32.xlu1 %v20538_v37  ;;  %9639 = vadd.xlane.f32.xlu0 %v20541_v5  ;;  %v9519_v0 = vmul.f32 1.442695, %v9445_v17  ;;  %v20546_v8 = vpop.eup %15531 }
 0x55f   : > { %v9463_v1 = vsub.f32 %v20317_v57, %v9364_v22  ;;  %v9334_v63 = vpop.xlane.xlu0 %9333  ;;  %15545 = vpow2.f32 %v9557_v15 }
 0x560   : > { %v9448_v24 = vsub.f32 %v20320_v58, %v9334_v63  ;;  %v20549_v47 = vpop.eup %15533  ;;  %15547 = vpow2.f32 %v9519_v0 }
 0x561   : > { %v9555_v6 = vmul.f32 1.442695, %v9463_v1  ;;  %v20554_v57 = vpop.eup %15535 }
 0x562   : > { %v9370_v9 = vpop.xlane.xlu1 %9369  ;;  %9675 = vadd.xlane.f32.xlu1 %v20549_v47  ;;  %9671 = vadd.xlane.f32.xlu0 %v20546_v8  ;;  %v9525_v44 = vmul.f32 1.442695, %v9448_v24 }
 0x563   : > { %v9466_v4 = vsub.f32 %v20325_v39, %v9370_v9  ;;  %v9332_v27 = vpop.xlane.xlu0 %9331  ;;  %15549 = vpow2.f32 %v9555_v6 }
 0x564   : > { %v9447_v30 = vsub.f32 %v20328_v32, %v9332_v27  ;;  %v20557_v55 = vpop.eup %15537  ;;  %15551 = vpow2.f32 %v9525_v44 }
 0x565   : > { %v9561_v58 = vmul.f32 1.442695, %v9466_v4  ;;  %v20562_v39 = vpop.eup %15539 }
 0x566   : > { %v9368_v35 = vpop.xlane.xlu1 %9367  ;;  %9681 = vadd.xlane.f32.xlu1 %v20557_v55  ;;  %9645 = vadd.xlane.f32.xlu0 %v20554_v57  ;;  %v9523_v50 = vmul.f32 1.442695, %v9447_v30 }
 0x567   : > { %v9465_v21 = vsub.f32 %v20333_v12, %v9368_v35  ;;  %v9338_v40 = vpop.xlane.xlu0 %9337  ;;  %15553 = vpow2.f32 %v9561_v58 }
 0x568   : > { %v9450_v7 = vsub.f32 %v20336_v48, %v9338_v40  ;;  %v20565_v18 = vpop.eup %15541  ;;  %15555 = vpow2.f32 %v9523_v50 }
 0x569   : > { %v9559_v32 = vmul.f32 1.442695, %v9465_v21  ;;  %v20569_v26 = vpop.eup %15543 }
 0x56a   : > { %9679 = vadd.xlane.f32.xlu1 %v20565_v18  ;;  %9643 = vadd.xlane.f32.xlu0 %v20562_v39  ;;  %v9529_v17 = vmul.f32 1.442695, %v9450_v7 }
 0x56b   : > { %v9336_v13 = vpop.xlane.xlu0 %9335  ;;  %15557 = vpow2.f32 %v9559_v32 }
 0x56c   : > { %v9449_v12 = vsub.f32 %v20341_v41, %v9336_v13  ;;  %v20572_v15 = vpop.eup %15545  ;;  %15559 = vpow2.f32 %v9529_v17 }
 0x56d   : > { %v20576_v48 = vpop.eup %15547 }
 0x56e   : > { %9685 = vadd.xlane.f32.xlu1 %v20572_v15  ;;  %9649 = vadd.xlane.f32.xlu0 %v20569_v26  ;;  %v9527_v22 = vmul.f32 1.442695, %v9449_v12 }
 0x570   : > { %v20578_v0 = vpop.eup %15549  ;;  %15561 = vpow2.f32 %v9527_v22 }
 0x571   : > { %v20584_v41 = vpop.eup %15551 }
 0x572   : > { %9683 = vadd.xlane.f32.xlu1 %v20578_v0  ;;  %9647 = vadd.xlane.f32.xlu0 %v20576_v48 }
 0x573   : > { %v9406_v1 = vpop.xlane.xlu1 %9405  ;;  %v9374_v63 = vpop.xlane.xlu0 %9373 }
 0x574   : > { %v9484_v24 = vsub.f32 %v20348_v29, %v9406_v1  ;;  %v9468_v6 = vsub.f32 %v20345_v33, %v9374_v63  ;;  %v20586_v4 = vpop.eup %15553 }
 0x575   : > { %v20592_v33 = vpop.eup %15555 }
 0x576   : > { %v9597_v9 = vmul.f32 1.442695, %v9484_v24  ;;  %v9565_v44 = vmul.f32 1.442695, %v9468_v6  ;;  %9689 = vadd.xlane.f32.xlu1 %v20586_v4  ;;  %9653 = vadd.xlane.f32.xlu0 %v20584_v41 }
 0x577   : > { %v9404_v27 = vpop.xlane.xlu1 %9403  ;;  %v9372_v30 = vpop.xlane.xlu0 %9371 }
 0x578   : > { %15563 = vpow2.f32 %v9597_v9  ;;  %v9483_v58 = vsub.f32 %v20356_v38, %v9404_v27  ;;  %v9467_v29 = vsub.f32 %v20353_v59, %v9372_v30  ;;  %v20594_v21 = vpop.eup %15557 }
 0x579   : > { %15565 = vpow2.f32 %v9565_v44  ;;  %v20600_v17 = vpop.eup %15559 }
 0x57a   : > { %v9595_v35 = vmul.f32 1.442695, %v9483_v58  ;;  %v9563_v50 = vmul.f32 1.442695, %v9467_v29  ;;  %9687 = vadd.xlane.f32.xlu1 %v20594_v21  ;;  %9651 = vadd.xlane.f32.xlu0 %v20592_v33 }
 0x57b   : > { %v9410_v40 = vpop.xlane.xlu1 %9409  ;;  %v9378_v7 = vpop.xlane.xlu0 %9377 }
 0x57c   : > { %15567 = vpow2.f32 %v9595_v35  ;;  %v9486_v32 = vsub.f32 %v20364_v14, %v9410_v40  ;;  %v9470_v38 = vsub.f32 %v20361_v62, %v9378_v7 }
 0x57d   : > { %15569 = vpow2.f32 %v9563_v50  ;;  %v20605_v24 = vpop.eup %15561 }
 0x57e   : > { %v9601_v59 = vmul.f32 1.442695, %v9486_v32  ;;  %v9569_v13 = vmul.f32 1.442695, %v9470_v38  ;;  %9657 = vadd.xlane.f32.xlu0 %v20600_v17 }
 0x57f   : > { %v9408_v12 = vpop.xlane.xlu1 %9407  ;;  %v9376_v22 = vpop.xlane.xlu0 %9375 }
 0x580   : > { %15571 = vpow2.f32 %v9601_v59  ;;  %v9485_v1 = vsub.f32 %v20372_v43, %v9408_v12  ;;  %v9469_v63 = vsub.f32 %v20369_v28, %v9376_v22 }
 0x581   : > { %15573 = vpow2.f32 %v9569_v13 }
 0x582   : > { %v9599_v14 = vmul.f32 1.442695, %v9485_v1  ;;  %v9567_v62 = vmul.f32 1.442695, %v9469_v63  ;;  %9655 = vadd.xlane.f32.xlu0 %v20605_v24 }
 0x583   : > { %v9414_v6 = vpop.xlane.xlu1 %9413  ;;  %v9382_v9 = vpop.xlane.xlu0 %9381 }
 0x584   : > { %15575 = vpow2.f32 %v9599_v14  ;;  %v9488_v44 = vsub.f32 %v20380_v23, %v9414_v6  ;;  %v9472_v27 = vsub.f32 %v20377_v45, %v9382_v9 }
 0x585   : > { %v20610_v30 = vpop.eup %15563  ;;  %15577 = vpow2.f32 %v9567_v62 }
 0x586   : > { %v9605_v43 = vmul.f32 1.442695, %v9488_v44  ;;  %9725 = vadd.xlane.f32.xlu1 %v20610_v30  ;;  %v9573_v28 = vmul.f32 1.442695, %v9472_v27  ;;  %v20613_v58 = vpop.eup %15565 }
 0x587   : > { %v9412_v29 = vpop.xlane.xlu1 %9411  ;;  %v9380_v35 = vpop.xlane.xlu0 %9379  ;;  %9693 = vadd.xlane.f32.xlu0 %v20613_v58 }
 0x588   : > { %15579 = vpow2.f32 %v9605_v43  ;;  %v9487_v50 = vsub.f32 %v20388_v46, %v9412_v29  ;;  %v9471_v23 = vsub.f32 %v20385_v20, %v9380_v35  ;;  %v23250_v29 = vld [vmem:[#allocation19_spill] sm:$0xff] }
 0x589   : > { %v20618_v45 = vpop.eup %15567  ;;  %15581 = vpow2.f32 %v9573_v28 }
 0x58a   : > { %v9603_v40 = vmul.f32 1.442695, %v9487_v50  ;;  %9723 = vadd.xlane.f32.xlu1 %v20618_v45  ;;  %v9571_v7 = vmul.f32 1.442695, %v9471_v23  ;;  %v20621_v32 = vpop.eup %15569 }
 0x58b   : > { %v9418_v38 = vpop.xlane.xlu1 %9417  ;;  %v9386_v59 = vpop.xlane.xlu0 %9385  ;;  %9691 = vadd.xlane.f32.xlu0 %v20621_v32 }
 0x58c   : > { %15583 = vpow2.f32 %v9603_v40  ;;  %v9490_v13 = vsub.f32 %v20396_v61, %v9418_v38  ;;  %v9474_v46 = vsub.f32 %v20393_v11, %v9386_v59  ;;  %v23251_v38 = vld [vmem:[#allocation39_spill] sm:$0xff] }
 0x58d   : > { %v20626_v20 = vpop.eup %15571  ;;  %15585 = vpow2.f32 %v9571_v7 }
 0x58e   : > { %v9609_v12 = vmul.f32 1.442695, %v9490_v13  ;;  %9729 = vadd.xlane.f32.xlu1 %v20626_v20  ;;  %v9577_v22 = vmul.f32 1.442695, %v9474_v46  ;;  %v20629_v1 = vpop.eup %15573  ;;  %v23252_v13 = vld [vmem:[#allocation94_spill] sm:$0xff] }
 0x58f   : > { %v9416_v63 = vpop.xlane.xlu1 %9415  ;;  %v9384_v14 = vpop.xlane.xlu0 %9383  ;;  %9697 = vadd.xlane.f32.xlu0 %v20629_v1 }
 0x590   : > { %15587 = vpow2.f32 %v9609_v12  ;;  %v9489_v62 = vsub.f32 %v20404_v19, %v9416_v63  ;;  %v9473_v61 = vsub.f32 %v20401_v16, %v9384_v14 }
 0x591   : > { %v20634_v11 = vpop.eup %15575  ;;  %15589 = vpow2.f32 %v9577_v22 }
 0x592   : > { %v9607_v6 = vmul.f32 1.442695, %v9489_v62  ;;  %9727 = vadd.xlane.f32.xlu1 %v20634_v11  ;;  %v9575_v9 = vmul.f32 1.442695, %v9473_v61  ;;  %v20637_v44 = vpop.eup %15577  ;;  %v23253_v61 = vld [vmem:[#allocation79_spill] sm:$0xff] }
 0x593   : > { %v9422_v27 = vpop.xlane.xlu1 %9421  ;;  %v9390_v43 = vpop.xlane.xlu0 %9389  ;;  %9695 = vadd.xlane.f32.xlu0 %v20637_v44 }
 0x594   : > { %15591 = vpow2.f32 %v9607_v6  ;;  %v9492_v28 = vsub.f32 %v20412_v2, %v9422_v27  ;;  %v9476_v19 = vsub.f32 %v23250_v29, %v9390_v43 }
 0x595   : > { %v20642_v16 = vpop.eup %15579  ;;  %15593 = vpow2.f32 %v9575_v9  ;;  %v23254_v9 = vld [vmem:[#allocation23_spill] sm:$0xff] }
 0x596   : > { %v9613_v35 = vmul.f32 1.442695, %v9492_v28  ;;  %9733 = vadd.xlane.f32.xlu1 %v20642_v16  ;;  %v9581_v50 = vmul.f32 1.442695, %v9476_v19  ;;  %v20645_v23 = vpop.eup %15581 }
 0x597   : > { %v9420_v40 = vpop.xlane.xlu1 %9419  ;;  %v9388_v7 = vpop.xlane.xlu0 %9387  ;;  %9701 = vadd.xlane.f32.xlu0 %v20645_v23 }
 0x598   : > { %15595 = vpow2.f32 %v9613_v35  ;;  %v9491_v59 = vsub.f32 %v23251_v38, %v9420_v40  ;;  %v9475_v2 = vsub.f32 %v23252_v13, %v9388_v7  ;;  %v23256_v40 = vld [vmem:[#allocation8_spill] sm:$0xff]  ;;  %v23257_v38 = vld [vmem:[#allocation78_spill] sm:$0xff] }
 0x599   : > { %v20650_v46 = vpop.eup %15583  ;;  %15597 = vpow2.f32 %v9581_v50 }
 0x59a   : > { %v9611_v12 = vmul.f32 1.442695, %v9491_v59  ;;  %9731 = vadd.xlane.f32.xlu1 %v20650_v46  ;;  %v9579_v22 = vmul.f32 1.442695, %v9475_v2  ;;  %v20653_v63 = vpop.eup %15585 }
 0x59b   : > { %v9426_v14 = vpop.xlane.xlu1 %9425  ;;  %v9394_v62 = vpop.xlane.xlu0 %9393  ;;  %9699 = vadd.xlane.f32.xlu0 %v20653_v63 }
 0x59c   : > { %15599 = vpow2.f32 %v9611_v12  ;;  %v9494_v6 = vsub.f32 %v23253_v61, %v9426_v14  ;;  %v9478_v27 = vsub.f32 %v23254_v9, %v9394_v62  ;;  %v23259_v61 = vld [vmem:[#allocation22_spill] sm:$0xff]  ;;  %v23260_v9 = vld [vmem:[#allocation125_spill] sm:$0xff] }
 0x59d   : > { %v20658_v43 = vpop.eup %15587  ;;  %15601 = vpow2.f32 %v9579_v22 }
 0x59e   : > { %v9617_v28 = vmul.f32 1.442695, %v9494_v6  ;;  %9737 = vadd.xlane.f32.xlu1 %v20658_v43  ;;  %v9585_v29 = vmul.f32 1.442695, %v9478_v27  ;;  %v20661_v19 = vpop.eup %15589 }
 0x59f   : > { %23255 = vst [vmem:[#allocation61_spill] sm:$0xff] %v20661_v19  ;;  %v9424_v35 = vpop.xlane.xlu1 %9423  ;;  %v9392_v50 = vpop.xlane.xlu0 %9391  ;;  %9705 = vadd.xlane.f32.xlu0 %v20661_v19 }
 0x5a0   : > { %15603 = vpow2.f32 %v9617_v28  ;;  %v9493_v7 = vsub.f32 %v23256_v40, %v9424_v35  ;;  %v9477_v59 = vsub.f32 %v23257_v38, %v9392_v50  ;;  %v23263_v38 = vld [vmem:[#allocation64_spill] sm:$0xff] }
 0x5a1   : > { %v20666_v13 = vpop.eup %15591  ;;  %15605 = vpow2.f32 %v9585_v29 }
 0x5a2   : > { %v9615_v2 = vmul.f32 1.442695, %v9493_v7  ;;  %9735 = vadd.xlane.f32.xlu1 %v20666_v13  ;;  %v9583_v12 = vmul.f32 1.442695, %v9477_v59  ;;  %v20669_v22 = vpop.eup %15593 }
 0x5a3   : > { %23258 = vst [vmem:[#allocation36_spill] sm:$0xff] %v20669_v22  ;;  %v9430_v14 = vpop.xlane.xlu1 %9429  ;;  %v9398_v62 = vpop.xlane.xlu0 %9397  ;;  %9703 = vadd.xlane.f32.xlu0 %v20669_v22 }
 0x5a4   : > { %15607 = vpow2.f32 %v9615_v2  ;;  %v9496_v6 = vsub.f32 %v23259_v61, %v9430_v14  ;;  %v9480_v27 = vsub.f32 %v23260_v9, %v9398_v62  ;;  %v23264_v2 = vld [vmem:[#allocation24_spill] sm:$0xff] }
 0x5a5   : > { %v20674_v28 = vpop.eup %15595  ;;  %15609 = vpow2.f32 %v9583_v12 }
 0x5a6   : > { %23261 = vst [vmem:[#allocation38_spill] sm:$0xff] %v20674_v28  ;;  %v9621_v35 = vmul.f32 1.442695, %v9496_v6  ;;  %9741 = vadd.xlane.f32.xlu1 %v20674_v28  ;;  %v9589_v29 = vmul.f32 1.442695, %v9480_v27  ;;  %v20677_v50 = vpop.eup %15597 }
 0x5a7   : > { %23262 = vst [vmem:[#allocation18_spill] sm:$0xff] %v20677_v50  ;;  %v9428_v40 = vpop.xlane.xlu1 %9427  ;;  %v9396_v7 = vpop.xlane.xlu0 %9395  ;;  %9709 = vadd.xlane.f32.xlu0 %v20677_v50  ;;  %v23270_v50 = vld [vmem:[#allocation28_spill] sm:$0xff] }
 0x5a8   : > { %15611 = vpow2.f32 %v9621_v35  ;;  %v9495_v59 = vsub.f32 %v23263_v38, %v9428_v40  ;;  %v9479_v14 = vsub.f32 %v23264_v2, %v9396_v7  ;;  %v23269_v2 = vld [vmem:[#allocation9_spill] sm:$0xff] }
 0x5a9   : > { %v20682_v62 = vpop.eup %15599  ;;  %15613 = vpow2.f32 %v9589_v29  ;;  %v23268_v29 = vld [vmem:[#allocation73_spill] sm:$0xff] }
 0x5aa   : > { %23265 = vst [vmem:[#allocation53_spill] sm:$0xff] %v20682_v62  ;;  %v9619_v61 = vmul.f32 1.442695, %v9495_v59  ;;  %9739 = vadd.xlane.f32.xlu1 %v20682_v62  ;;  %v9587_v12 = vmul.f32 1.442695, %v9479_v14  ;;  %v20685_v6 = vpop.eup %15601 }
 0x5ab   : > { %23266 = vst [vmem:[#allocation55_spill] sm:$0xff] %v20685_v6  ;;  %v9434_v9 = vpop.xlane.xlu1 %9433  ;;  %v9402_v27 = vpop.xlane.xlu0 %9401  ;;  %9707 = vadd.xlane.f32.xlu0 %v20685_v6  ;;  %v23271_v6 = vld [vmem:[#allocation65_spill] sm:$0xff] }
 0x5ac   : > { %15615 = vpow2.f32 %v9619_v61  ;;  %v9498_v59 = vsub.f32 %v23268_v29, %v9434_v9  ;;  %v9482_v62 = vsub.f32 %v23271_v6, %v9402_v27 }
 0x5ad   : > { %v20688_v35 = vpop.eup %15603  ;;  %15617 = vpow2.f32 %v9587_v12 }
 0x5ae   : > { %23267 = vst [vmem:[#allocation60_spill] sm:$0xff] %v20688_v35  ;;  %9745 = vadd.xlane.f32.xlu1 %v20688_v35  ;;  %v20691_v40 = vpop.eup %15605  ;;  %v9625_v22 = vmul.f32 1.442695, %v9498_v59 }
 0x5af   : > { %v9432_v7 = vpop.xlane.xlu1 %9431  ;;  %v9400_v38 = vpop.xlane.xlu0 %9399  ;;  %9713 = vadd.xlane.f32.xlu0 %v20691_v40 }
 0x5b0   : > { %v9497_v14 = vsub.f32 %v23269_v2, %v9432_v7  ;;  %v9481_v28 = vsub.f32 %v23270_v50, %v9400_v38  ;;  %v9593_v7 = vmul.f32 1.442695, %v9482_v62 }
 0x5b1   : > { %v20697_v61 = vpop.eup %15607 }
 0x5b2   : > { %v9623_v19 = vmul.f32 1.442695, %v9497_v14  ;;  %9743 = vadd.xlane.f32.xlu1 %v20697_v61  ;;  %v9591_v12 = vmul.f32 1.442695, %v9481_v28  ;;  %v20701_v35 = vpop.eup %15609 }
 0x5b3   : > { %9711 = vadd.xlane.f32.xlu0 %v20701_v35 }
 0x5b4   : > { %15619 = vpow2.f32 %v9623_v19 }
 0x5b5   : > { %v20704_v9 = vpop.eup %15611  ;;  %15621 = vpow2.f32 %v9591_v12 }
 0x5b6   : > { %23272 = vst [vmem:[#allocation27_spill] sm:$0xff] %v20704_v9  ;;  %9749 = vadd.xlane.f32.xlu1 %v20704_v9  ;;  %v20707_v50 = vpop.eup %15613  ;;  %15623 = vpow2.f32 %v9625_v22 }
 0x5b7   : > { %23273 = vst [vmem:[#allocation69_spill] sm:$0xff] %v20707_v50  ;;  %9717 = vadd.xlane.f32.xlu0 %v20707_v50  ;;  %15625 = vpow2.f32 %v9593_v7 }
 0x5b9   : > { %v20710_v6 = vpop.eup %15615 }
 0x5ba   : > { %23274 = vst [vmem:[#allocation77_spill] sm:$0xff] %v20710_v6  ;;  %9747 = vadd.xlane.f32.xlu1 %v20710_v6  ;;  %v20713_v28 = vpop.eup %15617 }
 0x5bb   : > { %23275 = vst [vmem:[#allocation74_spill] sm:$0xff] %v20713_v28  ;;  %9715 = vadd.xlane.f32.xlu0 %v20713_v28 }
 0x5c1   : > { %v20716_v19 = vpop.eup %15619 }
 0x5c2   : > { %23276 = vst [vmem:[#allocation100_spill] sm:$0xff] %v20716_v19  ;;  %v20718_v62 = vpop.eup %15621  ;;  %9751 = vadd.xlane.f32.xlu1 %v20716_v19 }
 0x5c3   : > { %23277 = vst [vmem:[#allocation120_spill] sm:$0xff] %v20718_v62  ;;  %9719 = vadd.xlane.f32.xlu0 %v20718_v62  ;;  %v20722_v22 = vpop.eup %15623 }
 0x5c4   : > { %23278 = vst [vmem:[#allocation89_spill] sm:$0xff] %v20722_v22  ;;  %v20724_v27 = vpop.eup %15625 }
 0x5c5   : > { %23279 = vst [vmem:[#allocation88_spill] sm:$0xff] %v20724_v27 }
 0x5c6   : > { %9753 = vadd.xlane.f32.xlu1 %v20722_v22 }
 0x5c7   : > { %9721 = vadd.xlane.f32.xlu0 %v20724_v27  ;;  %v9630_v38 = vpop.xlane.xlu0 %9629 }
 0x5c8   : > { %15627 = vrcp.f32 %v9630_v38 }
 0x5cb   : > { %v9662_v29 = vpop.xlane.xlu1 %9661 }
 0x5cc   : > { %15629 = vrcp.f32 %v9662_v29 }
 0x5cf   : > { %v9660_v59 = vpop.xlane.xlu1 %9659  ;;  %v9628_v2 = vpop.xlane.xlu0 %9627 }
 0x5d0   : > { %15631 = vrcp.f32 %v9660_v59 }
 0x5d1   : > { %15633 = vrcp.f32 %v9628_v2 }
 0x5d3   : > { %v9666_v14 = vpop.xlane.xlu1 %9665  ;;  %v9634_v12 = vpop.xlane.xlu0 %9633 }
 0x5d4   : > { %15635 = vrcp.f32 %v9634_v12 }
 0x5d5   : > { %v15628_v19 = vpop.eup %15627 }
 0x5d6   : > { %v9820_v12 = vmul.f32 %v15628_v19, %v20481_v10  ;;  %v23285_v19 = vld [vmem:[#allocation92_spill] sm:$0xff] }
 0x5d7   : > { %v9664_v7 = vpop.xlane.xlu1 %9663  ;;  %v9632_v62 = vpop.xlane.xlu0 %9631 }
 0x5d8   : > { %15637 = vrcp.f32 %v9664_v7 }
 0x5d9   : > { %15639 = vrcp.f32 %v9632_v62  ;;  %v15630_v27 = vpop.eup %15629  ;;  %v23280_v62 = vld [vmem:[#allocation72_spill] sm:$0xff] }
 0x5da   : > { %15641 = vrcp.f32 %v9666_v14  ;;  %v9836_v2 = vmul.f32 %v15630_v27, %v20486_v49  ;;  %v23281_v14 = vld [vmem:[#allocation68_spill] sm:$0xff]  ;;  %v23283_v49 = vld [vmem:[#allocation66_spill] sm:$0xff] }
 0x5db   : > { %v9670_v22 = vpop.xlane.xlu1 %9669  ;;  %v9638_v50 = vpop.xlane.xlu0 %9637 }
 0x5dd   : > { %v15632_v28 = vpop.eup %15631 }
 0x5de   : > { %v15634_v9 = vpop.eup %15633  ;;  %v9835_v38 = vmul.f32 %v15632_v28, %v20490_v60  ;;  %v23282_v60 = vld [vmem:[#allocation67_spill] sm:$0xff] }
 0x5df   : > { %v9668_v29 = vpop.xlane.xlu1 %9667  ;;  %v9636_v6 = vpop.xlane.xlu0 %9635  ;;  %v9819_v59 = vmul.f32 %v15634_v9, %v20493_v25  ;;  %v23284_v9 = vld [vmem:[#allocation17_spill] sm:$0xff] }
 0x5e0   : > { %15643 = vrcp.f32 %v9668_v29  ;;  %15129 = vmatprep.mubr.f32.mxu0 %v9835_v38 }
 0x5e1   : > { %15645 = vrcp.f32 %v9636_v6  ;;  %15073 = vmatprep.mubr.f32.mxu1 %v9819_v59  ;;  %15130 = vmatmul.mubr.f32.vlgmr.msra.gmra.mxu0 %v9836_v2  ;;  %v15636_v25 = vpop.eup %15635  ;;  %v23287_v2 = vld [vmem:[#allocation82_spill] sm:$0xff] }
 0x5e2   : > { %15074 = vmatmul.mubr.f32.vlgmr.msra.gmra.mxu1 %v9820_v12  ;;  %15210 = vmatpush3.msra.mxu0 %v23280_v62  ;;  %15647 = vrcp.f32 %v9638_v50  ;;  %v9822_v12 = vmul.f32 %v15636_v25, %v20500_v52  ;;  %v23291_v25 = vld [vmem:[#allocation97_spill] sm:$0xff] }
 0x5e3   : > { %15154 = vmatpush3.msra.mxu1 %v23281_v14  ;;  %15211 = vmatprep.subr.mxu0 %v23282_v60  ;;  %v9674_v28 = vpop.xlane.xlu1 %9673  ;;  %v9642_v7 = vpop.xlane.xlu0 %9641  ;;  %15649 = vrcp.f32 %v9670_v22  ;;  %v23286_v22 = vld [vmem:[#allocation85_spill] sm:$0xff] }
 0x5e4   : > { %15155 = vmatprep.subr.mxu1 %v23283_v49  ;;  %15212 = vmatpush3.msra.mxu0 %v23282_v60  ;;  %v23289_v14 = vld [vmem:[#allocation93_spill] sm:$0xff] }
 0x5e5   : > { %v15638_v10 = vpop.eup %15637  ;;  %15156 = vmatpush3.msra.mxu1 %v23283_v49  ;;  %15213 = vmatprep.subr.mxu0 %v23284_v9 }
 0x5e6   : > { %v15640_v6 = vpop.eup %15639  ;;  %15157 = vmatprep.subr.mxu1 %v23285_v19  ;;  %15214 = vmatpush3.msra.mxu0 %v23284_v9  ;;  %v9837_v50 = vmul.f32 %v15638_v10, %v20506_v36  ;;  %v23288_v36 = vld [vmem:[#allocation90_spill] sm:$0xff]  ;;  %v23290_v10 = vld [vmem:[#allocation96_spill] sm:$0xff] }
 0x5e7   : > { %v15642_v27 = vpop.eup %15641  ;;  %15158 = vmatpush3.msra.mxu1 %v23285_v19  ;;  %15215 = vmatprep.subr.mxu0 %v23286_v22  ;;  %v9678_v38 = vpop.xlane.xlu1 %9677  ;;  %v9821_v59 = vmul.f32 %v15640_v6, %v20509_v42 }
 0x5e8   : > { %v9640_v29 = vpop.xlane.xlu0 %9639  ;;  %15159 = vmatprep.subr.mxu1 %v23287_v2  ;;  %15216 = vmatpush3.msra.mxu0 %v23286_v22  ;;  %v9838_v62 = vmul.f32 %v15642_v27, %v20497_v54  ;;  %v23292_v54 = vld [vmem:[#allocation107_spill] sm:$0xff] }
 0x5e9   : > { %15160 = vmatpush3.msra.mxu1 %v23287_v2  ;;  %15651 = vrcp.f32 %v9640_v29  ;;  %15076 = vmatprep.mubr.f32.mxu1 %v9821_v59  ;;  %v23294_v29 = vld [vmem:[#allocation84_spill] sm:$0xff] }
 0x5ea   : > { %15132 = vmatprep.mubr.f32.mxu0 %v9837_v50  ;;  %15161 = vmatprep.subr.mxu1 %v23288_v36  ;;  %15653 = vrcp.f32 %v9642_v7  ;;  %v23293_v7 = vld [vmem:[#allocation108_spill] sm:$0xff] }
 0x5eb   : > { %15217 = vmatprep.subr.mxu0 %v23289_v14  ;;  %15077 = vmatmul.mubr.f32.gmra.mxu1 %v9822_v12  ;;  %v9676_v60 = vpop.xlane.xlu1 %9675  ;;  %v23295_v59 = vld [vmem:[#allocation76_spill] sm:$0xff] }
 0x5ec   : > { %v9672_v42 = vpop.xlane.xlu0 %9671  ;;  %15133 = vmatmul.mubr.f32.gmra.mxu0 %v9838_v62  ;;  %15162 = vmatpush3.msra.mxu1 %v23288_v36  ;;  %v23297_v62 = vld [vmem:[#allocation112_spill] sm:$0xff] }
 0x5ed   : > { %v15644_v49 = vpop.eup %15643  ;;  %15218 = vmatpush3.msra.mxu0 %v23289_v14  ;;  %15163 = vmatprep.subr.mxu1 %v23290_v10  ;;  %15655 = vrcp.f32 %v9672_v42  ;;  %v23299_v42 = vld [vmem:[#allocation114_spill] sm:$0xff] }
 0x5ee   : > { %v15646_v52 = vpop.eup %15645  ;;  %15219 = vmatprep.subr.mxu0 %v23291_v25  ;;  %15164 = vmatpush3.msra.mxu1 %v23290_v10  ;;  %v9839_v27 = vmul.f32 %v15644_v49, %v20522_v3  ;;  %15657 = vrcp.f32 %v9674_v28  ;;  %v23296_v3 = vld [vmem:[#allocation111_spill] sm:$0xff]  ;;  %v23301_v10 = vld [vmem:[#allocation80_spill] sm:$0xff] }
 0x5ef   : > { %15220 = vmatpush3.msra.mxu0 %v23291_v25  ;;  %15165 = vmatprep.subr.mxu1 %v23292_v54  ;;  %v9682_v9 = vpop.xlane.xlu1 %9681  ;;  %v9823_v19 = vmul.f32 %v15646_v52, %v20525_v56  ;;  %v15648_v50 = vpop.eup %15647  ;;  %15659 = vrcp.f32 %v9676_v60  ;;  %v23302_v25 = vld [vmem:[#allocation20_spill] sm:$0xff] }
 0x5f0   : > { %v9646_v6 = vpop.xlane.xlu0 %9645  ;;  %15221 = vmatprep.subr.mxu0 %v23293_v7  ;;  %15166 = vmatpush3.msra.mxu1 %v23292_v54  ;;  %v15650_v22 = vpop.eup %15649  ;;  %v9824_v56 = vmul.f32 %v15648_v50, %v20517_v53  ;;  %v23298_v53 = vld [vmem:[#allocation113_spill] sm:$0xff]  ;;  %v23305_v50 = vld [vmem:[#allocation116_spill] sm:$0xff] }
 0x5f1   : > { %15222 = vmatpush3.msra.mxu0 %v23293_v7  ;;  %15167 = vmatprep.subr.mxu1 %v23294_v29  ;;  %v9840_v36 = vmul.f32 %v15650_v22, %v20514_v34  ;;  %v23300_v34 = vld [vmem:[#allocation87_spill] sm:$0xff] }
 0x5f2   : > { %15223 = vmatprep.subr.mxu0 %v23295_v59  ;;  %15168 = vmatpush3.msra.mxu1 %v23294_v29 }
 0x5f3   : > { %15224 = vmatpush3.msra.mxu0 %v23295_v59  ;;  %15079 = vmatprep.mubr.f32.mxu1 %v9823_v19  ;;  %v9680_v2 = vpop.xlane.xlu1 %9679  ;;  %v23303_v19 = vld [vmem:[#allocation83_spill] sm:$0xff] }
 0x5f4   : > { %v9644_v12 = vpop.xlane.xlu0 %9643  ;;  %15135 = vmatprep.mubr.f32.mxu0 %v9839_v27  ;;  %15169 = vmatprep.subr.mxu1 %v23296_v3  ;;  %15661 = vrcp.f32 %v9680_v2  ;;  %v23307_v2 = vld [vmem:[#allocation117_spill] sm:$0xff] }
 0x5f5   : > { %15225 = vmatprep.subr.mxu0 %v23297_v62  ;;  %15080 = vmatmul.mubr.f32.gmra.mxu1 %v9824_v56  ;;  %15663 = vrcp.f32 %v9644_v12  ;;  %v23306_v56 = vld [vmem:[#allocation118_spill] sm:$0xff] }
 0x5f6   : > { %v15652_v28 = vpop.eup %15651  ;;  %15665 = vrcp.f32 %v9678_v38  ;;  %15136 = vmatmul.mubr.f32.gmra.mxu0 %v9840_v36  ;;  %15170 = vmatpush3.msra.mxu1 %v23296_v3  ;;  %v23308_v36 = vld [vmem:[#allocation91_spill] sm:$0xff] }
 0x5f7   : > { %15667 = vrcp.f32 %v9646_v6  ;;  %15226 = vmatpush3.msra.mxu0 %v23297_v62  ;;  %15171 = vmatprep.subr.mxu1 %v23298_v53  ;;  %v9686_v14 = vpop.xlane.xlu1 %9685  ;;  %v9825_v38 = vmul.f32 %v15652_v28, %v20541_v5  ;;  %v15654_v49 = vpop.eup %15653  ;;  %v23309_v62 = vld [vmem:[#allocation21_spill] sm:$0xff] }
 0x5f8   : > { %v9650_v60 = vpop.xlane.xlu0 %9649  ;;  %15227 = vmatprep.subr.mxu0 %v23299_v42  ;;  %15172 = vmatpush3.msra.mxu1 %v23298_v53  ;;  %15669 = vrcp.f32 %v9682_v9  ;;  %v9826_v5 = vmul.f32 %v15654_v49, %v20533_v31  ;;  %v23304_v9 = vld [vmem:[#allocation115_spill] sm:$0xff] }
 0x5f9   : > { %15228 = vmatpush3.msra.mxu0 %v23299_v42  ;;  %15173 = vmatprep.subr.mxu1 %v23300_v34  ;;  %15671 = vrcp.f32 %v9650_v60 }
 0x5fa   : > { %15229 = vmatprep.subr.mxu0 %v23301_v10  ;;  %15174 = vmatpush3.msra.mxu1 %v23300_v34  ;;  %v15656_v52 = vpop.eup %15655  ;;  %v23310_v34 = vld [vmem:[#allocation37_spill] sm:$0xff] }
 0x5fb   : > { %15230 = vmatpush3.msra.mxu0 %v23301_v10  ;;  %15175 = vmatprep.subr.mxu1 %v23302_v25  ;;  %v9684_v54 = vpop.xlane.xlu1 %9683  ;;  %v9841_v7 = vmul.f32 %v15656_v52, %v20546_v8  ;;  %v15658_v27 = vpop.eup %15657 }
 0x5fc   : > { %v9648_v6 = vpop.xlane.xlu0 %9647  ;;  %15231 = vmatprep.subr.mxu0 %v23303_v19  ;;  %15176 = vmatpush3.msra.mxu1 %v23302_v25  ;;  %15673 = vrcp.f32 %v9684_v54  ;;  %v15660_v59 = vpop.eup %15659  ;;  %v9842_v8 = vmul.f32 %v15658_v27, %v20530_v51 }
 0x5fd   : > { %15232 = vmatpush3.msra.mxu0 %v23303_v19  ;;  %15082 = vmatprep.mubr.f32.mxu1 %v9825_v38  ;;  %15675 = vrcp.f32 %v9648_v6  ;;  %v9843_v28 = vmul.f32 %v15660_v59, %v20549_v47  ;;  %v23311_v38 = vld [vmem:[#allocation119_spill] sm:$0xff] }
 0x5fe   : > { %15677 = vrcp.f32 %v9686_v14  ;;  %15177 = vmatprep.subr.mxu1 %v23304_v9  ;;  %15233 = vmatprep.subr.mxu0 %v23305_v50 }
 0x5ff   : > { %15083 = vmatmul.mubr.f32.gmra.mxu1 %v9826_v5  ;;  %15234 = vmatpush3.msra.mxu0 %v23305_v50  ;;  %v9690_v22 = vpop.xlane.xlu1 %9689 }
 0x600   : > { %v9654_v29 = vpop.xlane.xlu0 %9653  ;;  %15178 = vmatpush3.msra.mxu1 %v23304_v9  ;;  %15235 = vmatprep.subr.mxu0 %v23306_v56  ;;  %15679 = vrcp.f32 %v9690_v22 }
 0x601   : > { %v15662_v31 = vpop.eup %15661  ;;  %15179 = vmatprep.subr.mxu1 %v23307_v2  ;;  %15236 = vmatpush3.msra.mxu0 %v23306_v56  ;;  %15681 = vrcp.f32 %v9654_v29 }
 0x602   : > { %v15664_v12 = vpop.eup %15663  ;;  %15180 = vmatpush3.msra.mxu1 %v23307_v2  ;;  %15138 = vmatprep.mubr.f32.mxu0 %v9841_v7  ;;  %v9845_v51 = vmul.f32 %v15662_v31, %v20565_v18 }
 0x603   : > { %v15666_v3 = vpop.eup %15665  ;;  %15181 = vmatprep.subr.mxu1 %v23308_v36  ;;  %15237 = vmatprep.subr.mxu0 %v23309_v62  ;;  %v9688_v53 = vpop.xlane.xlu1 %9687  ;;  %v9827_v42 = vmul.f32 %v15664_v12, %v20562_v39 }
 0x604   : > { %v9652_v14 = vpop.xlane.xlu0 %9651  ;;  %v15668_v60 = vpop.eup %15667  ;;  %15139 = vmatmul.mubr.f32.gmra.mxu0 %v9842_v8  ;;  %15182 = vmatpush3.msra.mxu1 %v23308_v36  ;;  %15683 = vrcp.f32 %v9688_v53  ;;  %v9844_v47 = vmul.f32 %v15666_v3, %v20538_v37 }
 0x605   : > { %15238 = vmatpush3.msra.mxu0 %v23309_v62  ;;  %15141 = vmatprep.mubr.f32.mxu0 %v9843_v28  ;;  %15685 = vrcp.f32 %v9652_v14  ;;  %v15670_v49 = vpop.eup %15669  ;;  %v9828_v10 = vmul.f32 %v15668_v60, %v20554_v57 }
 0x606   : > { %15183 = vmatprep.subr.mxu1 %v23310_v34  ;;  %15239 = vmatprep.subr.mxu0 %v23311_v38  ;;  %v15672_v52 = vpop.eup %15671  ;;  %v9846_v54 = vmul.f32 %v15670_v49, %v20557_v55 }
 0x607   : > { %15240 = vmatpush3.msra.mxu0 %v23311_v38  ;;  %15184 = vmatpush3.msra.mxu1 %v23310_v34  ;;  %v9830_v57 = vmul.f32 %v15672_v52, %v20569_v26 }
 0x608   : > { %v9658_v39 = vpop.xlane.xlu0 %9657  ;;  %15142 = vmatmul.mubr.f32.gmra.mxu0 %v9844_v47  ;;  %15085 = vmatprep.mubr.f32.mxu1 %v9827_v42 }
 0x609   : > { %v15674_v25 = vpop.eup %15673  ;;  %15144 = vmatprep.mubr.f32.mxu0 %v9845_v51  ;;  %15086 = vmatmul.mubr.f32.gmra.mxu1 %v9828_v10  ;;  %15687 = vrcp.f32 %v9658_v39 }
 0x60a   : > { %v15676_v18 = vpop.eup %15675  ;;  %v9847_v6 = vmul.f32 %v15674_v25, %v20578_v0 }
 0x60b   : > { %v15678_v37 = vpop.eup %15677  ;;  %v9829_v5 = vmul.f32 %v15676_v18, %v20576_v48 }
 0x60c   : > { %v9656_v19 = vpop.xlane.xlu0 %9655  ;;  %15145 = vmatmul.mubr.f32.gmra.mxu0 %v9846_v54  ;;  %v9848_v50 = vmul.f32 %v15678_v37, %v20572_v15 }
 0x60d   : > { %15689 = vrcp.f32 %v9656_v19  ;;  %15088 = vmatprep.mubr.f32.mxu1 %v9829_v5  ;;  %15147 = vmatprep.mubr.f32.mxu0 %v9847_v6  ;;  %v15680_v7 = vpop.eup %15679 }
 0x60e   : > { %15089 = vmatmul.mubr.f32.gmra.mxu1 %v9830_v57  ;;  %v15682_v55 = vpop.eup %15681  ;;  %v9850_v56 = vmul.f32 %v15680_v7, %v20586_v4 }
 0x60f   : > { %v9726_v9 = vpop.xlane.xlu1 %9725  ;;  %v9832_v15 = vmul.f32 %v15682_v55, %v20584_v41 }
 0x610   : > { %v9694_v27 = vpop.xlane.xlu0 %9693  ;;  %15148 = vmatmul.mubr.f32.gmra.mxu0 %v9848_v50  ;;  %15691 = vrcp.f32 %v9726_v9 }
 0x611   : > { %v15684_v0 = vpop.eup %15683 }
 0x612   : > { %v15686_v29 = vpop.eup %15685  ;;  %v9849_v48 = vmul.f32 %v15684_v0, %v20594_v21 }
 0x613   : > { %v9724_v22 = vpop.xlane.xlu1 %9723  ;;  %v9831_v26 = vmul.f32 %v15686_v29, %v20592_v33 }
 0x614   : > { %15693 = vrcp.f32 %v9724_v22  ;;  %v9692_v59 = vpop.xlane.xlu0 %9691  ;;  %15150 = vmatprep.mubr.f32.mxu0 %v9849_v48  ;;  %v23312_v48 = vld [vmem:[#allocation36_spill] sm:$0xff] }
 0x615   : > { %15695 = vrcp.f32 %v9694_v27  ;;  %15091 = vmatprep.mubr.f32.mxu1 %v9831_v26  ;;  %15151 = vmatmul.mubr.f32.gmra.mxu0 %v9850_v56  ;;  %v23313_v26 = vld [vmem:[#allocation61_spill] sm:$0xff] }
 0x616   : > { %15697 = vrcp.f32 %v9692_v59  ;;  %15092 = vmatmul.mubr.f32.gmra.mxu1 %v9832_v15  ;;  %v15688_v12 = vpop.eup %15687 }
 0x617   : > { %v9730_v31 = vpop.xlane.xlu1 %9729  ;;  %v9834_v4 = vmul.f32 %v15688_v12, %v20600_v17 }
 0x618   : > { %v9698_v2 = vpop.xlane.xlu0 %9697  ;;  %15699 = vrcp.f32 %v9730_v31 }
 0x61a   : > { %v15690_v8 = vpop.eup %15689 }
 0x61b   : > { %v9728_v3 = vpop.xlane.xlu1 %9727  ;;  %v9833_v21 = vmul.f32 %v15690_v8, %v20605_v24  ;;  %v23314_v8 = vld [vmem:[#allocation53_spill] sm:$0xff] }
 0x61c   : > { %15701 = vrcp.f32 %v9728_v3  ;;  %v9696_v33 = vpop.xlane.xlu0 %9695 }
 0x61d   : > { %15703 = vrcp.f32 %v9698_v2  ;;  %15094 = vmatprep.mubr.f32.mxu1 %v9833_v21  ;;  %v15692_v41 = vpop.eup %15691 }
 0x61e   : > { %15705 = vrcp.f32 %v9696_v33  ;;  %15095 = vmatmul.mubr.f32.gmra.mxu1 %v9834_v4  ;;  %v9868_v51 = vmul.f32 %v15692_v41, %v20610_v30  ;;  %v23315_v33 = vld [vmem:[#allocation38_spill] sm:$0xff] }
 0x61f   : > { %v9734_v36 = vpop.xlane.xlu1 %9733 }
 0x620   : > { %v9702_v28 = vpop.xlane.xlu0 %9701  ;;  %15707 = vrcp.f32 %v9734_v36  ;;  %v23316_v36 = vld [vmem:[#allocation55_spill] sm:$0xff] }
 0x621   : > { %v15694_v62 = vpop.eup %15693 }
 0x622   : > { %v15696_v53 = vpop.eup %15695  ;;  %v9867_v14 = vmul.f32 %v15694_v62, %v20618_v45 }
 0x623   : > { %v15698_v60 = vpop.eup %15697  ;;  %v9732_v42 = vpop.xlane.xlu1 %9731  ;;  %v9852_v34 = vmul.f32 %v15696_v53, %v20613_v58 }
 0x624   : > { %15709 = vrcp.f32 %v9732_v42  ;;  %15241 = vmatprep.mubr.f32.mxu0 %v9867_v14  ;;  %v9851_v24 = vmul.f32 %v15698_v60, %v20621_v32  ;;  %v9700_v17 = vpop.xlane.xlu0 %9699 }
 0x625   : > { %15242 = vmatmul.mubr.f32.vlgmr.msra.gmra.mxu0 %v9868_v51  ;;  %15711 = vrcp.f32 %v9702_v28  ;;  %v15700_v47 = vpop.eup %15699  ;;  %v23317_v28 = vld [vmem:[#allocation18_spill] sm:$0xff] }
 0x626   : > { %15713 = vrcp.f32 %v9700_v17  ;;  %15185 = vmatprep.mubr.f32.mxu1 %v9851_v24  ;;  %v9870_v32 = vmul.f32 %v15700_v47, %v20626_v20 }
 0x627   : > { %v9738_v38 = vpop.xlane.xlu1 %9737  ;;  %15186 = vmatmul.mubr.f32.vlgmr.msra.gmra.mxu1 %v9852_v34  ;;  %v23318_v34 = vld [vmem:[#allocation60_spill] sm:$0xff] }
 0x628   : > { %v9706_v49 = vpop.xlane.xlu0 %9705  ;;  %15715 = vrcp.f32 %v9738_v38 }
 0x629   : > { %v15702_v45 = vpop.eup %15701 }
 0x62a   : > { %v15704_v10 = vpop.eup %15703  ;;  %v9869_v39 = vmul.f32 %v15702_v45, %v20634_v11 }
 0x62b   : > { %v15706_v30 = vpop.eup %15705  ;;  %v9736_v52 = vpop.xlane.xlu1 %9735  ;;  %v9854_v18 = vmul.f32 %v15704_v10, %v20629_v1 }
 0x62c   : > { %15717 = vrcp.f32 %v9736_v52  ;;  %15244 = vmatprep.mubr.f32.mxu0 %v9869_v39  ;;  %v9853_v25 = vmul.f32 %v15706_v30, %v20637_v44  ;;  %v9704_v58 = vpop.xlane.xlu0 %9703 }
 0x62d   : > { %15245 = vmatmul.mubr.f32.gmra.mxu0 %v9870_v32  ;;  %15719 = vrcp.f32 %v9706_v49  ;;  %v15708_v6 = vpop.eup %15707  ;;  %v23319_v32 = vld [vmem:[#allocation77_spill] sm:$0xff] }
 0x62e   : > { %15721 = vrcp.f32 %v9704_v58  ;;  %15188 = vmatprep.mubr.f32.mxu1 %v9853_v25  ;;  %v9872_v44 = vmul.f32 %v15708_v6, %v20642_v16 }
 0x62f   : > { %v9742_v54 = vpop.xlane.xlu1 %9741  ;;  %15189 = vmatmul.mubr.f32.gmra.mxu1 %v9854_v18  ;;  %v23320_v18 = vld [vmem:[#allocation27_spill] sm:$0xff] }
 0x630   : > { %v9710_v37 = vpop.xlane.xlu0 %9709  ;;  %15723 = vrcp.f32 %v9742_v54 }
 0x631   : > { %v15710_v11 = vpop.eup %15709 }
 0x632   : > { %v15712_v19 = vpop.eup %15711  ;;  %v9871_v5 = vmul.f32 %v15710_v11, %v20650_v46  ;;  %v23322_v11 = vld [vmem:[#allocation69_spill] sm:$0xff] }
 0x633   : > { %v15714_v20 = vpop.eup %15713  ;;  %v9740_v57 = vpop.xlane.xlu1 %9739  ;;  %v9856_v50 = vmul.f32 %v15712_v19, %v20645_v23 }
 0x634   : > { %15725 = vrcp.f32 %v9740_v57  ;;  %15247 = vmatprep.mubr.f32.mxu0 %v9871_v5  ;;  %v9855_v9 = vmul.f32 %v15714_v20, %v20653_v63  ;;  %v9708_v1 = vpop.xlane.xlu0 %9707  ;;  %v23323_v5 = vld [vmem:[#allocation100_spill] sm:$0xff] }
 0x635   : > { %15248 = vmatmul.mubr.f32.gmra.mxu0 %v9872_v44  ;;  %15727 = vrcp.f32 %v9710_v37  ;;  %v15716_v27 = vpop.eup %15715  ;;  %v23324_v57 = vld [vmem:[#allocation120_spill] sm:$0xff] }
 0x636   : > { %15729 = vrcp.f32 %v9708_v1  ;;  %15191 = vmatprep.mubr.f32.mxu1 %v9855_v9  ;;  %v9874_v63 = vmul.f32 %v15716_v27, %v20658_v43  ;;  %v23326_v27 = vld [vmem:[#allocation88_spill] sm:$0xff] }
 0x637   : > { %v9746_v7 = vpop.xlane.xlu1 %9745  ;;  %15192 = vmatmul.mubr.f32.gmra.mxu1 %v9856_v50  ;;  %v23325_v50 = vld [vmem:[#allocation89_spill] sm:$0xff] }
 0x638   : > { %v9714_v55 = vpop.xlane.xlu0 %9713  ;;  %15731 = vrcp.f32 %v9746_v7 }
 0x639   : > { %v15718_v46 = vpop.eup %15717 }
 0x63a   : > { %v15720_v0 = vpop.eup %15719  ;;  %v9873_v22 = vmul.f32 %v15718_v46, %v20666_v13 }
 0x63b   : > { %v15722_v16 = vpop.eup %15721  ;;  %v9744_v29 = vpop.xlane.xlu1 %9743  ;;  %v9858_v56 = vmul.f32 %v15720_v0, %v23313_v26 }
 0x63c   : > { %15733 = vrcp.f32 %v9744_v29  ;;  %15250 = vmatprep.mubr.f32.mxu0 %v9873_v22  ;;  %v9857_v59 = vmul.f32 %v15722_v16, %v23312_v48  ;;  %v9712_v23 = vpop.xlane.xlu0 %9711 }
 0x63d   : > { %15251 = vmatmul.mubr.f32.gmra.mxu0 %v9874_v63  ;;  %15735 = vrcp.f32 %v9714_v55  ;;  %v15724_v31 = vpop.eup %15723 }
 0x63e   : > { %15737 = vrcp.f32 %v9712_v23  ;;  %15194 = vmatprep.mubr.f32.mxu1 %v9857_v59  ;;  %v9876_v4 = vmul.f32 %v15724_v31, %v23315_v33 }
 0x63f   : > { %v9750_v15 = vpop.xlane.xlu1 %9749  ;;  %15195 = vmatmul.mubr.f32.gmra.mxu1 %v9858_v56 }
 0x640   : > { %v9718_v2 = vpop.xlane.xlu0 %9717  ;;  %15739 = vrcp.f32 %v9750_v15 }
 0x641   : > { %v15726_v13 = vpop.eup %15725 }
 0x642   : > { %v15728_v12 = vpop.eup %15727  ;;  %v9875_v3 = vmul.f32 %v15726_v13, %v23314_v8 }
 0x643   : > { %v15730_v43 = vpop.eup %15729  ;;  %v9748_v21 = vpop.xlane.xlu1 %9747  ;;  %v9860_v53 = vmul.f32 %v15728_v12, %v23317_v28 }
 0x644   : > { %15741 = vrcp.f32 %v9748_v21  ;;  %15253 = vmatprep.mubr.f32.mxu0 %v9875_v3  ;;  %v9859_v41 = vmul.f32 %v15730_v43, %v23316_v36  ;;  %v9716_v62 = vpop.xlane.xlu0 %9715 }
 0x645   : > { %15254 = vmatmul.mubr.f32.gmra.mxu0 %v9876_v4  ;;  %15743 = vrcp.f32 %v9718_v2  ;;  %v15732_v14 = vpop.eup %15731 }
 0x646   : > { %15745 = vrcp.f32 %v9716_v62  ;;  %15197 = vmatprep.mubr.f32.mxu1 %v9859_v41  ;;  %v9878_v38 = vmul.f32 %v15732_v14, %v23318_v34 }
 0x647   : > { %15198 = vmatmul.mubr.f32.gmra.mxu1 %v9860_v53 }
 0x649   : > { %v15734_v60 = vpop.eup %15733 }
 0x64a   : > { %v15736_v42 = vpop.eup %15735  ;;  %v9877_v51 = vmul.f32 %v15734_v60, %v20697_v61 }
 0x64b   : > { %v15738_v24 = vpop.eup %15737  ;;  %v9752_v17 = vpop.xlane.xlu1 %9751  ;;  %v9862_v49 = vmul.f32 %v15736_v42, %v20691_v40 }
 0x64c   : > { %15747 = vrcp.f32 %v9752_v17  ;;  %15256 = vmatprep.mubr.f32.mxu0 %v9877_v51  ;;  %v9720_v47 = vpop.xlane.xlu0 %9719  ;;  %v9861_v45 = vmul.f32 %v15738_v24, %v20701_v35  ;;  %v23321_v35 = vld [vmem:[#allocation74_spill] sm:$0xff] }
 0x64d   : > { %15257 = vmatmul.mubr.f32.gmra.mxu0 %v9878_v38  ;;  %15749 = vrcp.f32 %v9720_v47  ;;  %v15740_v39 = vpop.eup %15739 }
 0x64e   : > { %15200 = vmatprep.mubr.f32.mxu1 %v9861_v45  ;;  %v9880_v54 = vmul.f32 %v15740_v39, %v23320_v18 }
 0x64f   : > { %v9754_v10 = vpop.xlane.xlu1 %9753  ;;  %15201 = vmatmul.mubr.f32.gmra.mxu1 %v9862_v49 }
 0x650   : > { %15751 = vrcp.f32 %v9754_v10  ;;  %v9722_v30 = vpop.xlane.xlu0 %9721 }
 0x651   : > { %v15742_v61 = vpop.eup %15741  ;;  %15753 = vrcp.f32 %v9722_v30 }
 0x652   : > { %v15744_v52 = vpop.eup %15743  ;;  %v9879_v25 = vmul.f32 %v15742_v61, %v23319_v32  ;;  %v23327_v61 = vld [vmem:[#allocation26_spill] sm:$0xff] }
 0x653   : > { %v15746_v58 = vpop.eup %15745  ;;  %v9864_v40 = vmul.f32 %v15744_v52, %v23322_v11 }
 0x654   : > { %15259 = vmatprep.mubr.f32.mxu0 %v9879_v25  ;;  %v9863_v6 = vmul.f32 %v15746_v58, %v23321_v35 }
 0x655   : > { %15260 = vmatmul.mubr.f32.gmra.mxu0 %v9880_v54 }
 0x656   : > { %15203 = vmatprep.mubr.f32.mxu1 %v9863_v6 }
 0x657   : > { %15204 = vmatmul.mubr.f32.gmra.mxu1 %v9864_v40 }
 0x659   : > { %v15748_v37 = vpop.eup %15747 }
 0x65a   : > { %v15750_v19 = vpop.eup %15749  ;;  %v9881_v20 = vmul.f32 %v15748_v37, %v23323_v5 }
 0x65b   : > { %v9865_v44 = vmul.f32 %v15750_v19, %v23324_v57 }
 0x65c   : > { %15262 = vmatprep.mubr.f32.mxu0 %v9881_v20 }
 0x65d   : > { %v15752_v9 = vpop.eup %15751  ;;  %15206 = vmatprep.mubr.f32.mxu1 %v9865_v44 }
 0x65e   : > { %v15754_v1 = vpop.eup %15753  ;;  %v9882_v7 = vmul.f32 %v15752_v9, %v23325_v50 }
 0x65f   : > { %v9866_v46 = vmul.f32 %v15754_v1, %v23326_v27 }
 0x660   : > { %15263 = vmatmul.mubr.f32.gmra.mxu0 %v9882_v7  ;;  %v23328_v7 = vld [vmem:[#allocation29_spill] sm:$0xff] }
 0x661   : > { %15207 = vmatmul.mubr.f32.gmra.mxu1 %v9866_v46 }
 0x6a1   : > { %v15131_v55 = vpop.f32.mrf.mxu0 }
 0x6a2   : > { %v15075_v0 = vpop.f32.mrf.mxu1 }
 0x6a3   : > { %v10094_v22 = vpop.f32.mrf.mxu0 }
 0x6a4   : > { %v9949_v29 = vpop.f32.mrf.mxu1 }
 0x6ab   : > { %v20856_v63 = vpop.f32.mrf.mxu1 }
 0x6ac   : > { %v20854_v16 = vpop.f32.mrf.mxu0 }
 0x6ad   : > { %v20862_v23 = vpop.f32.mrf.mxu1 }
 0x6ae   : > { %v20858_v48 = vpop.f32.mrf.mxu0 }
 0x6b5   : > { %v20864_v26 = vpop.f32.mrf.mxu1 }
 0x6b6   : > { %v20860_v59 = vpop.f32.mrf.mxu0 }
 0x6b7   : > { %v20870_v31 = vpop.f32.mrf.mxu1 }
 0x6b8   : > { %v20866_v56 = vpop.f32.mrf.mxu0 }
 0x6bf   : > { %v20872_v13 = vpop.f32.mrf.mxu1 }
 0x6c1   : > { %v20876_v12 = vpop.f32.mrf.mxu1 }
 0x6c4   : > { %v20868_v15 = vpop.f32.mrf.mxu0 }
 0x6c6   : > { %v20874_v2 = vpop.f32.mrf.mxu0 }
 0x6c8   : > { %v20878_v8 = vpop.f32.mrf.mxu0 }
 0x6c9   : > { %v20880_v3 = vpop.f32.mrf.mxu1 }
 0x6ca   : > { %v20882_v43 = vpop.f32.mrf.mxu0 }
 0x6cb   : > { %v20884_v21 = vpop.f32.mrf.mxu1 }
 0x6cc   : > { %v20886_v33 = vpop.f32.mrf.mxu0 }
 0x6ce   : > { %v20888_v4 = vpop.f32.mrf.mxu1  ;;  %v20890_v36 = vpop.f32.mrf.mxu0 }
 0x6d0   : > { %v20892_v41 = vpop.f32.mrf.mxu1  ;;  %v20894_v62 = vpop.f32.mrf.mxu0 }
 0x6d2   : > { %v20898_v53 = vpop.f32.mrf.mxu0 }
 0x6d5   : > { %v20902_v60 = vpop.f32.mrf.mxu0 }
 0x6d6   : > { %v20896_v28 = vpop.f32.mrf.mxu1 }
 0x6d7   : > { %v20906_v51 = vpop.f32.mrf.mxu0 }
 0x6d8   : > { %v20900_v14 = vpop.f32.mrf.mxu1 }
 0x6de   : > { %v20904_v42 = vpop.f32.mrf.mxu1 }
 0x6e0   : > { %v20908_v24 = vpop.f32.mrf.mxu1 }
 0x6e5   : > { %v15243_v17 = vpop.f32.mrf.mxu0 }
 0x6e6   : > { %v10547_v45 = vcombine.low %v15131_v55, %v15243_v17  ;;  %v10548_v30 = vcombine.high %v15131_v55, %v15243_v17 }
 0x6e7   : > { %v15187_v34 = vpop.f32.mrf.mxu1  ;;  %v10384_v49 = vpop.f32.mrf.mxu0 }
 0x6e8   : > { %v10531_v38 = vcombine.low %v15075_v0, %v15187_v34  ;;  %v10532_v10 = vcombine.high %v15075_v0, %v15187_v34  ;;  %v10479_v32 = vcombine.low %v10094_v22, %v10384_v49  ;;  %v10555_v25 = vrot.slane %v10547_v45, %v23327_v61 }
 0x6e9   : > { %v10239_v47 = vpop.f32.mrf.mxu1  ;;  %v10480_v54 = vcombine.high %v10094_v22, %v10384_v49  ;;  %v10562_v6 = vrot.slane %v10548_v30, %v23327_v61 }
 0x6ea   : > { %v10463_v39 = vcombine.low %v9949_v29, %v10239_v47  ;;  %v10539_v52 = vrot.slane %v10531_v38, %v23327_v61  ;;  %v10546_v58 = vrot.slane %v10532_v10, %v23327_v61  ;;  %v10464_v18 = vcombine.high %v9949_v29, %v10239_v47 }
 0x6eb   : > { %v10487_v37 = vrot.slane %v10479_v32, %v23327_v61  ;;  %v10494_v9 = vrot.slane %v10480_v54, %v23327_v61 }
 0x6ec   : > { %v10471_v35 = vrot.slane %v10463_v39, %v23327_v61  ;;  %v10563_v11 = vcombine.low %v10539_v52, %v10555_v25  ;;  %v10564_v40 = vcombine.high %v10539_v52, %v10555_v25  ;;  %v10579_v20 = vcombine.low %v10546_v58, %v10562_v6 }
 0x6ed   : > { %v15246_v19 = vpop.f32.mrf.mxu0  ;;  %v10580_v57 = vcombine.high %v10546_v58, %v10562_v6  ;;  %v10478_v44 = vrot.slane %v10464_v18, %v23327_v61 }
 0x6ee   : > { %v10495_v1 = vcombine.low %v10471_v35, %v10487_v37  ;;  %v10496_v50 = vcombine.high %v10471_v35, %v10487_v37  ;;  %v10571_v27 = vrot.slane %v10563_v11, %v23328_v7  ;;  %v10578_v46 = vrot.slane %v10564_v40, %v23328_v7 }
 0x6ef   : > { %v15190_v5 = vpop.f32.mrf.mxu1  ;;  %v10683_v55 = vcombine.low %v20854_v16, %v15246_v19  ;;  %v10587_v29 = vrot.slane %v10579_v20, %v23328_v7  ;;  %v10594_v17 = vrot.slane %v10580_v57, %v23328_v7  ;;  %v10511_v34 = vcombine.low %v10478_v44, %v10494_v9  ;;  %v10394_v47 = vpop.f32.mrf.mxu0 }
 0x6f0   : > { %v10667_v0 = vcombine.low %v20856_v63, %v15190_v5  ;;  %v10668_v22 = vcombine.high %v20856_v63, %v15190_v5  ;;  %v10512_v38 = vcombine.high %v10478_v44, %v10494_v9  ;;  %v10684_v49 = vcombine.high %v20854_v16, %v15246_v19 }
 0x6f1   : > { %v10249_v45 = vpop.f32.mrf.mxu1  ;;  %v10503_v10 = vrot.slane %v10495_v1, %v23328_v7  ;;  %v10510_v39 = vrot.slane %v10496_v50, %v23328_v7  ;;  %v11619_v30 = vcombine.low %v10571_v27, %v10578_v46  ;;  %v10691_v52 = vrot.slane %v10683_v55, %v23327_v61 }
 0x6f2   : > { %v10675_v32 = vrot.slane %v10667_v0, %v23327_v61  ;;  %v14346_v63 = vcombine.high %v10571_v27, %v10578_v46  ;;  %v10615_v25 = vcombine.low %v20858_v48, %v10394_v47  ;;  %v10682_v58 = vrot.slane %v10668_v22, %v23327_v61 }
 0x6f3   : > { %v10599_v18 = vcombine.low %v20862_v23, %v10249_v45  ;;  %v11635_v54 = vcombine.low %v10587_v29, %v10594_v17  ;;  %v10519_v35 = vrot.slane %v10511_v34, %v23328_v7  ;;  %v10526_v16 = vrot.slane %v10512_v38, %v23328_v7 }
 0x6f4   : > { %v10600_v6 = vcombine.high %v20862_v23, %v10249_v45  ;;  %v14347_v11 = vcombine.high %v10587_v29, %v10594_v17  ;;  %v10698_v40 = vrot.slane %v10684_v49, %v23327_v61  ;;  %v11551_v37 = vcombine.low %v10503_v10, %v10510_v39 }
 0x6f5   : > { %v10607_v19 = vrot.slane %v10599_v18, %v23327_v61  ;;  %v14344_v5 = vcombine.high %v10503_v10, %v10510_v39  ;;  %v10616_v20 = vcombine.high %v20858_v48, %v10394_v47  ;;  %v10699_v57 = vcombine.low %v10675_v32, %v10691_v52  ;;  %v15249_v46 = vpop.f32.mrf.mxu0 }
 0x6f6   : > { %v10700_v44 = vcombine.high %v10675_v32, %v10691_v52  ;;  %v20940_v9 = vrot.slane %v11619_v30, %v23327_v61  ;;  %v10623_v1 = vrot.slane %v10615_v25, %v23327_v61  ;;  %v10715_v50 = vcombine.low %v10682_v58, %v10698_v40 }
 0x6f7   : > { %v10716_v27 = vcombine.high %v10682_v58, %v10698_v40  ;;  %v20944_v23 = vrot.slane %v14346_v63, %v23327_v61  ;;  %v20947_v55 = vrot.slane %v11635_v54, %v23327_v61  ;;  %v11567_v0 = vcombine.low %v10519_v35, %v10526_v16  ;;  %v15193_v10 = vpop.f32.mrf.mxu1  ;;  %v10404_v63 = vpop.f32.mrf.mxu0 }
 0x6f8   : > { %v10614_v22 = vrot.slane %v10600_v6, %v23327_v61  ;;  %v20951_v48 = vrot.slane %v14347_v11, %v23327_v61  ;;  %v14345_v29 = vcombine.high %v10519_v35, %v10526_v16  ;;  %v10631_v17 = vcombine.low %v10607_v19, %v10623_v1 }
 0x6f9   : > { %v10632_v34 = vcombine.high %v10607_v19, %v10623_v1  ;;  %v20954_v38 = vrot.slane %v11551_v37, %v23327_v61  ;;  %v10630_v47 = vrot.slane %v10616_v20, %v23327_v61  ;;  %v10707_v45 = vrot.slane %v10699_v57, %v23328_v7  ;;  %v10259_v20 = vpop.f32.mrf.mxu1 }
 0x6fa   : > { %v10714_v49 = vrot.slane %v10700_v44, %v23328_v7  ;;  %v10723_v39 = vrot.slane %v10715_v50, %v23328_v7  ;;  %v10730_v30 = vrot.slane %v10716_v27, %v23328_v7  ;;  %v10819_v52 = vcombine.low %v20860_v59, %v15249_v46 }
 0x6fb   : > { %v10820_v32 = vcombine.high %v20860_v59, %v15249_v46  ;;  %v20964_v25 = vrot.slane %v14344_v5, %v23327_v61  ;;  %v20967_v58 = vrot.slane %v11567_v0, %v23327_v61  ;;  %v10647_v18 = vcombine.low %v10614_v22, %v10630_v47 }
 0x6fc   : > { %v10648_v54 = vcombine.high %v10614_v22, %v10630_v47  ;;  %v20970_v35 = vrot.slane %v14345_v29, %v23327_v61  ;;  %v10639_v16 = vrot.slane %v10631_v17, %v23328_v7  ;;  %v10646_v6 = vrot.slane %v10632_v34, %v23328_v7 }
 0x6fd   : > { %v10803_v11 = vcombine.low %v20864_v26, %v15193_v10  ;;  %v15252_v40 = vpop.f32.mrf.mxu0  ;;  %v11755_v59 = vcombine.low %v10707_v45, %v10714_v49  ;;  %v14350_v37 = vcombine.high %v10707_v45, %v10714_v49  ;;  %v10751_v19 = vcombine.low %v20866_v56, %v10404_v63 }
 0x6fe   : > { %v10752_v5 = vcombine.high %v20866_v56, %v10404_v63  ;;  %v11771_v57 = vcombine.low %v10723_v39, %v10730_v30  ;;  %v10827_v44 = vrot.slane %v10819_v52, %v23327_v61  ;;  %v10834_v1 = vrot.slane %v10820_v32, %v23327_v61  ;;  %v12883_v63 = vld [vmem:[%s16061_s0 + $0x10] sm:$0xff] }
 0x6ff   : > { %v10804_v50 = vcombine.high %v20864_v26, %v15193_v10  ;;  %v14351_v27 = vcombine.high %v10723_v39, %v10730_v30  ;;  %v20981_v46 = vrot.slane %v10647_v18, %v23328_v7  ;;  %v20984_v0 = vrot.slane %v10648_v54, %v23328_v7 }
 0x700   : > { %v10955_v22 = vcombine.low %v20868_v15, %v15252_v40  ;;  %v11687_v29 = vcombine.low %v10639_v16, %v10646_v6  ;;  %v10811_v56 = vrot.slane %v10803_v11, %v23327_v61  ;;  %v10956_v17 = vcombine.high %v20868_v15, %v15252_v40 }
 0x701   : > { %v10735_v34 = vcombine.low %v20870_v31, %v10259_v20  ;;  %v20991_v47 = vrot.slane %v11755_v59, %v23327_v61  ;;  %v20994_v26 = vrot.slane %v14350_v37, %v23327_v61  ;;  %v10759_v45 = vrot.slane %v10751_v19, %v23327_v61 }
 0x702   : > { %v10766_v49 = vrot.slane %v10752_v5, %v23327_v61  ;;  %v20999_v10 = vrot.slane %v11771_v57, %v23327_v61  ;;  %v14348_v39 = vcombine.high %v10639_v16, %v10646_v6  ;;  %v10818_v30 = vrot.slane %v10804_v50, %v23327_v61 }
 0x703   : > { %v10736_v15 = vcombine.high %v20870_v31, %v10259_v20  ;;  %v21004_v52 = vrot.slane %v14351_v27, %v23327_v61  ;;  %v11703_v32 = vcombine.low %v20981_v46, %v20984_v0  ;;  %v21011_v18 = vrot.slane %v10955_v22, %v23327_v61 }
 0x704   : > { %v21014_v54 = vrot.slane %v11687_v29, %v23327_v61  ;;  %v10835_v16 = vcombine.low %v10811_v56, %v10827_v44  ;;  %v21017_v6 = vrot.slane %v10956_v17, %v23327_v61  ;;  %v10743_v31 = vrot.slane %v10735_v34, %v23327_v61 }
 0x705   : > { %v11651_v11 = vcombine.low %v20940_v9, %v20944_v23  ;;  %v11667_v40 = vcombine.low %v20947_v55, %v20951_v48  ;;  %v11583_v59 = vcombine.low %v20954_v38, %v20964_v25  ;;  %v11599_v37 = vcombine.low %v20967_v58, %v20970_v35 }
 0x706   : > { %v21029_v19 = vrot.slane %v14348_v39, %v23327_v61  ;;  %v10836_v5 = vcombine.high %v10811_v56, %v10827_v44  ;;  %v10851_v20 = vcombine.low %v10818_v30, %v10834_v1  ;;  %v10750_v57 = vrot.slane %v10736_v15, %v23327_v61  ;;  %v15196_v39 = vpop.f32.mrf.mxu1 }
 0x707   : > { %v21033_v50 = vrot.slane %v11651_v11, %v23328_v7  ;;  %v21036_v27 = vrot.slane %v11667_v40, %v23328_v7  ;;  %v21039_v22 = vrot.slane %v11583_v59, %v23328_v7  ;;  %v21042_v29 = vrot.slane %v11599_v37, %v23328_v7 }
 0x708   : > { %v21045_v17 = vrot.slane %v10835_v16, %v23328_v7  ;;  %v10852_v34 = vcombine.high %v10818_v30, %v10834_v1  ;;  %v10767_v44 = vcombine.low %v10743_v31, %v10759_v45  ;;  %v10768_v56 = vcombine.high %v10743_v31, %v10759_v45  ;;  %v10414_v45 = vpop.f32.mrf.mxu0 }
 0x709   : > { %23329 = vst [vmem:[#allocation33_spill] sm:$0xff] %v21033_v50  ;;  %23330 = vst [vmem:[#allocation103_spill] sm:$0xff] %v21036_v27  ;;  %v11684_v15 = vcombine.high %v21033_v50, %v21036_v27  ;;  %v11616_v11 = vcombine.high %v21039_v22, %v21042_v29  ;;  %v11652_v40 = vcombine.high %v20940_v9, %v20944_v23 }
 0x70a   : > { %23331 = vst [vmem:[#allocation102_spill] sm:$0xff] %v21039_v22  ;;  %v11668_v59 = vcombine.high %v20947_v55, %v20951_v48  ;;  %v10850_v37 = vrot.slane %v10836_v5, %v23328_v7  ;;  %v10859_v16 = vrot.slane %v10851_v20, %v23328_v7  ;;  %v10783_v1 = vcombine.low %v10750_v57, %v10766_v49  ;;  %v10269_v20 = vpop.f32.mrf.mxu1 }
 0x70b   : > { %v10784_v30 = vcombine.high %v10750_v57, %v10766_v49  ;;  %12657 = vrot.lane.b32.xlu1 %v11684_v15, %s15914_s30  ;;  %12655 = vrot.lane.b32.xlu0 %v11616_v11, %s15914_s30  ;;  %v21060_v31 = vrot.slane %v11652_v40, %v23328_v7  ;;  %v11584_v23 = vcombine.high %v20954_v38, %v20964_v25 }
 0x70c   : > { %v21063_v9 = vrot.slane %v11668_v59, %v23328_v7  ;;  %v10866_v55 = vrot.slane %v10852_v34, %v23328_v7  ;;  %v10775_v48 = vrot.slane %v10767_v44, %v23328_v7  ;;  %v10782_v49 = vrot.slane %v10768_v56, %v23328_v7 }
 0x70d   : > { %v10939_v5 = vcombine.low %v20872_v13, %v15196_v39  ;;  %v10940_v15 = vcombine.high %v20872_v13, %v15196_v39  ;;  %v21075_v11 = vrot.slane %v11584_v23, %v23328_v7  ;;  %v11600_v38 = vcombine.high %v20967_v58, %v20970_v35 }
 0x70e   : > { %v11685_v57 = vcombine.low %v21060_v31, %v21063_v9  ;;  %v11891_v25 = vcombine.low %v21045_v17, %v10850_v37  ;;  %v10791_v34 = vrot.slane %v10783_v1, %v23328_v7  ;;  %v10887_v44 = vcombine.low %v20874_v2, %v10414_v45 }
 0x70f   : > { %v10888_v56 = vcombine.high %v20874_v2, %v10414_v45  ;;  %v10798_v40 = vrot.slane %v10784_v30, %v23328_v7  ;;  %v21086_v13 = vrot.slane %v11600_v38, %v23328_v7  ;;  %v10871_v39 = vcombine.low %v20876_v12, %v10269_v20  ;;  %v12884_v45 = vld [vmem:[%s16061_s0 + $0x18] sm:$0xff] }
 0x710   : > { %12721 = vrot.lane.b32.xlu1 %v11685_v57, %s15915_s6  ;;  %v10872_v58 = vcombine.high %v20876_v12, %v10269_v20  ;;  %v21091_v35 = vrot.slane %v11703_v32, %v23327_v61  ;;  %v14354_v59 = vcombine.high %v21045_v17, %v10850_v37  ;;  %v11907_v1 = vcombine.low %v10859_v16, %v10866_v55 }
 0x711   : > { %v14355_v2 = vcombine.high %v10859_v16, %v10866_v55  ;;  %v11823_v30 = vcombine.low %v10775_v48, %v10782_v49  ;;  %v10947_v23 = vrot.slane %v10939_v5, %v23327_v61  ;;  %v10954_v57 = vrot.slane %v10940_v15, %v23327_v61  ;;  %15265 = vmatprep.subr.mxu1 %v12884_v45 }
 0x712   : > { %v11618_v38 = vcombine.high %v21075_v11, %v21086_v13  ;;  %v23332_v12 = vcombine.high %v20981_v46, %v20984_v0  ;;  %v14352_v17 = vcombine.high %v10775_v48, %v10782_v49  ;;  %v10895_v37 = vrot.slane %v10887_v44, %v23327_v61  ;;  %15266 = vmatpush3.msra.mxu1 %v12884_v45  ;;  %v12882_v46 = vld [vmem:[%s16061_s0 + $0x8] sm:$0xff]  ;;  %v15255_v45 = vpop.f32.mrf.mxu0 }
 0x713   : > { %v10902_v16 = vrot.slane %v10888_v56, %v23327_v61  ;;  %v21109_v55 = vrot.slane %v11891_v25, %v23327_v61  ;;  %v11839_v5 = vcombine.low %v10791_v34, %v10798_v40  ;;  %v10879_v20 = vrot.slane %v10871_v39, %v23327_v61  ;;  %15267 = vmatprep.subr.mxu1 %v12883_v63 }
 0x714   : > { %v21104_v32 = vrot.slane %v23332_v12, %v23327_v61  ;;  %12783 = vrot.lane.b32.xlu0 %v11618_v38, %s15916_s13  ;;  %v10886_v15 = vrot.slane %v10872_v58, %v23327_v61  ;;  %v21116_v0 = vrot.slane %v14354_v59, %v23327_v61  ;;  %v21119_v48 = vrot.slane %v11907_v1, %v23327_v61  ;;  %v15199_v38 = vpop.f32.mrf.mxu1 }
 0x715   : > { %v21122_v49 = vrot.slane %v14355_v2, %v23327_v61  ;;  %v14353_v25 = vcombine.high %v10791_v34, %v10798_v40  ;;  %v21125_v44 = vrot.slane %v11823_v30, %v23327_v61  ;;  %v10971_v56 = vcombine.low %v10947_v23, %v21011_v18  ;;  %15268 = vmatpush3.msra.mxu1 %v12883_v63  ;;  %v12881_v2 = vld [vmem:[%s16061_s0] sm:$0xff] }
 0x716   : > { %v10972_v39 = vcombine.high %v10947_v23, %v21011_v18  ;;  %v10987_v58 = vcombine.low %v10954_v57, %v21017_v6  ;;  %v21131_v59 = vrot.slane %v14352_v17, %v23327_v61  ;;  %v10988_v1 = vcombine.high %v10954_v57, %v21017_v6  ;;  %15269 = vmatprep.subr.mxu1 %v12882_v46 }
 0x717   : > { %v11686_v34 = vcombine.high %v21060_v31, %v21063_v9  ;;  %v11719_v40 = vcombine.low %v21014_v54, %v21029_v19  ;;  %v21140_v30 = vrot.slane %v11839_v5, %v23327_v61  ;;  %v10903_v18 = vcombine.low %v10879_v20, %v10895_v37  ;;  %15270 = vmatpush3.msra.mxu1 %v12882_v46 }
 0x718   : > { %v10904_v23 = vcombine.high %v10879_v20, %v10895_v37  ;;  %v10919_v63 = vcombine.low %v10886_v15, %v10902_v16  ;;  %v21143_v12 = vrot.slane %v14353_v25, %v23327_v61  ;;  %v10920_v6 = vcombine.high %v10886_v15, %v10902_v16  ;;  %15271 = vmatprep.subr.mxu1 %v12881_v2 }
 0x719   : > { %12785 = vrot.lane.b32.xlu1 %v11686_v34, %s15916_s13  ;;  %v21147_v31 = vrot.slane %v11719_v40, %v23328_v7  ;;  %v11735_v9 = vcombine.low %v21091_v35, %v21104_v32  ;;  %v10979_v57 = vrot.slane %v10971_v56, %v23328_v7  ;;  %v10986_v17 = vrot.slane %v10972_v39, %v23328_v7  ;;  %v10424_v40 = vpop.f32.mrf.mxu0 }
 0x71a   : > { %v10995_v37 = vrot.slane %v10987_v58, %v23328_v7  ;;  %v11091_v5 = vcombine.low %v20878_v8, %v15255_v45  ;;  %v11002_v20 = vrot.slane %v10988_v1, %v23328_v7  ;;  %v11617_v15 = vcombine.low %v21075_v11, %v21086_v13  ;;  %15272 = vmatpush3.msra.mxu1 %v12881_v2  ;;  %v10279_v1 = vpop.f32.mrf.mxu1 }
 0x71b   : > { %23333 = vst [vmem:[#allocation105_spill] sm:$0xff] %v21147_v31  ;;  %v21157_v16 = vrot.slane %v11735_v9, %v23328_v7  ;;  %v11720_v46 = vcombine.high %v21014_v54, %v21029_v19  ;;  %v10911_v25 = vrot.slane %v10903_v18, %v23328_v7  ;;  %v10918_v56 = vrot.slane %v10904_v23, %v23328_v7 }
 0x71c   : > { %v10927_v39 = vrot.slane %v10919_v63, %v23328_v7  ;;  %v11736_v58 = vcombine.high %v21091_v35, %v21104_v32  ;;  %v10934_v34 = vrot.slane %v10920_v6, %v23328_v7  ;;  %v11075_v54 = vcombine.low %v20880_v3, %v15199_v38 }
 0x71d   : > { %23334 = vst [vmem:[#allocation104_spill] sm:$0xff] %v21157_v16  ;;  %v11752_v11 = vcombine.high %v21147_v31, %v21157_v16  ;;  %12719 = vrot.lane.b32.xlu1 %v11617_v15, %s15915_s6  ;;  %v11734_v19 = vrot.slane %v11720_v46, %v23328_v7  ;;  %v12027_v13 = vcombine.low %v10979_v57, %v10986_v17 }
 0x71e   : > { %v11092_v2 = vcombine.high %v20878_v8, %v15255_v45  ;;  %v11099_v18 = vrot.slane %v11091_v5, %v23327_v61  ;;  %v11076_v35 = vcombine.high %v20880_v3, %v15199_v38  ;;  %v14358_v32 = vcombine.high %v10979_v57, %v10986_v17 }
 0x71f   : > { %v12043_v23 = vcombine.low %v10995_v37, %v11002_v20  ;;  %12659 = vrot.lane.b32.xlu0 %v11752_v11, %s15914_s30  ;;  %v11750_v63 = vrot.slane %v11736_v58, %v23328_v7  ;;  %v11007_v6 = vcombine.low %v20884_v21, %v10279_v1  ;;  %v14359_v9 = vcombine.high %v10995_v37, %v11002_v20 }
 0x720   : > { %v11959_v15 = vcombine.low %v10911_v25, %v10918_v56  ;;  %v14356_v31 = vcombine.high %v10911_v25, %v10918_v56  ;;  %v11023_v46 = vcombine.low %v20882_v43, %v10424_v40  ;;  %v11975_v16 = vcombine.low %v10927_v39, %v10934_v34 }
 0x721   : > { %v11024_v8 = vcombine.high %v20882_v43, %v10424_v40  ;;  %v11083_v45 = vrot.slane %v11075_v54, %v23327_v61  ;;  %v11753_v5 = vcombine.low %v11734_v19, %v11750_v63  ;;  %v21184_v3 = vrot.slane %v12027_v13, %v23327_v61 }
 0x722   : > { %v11106_v38 = vrot.slane %v11092_v2, %v23327_v61  ;;  %v11090_v57 = vrot.slane %v11076_v35, %v23327_v61  ;;  %v11008_v17 = vcombine.high %v20884_v21, %v10279_v1  ;;  %v21190_v37 = vrot.slane %v14358_v32, %v23327_v61  ;;  %v15258_v1 = vpop.f32.mrf.mxu0 }
 0x723   : > { %v21193_v20 = vrot.slane %v12043_v23, %v23327_v61  ;;  %v14357_v25 = vcombine.high %v10927_v39, %v10934_v34  ;;  %12723 = vrot.lane.b32.xlu0 %v11753_v5, %s15915_s6  ;;  %v11015_v43 = vrot.slane %v11007_v6, %v23327_v61  ;;  %v21198_v56 = vrot.slane %v14359_v9, %v23327_v61 }
 0x724   : > { %v21201_v58 = vrot.slane %v11959_v15, %v23327_v61  ;;  %v21204_v40 = vrot.slane %v14356_v31, %v23327_v61  ;;  %v11031_v21 = vrot.slane %v11023_v46, %v23327_v61  ;;  %v21208_v11 = vrot.slane %v11975_v16, %v23327_v61 }
 0x725   : > { %v11038_v39 = vrot.slane %v11024_v8, %v23327_v61  ;;  %v11107_v34 = vcombine.low %v11083_v45, %v11099_v18  ;;  %v11108_v54 = vcombine.high %v11083_v45, %v11099_v18  ;;  %v11123_v13 = vcombine.low %v11090_v57, %v11106_v38  ;;  %v15202_v8 = vpop.f32.mrf.mxu1 }
 0x726   : > { %v11022_v2 = vrot.slane %v11008_v17, %v23327_v61  ;;  %v11787_v35 = vcombine.low %v20991_v47, %v20994_v26  ;;  %v11803_v31 = vcombine.low %v20999_v10, %v21004_v52  ;;  %v21217_v32 = vrot.slane %v14357_v25, %v23327_v61 }
 0x727   : > { %v11124_v23 = vcombine.high %v11090_v57, %v11106_v38  ;;  %v11227_v16 = vcombine.low %v20886_v33, %v15258_v1  ;;  %v11039_v6 = vcombine.low %v11015_v43, %v11031_v21  ;;  %v11040_v9 = vcombine.high %v11015_v43, %v11031_v21 }
 0x728   : > { %v21221_v15 = vrot.slane %v11787_v35, %v23328_v7  ;;  %v21224_v18 = vrot.slane %v11803_v31, %v23328_v7  ;;  %v11754_v46 = vcombine.high %v11734_v19, %v11750_v63  ;;  %v11115_v45 = vrot.slane %v11107_v34, %v23328_v7 }
 0x729   : > { %v11122_v5 = vrot.slane %v11108_v54, %v23328_v7  ;;  %v11788_v17 = vcombine.high %v20991_v47, %v20994_v26  ;;  %v11804_v38 = vcombine.high %v20999_v10, %v21004_v52  ;;  %v11131_v57 = vrot.slane %v11123_v13, %v23328_v7  ;;  %v10289_v54 = vpop.f32.mrf.mxu1 }
 0x72a   : > { %23335 = vst [vmem:[#allocation81_spill] sm:$0xff] %v21221_v15  ;;  %23336 = vst [vmem:[#allocation30_spill] sm:$0xff] %v21224_v18  ;;  %v11055_v25 = vcombine.low %v11022_v2, %v11038_v39  ;;  %v11056_v43 = vcombine.high %v11022_v2, %v11038_v39  ;;  %v11820_v21 = vcombine.high %v21221_v15, %v21224_v18  ;;  %12787 = vrot.lane.b32.xlu0 %v11754_v46, %s15916_s13  ;;  %v10434_v2 = vpop.f32.mrf.mxu0 }
 0x72b   : > { %v11138_v19 = vrot.slane %v11124_v23, %v23328_v7  ;;  %v11802_v63 = vrot.slane %v11788_v17, %v23328_v7  ;;  %v11818_v34 = vrot.slane %v11804_v38, %v23328_v7  ;;  %v11855_v47 = vcombine.low %v21125_v44, %v21131_v59 }
 0x72c   : > { %v11228_v26 = vcombine.high %v20886_v33, %v15258_v1  ;;  %v11047_v10 = vrot.slane %v11039_v6, %v23328_v7  ;;  %v11054_v52 = vrot.slane %v11040_v9, %v23328_v7  ;;  %12661 = vrot.lane.b32.xlu1 %v11820_v21, %s15914_s30  ;;  %v11871_v39 = vcombine.low %v21140_v30, %v21143_v12 }
 0x72d   : > { %v12163_v13 = vcombine.low %v11115_v45, %v11122_v5  ;;  %v11211_v35 = vcombine.low %v20888_v4, %v15202_v8  ;;  %v11212_v31 = vcombine.high %v20888_v4, %v15202_v8  ;;  %v21250_v23 = vrot.slane %v11855_v47, %v23328_v7 }
 0x72e   : > { %v14362_v33 = vcombine.high %v11115_v45, %v11122_v5  ;;  %v11063_v1 = vrot.slane %v11055_v25, %v23328_v7  ;;  %v11070_v6 = vrot.slane %v11056_v43, %v23328_v7  ;;  %v11821_v9 = vcombine.low %v11802_v63, %v11818_v34 }
 0x72f   : > { %v12179_v46 = vcombine.low %v11131_v57, %v11138_v19  ;;  %v11235_v17 = vrot.slane %v11227_v16, %v23327_v61  ;;  %v21256_v38 = vrot.slane %v11871_v39, %v23328_v7  ;;  %v11143_v21 = vcombine.low %v20892_v41, %v10289_v54 }
 0x730   : > { %v14363_v15 = vcombine.high %v11131_v57, %v11138_v19  ;;  %v12095_v18 = vcombine.low %v11047_v10, %v11054_v52  ;;  %v14360_v4 = vcombine.high %v11047_v10, %v11054_v52  ;;  %v11159_v8 = vcombine.low %v20890_v36, %v10434_v2  ;;  %12725 = vrot.lane.b32.xlu1 %v11821_v9, %s15915_s6  ;;  %v15261_v9 = vpop.f32.mrf.mxu0 }
 0x731   : > { %v11160_v45 = vcombine.high %v20890_v36, %v10434_v2  ;;  %v11219_v5 = vrot.slane %v11211_v35, %v23327_v61  ;;  %v11226_v25 = vrot.slane %v11212_v31, %v23327_v61  ;;  %v11888_v16 = vcombine.high %v21250_v23, %v21256_v38 }
 0x732   : > { %v21267_v43 = vrot.slane %v12163_v13, %v23327_v61  ;;  %v21270_v57 = vrot.slane %v14362_v33, %v23327_v61  ;;  %v11242_v19 = vrot.slane %v11228_v26, %v23327_v61  ;;  %v12111_v47 = vcombine.low %v11063_v1, %v11070_v6 }
 0x733   : > { %v21274_v10 = vrot.slane %v12179_v46, %v23327_v61  ;;  %v14361_v36 = vcombine.high %v11063_v1, %v11070_v6  ;;  %12663 = vrot.lane.b32.xlu0 %v11888_v16, %s15914_s30  ;;  %v11144_v52 = vcombine.high %v20892_v41, %v10289_v54  ;;  %v11151_v39 = vrot.slane %v11143_v21, %v23327_v61  ;;  %v15205_v46 = vpop.f32.mrf.mxu1 }
 0x734   : > { %v21280_v2 = vrot.slane %v14363_v15, %v23327_v61  ;;  %v21283_v13 = vrot.slane %v12095_v18, %v23327_v61  ;;  %v21286_v35 = vrot.slane %v14360_v4, %v23327_v61  ;;  %v11167_v26 = vrot.slane %v11159_v8, %v23327_v61 }
 0x735   : > { %v11174_v31 = vrot.slane %v11160_v45, %v23327_v61  ;;  %v11243_v33 = vcombine.low %v11219_v5, %v11235_v17  ;;  %v11244_v1 = vcombine.high %v11219_v5, %v11235_v17  ;;  %v11259_v6 = vcombine.low %v11226_v25, %v11242_v19 }
 0x736   : > { %v21291_v41 = vrot.slane %v12111_v47, %v23327_v61  ;;  %v11260_v54 = vcombine.high %v11226_v25, %v11242_v19  ;;  %v11822_v15 = vcombine.high %v11802_v63, %v11818_v34  ;;  %v11856_v18 = vcombine.high %v21125_v44, %v21131_v59 }
 0x737   : > { %v21296_v21 = vrot.slane %v14361_v36, %v23327_v61  ;;  %v11158_v4 = vrot.slane %v11144_v52, %v23327_v61  ;;  %v11175_v8 = vcombine.low %v11151_v39, %v11167_v26  ;;  %v11176_v45 = vcombine.high %v11151_v39, %v11167_v26 }
 0x738   : > { %v11363_v17 = vcombine.low %v20894_v62, %v15261_v9  ;;  %12789 = vrot.lane.b32.xlu1 %v11822_v15, %s15916_s13  ;;  %v11870_v5 = vrot.slane %v11856_v18, %v23328_v7  ;;  %v11872_v63 = vcombine.high %v21140_v30, %v21143_v12  ;;  %v11923_v44 = vcombine.low %v21109_v55, %v21116_v0  ;;  %v10299_v12 = vpop.f32.mrf.mxu1 }
 0x739   : > { %v11251_v59 = vrot.slane %v11243_v33, %v23328_v7  ;;  %v11258_v34 = vrot.slane %v11244_v1, %v23328_v7  ;;  %v11267_v25 = vrot.slane %v11259_v6, %v23328_v7  ;;  %v11939_v16 = vcombine.low %v21119_v48, %v21122_v49  ;;  %v10444_v33 = vpop.f32.mrf.mxu0 }
 0x73a   : > { %v11274_v19 = vrot.slane %v11260_v54, %v23328_v7  ;;  %v11886_v47 = vrot.slane %v11872_v63, %v23328_v7  ;;  %v21314_v36 = vrot.slane %v11923_v44, %v23328_v7  ;;  %v11347_v30 = vcombine.low %v20896_v28, %v15205_v46 }
 0x73b   : > { %v11183_v52 = vrot.slane %v11175_v8, %v23328_v7  ;;  %v11190_v39 = vrot.slane %v11176_v45, %v23328_v7  ;;  %v11191_v26 = vcombine.low %v11158_v4, %v11174_v31  ;;  %v21320_v1 = vrot.slane %v11939_v16, %v23328_v7 }
 0x73c   : > { %v11364_v6 = vcombine.high %v20894_v62, %v15261_v9  ;;  %v11192_v54 = vcombine.high %v11158_v4, %v11174_v31  ;;  %v11889_v15 = vcombine.low %v11870_v5, %v11886_v47  ;;  %v11348_v18 = vcombine.high %v20896_v28, %v15205_v46 }
 0x73d   : > { %v12299_v63 = vcombine.low %v11251_v59, %v11258_v34  ;;  %v11371_v44 = vrot.slane %v11363_v17, %v23327_v61  ;;  %v11956_v50 = vcombine.high %v21314_v36, %v21320_v1  ;;  %v11279_v8 = vcombine.low %v20900_v14, %v10299_v12 }
 0x73e   : > { %v14366_v45 = vcombine.high %v11251_v59, %v11258_v34  ;;  %v12315_v27 = vcombine.low %v11267_v25, %v11274_v19  ;;  %v11295_v22 = vcombine.low %v20898_v53, %v10444_v33  ;;  %12727 = vrot.lane.b32.xlu0 %v11889_v15, %s15915_s6  ;;  %v11355_v62 = vrot.slane %v11347_v30, %v23327_v61 }
 0x73f   : > { %v14367_v31 = vcombine.high %v11267_v25, %v11274_v19  ;;  %v11199_v9 = vrot.slane %v11191_v26, %v23328_v7  ;;  %v12231_v28 = vcombine.low %v11183_v52, %v11190_v39  ;;  %12665 = vrot.lane.b32.xlu1 %v11956_v50, %s15914_s30  ;;  %v11280_v46 = vcombine.high %v20900_v14, %v10299_v12 }
 0x740   : > { %v11206_v4 = vrot.slane %v11192_v54, %v23328_v7  ;;  %v14364_v17 = vcombine.high %v11183_v52, %v11190_v39  ;;  %v11362_v59 = vrot.slane %v11348_v18, %v23327_v61  ;;  %v11890_v34 = vcombine.high %v11870_v5, %v11886_v47 }
 0x741   : > { %v21337_v16 = vrot.slane %v12299_v63, %v23327_v61  ;;  %v11378_v15 = vrot.slane %v11364_v6, %v23327_v61  ;;  %v11296_v25 = vcombine.high %v20898_v53, %v10444_v33  ;;  %v11287_v19 = vrot.slane %v11279_v8, %v23327_v61 }
 0x742   : > { %v21343_v30 = vrot.slane %v14366_v45, %v23327_v61  ;;  %v21346_v14 = vrot.slane %v12315_v27, %v23327_v61  ;;  %v11379_v50 = vcombine.low %v11355_v62, %v11371_v44  ;;  %v11380_v12 = vcombine.high %v11355_v62, %v11371_v44  ;;  %12791 = vrot.lane.b32.xlu0 %v11890_v34, %s15916_s13 }
 0x743   : > { %v21350_v5 = vrot.slane %v14367_v31, %v23327_v61  ;;  %v21353_v47 = vrot.slane %v12231_v28, %v23327_v61  ;;  %v11303_v53 = vrot.slane %v11295_v22, %v23327_v61  ;;  %v11294_v52 = vrot.slane %v11280_v46, %v23327_v61 }
 0x744   : > { %v21358_v39 = vrot.slane %v14364_v17, %v23327_v61  ;;  %v12247_v26 = vcombine.low %v11199_v9, %v11206_v4  ;;  %v11395_v27 = vcombine.low %v11362_v59, %v11378_v15  ;;  %v11396_v33 = vcombine.high %v11362_v59, %v11378_v15  ;;  %v15208_v15 = vpop.f32.mrf.mxu1 }
 0x745   : > { %v14365_v6 = vcombine.high %v11199_v9, %v11206_v4  ;;  %v11310_v54 = vrot.slane %v11296_v25, %v23327_v61  ;;  %v11311_v18 = vcombine.low %v11287_v19, %v11303_v53  ;;  %v11312_v63 = vcombine.high %v11287_v19, %v11303_v53 }
 0x746   : > { %v11387_v44 = vrot.slane %v11379_v50, %v23328_v7  ;;  %v11394_v8 = vrot.slane %v11380_v12, %v23328_v7  ;;  %v11924_v22 = vcombine.high %v21109_v55, %v21116_v0  ;;  %v11940_v45 = vcombine.high %v21119_v48, %v21122_v49  ;;  %v15264_v48 = vpop.f32.mrf.mxu0 }
 0x747   : > { %v11327_v62 = vcombine.low %v11294_v52, %v11310_v54  ;;  %v11328_v31 = vcombine.high %v11294_v52, %v11310_v54  ;;  %v11991_v28 = vcombine.low %v21201_v58, %v21204_v40  ;;  %v12007_v9 = vcombine.low %v21208_v11, %v21217_v32 }
 0x748   : > { %v11403_v46 = vrot.slane %v11395_v27, %v23328_v7  ;;  %v11410_v4 = vrot.slane %v11396_v33, %v23328_v7  ;;  %v11938_v17 = vrot.slane %v11924_v22, %v23328_v7  ;;  %v11954_v59 = vrot.slane %v11940_v45, %v23328_v7 }
 0x749   : > { %v11319_v55 = vrot.slane %v11311_v18, %v23328_v7  ;;  %v11326_v0 = vrot.slane %v11312_v63, %v23328_v7  ;;  %v21378_v49 = vrot.slane %v11991_v28, %v23328_v7  ;;  %v21381_v34 = vrot.slane %v12007_v9, %v23328_v7  ;;  %v10454_v63 = vpop.f32.mrf.mxu0 }
 0x74a   : > { %v21384_v25 = vrot.slane %v12247_v26, %v23327_v61  ;;  %v11957_v19 = vcombine.low %v11938_v17, %v11954_v59  ;;  %v11992_v50 = vcombine.high %v21201_v58, %v21204_v40  ;;  %v12008_v12 = vcombine.high %v21208_v11, %v21217_v32 }
 0x74b   : > { %v21391_v53 = vrot.slane %v14365_v6, %v23327_v61  ;;  %v12435_v52 = vcombine.low %v11387_v44, %v11394_v8  ;;  %v14370_v27 = vcombine.high %v11387_v44, %v11394_v8  ;;  %v12024_v33 = vcombine.high %v21378_v49, %v21381_v34  ;;  %v10309_v44 = vpop.f32.mrf.mxu1 }
 0x74c   : > { %v21396_v54 = vrot.slane %v11327_v62, %v23328_v7  ;;  %v11499_v26 = vcombine.low %v20902_v60, %v15264_v48  ;;  %12729 = vrot.lane.b32.xlu1 %v11957_v19, %s15915_s6  ;;  %v12006_v58 = vrot.slane %v11992_v50, %v23328_v7  ;;  %v12022_v40 = vrot.slane %v12008_v12, %v23328_v7 }
 0x74d   : > { %v12451_v11 = vcombine.low %v11403_v46, %v11410_v4  ;;  %v14371_v32 = vcombine.high %v11403_v46, %v11410_v4  ;;  %v21403_v6 = vrot.slane %v11328_v31, %v23328_v7  ;;  %v12367_v18 = vcombine.low %v11319_v55, %v11326_v0  ;;  %12667 = vrot.lane.b32.xlu0 %v12024_v33, %s15914_s30 }
 0x74e   : > { %v14368_v8 = vcombine.high %v11319_v55, %v11326_v0  ;;  %v11958_v22 = vcombine.high %v11938_v17, %v11954_v59  ;;  %v11483_v45 = vcombine.low %v20904_v42, %v15208_v15  ;;  %v11484_v62 = vcombine.high %v20904_v42, %v15208_v15 }
 0x74f   : > { %v21409_v28 = vrot.slane %v12435_v52, %v23327_v61  ;;  %v21412_v9 = vrot.slane %v14370_v27, %v23327_v61  ;;  %v12025_v46 = vcombine.low %v12006_v58, %v12022_v40  ;;  %v12059_v31 = vcombine.low %v21184_v3, %v21190_v37 }
 0x750   : > { %v11500_v4 = vcombine.high %v20902_v60, %v15264_v48  ;;  %v11431_v19 = vcombine.low %v20906_v51, %v10454_v63  ;;  %12793 = vrot.lane.b32.xlu1 %v11958_v22, %s15916_s13  ;;  %v11415_v17 = vcombine.low %v20908_v24, %v10309_v44  ;;  %v11416_v42 = vcombine.high %v20908_v24, %v10309_v44 }
 0x751   : > { %v21422_v59 = vrot.slane %v12451_v11, %v23327_v61  ;;  %v21425_v55 = vrot.slane %v14371_v32, %v23327_v61  ;;  %v12383_v0 = vcombine.low %v21396_v54, %v21403_v6  ;;  %v14369_v60 = vcombine.high %v21396_v54, %v21403_v6  ;;  %12731 = vrot.lane.b32.xlu0 %v12025_v46, %s15915_s6 }
 0x752   : > { %v21433_v48 = vrot.slane %v12367_v18, %v23327_v61  ;;  %v11432_v15 = vcombine.high %v20906_v51, %v10454_v63  ;;  %v11491_v24 = vrot.slane %v11483_v45, %v23327_v61  ;;  %v11498_v50 = vrot.slane %v11484_v62, %v23327_v61 }
 0x753   : > { %v21439_v12 = vrot.slane %v14368_v8, %v23327_v61  ;;  %v11507_v52 = vrot.slane %v11499_v26, %v23327_v61  ;;  %v21443_v27 = vrot.slane %v12059_v31, %v23328_v7  ;;  %v12075_v33 = vcombine.low %v21193_v20, %v21198_v56 }
 0x754   : > { %v11514_v54 = vrot.slane %v11500_v4, %v23327_v61  ;;  %v11439_v11 = vrot.slane %v11431_v19, %v23327_v61  ;;  %v11423_v51 = vrot.slane %v11415_v17, %v23327_v61  ;;  %v11430_v32 = vrot.slane %v11416_v42, %v23327_v61 }
 0x755   : > { %v21452_v6 = vrot.slane %v12075_v33, %v23328_v7  ;;  %v12026_v18 = vcombine.high %v12006_v58, %v12022_v40  ;;  %v12060_v26 = vcombine.high %v21184_v3, %v21190_v37  ;;  %v12076_v63 = vcombine.high %v21193_v20, %v21198_v56 }
 0x756   : > { %v11446_v44 = vrot.slane %v11432_v15, %v23327_v61  ;;  %v11515_v8 = vcombine.low %v11491_v24, %v11507_v52  ;;  %v11516_v22 = vcombine.high %v11491_v24, %v11507_v52  ;;  %v11531_v45 = vcombine.low %v11498_v50, %v11514_v54 }
 0x757   : > { %v12092_v62 = vcombine.high %v21443_v27, %v21452_v6  ;;  %12795 = vrot.lane.b32.xlu0 %v12026_v18, %s15916_s13  ;;  %v12074_v46 = vrot.slane %v12060_v26, %v23328_v7  ;;  %v12090_v58 = vrot.slane %v12076_v63, %v23328_v7  ;;  %v12127_v3 = vcombine.low %v21283_v13, %v21286_v35 }
 0x758   : > { %v11532_v37 = vcombine.high %v11498_v50, %v11514_v54  ;;  %v12143_v20 = vcombine.low %v21291_v41, %v21296_v21  ;;  %v12128_v56 = vcombine.high %v21283_v13, %v21286_v35  ;;  %v12144_v40 = vcombine.high %v21291_v41, %v21296_v21 }
 0x759   : > { %v11447_v31 = vcombine.low %v11423_v51, %v11439_v11  ;;  %v11448_v4 = vcombine.high %v11423_v51, %v11439_v11  ;;  %v11463_v19 = vcombine.low %v11430_v32, %v11446_v44  ;;  %12669 = vrot.lane.b32.xlu1 %v12092_v62, %s15914_s30  ;;  %v21474_v17 = vrot.slane %v12127_v3, %v23328_v7 }
 0x75a   : > { %v11464_v42 = vcombine.high %v11430_v32, %v11446_v44  ;;  %v21477_v15 = vrot.slane %v12143_v20, %v23328_v7  ;;  %v12195_v24 = vcombine.low %v21267_v43, %v21270_v57  ;;  %v12211_v13 = vcombine.low %v21274_v10, %v21280_v2 }
 0x75b   : > { %v21484_v35 = vrot.slane %v12383_v0, %v23327_v61  ;;  %v11523_v41 = vrot.slane %v11515_v8, %v23328_v7  ;;  %v11530_v21 = vrot.slane %v11516_v22, %v23328_v7  ;;  %v12093_v50 = vcombine.low %v12074_v46, %v12090_v58 }
 0x75c   : > { %v11539_v52 = vrot.slane %v11531_v45, %v23328_v7  ;;  %v12160_v33 = vcombine.high %v21474_v17, %v21477_v15  ;;  %v12142_v54 = vrot.slane %v12128_v56, %v23328_v7  ;;  %v12158_v11 = vrot.slane %v12144_v40, %v23328_v7 }
 0x75d   : > { %v11546_v51 = vrot.slane %v11532_v37, %v23328_v7  ;;  %v11455_v32 = vrot.slane %v11447_v31, %v23328_v7  ;;  %v11462_v0 = vrot.slane %v11448_v4, %v23328_v7  ;;  %v11471_v18 = vrot.slane %v11463_v19, %v23328_v7  ;;  %12733 = vrot.lane.b32.xlu1 %v12093_v50, %s15915_s6 }
 0x75e   : > { %v11478_v26 = vrot.slane %v11464_v42, %v23328_v7  ;;  %12671 = vrot.lane.b32.xlu0 %v12160_v33, %s15914_s30  ;;  %v12094_v63 = vcombine.high %v12074_v46, %v12090_v58  ;;  %v21501_v44 = vrot.slane %v12195_v24, %v23328_v7  ;;  %v21504_v8 = vrot.slane %v12211_v13, %v23328_v7 }
 0x75f   : > { %v12196_v22 = vcombine.high %v21267_v43, %v21270_v57  ;;  %v12212_v45 = vcombine.high %v21274_v10, %v21280_v2  ;;  %v12263_v62 = vcombine.low %v21353_v47, %v21358_v39  ;;  %v12279_v3 = vcombine.low %v21384_v25, %v21391_v53 }
 0x760   : > { %v21515_v46 = vrot.slane %v14369_v60, %v23327_v61  ;;  %v12571_v58 = vcombine.low %v11523_v41, %v11530_v21  ;;  %v14374_v37 = vcombine.high %v11523_v41, %v11530_v21  ;;  %v12161_v20 = vcombine.low %v12142_v54, %v12158_v11 }
 0x761   : > { %v12587_v56 = vcombine.low %v11539_v52, %v11546_v51  ;;  %v14375_v40 = vcombine.high %v11539_v52, %v11546_v51  ;;  %v12503_v31 = vcombine.low %v11455_v32, %v11462_v0  ;;  %v14372_v4 = vcombine.high %v11455_v32, %v11462_v0  ;;  %12797 = vrot.lane.b32.xlu1 %v12094_v63, %s15916_s13 }
 0x762   : > { %v12519_v43 = vcombine.low %v11471_v18, %v11478_v26  ;;  %v14373_v57 = vcombine.high %v11471_v18, %v11478_v26  ;;  %12735 = vrot.lane.b32.xlu0 %v12161_v20, %s15915_s6  ;;  %v12228_v10 = vcombine.high %v21501_v44, %v21504_v8  ;;  %v12162_v2 = vcombine.high %v12142_v54, %v12158_v11 }
 0x763   : > { %v12210_v60 = vrot.slane %v12196_v22, %v23328_v7  ;;  %v12226_v19 = vrot.slane %v12212_v45, %v23328_v7  ;;  %v21524_v42 = vrot.slane %v12263_v62, %v23328_v7  ;;  %v21527_v24 = vrot.slane %v12279_v3, %v23328_v7 }
 0x764   : > { %v12264_v13 = vcombine.high %v21353_v47, %v21358_v39  ;;  %v12280_v41 = vcombine.high %v21384_v25, %v21391_v53  ;;  %v12331_v21 = vcombine.low %v21337_v16, %v21343_v30  ;;  %v12347_v50 = vcombine.low %v21346_v14, %v21350_v5 }
 0x765   : > { %v21538_v52 = vrot.slane %v12571_v58, %v23327_v61  ;;  %v21541_v33 = vrot.slane %v14374_v37, %v23327_v61  ;;  %v21544_v54 = vrot.slane %v12587_v56, %v23327_v61  ;;  %v21547_v47 = vrot.slane %v14375_v40, %v23327_v61  ;;  %12673 = vrot.lane.b32.xlu1 %v12228_v10, %s15914_s30 }
 0x766   : > { %v21551_v39 = vrot.slane %v12503_v31, %v23327_v61  ;;  %v21554_v25 = vrot.slane %v14372_v4, %v23327_v61  ;;  %v21557_v53 = vrot.slane %v12519_v43, %v23327_v61  ;;  %v21560_v11 = vrot.slane %v14373_v57, %v23327_v61  ;;  %12799 = vrot.lane.b32.xlu0 %v12162_v2, %s15916_s13 }
 0x767   : > { %v12229_v51 = vcombine.low %v12210_v60, %v12226_v19  ;;  %v12296_v32 = vcombine.high %v21524_v42, %v21527_v24  ;;  %v12332_v0 = vcombine.high %v21337_v16, %v21343_v30  ;;  %v12278_v18 = vrot.slane %v12264_v13, %v23328_v7 }
 0x768   : > { %v12294_v26 = vrot.slane %v12280_v41, %v23328_v7  ;;  %v21570_v63 = vrot.slane %v12331_v21, %v23328_v7  ;;  %v21573_v22 = vrot.slane %v12347_v50, %v23328_v7  ;;  %v12399_v61 = vcombine.low %v21433_v48, %v21439_v12 }
 0x769   : > { %12737 = vrot.lane.b32.xlu1 %v12229_v51, %s15915_s6  ;;  %v12415_v45 = vcombine.low %v21484_v35, %v21515_v46  ;;  %v12467_v16 = vcombine.low %v21409_v28, %v21412_v9  ;;  %v12483_v30 = vcombine.low %v21422_v59, %v21425_v55  ;;  %v12535_v62 = vcombine.low %v21551_v39, %v21554_v25 }
 0x76a   : > { %12675 = vrot.lane.b32.xlu0 %v12296_v32, %s15914_s30  ;;  %v12551_v3 = vcombine.low %v21557_v53, %v21560_v11  ;;  %v12603_v58 = vcombine.low %v21538_v52, %v21541_v33  ;;  %v12619_v37 = vcombine.low %v21544_v54, %v21547_v47  ;;  %v12230_v20 = vcombine.high %v12210_v60, %v12226_v19 }
 0x76b   : > { %v12348_v56 = vcombine.high %v21346_v14, %v21350_v5  ;;  %v12297_v40 = vcombine.low %v12278_v18, %v12294_v26  ;;  %v12364_v31 = vcombine.high %v21570_v63, %v21573_v22  ;;  %v12298_v4 = vcombine.high %v12278_v18, %v12294_v26 }
 0x76c   : > { %v12346_v43 = vrot.slane %v12332_v0, %v23328_v7  ;;  %v21600_v57 = vrot.slane %v12399_v61, %v23328_v7  ;;  %v21603_v10 = vrot.slane %v12415_v45, %v23328_v7  ;;  %v21606_v2 = vrot.slane %v12467_v16, %v23328_v7 }
 0x76d   : > { %12801 = vrot.lane.b32.xlu1 %v12230_v20, %s15916_s13  ;;  %v21609_v14 = vrot.slane %v12483_v30, %v23328_v7  ;;  %v21613_v5 = vrot.slane %v12535_v62, %v23328_v7  ;;  %v21616_v60 = vrot.slane %v12551_v3, %v23328_v7  ;;  %v21619_v19 = vrot.slane %v12603_v58, %v23328_v7 }
 0x76e   : > { %12739 = vrot.lane.b32.xlu0 %v12297_v40, %s15915_s6  ;;  %v21622_v13 = vrot.slane %v12619_v37, %v23328_v7  ;;  %v12362_v41 = vrot.slane %v12348_v56, %v23328_v7  ;;  %v11887_v21 = vcombine.low %v21250_v23, %v21256_v38  ;;  %v11955_v50 = vcombine.low %v21314_v36, %v21320_v1 }
 0x76f   : > { %v12023_v51 = vcombine.low %v21378_v49, %v21381_v34  ;;  %v12400_v32 = vcombine.high %v21433_v48, %v21439_v12  ;;  %v12416_v0 = vcombine.high %v21484_v35, %v21515_v46  ;;  %v12091_v18 = vcombine.low %v21443_v27, %v21452_v6 }
 0x770   : > { %v12159_v26 = vcombine.low %v21474_v17, %v21477_v15  ;;  %v12227_v61 = vcombine.low %v21501_v44, %v21504_v8  ;;  %v12295_v45 = vcombine.low %v21524_v42, %v21527_v24  ;;  %v12363_v48 = vcombine.low %v21570_v63, %v21573_v22 }
 0x771   : > { %12677 = vrot.lane.b32.xlu1 %v12364_v31, %s15914_s30  ;;  %v12431_v12 = vcombine.low %v21600_v57, %v21603_v10  ;;  %v12499_v35 = vcombine.low %v21606_v2, %v21609_v14  ;;  %v12567_v46 = vcombine.low %v21613_v5, %v21616_v60  ;;  %v12635_v16 = vcombine.low %v21619_v19, %v21622_v13 }
 0x772   : > { %12803 = vrot.lane.b32.xlu0 %v12298_v4, %s15916_s13  ;;  %v12365_v30 = vcombine.low %v12346_v43, %v12362_v41  ;;  %v12432_v62 = vcombine.high %v21600_v57, %v21603_v10  ;;  %v12414_v3 = vrot.slane %v12400_v32, %v23328_v7  ;;  %v12430_v58 = vrot.slane %v12416_v0, %v23328_v7 }
 0x773   : > { %v12366_v37 = vcombine.high %v12346_v43, %v12362_v41  ;;  %v12468_v20 = vcombine.high %v21409_v28, %v21412_v9  ;;  %v12484_v56 = vcombine.high %v21422_v59, %v21425_v55  ;;  %v12500_v31 = vcombine.high %v21606_v2, %v21609_v14 }
 0x774   : > { %v12433_v40 = vcombine.low %v12414_v3, %v12430_v58  ;;  %v12434_v0 = vcombine.high %v12414_v3, %v12430_v58  ;;  %v12536_v43 = vcombine.high %v21551_v39, %v21554_v25  ;;  %v12552_v28 = vcombine.high %v21557_v53, %v21560_v11 }
 0x775   : > { %12741 = vrot.lane.b32.xlu1 %v12365_v30, %s15915_s6  ;;  %v12482_v4 = vrot.slane %v12468_v20, %v23328_v7  ;;  %v12498_v32 = vrot.slane %v12484_v56, %v23328_v7  ;;  %v12568_v55 = vcombine.high %v21613_v5, %v21616_v60  ;;  %v12604_v25 = vcombine.high %v21538_v52, %v21541_v33 }
 0x776   : > { %12679 = vrot.lane.b32.xlu0 %v12432_v62, %s15914_s30  ;;  %v12550_v41 = vrot.slane %v12536_v43, %v23328_v7  ;;  %v12566_v30 = vrot.slane %v12552_v28, %v23328_v7  ;;  %v12620_v53 = vcombine.high %v21544_v54, %v21547_v47  ;;  %v12636_v58 = vcombine.high %v21619_v19, %v21622_v13  ;;  %v23337_v47 = vld [vmem:[#allocation102_spill] sm:$0xff]  ;;  %v15851_v13 = vld [vmem:[%s16097_s1 + $0x8] sm:$0xff] }
 0x777   : > { %v12501_v9 = vcombine.low %v12482_v4, %v12498_v32  ;;  %v12502_v39 = vcombine.high %v12482_v4, %v12498_v32  ;;  %v23339_v4 = vld [vmem:[#allocation33_spill] sm:$0xff] }
 0x778   : > { %v12569_v11 = vcombine.low %v12550_v41, %v12566_v30  ;;  %v12634_v20 = vrot.slane %v12620_v53, %v23328_v7  ;;  %v12570_v56 = vcombine.high %v12550_v41, %v12566_v30  ;;  %v23341_v53 = vld [vmem:[#allocation105_spill] sm:$0xff] }
 0x779   : > { %12805 = vrot.lane.b32.xlu1 %v12366_v37, %s15916_s13  ;;  %v12618_v37 = vrot.slane %v12604_v25, %v23328_v7  ;;  %v23340_v25 = vld [vmem:[#allocation104_spill] sm:$0xff] }
 0x77a   : > { %12743 = vrot.lane.b32.xlu0 %v12433_v40, %s15915_s6  ;;  %v11615_v40 = vcombine.low %v23337_v47, %v21042_v29 }
 0x77b   : > { %v12637_v52 = vcombine.low %v12618_v37, %v12634_v20 }
 0x77d   : > { %12681 = vrot.lane.b32.xlu1 %v12500_v31, %s15914_s30  ;;  %v12658_v59 = vpop.permute.xlu1 %12657  ;;  %v12656_v62 = vpop.permute.xlu0 %12655  ;;  %v23338_v31 = vld [vmem:[#allocation103_spill] sm:$0xff] }
 0x77e   : > { %12807 = vrot.lane.b32.xlu0 %v12434_v0, %s15916_s13  ;;  %v11683_v32 = vcombine.low %v23339_v4, %v23338_v31  ;;  %v12638_v0 = vcombine.high %v12618_v37, %v12634_v20  ;;  %v12831_v7 = vsel %vm8271_vm2, %v11615_v40, %v12656_v62 }
 0x780   : > { %v12832_v28 = vsel %vm8271_vm2, %v11683_v32, %v12658_v59 }
 0x781   : > { %12745 = vrot.lane.b32.xlu1 %v12501_v9, %s15915_s6 }
 0x782   : > { %12683 = vrot.lane.b32.xlu0 %v12568_v55, %s15914_s30  ;;  %v12722_v3 = vpop.permute.xlu1 %12721 }
 0x783   : > { %v12849_v55 = vsel %vm12847_vm3, %v12832_v28, %v12722_v3 }
 0x785   : > { %12809 = vrot.lane.b32.xlu1 %v12502_v39, %s15916_s13 }
 0x786   : > { %12747 = vrot.lane.b32.xlu0 %v12569_v11, %s15915_s6  ;;  %v12784_v33 = vpop.permute.xlu0 %12783  ;;  %v11751_v11 = vcombine.low %v23341_v53, %v23340_v25 }
 0x789   : > { %12685 = vrot.lane.b32.xlu1 %v12636_v58, %s15914_s30 }
 0x78a   : > { %12811 = vrot.lane.b32.xlu0 %v12570_v56, %s15916_s13  ;;  %v23342_v56 = vld [vmem:[#allocation30_spill] sm:$0xff] }
 0x78b   : > { %v12786_v54 = vpop.permute.xlu1 %12785 }
 0x78c   : > { %v12866_v30 = vsel %vm12864_vm4, %v12849_v55, %v12786_v54 }
 0x78d   : > { %12749 = vrot.lane.b32.xlu1 %v12637_v52, %s15915_s6  ;;  %v23343_v52 = vld [vmem:[#allocation81_spill] sm:$0xff] }
 0x78f   : > { %v12720_v43 = vpop.permute.xlu1 %12719 }
 0x790   : > { %v12848_v9 = vsel %vm12847_vm3, %v12831_v7, %v12720_v43 }
 0x791   : > { %12813 = vrot.lane.b32.xlu1 %v12638_v0, %s15916_s13  ;;  %v12660_v41 = vpop.permute.xlu0 %12659  ;;  %v12865_v29 = vsel %vm12864_vm4, %v12848_v9, %v12784_v33  ;;  %v11819_v33 = vcombine.low %v23343_v52, %v23342_v56 }
 0x792   : > { %15273 = vmatprep.mubr.msk.f32.mxu1 %vm741_vm1, %v12865_v29  ;;  %v12833_v59 = vsel %vm8271_vm2, %v11751_v11, %v12660_v41 }
 0x793   : > { %15274 = vmatmul.mubr.msk.f32.vlgmr.msra.gmra.mxu1 %vm741_vm1, %v12866_v30 }
 0x795   : > { %v12724_v39 = vpop.permute.xlu0 %12723 }
 0x796   : > { %v12850_v62 = vsel %vm12847_vm3, %v12833_v59, %v12724_v39 }
 0x79c   : > { %v12788_v58 = vpop.permute.xlu0 %12787 }
 0x79d   : > { %v12867_v3 = vsel %vm12864_vm4, %v12850_v62, %v12788_v58 }
 0x79e   : > { %v12662_v37 = vpop.permute.xlu1 %12661  ;;  %15276 = vmatprep.mubr.msk.f32.mxu1 %vm741_vm1, %v12867_v3 }
 0x79f   : > { %v12834_v54 = vsel %vm8271_vm2, %v11819_v33, %v12662_v37 }
 0x7a2   : > { %v12726_v20 = vpop.permute.xlu1 %12725 }
 0x7a3   : > { %v12851_v47 = vsel %vm12847_vm3, %v12834_v54, %v12726_v20 }
 0x7a5   : > { %v12664_v40 = vpop.permute.xlu0 %12663 }
 0x7a6   : > { %v12835_v0 = vsel %vm8271_vm2, %v11887_v21, %v12664_v40 }
 0x7aa   : > { %v12790_v31 = vpop.permute.xlu1 %12789 }
 0x7ab   : > { %v12868_v4 = vsel %vm12864_vm4, %v12851_v47, %v12790_v31 }
 0x7ac   : > { %15277 = vmatmul.mubr.msk.f32.gmra.mxu1 %vm741_vm1, %v12868_v4 }
 0x7b0   : > { %v12728_v32 = vpop.permute.xlu0 %12727 }
 0x7b1   : > { %v12852_v7 = vsel %vm12847_vm3, %v12835_v0, %v12728_v32  ;;  %v12666_v9 = vpop.permute.xlu1 %12665 }
 0x7b2   : > { %v12836_v29 = vsel %vm8271_vm2, %v11955_v50, %v12666_v9 }
 0x7b4   : > { %v12792_v43 = vpop.permute.xlu0 %12791 }
 0x7b5   : > { %v12869_v28 = vsel %vm12864_vm4, %v12852_v7, %v12792_v43 }
 0x7b6   : > { %15279 = vmatprep.mubr.msk.f32.mxu1 %vm741_vm1, %v12869_v28 }
 0x7be   : > { %v12730_v55 = vpop.permute.xlu1 %12729 }
 0x7bf   : > { %v12668_v41 = vpop.permute.xlu0 %12667  ;;  %v12853_v30 = vsel %vm12847_vm3, %v12836_v29, %v12730_v55 }
 0x7c0   : > { %v12837_v39 = vsel %vm8271_vm2, %v12023_v51, %v12668_v41 }
 0x7c2   : > { %v12794_v23 = vpop.permute.xlu1 %12793 }
 0x7c3   : > { %v12870_v38 = vsel %vm12864_vm4, %v12853_v30, %v12794_v23  ;;  %v12732_v21 = vpop.permute.xlu0 %12731  ;;  %v21810_v23 = vld [vmem:[%s23345_s27] ss:$0 sm:$0xff] }
 0x7c4   : > { %15280 = vmatmul.mubr.msk.f32.gmra.mxu1 %vm741_vm1, %v12870_v38  ;;  %v12854_v25 = vsel %vm12847_vm3, %v12837_v39, %v12732_v21 }
 0x7c9   : > { %v12796_v53 = vpop.permute.xlu0 %12795 }
 0x7ca   : > { %v12871_v36 = vsel %vm12864_vm4, %v12854_v25, %v12796_v53  ;;  %v15852_v25 = vld [vmem:[%s16097_s1] sm:$0xff] }
 0x7cb   : > { %v12670_v1 = vpop.permute.xlu1 %12669  ;;  %15282 = vmatprep.mubr.msk.f32.mxu1 %vm741_vm1, %v12871_v36 }
 0x7cc   : > { %v12838_v59 = vsel %vm8271_vm2, %v12091_v18, %v12670_v1 }
 0x7cf   : > { %v12734_v50 = vpop.permute.xlu1 %12733 }
 0x7d0   : > { %v12672_v11 = vpop.permute.xlu0 %12671  ;;  %v12855_v62 = vsel %vm12847_vm3, %v12838_v59, %v12734_v50 }
 0x7d1   : > { %v12839_v58 = vsel %vm8271_vm2, %v12159_v26, %v12672_v11 }
 0x7d3   : > { %v12798_v49 = vpop.permute.xlu1 %12797 }
 0x7d4   : > { %v12872_v34 = vsel %vm12864_vm4, %v12855_v62, %v12798_v49  ;;  %v12736_v51 = vpop.permute.xlu0 %12735  ;;  %v15853_v62 = vld [vmem:[%s16097_s1 + $0x18] sm:$0xff] }
 0x7d5   : > { %15283 = vmatmul.mubr.msk.f32.gmra.mxu1 %vm741_vm1, %v12872_v34  ;;  %v12856_v37 = vsel %vm12847_vm3, %v12839_v58, %v12736_v51  ;;  %v15854_v51 = vld [vmem:[%s16097_s1 + $0x10] sm:$0xff] }
 0x7d7   : > { %v12674_v3 = vpop.permute.xlu1 %12673 }
 0x7d8   : > { %v12800_v20 = vpop.permute.xlu0 %12799  ;;  %v12840_v56 = vsel %vm8271_vm2, %v12227_v61, %v12674_v3 }
 0x7d9   : > { %v12873_v27 = vsel %vm12864_vm4, %v12856_v37, %v12800_v20 }
 0x7da   : > { %15285 = vmatprep.mubr.msk.f32.mxu1 %vm741_vm1, %v12873_v27 }
 0x7db   : > { %v12738_v6 = vpop.permute.xlu1 %12737 }
 0x7dc   : > { %v12676_v18 = vpop.permute.xlu0 %12675  ;;  %v12857_v52 = vsel %vm12847_vm3, %v12840_v56, %v12738_v6 }
 0x7dd   : > { %v12841_v33 = vsel %vm8271_vm2, %v12295_v45, %v12676_v18  ;;  %v15855_v18 = vld [vmem:[%s16097_s1 + $0x28] sm:$0xff] }
 0x7df   : > { %v12802_v17 = vpop.permute.xlu1 %12801 }
 0x7e0   : > { %v12874_v15 = vsel %vm12864_vm4, %v12857_v52, %v12802_v17  ;;  %v12740_v26 = vpop.permute.xlu0 %12739  ;;  %v15856_v17 = vld [vmem:[%s16097_s1 + $0x20] sm:$0xff] }
 0x7e1   : > { %15286 = vmatmul.mubr.msk.f32.gmra.mxu1 %vm741_vm1, %v12874_v15  ;;  %v12858_v47 = vsel %vm12847_vm3, %v12841_v33, %v12740_v26 }
 0x7e3   : > { %v12678_v54 = vpop.permute.xlu1 %12677 }
 0x7e4   : > { %v12804_v40 = vpop.permute.xlu0 %12803  ;;  %v12842_v31 = vsel %vm8271_vm2, %v12363_v48, %v12678_v54 }
 0x7e5   : > { %v12875_v44 = vsel %vm12864_vm4, %v12858_v47, %v12804_v40 }
 0x7e6   : > { %15288 = vmatprep.mubr.msk.f32.mxu1 %vm741_vm1, %v12875_v44  ;;  %v15857_v44 = vld [vmem:[%s16097_s1 + $0x38] sm:$0xff] }
 0x7e7   : > { %v12742_v8 = vpop.permute.xlu1 %12741 }
 0x7e8   : > { %v12680_v61 = vpop.permute.xlu0 %12679  ;;  %v12859_v4 = vsel %vm12847_vm3, %v12842_v31, %v12742_v8  ;;  %v15858_v31 = vld [vmem:[%s16097_s1 + $0x30] sm:$0xff] }
 0x7e9   : > { %v12843_v32 = vsel %vm8271_vm2, %v12431_v12, %v12680_v61 }
 0x7eb   : > { %v12806_v42 = vpop.permute.xlu1 %12805 }
 0x7ec   : > { %v12876_v24 = vsel %vm12864_vm4, %v12859_v4, %v12806_v42  ;;  %v12744_v45 = vpop.permute.xlu0 %12743 }
 0x7ed   : > { %15289 = vmatmul.mubr.msk.f32.gmra.mxu1 %vm741_vm1, %v12876_v24  ;;  %v12860_v7 = vsel %vm12847_vm3, %v12843_v32, %v12744_v45 }
 0x7ef   : > { %v12682_v0 = vpop.permute.xlu1 %12681 }
 0x7f0   : > { %v12808_v43 = vpop.permute.xlu0 %12807  ;;  %v12844_v28 = vsel %vm8271_vm2, %v12499_v35, %v12682_v0 }
 0x7f1   : > { %v12877_v63 = vsel %vm12864_vm4, %v12860_v7, %v12808_v43  ;;  %v15859_v7 = vld [vmem:[%s16097_s1 + $0x48] sm:$0xff] }
 0x7f2   : > { %15291 = vmatprep.mubr.msk.f32.mxu1 %vm741_vm1, %v12877_v63 }
 0x7f3   : > { %v12746_v22 = vpop.permute.xlu1 %12745 }
 0x7f4   : > { %v12684_v48 = vpop.permute.xlu0 %12683  ;;  %v12861_v9 = vsel %vm12847_vm3, %v12844_v28, %v12746_v22  ;;  %v15860_v22 = vld [vmem:[%s16097_s1 + $0x40] sm:$0xff] }
 0x7f5   : > { %v12845_v55 = vsel %vm8271_vm2, %v12567_v46, %v12684_v48 }
 0x7f7   : > { %v12810_v57 = vpop.permute.xlu1 %12809 }
 0x7f8   : > { %v12878_v10 = vsel %vm12864_vm4, %v12861_v9, %v12810_v57  ;;  %v12748_v12 = vpop.permute.xlu0 %12747 }
 0x7f9   : > { %15292 = vmatmul.mubr.msk.f32.gmra.mxu1 %vm741_vm1, %v12878_v10  ;;  %v12862_v2 = vsel %vm12847_vm3, %v12845_v55, %v12748_v12  ;;  %v15861_v55 = vld [vmem:[%s16097_s1 + $0x58] sm:$0xff] }
 0x7fb   : > { %v12686_v41 = vpop.permute.xlu1 %12685 }
 0x7fc   : > { %v12812_v14 = vpop.permute.xlu0 %12811  ;;  %v12846_v30 = vsel %vm8271_vm2, %v12635_v16, %v12686_v41 }
 0x7fd   : > { %v12879_v35 = vsel %vm12864_vm4, %v12862_v2, %v12812_v14  ;;  %v15862_v14 = vld [vmem:[%s16097_s1 + $0x50] sm:$0xff] }
 0x7fe   : > { %15294 = vmatprep.mubr.msk.f32.mxu1 %vm741_vm1, %v12879_v35 }
 0x7ff   : > { %v12750_v29 = vpop.permute.xlu1 %12749 }
 0x800   : > { %v12863_v5 = vsel %vm12847_vm3, %v12846_v30, %v12750_v29 }
 0x803   : > { %v12814_v60 = vpop.permute.xlu1 %12813 }
 0x804   : > { %v12880_v46 = vsel %vm12864_vm4, %v12863_v5, %v12814_v60 }
 0x805   : > { %15295 = vmatmul.mubr.msk.f32.gmra.mxu1 %vm741_vm1, %v12880_v46 }
 0x853   : > { %v15275_v38 = vpop.f32.mrf.mxu1 }
 0x854   : > { %v13012_v21 = vadd.f32 %v15275_v38, %v21810_v23  ;;  %v15863_v38 = vld [vmem:[%s16097_s1 + $0x68] sm:$0xff] }
 0x855   : > { %v13006_v19 = vpop.f32.mrf.mxu1 }
 0x856   : > { %v21814_v16 = vadd.f32 %v15851_v13, %v13012_v21  ;;  %v13007_v39 = vadd.f32 %v21810_v23, %v13006_v19  ;;  %v15864_v13 = vld [vmem:[%s16097_s1 + $0x60] sm:$0xff] }
 0x858   : > { %v21818_v53 = vadd.f32 %v15852_v25, %v13007_v39  ;;  %v13106_v36 = vsel %vm741_vm1, %v21814_v16, 0.0 }
 0x859   : > { %13107 = vadd.xlane.f32.xlu1 %v13106_v36 }
 0x85a   : > { %v13103_v1 = vsel %vm741_vm1, %v21818_v53, 0.0 }
 0x85b   : > { %13104 = vadd.xlane.f32.xlu0 %v13103_v1 }
 0x86c   : > { %v15278_v50 = vpop.f32.mrf.mxu1 }
 0x86d   : > { %v13022_v11 = vadd.f32 %v15278_v50, %v21810_v23 }
 0x86e   : > { %v13016_v59 = vpop.f32.mrf.mxu1 }
 0x86f   : > { %v21826_v49 = vadd.f32 %v15853_v62, %v13022_v11  ;;  %v13017_v34 = vadd.f32 %v21810_v23, %v13016_v59  ;;  %v15865_v59 = vld [vmem:[%s16097_s1 + $0x78] sm:$0xff] }
 0x871   : > { %v21830_v58 = vadd.f32 %v15854_v51, %v13017_v34  ;;  %v13112_v3 = vsel %vm741_vm1, %v21826_v49, 0.0  ;;  %v15866_v51 = vld [vmem:[%s16097_s1 + $0x70] sm:$0xff] }
 0x872   : > { %13113 = vadd.xlane.f32.xlu0 %v13112_v3 }
 0x873   : > { %v13109_v37 = vsel %vm741_vm1, %v21830_v58, 0.0 }
 0x876   : > { %13110 = vadd.xlane.f32.xlu0 %v13109_v37 }
 0x884   : > { %v15281_v20 = vpop.f32.mrf.mxu1 }
 0x885   : > { %v13032_v27 = vadd.f32 %v15281_v20, %v21810_v23 }
 0x886   : > { %v13026_v6 = vpop.f32.mrf.mxu1 }
 0x887   : > { %v21838_v56 = vadd.f32 %v15855_v18, %v13032_v27  ;;  %v13027_v52 = vadd.f32 %v21810_v23, %v13026_v6 }
 0x889   : > { %v21842_v15 = vadd.f32 %v15856_v17, %v13027_v52  ;;  %v13118_v26 = vsel %vm741_vm1, %v21838_v56, 0.0 }
 0x88a   : > { %13119 = vadd.xlane.f32.xlu1 %v13118_v26 }
 0x88b   : > { %v13115_v33 = vsel %vm741_vm1, %v21842_v15, 0.0 }
 0x88c   : > { %13116 = vadd.xlane.f32.xlu0 %v13115_v33 }
 0x895   : > { %v15284_v54 = vpop.f32.mrf.mxu1 }
 0x896   : > { %v13042_v47 = vadd.f32 %v15284_v54, %v21810_v23 }
 0x897   : > { %v13036_v40 = vpop.f32.mrf.mxu1 }
 0x898   : > { %v21850_v8 = vadd.f32 %v15857_v44, %v13042_v47  ;;  %v13037_v61 = vadd.f32 %v21810_v23, %v13036_v40 }
 0x89a   : > { %v21854_v4 = vadd.f32 %v15858_v31, %v13037_v61  ;;  %v13124_v42 = vsel %vm741_vm1, %v21850_v8, 0.0 }
 0x89b   : > { %13125 = vadd.xlane.f32.xlu1 %v13124_v42 }
 0x89c   : > { %v13121_v24 = vsel %vm741_vm1, %v21854_v4, 0.0 }
 0x89d   : > { %13122 = vadd.xlane.f32.xlu0 %v13121_v24 }
 0x8a1   : > { %v15287_v45 = vpop.f32.mrf.mxu1 }
 0x8a2   : > { %v13052_v32 = vadd.f32 %v15287_v45, %v21810_v23 }
 0x8a3   : > { %v13046_v0 = vpop.f32.mrf.mxu1 }
 0x8a4   : > { %v21862_v43 = vadd.f32 %v15859_v7, %v13052_v32  ;;  %v13047_v63 = vadd.f32 %v21810_v23, %v13046_v0 }
 0x8a6   : > { %v21866_v48 = vadd.f32 %v15860_v22, %v13047_v63  ;;  %v13130_v28 = vsel %vm741_vm1, %v21862_v43, 0.0 }
 0x8a7   : > { %13131 = vadd.xlane.f32.xlu1 %v13130_v28 }
 0x8a8   : > { %v13127_v9 = vsel %vm741_vm1, %v21866_v48, 0.0 }
 0x8a9   : > { %13128 = vadd.xlane.f32.xlu0 %v13127_v9  ;;  %v13358_v9 = vld [vmem:[%s16078_s23 + $0x18] sm:$0xff] }
 0x8aa   : > { %15297 = vmatprep.subr.mxu0 %v13358_v9 }
 0x8ab   : > { %15298 = vmatpush3.msra.mxu0 %v13358_v9 }
 0x8ad   : > { %v15290_v57 = vpop.f32.mrf.mxu1 }
 0x8ae   : > { %v13062_v10 = vadd.f32 %v15290_v57, %v21810_v23  ;;  %v13357_v57 = vld [vmem:[%s16078_s23 + $0x10] sm:$0xff] }
 0x8af   : > { %v13056_v12 = vpop.f32.mrf.mxu1  ;;  %15299 = vmatprep.subr.mxu0 %v13357_v57 }
 0x8b0   : > { %v21874_v41 = vadd.f32 %v15861_v55, %v13062_v10  ;;  %v13057_v2 = vadd.f32 %v21810_v23, %v13056_v12  ;;  %15300 = vmatpush3.msra.mxu0 %v13357_v57 }
 0x8b2   : > { %v21878_v35 = vadd.f32 %v15862_v14, %v13057_v2  ;;  %v13136_v29 = vsel %vm741_vm1, %v21874_v41, 0.0 }
 0x8b3   : > { %13137 = vadd.xlane.f32.xlu1 %v13136_v29 }
 0x8b4   : > { %v13133_v30 = vsel %vm741_vm1, %v21878_v35, 0.0 }
 0x8b5   : > { %13134 = vadd.xlane.f32.xlu0 %v13133_v30 }
 0x8b9   : > { %v15293_v5 = vpop.f32.mrf.mxu1 }
 0x8ba   : > { %v13072_v60 = vadd.f32 %v15293_v5, %v21810_v23 }
 0x8bb   : > { %v13066_v46 = vpop.f32.mrf.mxu1 }
 0x8bc   : > { %v21886_v21 = vadd.f32 %v15863_v38, %v13072_v60  ;;  %v13067_v19 = vadd.f32 %v21810_v23, %v13066_v46 }
 0x8be   : > { %v21890_v39 = vadd.f32 %v15864_v13, %v13067_v19  ;;  %v13142_v25 = vsel %vm741_vm1, %v21886_v21, 0.0 }
 0x8bf   : > { %13143 = vadd.xlane.f32.xlu1 %v13142_v25 }
 0x8c0   : > { %v13139_v36 = vsel %vm741_vm1, %v21890_v39, 0.0 }
 0x8c1   : > { %13140 = vadd.xlane.f32.xlu0 %v13139_v36  ;;  %v13356_v36 = vld [vmem:[%s16078_s23 + $0x8] sm:$0xff] }
 0x8c2   : > { %15301 = vmatprep.subr.mxu0 %v13356_v36 }
 0x8c3   : > { %15302 = vmatpush3.msra.mxu0 %v13356_v36 }
 0x8c5   : > { %v15296_v1 = vpop.f32.mrf.mxu1 }
 0x8c6   : > { %v13082_v50 = vadd.f32 %v15296_v1, %v21810_v23 }
 0x8c7   : > { %v13076_v11 = vpop.f32.mrf.mxu1 }
 0x8c8   : > { %v21898_v62 = vadd.f32 %v15865_v59, %v13082_v50  ;;  %v13077_v34 = vadd.f32 %v21810_v23, %v13076_v11  ;;  %v13355_v11 = vld [vmem:[%s16078_s23] sm:$0xff] }
 0x8c9   : > { %15303 = vmatprep.subr.mxu0 %v13355_v11 }
 0x8ca   : > { %v21902_v3 = vadd.f32 %v15866_v51, %v13077_v34  ;;  %v13148_v37 = vsel %vm741_vm1, %v21898_v62, 0.0  ;;  %15304 = vmatpush3.msra.mxu0 %v13355_v11 }
 0x8cb   : > { %13149 = vadd.xlane.f32.xlu1 %v13148_v37 }
 0x8cc   : > { %v13145_v20 = vsel %vm741_vm1, %v21902_v3, 0.0 }
 0x8cd   : > { %13146 = vadd.xlane.f32.xlu0 %v13145_v20 }
 0x8e2   : > { %v13108_v27 = vpop.xlane.xlu1 %13107 }
 0x8e3   : > { %v13152_v6 = vmul.f32 0.03125, %v13108_v27 }
 0x8e4   : > { %v13105_v18 = vpop.xlane.xlu0 %13104 }
 0x8e5   : > { %v21909_v52 = vsub.f32 %v21814_v16, %v13152_v6  ;;  %v13151_v17 = vmul.f32 0.03125, %v13105_v18 }
 0x8e7   : > { %v21912_v23 = vsub.f32 %v21818_v53, %v13151_v17  ;;  %v13184_v26 = vmul.f32 %v21909_v52, %v21909_v52 }
 0x8e9   : > { %v13202_v33 = vsel %vm741_vm1, %v13184_v26, 0.0  ;;  %v13183_v54 = vmul.f32 %v21912_v23, %v21912_v23 }
 0x8ea   : > { %13203 = vadd.xlane.f32.xlu1 %v13202_v33 }
 0x8eb   : > { %v13199_v47 = vsel %vm741_vm1, %v13183_v54, 0.0 }
 0x8ec   : > { %13200 = vadd.xlane.f32.xlu0 %v13199_v47 }
 0x8fb   : > { %v13114_v40 = vpop.xlane.xlu0 %13113 }
 0x8fc   : > { %v13154_v44 = vmul.f32 0.03125, %v13114_v40 }
 0x8fe   : > { %v21921_v61 = vsub.f32 %v21826_v49, %v13154_v44 }
 0x8ff   : > { %v13111_v31 = vpop.xlane.xlu0 %13110 }
 0x900   : > { %v13153_v42 = vmul.f32 0.03125, %v13111_v31  ;;  %v13186_v24 = vmul.f32 %v21921_v61, %v21921_v61 }
 0x902   : > { %v21926_v45 = vsub.f32 %v21830_v58, %v13153_v42  ;;  %v13208_v32 = vsel %vm741_vm1, %v13186_v24, 0.0 }
 0x903   : > { %13209 = vadd.xlane.f32.xlu1 %v13208_v32 }
 0x904   : > { %v13185_v0 = vmul.f32 %v21926_v45, %v21926_v45 }
 0x906   : > { %v13205_v7 = vsel %vm741_vm1, %v13185_v0, 0.0 }
 0x907   : > { %13206 = vadd.xlane.f32.xlu0 %v13205_v7 }
 0x913   : > { %v13120_v63 = vpop.xlane.xlu1 %13119 }
 0x914   : > { %v13156_v22 = vmul.f32 0.03125, %v13120_v63 }
 0x915   : > { %v13117_v28 = vpop.xlane.xlu0 %13116 }
 0x916   : > { %v21935_v10 = vsub.f32 %v21838_v56, %v13156_v22  ;;  %v13155_v12 = vmul.f32 0.03125, %v13117_v28 }
 0x918   : > { %v21938_v55 = vsub.f32 %v21842_v15, %v13155_v12  ;;  %v13188_v2 = vmul.f32 %v21935_v10, %v21935_v10 }
 0x91a   : > { %v13214_v14 = vsel %vm741_vm1, %v13188_v2, 0.0  ;;  %v13187_v29 = vmul.f32 %v21938_v55, %v21938_v55 }
 0x91b   : > { %13215 = vadd.xlane.f32.xlu1 %v13214_v14 }
 0x91c   : > { %v13211_v30 = vsel %vm741_vm1, %v13187_v29, 0.0 }
 0x91d   : > { %13212 = vadd.xlane.f32.xlu0 %v13211_v30 }
 0x924   : > { %v13126_v5 = vpop.xlane.xlu1 %13125 }
 0x925   : > { %v13158_v60 = vmul.f32 0.03125, %v13126_v5 }
 0x926   : > { %v13123_v46 = vpop.xlane.xlu0 %13122 }
 0x927   : > { %v21947_v38 = vsub.f32 %v21850_v8, %v13158_v60  ;;  %v13157_v19 = vmul.f32 0.03125, %v13123_v46 }
 0x929   : > { %v21950_v13 = vsub.f32 %v21854_v4, %v13157_v19  ;;  %v13190_v25 = vmul.f32 %v21947_v38, %v21947_v38 }
 0x92b   : > { %v13220_v1 = vsel %vm741_vm1, %v13190_v25, 0.0  ;;  %v13189_v50 = vmul.f32 %v21950_v13, %v21950_v13 }
 0x92c   : > { %13221 = vadd.xlane.f32.xlu1 %v13220_v1 }
 0x92d   : > { %v13217_v59 = vsel %vm741_vm1, %v13189_v50, 0.0 }
 0x92e   : > { %13218 = vadd.xlane.f32.xlu0 %v13217_v59 }
 0x930   : > { %v13132_v34 = vpop.xlane.xlu1 %13131 }
 0x931   : > { %v13160_v51 = vmul.f32 0.03125, %v13132_v34 }
 0x932   : > { %v13129_v37 = vpop.xlane.xlu0 %13128 }
 0x933   : > { %v21961_v20 = vsub.f32 %v21862_v43, %v13160_v51  ;;  %v13159_v27 = vmul.f32 0.03125, %v13129_v37 }
 0x935   : > { %v21964_v6 = vsub.f32 %v21866_v48, %v13159_v27  ;;  %v13192_v18 = vmul.f32 %v21961_v20, %v21961_v20 }
 0x937   : > { %v13226_v17 = vsel %vm741_vm1, %v13192_v18, 0.0  ;;  %v13191_v26 = vmul.f32 %v21964_v6, %v21964_v6 }
 0x938   : > { %13227 = vadd.xlane.f32.xlu1 %v13226_v17 }
 0x939   : > { %v13223_v33 = vsel %vm741_vm1, %v13191_v26, 0.0 }
 0x93a   : > { %13224 = vadd.xlane.f32.xlu0 %v13223_v33  ;;  %v22013_v33 = vld [vmem:[%s23347_s24] ss:$0 sm:$0xff] }
 0x93c   : > { %v13138_v54 = vpop.xlane.xlu1 %13137 }
 0x93d   : > { %v13162_v47 = vmul.f32 0.03125, %v13138_v54 }
 0x93e   : > { %v13135_v40 = vpop.xlane.xlu0 %13134 }
 0x93f   : > { %v21973_v44 = vsub.f32 %v21874_v41, %v13162_v47  ;;  %v13161_v31 = vmul.f32 0.03125, %v13135_v40 }
 0x941   : > { %v21976_v42 = vsub.f32 %v21878_v35, %v13161_v31  ;;  %v13194_v24 = vmul.f32 %v21973_v44, %v21973_v44 }
 0x943   : > { %v13232_v32 = vsel %vm741_vm1, %v13194_v24, 0.0  ;;  %v13193_v0 = vmul.f32 %v21976_v42, %v21976_v42  ;;  %v22023_v24 = vld [vmem:[%s23348_s28] ss:$0 sm:$0xff] }
 0x944   : > { %13233 = vadd.xlane.f32.xlu1 %v13232_v32 }
 0x945   : > { %v13229_v7 = vsel %vm741_vm1, %v13193_v0, 0.0 }
 0x946   : > { %13230 = vadd.xlane.f32.xlu0 %v13229_v7 }
 0x948   : > { %v13144_v63 = vpop.xlane.xlu1 %13143 }
 0x949   : > { %v13164_v22 = vmul.f32 0.03125, %v13144_v63 }
 0x94a   : > { %v13141_v28 = vpop.xlane.xlu0 %13140 }
 0x94b   : > { %v21985_v9 = vsub.f32 %v21886_v21, %v13164_v22  ;;  %v13163_v57 = vmul.f32 0.03125, %v13141_v28 }
 0x94d   : > { %v21988_v12 = vsub.f32 %v21890_v39, %v13163_v57  ;;  %v13196_v2 = vmul.f32 %v21985_v9, %v21985_v9 }
 0x94f   : > { %v13238_v14 = vsel %vm741_vm1, %v13196_v2, 0.0  ;;  %v13195_v29 = vmul.f32 %v21988_v12, %v21988_v12 }
 0x950   : > { %13239 = vadd.xlane.f32.xlu1 %v13238_v14 }
 0x951   : > { %v13235_v30 = vsel %vm741_vm1, %v13195_v29, 0.0 }
 0x952   : > { %13236 = vadd.xlane.f32.xlu0 %v13235_v30 }
 0x954   : > { %v13150_v5 = vpop.xlane.xlu1 %13149 }
 0x955   : > { %v13166_v60 = vmul.f32 0.03125, %v13150_v5 }
 0x956   : > { %v13147_v46 = vpop.xlane.xlu0 %13146 }
 0x957   : > { %v21997_v19 = vsub.f32 %v21898_v62, %v13166_v60  ;;  %v13165_v25 = vmul.f32 0.03125, %v13147_v46 }
 0x959   : > { %v22000_v36 = vsub.f32 %v21902_v3, %v13165_v25  ;;  %v13198_v1 = vmul.f32 %v21997_v19, %v21997_v19 }
 0x95b   : > { %v13244_v50 = vsel %vm741_vm1, %v13198_v1, 0.0  ;;  %v13197_v11 = vmul.f32 %v22000_v36, %v22000_v36 }
 0x95c   : > { %13245 = vadd.xlane.f32.xlu1 %v13244_v50 }
 0x95d   : > { %v13241_v59 = vsel %vm741_vm1, %v13197_v11, 0.0 }
 0x95e   : > { %13242 = vadd.xlane.f32.xlu0 %v13241_v59 }
 0x973   : > { %v13204_v34 = vpop.xlane.xlu1 %13203 }
 0x974   : > { %v13248_v51 = vmul.f32 0.03125, %v13204_v34 }
 0x975   : > { %v13201_v37 = vpop.xlane.xlu0 %13200 }
 0x976   : > { %v13264_v27 = vadd.f32 1e-05, %v13248_v51  ;;  %v13247_v18 = vmul.f32 0.03125, %v13201_v37 }
 0x978   : > { %15755 = vrsqrt.f32 %v13264_v27  ;;  %v13263_v17 = vadd.f32 1e-05, %v13247_v18 }
 0x97a   : > { %15757 = vrsqrt.f32 %v13263_v17 }
 0x985   : > { %v15756_v26 = vpop.eup %15755 }
 0x986   : > { %v13296_v54 = vmul.f32 %v15756_v26, %v21909_v52 }
 0x987   : > { %v15758_v47 = vpop.eup %15757 }
 0x988   : > { %v13295_v40 = vmul.f32 %v15758_v47, %v21912_v23  ;;  %v13318_v31 = vmul.f32 %v22013_v33, %v13296_v54 }
 0x98a   : > { %v13317_v32 = vmul.f32 %v22013_v33, %v13295_v40  ;;  %v13340_v22 = vadd.f32 %v22023_v24, %v13318_v31 }
 0x98c   : > { %v13210_v0 = vpop.xlane.xlu1 %13209  ;;  %v13339_v7 = vadd.f32 %v22023_v24, %v13317_v32 }
 0x98d   : > { %v13250_v63 = vmul.f32 0.03125, %v13210_v0 }
 0x98e   : > { %15305 = vmatprep.mubr.msk.f32.mxu0 %vm741_vm1, %v13339_v7 }
 0x98f   : > { %v13266_v52 = vadd.f32 1e-05, %v13250_v63  ;;  %15306 = vmatmul.mubr.msk.f32.vlgmr.msra.gmra.mxu0 %vm741_vm1, %v13340_v22 }
 0x990   : > { %v13207_v23 = vpop.xlane.xlu0 %13206 }
 0x991   : > { %15759 = vrsqrt.f32 %v13266_v52  ;;  %v13249_v28 = vmul.f32 0.03125, %v13207_v23 }
 0x993   : > { %v13265_v57 = vadd.f32 1e-05, %v13249_v28 }
 0x995   : > { %15761 = vrsqrt.f32 %v13265_v57 }
 0x99e   : > { %v15760_v2 = vpop.eup %15759 }
 0x99f   : > { %v13298_v14 = vmul.f32 %v15760_v2, %v21921_v61 }
 0x9a1   : > { %v13320_v60 = vmul.f32 %v22013_v33, %v13298_v14 }
 0x9a2   : > { %v15762_v29 = vpop.eup %15761 }
 0x9a3   : > { %v13297_v30 = vmul.f32 %v15762_v29, %v21926_v45  ;;  %v13342_v34 = vadd.f32 %v22023_v24, %v13320_v60 }
 0x9a4   : > { %v13216_v5 = vpop.xlane.xlu1 %13215 }
 0x9a5   : > { %v13252_v46 = vmul.f32 0.03125, %v13216_v5  ;;  %v13319_v25 = vmul.f32 %v22013_v33, %v13297_v30 }
 0x9a6   : > { %v13213_v1 = vpop.xlane.xlu0 %13212 }
 0x9a7   : > { %v13268_v50 = vadd.f32 1e-05, %v13252_v46  ;;  %v13251_v11 = vmul.f32 0.03125, %v13213_v1  ;;  %v13341_v59 = vadd.f32 %v22023_v24, %v13319_v25 }
 0x9a9   : > { %15763 = vrsqrt.f32 %v13268_v50  ;;  %v13267_v51 = vadd.f32 1e-05, %v13251_v11  ;;  %15308 = vmatprep.mubr.msk.f32.mxu0 %vm741_vm1, %v13341_v59 }
 0x9aa   : > { %15309 = vmatmul.mubr.msk.f32.gmra.mxu0 %vm741_vm1, %v13342_v34 }
 0x9ab   : > { %15765 = vrsqrt.f32 %v13267_v51 }
 0x9b5   : > { %v13222_v61 = vpop.xlane.xlu1 %13221 }
 0x9b6   : > { %v15764_v45 = vpop.eup %15763  ;;  %v13254_v37 = vmul.f32 0.03125, %v13222_v61 }
 0x9b7   : > { %v13219_v27 = vpop.xlane.xlu0 %13218  ;;  %v13300_v18 = vmul.f32 %v15764_v45, %v21935_v10 }
 0x9b8   : > { %v15766_v17 = vpop.eup %15765  ;;  %v13270_v26 = vadd.f32 1e-05, %v13254_v37  ;;  %v13253_v54 = vmul.f32 0.03125, %v13219_v27 }
 0x9b9   : > { %v13299_v47 = vmul.f32 %v15766_v17, %v21938_v55  ;;  %v13322_v31 = vmul.f32 %v22013_v33, %v13300_v18 }
 0x9ba   : > { %15767 = vrsqrt.f32 %v13270_v26  ;;  %v13269_v40 = vadd.f32 1e-05, %v13253_v54 }
 0x9bb   : > { %v13321_v32 = vmul.f32 %v22013_v33, %v13299_v47  ;;  %v13344_v7 = vadd.f32 %v22023_v24, %v13322_v31 }
 0x9bc   : > { %15769 = vrsqrt.f32 %v13269_v40 }
 0x9bd   : > { %v13343_v0 = vadd.f32 %v22023_v24, %v13321_v32 }
 0x9bf   : > { %15311 = vmatprep.mubr.msk.f32.mxu0 %vm741_vm1, %v13343_v0 }
 0x9c0   : > { %15312 = vmatmul.mubr.msk.f32.gmra.mxu0 %vm741_vm1, %v13344_v7 }
 0x9c1   : > { %v13228_v10 = vpop.xlane.xlu1 %13227 }
 0x9c2   : > { %v13256_v63 = vmul.f32 0.03125, %v13228_v10 }
 0x9c3   : > { %v13225_v22 = vpop.xlane.xlu0 %13224 }
 0x9c4   : > { %v13272_v52 = vadd.f32 1e-05, %v13256_v63  ;;  %v13255_v55 = vmul.f32 0.03125, %v13225_v22 }
 0x9c6   : > { %15771 = vrsqrt.f32 %v13272_v52  ;;  %v13271_v23 = vadd.f32 1e-05, %v13255_v55 }
 0x9c7   : > { %v15768_v28 = vpop.eup %15767 }
 0x9c8   : > { %15773 = vrsqrt.f32 %v13271_v23  ;;  %v13302_v57 = vmul.f32 %v15768_v28, %v21947_v38 }
 0x9c9   : > { %v15770_v2 = vpop.eup %15769 }
 0x9ca   : > { %v13301_v14 = vmul.f32 %v15770_v2, %v21950_v13  ;;  %v13324_v29 = vmul.f32 %v22013_v33, %v13302_v57 }
 0x9cc   : > { %v13323_v30 = vmul.f32 %v22013_v33, %v13301_v14  ;;  %v13346_v1 = vadd.f32 %v22023_v24, %v13324_v29 }
 0x9cd   : > { %v13234_v5 = vpop.xlane.xlu1 %13233 }
 0x9ce   : > { %v13258_v60 = vmul.f32 0.03125, %v13234_v5  ;;  %v13345_v46 = vadd.f32 %v22023_v24, %v13323_v30 }
 0x9cf   : > { %v13231_v25 = vpop.xlane.xlu0 %13230 }
 0x9d0   : > { %v13274_v50 = vadd.f32 1e-05, %v13258_v60  ;;  %v13257_v11 = vmul.f32 0.03125, %v13231_v25  ;;  %15314 = vmatprep.mubr.msk.f32.mxu0 %vm741_vm1, %v13345_v46  ;;  %v13702_v46 = vld [vmem:[%s16092_s8 + $0x78] sm:$0xff] }
 0x9d1   : > { %15315 = vmatmul.mubr.msk.f32.gmra.mxu0 %vm741_vm1, %v13346_v1  ;;  %15329 = vmatprep.subr.mxu0 %v13702_v46 }
 0x9d2   : > { %15775 = vrsqrt.f32 %v13274_v50  ;;  %v13273_v38 = vadd.f32 1e-05, %v13257_v11  ;;  %15385 = vmatprep.subr.mxu1 %v13702_v46  ;;  %15330 = vmatpush3.msra.mxu0 %v13702_v46 }
 0x9d3   : > { %v15772_v13 = vpop.eup %15771  ;;  %15401 = vmatpush3.msra.mxu1 %v13702_v46 }
 0x9d4   : > { %15777 = vrsqrt.f32 %v13273_v38  ;;  %v13304_v59 = vmul.f32 %v15772_v13, %v21961_v20 }
 0x9d5   : > { %v15774_v34 = vpop.eup %15773 }
 0x9d6   : > { %v13303_v51 = vmul.f32 %v15774_v34, %v21964_v6  ;;  %v13326_v61 = vmul.f32 %v22013_v33, %v13304_v59  ;;  %v13700_v59 = vld [vmem:[%s16092_s8 + $0x68] sm:$0xff] }
 0x9d7   : > { %v13696_v34 = vld [vmem:[%s16092_s8 + $0x48] sm:$0xff] }
 0x9d8   : > { %v13325_v45 = vmul.f32 %v22013_v33, %v13303_v51  ;;  %v13348_v26 = vadd.f32 %v22023_v24, %v13326_v61  ;;  %v13695_v51 = vld [vmem:[%s16092_s8 + $0x40] sm:$0xff]  ;;  %v13694_v61 = vld [vmem:[%s16092_s8 + $0x38] sm:$0xff] }
 0x9d9   : > { %v13240_v37 = vpop.xlane.xlu1 %13239 }
 0x9da   : > { %v13260_v27 = vmul.f32 0.03125, %v13240_v37  ;;  %v13347_v18 = vadd.f32 %v22023_v24, %v13325_v45  ;;  %v13693_v45 = vld [vmem:[%s16092_s8 + $0x30] sm:$0xff]  ;;  %v13692_v37 = vld [vmem:[%s16092_s8 + $0x28] sm:$0xff] }
 0x9db   : > { %v13237_v17 = vpop.xlane.xlu0 %13236 }
 0x9dc   : > { %v13276_v54 = vadd.f32 1e-05, %v13260_v27  ;;  %v13259_v47 = vmul.f32 0.03125, %v13237_v17  ;;  %15317 = vmatprep.mubr.msk.f32.mxu0 %vm741_vm1, %v13347_v18  ;;  %v13691_v27 = vld [vmem:[%s16092_s8 + $0x20] sm:$0xff]  ;;  %v13690_v18 = vld [vmem:[%s16092_s8 + $0x18] sm:$0xff]  ;;  %v13689_v17 = vld [vmem:[%s16092_s8 + $0x10] sm:$0xff] }
 0x9dd   : > { %15318 = vmatmul.mubr.msk.f32.gmra.mxu0 %vm741_vm1, %v13348_v26  ;;  %v13688_v26 = vld [vmem:[%s16092_s8 + $0x8] sm:$0xff] }
 0x9de   : > { %15779 = vrsqrt.f32 %v13276_v54  ;;  %v13275_v20 = vadd.f32 1e-05, %v13259_v47  ;;  %v13687_v54 = vld [vmem:[%s16092_s8] sm:$0xff] }
 0x9df   : > { %v15776_v6 = vpop.eup %15775  ;;  %v22107_v47 = vld [vmem:[%s672_s25] ss:$0 sm:$0xff] }
 0x9e0   : > { %15781 = vrsqrt.f32 %v13275_v20  ;;  %v13306_v40 = vmul.f32 %v15776_v6, %v21973_v44 }
 0x9e1   : > { %v15778_v31 = vpop.eup %15777 }
 0x9e2   : > { %v13305_v32 = vmul.f32 %v15778_v31, %v21976_v42  ;;  %v13328_v0 = vmul.f32 %v22013_v33, %v13306_v40 }
 0x9e4   : > { %v13327_v7 = vmul.f32 %v22013_v33, %v13305_v32  ;;  %v13350_v55 = vadd.f32 %v22023_v24, %v13328_v0 }
 0x9e5   : > { %v13246_v10 = vpop.xlane.xlu1 %13245 }
 0x9e6   : > { %v13262_v63 = vmul.f32 0.03125, %v13246_v10  ;;  %v13349_v22 = vadd.f32 %v22023_v24, %v13327_v7 }
 0x9e7   : > { %v13243_v52 = vpop.xlane.xlu0 %13242 }
 0x9e8   : > { %v13278_v23 = vadd.f32 1e-05, %v13262_v63  ;;  %v13261_v28 = vmul.f32 0.03125, %v13243_v52  ;;  %15320 = vmatprep.mubr.msk.f32.mxu0 %vm741_vm1, %v13349_v22 }
 0x9e9   : > { %15321 = vmatmul.mubr.msk.f32.gmra.mxu0 %vm741_vm1, %v13350_v55 }
 0x9ea   : > { %15783 = vrsqrt.f32 %v13278_v23  ;;  %v13277_v44 = vadd.f32 1e-05, %v13261_v28 }
 0x9eb   : > { %v15780_v42 = vpop.eup %15779 }
 0x9ec   : > { %15785 = vrsqrt.f32 %v13277_v44  ;;  %v13308_v57 = vmul.f32 %v15780_v42, %v21985_v9 }
 0x9ed   : > { %v15782_v2 = vpop.eup %15781 }
 0x9ee   : > { %v13307_v14 = vmul.f32 %v15782_v2, %v21988_v12  ;;  %v13330_v29 = vmul.f32 %v22013_v33, %v13308_v57 }
 0x9f0   : > { %v13329_v30 = vmul.f32 %v22013_v33, %v13307_v14  ;;  %v13352_v60 = vadd.f32 %v22023_v24, %v13330_v29 }
 0x9f2   : > { %v13351_v5 = vadd.f32 %v22023_v24, %v13329_v30 }
 0x9f4   : > { %15323 = vmatprep.mubr.msk.f32.mxu0 %vm741_vm1, %v13351_v5 }
 0x9f5   : > { %15324 = vmatmul.mubr.msk.f32.gmra.mxu0 %vm741_vm1, %v13352_v60 }
 0x9f7   : > { %v15784_v25 = vpop.eup %15783 }
 0x9f8   : > { %v13310_v9 = vmul.f32 %v15784_v25, %v21997_v19  ;;  %v13701_v19 = vld [vmem:[%s16092_s8 + $0x70] sm:$0xff] }
 0x9f9   : > { %v15786_v12 = vpop.eup %15785  ;;  %15331 = vmatprep.subr.mxu0 %v13701_v19  ;;  %15386 = vmatprep.subr.mxu1 %v13701_v19 }
 0x9fa   : > { %v13309_v1 = vmul.f32 %v15786_v12, %v22000_v36  ;;  %v13332_v50 = vmul.f32 %v22013_v33, %v13310_v9  ;;  %15332 = vmatpush3.msra.mxu0 %v13701_v19  ;;  %v13699_v36 = vld [vmem:[%s16092_s8 + $0x60] sm:$0xff]  ;;  %15402 = vmatpush3.msra.mxu1 %v13701_v19 }
 0x9fb   : > { %15333 = vmatprep.subr.mxu0 %v13700_v59  ;;  %15387 = vmatprep.subr.mxu1 %v13700_v59 }
 0x9fc   : > { %v13331_v11 = vmul.f32 %v22013_v33, %v13309_v1  ;;  %v13354_v13 = vadd.f32 %v22023_v24, %v13332_v50  ;;  %15334 = vmatpush3.msra.mxu0 %v13700_v59  ;;  %v13698_v33 = vld [vmem:[%s16092_s8 + $0x58] sm:$0xff]  ;;  %15403 = vmatpush3.msra.mxu1 %v13700_v59 }
 0x9fd   : > { %15335 = vmatprep.subr.mxu0 %v13699_v36  ;;  %15388 = vmatprep.subr.mxu1 %v13699_v36 }
 0x9fe   : > { %v13353_v38 = vadd.f32 %v22023_v24, %v13331_v11  ;;  %15336 = vmatpush3.msra.mxu0 %v13699_v36  ;;  %v13697_v24 = vld [vmem:[%s16092_s8 + $0x50] sm:$0xff]  ;;  %15404 = vmatpush3.msra.mxu1 %v13699_v36 }
 0x9ff   : > { %15337 = vmatprep.subr.mxu0 %v13698_v33  ;;  %15389 = vmatprep.subr.mxu1 %v13698_v33 }
 0xa00   : > { %15326 = vmatprep.mubr.msk.f32.mxu0 %vm741_vm1, %v13353_v38  ;;  %15338 = vmatpush3.msra.mxu0 %v13698_v33 }
 0xa01   : > { %15327 = vmatmul.mubr.msk.f32.gmra.mxu0 %vm741_vm1, %v13354_v13  ;;  %15405 = vmatpush3.msra.mxu1 %v13698_v33 }
 0xa02   : > { %15339 = vmatprep.subr.mxu0 %v13697_v24  ;;  %15390 = vmatprep.subr.mxu1 %v13697_v24 }
 0xa03   : > { %15340 = vmatpush3.msra.mxu0 %v13697_v24  ;;  %15406 = vmatpush3.msra.mxu1 %v13697_v24 }
 0xa04   : > { %15341 = vmatprep.subr.mxu0 %v13696_v34  ;;  %15391 = vmatprep.subr.mxu1 %v13696_v34 }
 0xa05   : > { %15342 = vmatpush3.msra.mxu0 %v13696_v34  ;;  %15407 = vmatpush3.msra.mxu1 %v13696_v34 }
 0xa06   : > { %15343 = vmatprep.subr.mxu0 %v13695_v51  ;;  %15392 = vmatprep.subr.mxu1 %v13695_v51 }
 0xa07   : > { %15344 = vmatpush3.msra.mxu0 %v13695_v51  ;;  %15408 = vmatpush3.msra.mxu1 %v13695_v51 }
 0xa08   : > { %15345 = vmatprep.subr.mxu0 %v13694_v61  ;;  %15393 = vmatprep.subr.mxu1 %v13694_v61 }
 0xa09   : > { %15346 = vmatpush3.msra.mxu0 %v13694_v61  ;;  %15409 = vmatpush3.msra.mxu1 %v13694_v61 }
 0xa0a   : > { %15347 = vmatprep.subr.mxu0 %v13693_v45  ;;  %15394 = vmatprep.subr.mxu1 %v13693_v45 }
 0xa0b   : > { %15348 = vmatpush3.msra.mxu0 %v13693_v45  ;;  %15410 = vmatpush3.msra.mxu1 %v13693_v45 }
 0xa0c   : > { %15349 = vmatprep.subr.mxu0 %v13692_v37  ;;  %15395 = vmatprep.subr.mxu1 %v13692_v37 }
 0xa0d   : > { %15350 = vmatpush3.msra.mxu0 %v13692_v37  ;;  %15411 = vmatpush3.msra.mxu1 %v13692_v37 }
 0xa0e   : > { %15351 = vmatprep.subr.mxu0 %v13691_v27  ;;  %15396 = vmatprep.subr.mxu1 %v13691_v27 }
 0xa0f   : > { %15352 = vmatpush3.msra.mxu0 %v13691_v27  ;;  %15412 = vmatpush3.msra.mxu1 %v13691_v27 }
 0xa10   : > { %15353 = vmatprep.subr.mxu0 %v13690_v18  ;;  %15397 = vmatprep.subr.mxu1 %v13690_v18 }
 0xa11   : > { %15354 = vmatpush3.msra.mxu0 %v13690_v18  ;;  %15413 = vmatpush3.msra.mxu1 %v13690_v18 }
 0xa12   : > { %15355 = vmatprep.subr.mxu0 %v13689_v17  ;;  %15398 = vmatprep.subr.mxu1 %v13689_v17 }
 0xa13   : > { %15356 = vmatpush3.msra.mxu0 %v13689_v17  ;;  %15414 = vmatpush3.msra.mxu1 %v13689_v17 }
 0xa14   : > { %15357 = vmatprep.subr.mxu0 %v13688_v26  ;;  %15399 = vmatprep.subr.mxu1 %v13688_v26 }
 0xa15   : > { %15358 = vmatpush3.msra.mxu0 %v13688_v26  ;;  %15415 = vmatpush3.msra.mxu1 %v13688_v26 }
 0xa16   : > { %15359 = vmatprep.subr.mxu0 %v13687_v54  ;;  %15400 = vmatprep.subr.mxu1 %v13687_v54 }
 0xa17   : > { %15360 = vmatpush3.msra.mxu0 %v13687_v54  ;;  %15416 = vmatpush3.msra.mxu1 %v13687_v54 }
 0xa4f   : > { %v15307_v20 = vpop.f32.mrf.mxu0 }
 0xa50   : > { %v13486_v6 = vadd.f32 %v15307_v20, %v22107_v47 }
 0xa51   : > { %v13480_v40 = vpop.f32.mrf.mxu0 }
 0xa52   : > { %v14413_v31 = vmul.f32 -1.702, %v13486_v6  ;;  %v13481_v32 = vadd.f32 %v22107_v47, %v13480_v40 }
 0xa54   : > { %v13593_v0 = vmul.f32 1.442695, %v14413_v31  ;;  %v14412_v7 = vmul.f32 -1.702, %v13481_v32 }
 0xa56   : > { %15787 = vpow2.f32 %v13593_v0  ;;  %v13591_v10 = vmul.f32 1.442695, %v14412_v7 }
 0xa58   : > { %15789 = vpow2.f32 %v13591_v10 }
 0xa63   : > { %v15788_v63 = vpop.eup %15787 }
 0xa64   : > { %v13624_v22 = vadd.f32 1.0, %v15788_v63 }
 0xa65   : > { %v15790_v52 = vpop.eup %15789 }
 0xa66   : > { %v13623_v55 = vadd.f32 1.0, %v15790_v52  ;;  %15791 = vrcp.f32 %v13624_v22 }
 0xa68   : > { %15793 = vrcp.f32 %v13623_v55 }
 0xa6a   : > { %v15310_v23 = vpop.f32.mrf.mxu0 }
 0xa6b   : > { %v13496_v28 = vadd.f32 %v15310_v23, %v22107_v47 }
 0xa6c   : > { %v13490_v44 = vpop.f32.mrf.mxu0 }
 0xa6d   : > { %v14415_v42 = vmul.f32 -1.702, %v13496_v28  ;;  %v13491_v57 = vadd.f32 %v22107_v47, %v13490_v44 }
 0xa6f   : > { %v13597_v2 = vmul.f32 1.442695, %v14415_v42  ;;  %v14414_v14 = vmul.f32 -1.702, %v13491_v57 }
 0xa71   : > { %15795 = vpow2.f32 %v13597_v2  ;;  %v13595_v29 = vmul.f32 1.442695, %v14414_v14 }
 0xa73   : > { %15797 = vpow2.f32 %v13595_v29  ;;  %v15792_v30 = vpop.eup %15791 }
 0xa74   : > { %v13672_v46 = vmul.f32 %v15792_v30, %v13486_v6 }
 0xa75   : > { %v15794_v5 = vpop.eup %15793 }
 0xa76   : > { %v13671_v60 = vmul.f32 %v15794_v5, %v13481_v32 }
 0xa78   : > { %15361 = vmatprep.mubr.f32.mxu0 %v13671_v60 }
 0xa79   : > { %15362 = vmatmul.mubr.f32.vlgmr.msra.gmra.mxu0 %v13672_v46 }
 0xa7e   : > { %v15796_v25 = vpop.eup %15795 }
 0xa7f   : > { %v13626_v9 = vadd.f32 1.0, %v15796_v25 }
 0xa80   : > { %v15798_v12 = vpop.eup %15797  ;;  %v15313_v1 = vpop.f32.mrf.mxu0 }
 0xa81   : > { %v13625_v50 = vadd.f32 1.0, %v15798_v12  ;;  %v13506_v11 = vadd.f32 %v15313_v1, %v22107_v47  ;;  %15799 = vrcp.f32 %v13626_v9 }
 0xa82   : > { %v13500_v38 = vpop.f32.mrf.mxu0 }
 0xa83   : > { %15801 = vrcp.f32 %v13625_v50  ;;  %v14417_v13 = vmul.f32 -1.702, %v13506_v11  ;;  %v13501_v19 = vadd.f32 %v22107_v47, %v13500_v38 }
 0xa85   : > { %v13601_v59 = vmul.f32 1.442695, %v14417_v13  ;;  %v14416_v36 = vmul.f32 -1.702, %v13501_v19 }
 0xa87   : > { %15803 = vpow2.f32 %v13601_v59  ;;  %v13599_v33 = vmul.f32 1.442695, %v14416_v36 }
 0xa89   : > { %15805 = vpow2.f32 %v13599_v33 }
 0xa8e   : > { %v15800_v24 = vpop.eup %15799 }
 0xa8f   : > { %v13674_v45 = vmul.f32 %v15800_v24, %v13496_v28 }
 0xa90   : > { %v15802_v34 = vpop.eup %15801 }
 0xa91   : > { %v13673_v51 = vmul.f32 %v15802_v34, %v13491_v57  ;;  %v15316_v61 = vpop.f32.mrf.mxu0 }
 0xa92   : > { %v22116_v37 = vadd.f32 %v15316_v61, %v22107_v47 }
 0xa93   : > { %v13510_v27 = vpop.f32.mrf.mxu0  ;;  %15364 = vmatprep.mubr.f32.mxu0 %v13673_v51 }
 0xa94   : > { %v15804_v18 = vpop.eup %15803  ;;  %v14419_v17 = vmul.f32 -1.702, %v22116_v37  ;;  %v13511_v26 = vadd.f32 %v22107_v47, %v13510_v27  ;;  %15365 = vmatmul.mubr.f32.gmra.mxu0 %v13674_v45 }
 0xa95   : > { %v13628_v54 = vadd.f32 1.0, %v15804_v18 }
 0xa96   : > { %v15806_v20 = vpop.eup %15805  ;;  %v13605_v6 = vmul.f32 1.442695, %v14419_v17  ;;  %v14418_v40 = vmul.f32 -1.702, %v13511_v26 }
 0xa97   : > { %15807 = vrcp.f32 %v13628_v54  ;;  %v13627_v31 = vadd.f32 1.0, %v15806_v20 }
 0xa98   : > { %15809 = vpow2.f32 %v13605_v6  ;;  %v13603_v32 = vmul.f32 1.442695, %v14418_v40 }
 0xa99   : > { %15811 = vrcp.f32 %v13627_v31 }
 0xa9a   : > { %15813 = vpow2.f32 %v13603_v32 }
 0xa9d   : > { %v15319_v0 = vpop.f32.mrf.mxu0 }
 0xa9e   : > { %v22121_v7 = vadd.f32 %v15319_v0, %v22107_v47 }
 0xa9f   : > { %v13520_v10 = vpop.f32.mrf.mxu0 }
 0xaa0   : > { %v14421_v63 = vmul.f32 -1.702, %v22121_v7  ;;  %v13521_v22 = vadd.f32 %v22107_v47, %v13520_v10 }
 0xaa2   : > { %v13609_v52 = vmul.f32 1.442695, %v14421_v63  ;;  %v14420_v55 = vmul.f32 -1.702, %v13521_v22 }
 0xaa4   : > { %v15808_v23 = vpop.eup %15807  ;;  %15815 = vpow2.f32 %v13609_v52  ;;  %v13607_v28 = vmul.f32 1.442695, %v14420_v55 }
 0xaa5   : > { %v15810_v44 = vpop.eup %15809  ;;  %v13676_v29 = vmul.f32 %v15808_v23, %v13506_v11 }
 0xaa6   : > { %v15812_v42 = vpop.eup %15811  ;;  %v13630_v57 = vadd.f32 1.0, %v15810_v44  ;;  %15817 = vpow2.f32 %v13607_v28 }
 0xaa7   : > { %v15814_v2 = vpop.eup %15813  ;;  %v13675_v14 = vmul.f32 %v15812_v42, %v13501_v19 }
 0xaa8   : > { %v13629_v30 = vadd.f32 1.0, %v15814_v2  ;;  %15819 = vrcp.f32 %v13630_v57 }
 0xaa9   : > { %v15322_v5 = vpop.f32.mrf.mxu0  ;;  %15367 = vmatprep.mubr.f32.mxu0 %v13675_v14 }
 0xaaa   : > { %15821 = vrcp.f32 %v13629_v30  ;;  %v22126_v60 = vadd.f32 %v15322_v5, %v22107_v47  ;;  %15368 = vmatmul.mubr.f32.gmra.mxu0 %v13676_v29 }
 0xaab   : > { %v13530_v46 = vpop.f32.mrf.mxu0 }
 0xaac   : > { %v14423_v25 = vmul.f32 -1.702, %v22126_v60  ;;  %v13531_v9 = vadd.f32 %v22107_v47, %v13530_v46 }
 0xaae   : > { %v13613_v12 = vmul.f32 1.442695, %v14423_v25  ;;  %v14422_v1 = vmul.f32 -1.702, %v13531_v9 }
 0xab0   : > { %15823 = vpow2.f32 %v13613_v12  ;;  %v13611_v50 = vmul.f32 1.442695, %v14422_v1 }
 0xab1   : > { %v15816_v38 = vpop.eup %15815 }
 0xab2   : > { %v13632_v11 = vadd.f32 1.0, %v15816_v38  ;;  %15825 = vpow2.f32 %v13611_v50 }
 0xab3   : > { %v15818_v13 = vpop.eup %15817 }
 0xab4   : > { %v13631_v19 = vadd.f32 1.0, %v15818_v13  ;;  %15827 = vrcp.f32 %v13632_v11 }
 0xab5   : > { %v15325_v59 = vpop.f32.mrf.mxu0  ;;  %v15820_v36 = vpop.eup %15819 }
 0xab6   : > { %15829 = vrcp.f32 %v13631_v19  ;;  %v13546_v33 = vadd.f32 %v15325_v59, %v22107_v47  ;;  %v13678_v27 = vmul.f32 %v15820_v36, %v22116_v37  ;;  %v14428_v59 = vld [vmem:[%s680_s7] ss:$0 sm:$0xff] }
 0xab7   : > { %v15822_v24 = vpop.eup %15821  ;;  %v13540_v34 = vpop.f32.mrf.mxu0 }
 0xab8   : > { %v13677_v51 = vmul.f32 %v15822_v24, %v13511_v26  ;;  %v14425_v61 = vmul.f32 -1.702, %v13546_v33  ;;  %v13541_v45 = vadd.f32 %v22107_v47, %v13540_v34 }
 0xaba   : > { %v13617_v18 = vmul.f32 1.442695, %v14425_v61  ;;  %v14424_v17 = vmul.f32 -1.702, %v13541_v45  ;;  %15370 = vmatprep.mubr.f32.mxu1 %v13677_v51 }
 0xabb   : > { %15371 = vmatmul.mubr.f32.vlgmr.msra.gmra.mxu1 %v13678_v27 }
 0xabc   : > { %15831 = vpow2.f32 %v13617_v18  ;;  %v13615_v54 = vmul.f32 1.442695, %v14424_v17 }
 0xabd   : > { %v15824_v20 = vpop.eup %15823 }
 0xabe   : > { %v13634_v6 = vadd.f32 1.0, %v15824_v20  ;;  %15833 = vpow2.f32 %v13615_v54 }
 0xabf   : > { %v15826_v40 = vpop.eup %15825 }
 0xac0   : > { %v13633_v31 = vadd.f32 1.0, %v15826_v40  ;;  %15835 = vrcp.f32 %v13634_v6 }
 0xac1   : > { %v15328_v32 = vpop.f32.mrf.mxu0  ;;  %v15828_v0 = vpop.eup %15827 }
 0xac2   : > { %15837 = vrcp.f32 %v13633_v31  ;;  %v13556_v26 = vadd.f32 %v15328_v32, %v22107_v47  ;;  %v13680_v23 = vmul.f32 %v15828_v0, %v22121_v7 }
 0xac3   : > { %v15830_v10 = vpop.eup %15829  ;;  %v13550_v63 = vpop.f32.mrf.mxu0 }
 0xac4   : > { %v13679_v37 = vmul.f32 %v15830_v10, %v13521_v22  ;;  %v14427_v52 = vmul.f32 -1.702, %v13556_v26  ;;  %v13551_v55 = vadd.f32 %v22107_v47, %v13550_v63 }
 0xac6   : > { %v13621_v28 = vmul.f32 1.442695, %v14427_v52  ;;  %v14426_v44 = vmul.f32 -1.702, %v13551_v55  ;;  %15373 = vmatprep.mubr.f32.mxu1 %v13679_v37 }
 0xac7   : > { %15374 = vmatmul.mubr.f32.gmra.mxu1 %v13680_v23 }
 0xac8   : > { %15839 = vpow2.f32 %v13621_v28  ;;  %v13619_v42 = vmul.f32 1.442695, %v14426_v44 }
 0xac9   : > { %v15832_v57 = vpop.eup %15831 }
 0xaca   : > { %v13636_v2 = vadd.f32 1.0, %v15832_v57  ;;  %15841 = vpow2.f32 %v13619_v42 }
 0xacb   : > { %v15834_v14 = vpop.eup %15833 }
 0xacc   : > { %v13635_v29 = vadd.f32 1.0, %v15834_v14  ;;  %15843 = vrcp.f32 %v13636_v2 }
 0xacd   : > { %v15836_v30 = vpop.eup %15835 }
 0xace   : > { %15845 = vrcp.f32 %v13635_v29  ;;  %v13682_v47 = vmul.f32 %v15836_v30, %v22126_v60 }
 0xacf   : > { %v15838_v22 = vpop.eup %15837 }
 0xad0   : > { %v13681_v5 = vmul.f32 %v15838_v22, %v13531_v9 }
 0xad2   : > { %15376 = vmatprep.mubr.f32.mxu1 %v13681_v5 }
 0xad3   : > { %15377 = vmatmul.mubr.f32.gmra.mxu1 %v13682_v47 }
 0xad5   : > { %v15840_v7 = vpop.eup %15839 }
 0xad6   : > { %v13638_v46 = vadd.f32 1.0, %v15840_v7 }
 0xad7   : > { %v15842_v25 = vpop.eup %15841 }
 0xad8   : > { %v13637_v12 = vadd.f32 1.0, %v15842_v25  ;;  %15847 = vrcp.f32 %v13638_v46 }
 0xad9   : > { %v15844_v1 = vpop.eup %15843 }
 0xada   : > { %15849 = vrcp.f32 %v13637_v12  ;;  %v13684_v11 = vmul.f32 %v15844_v1, %v13546_v33 }
 0xadb   : > { %v15846_v50 = vpop.eup %15845 }
 0xadc   : > { %v13683_v38 = vmul.f32 %v15846_v50, %v13541_v45 }
 0xade   : > { %15379 = vmatprep.mubr.f32.mxu1 %v13683_v38 }
 0xadf   : > { %15380 = vmatmul.mubr.f32.gmra.mxu1 %v13684_v11 }
 0xae5   : > { %v15848_v9 = vpop.eup %15847 }
 0xae6   : > { %v13686_v19 = vmul.f32 %v15848_v9, %v13556_v26 }
 0xae7   : > { %v15850_v13 = vpop.eup %15849 }
 0xae8   : > { %v13685_v60 = vmul.f32 %v15850_v13, %v13551_v55 }
 0xaea   : > { %15382 = vmatprep.mubr.f32.mxu1 %v13685_v60 }
 0xaeb   : > { %15383 = vmatmul.mubr.f32.gmra.mxu1 %v13686_v19 }
 0xb39   : > { %v15363_v36 = vpop.f32.mrf.mxu0 }
 0xb3a   : > { %v13782_v24 = vadd.f32 %v15363_v36, %v14428_v59 }
 0xb3b   : > { %v13776_v34 = vpop.f32.mrf.mxu0 }
 0xb3c   : > { %v13856_v33 = vadd.f32 %v13782_v24, %v21814_v16  ;;  %v13777_v51 = vadd.f32 %v14428_v59, %v13776_v34 }
 0xb3e   : > { %13872 = vst.msk [vmem:[%s16097_s1 + $0x8] sm:$0xff] %vm741_vm1, %v13856_v33  ;;  %v13855_v61 = vadd.f32 %v13777_v51, %v21818_v53 }
 0xb40   : > { %13871 = vst.msk [vmem:[%s16097_s1] sm:$0xff] %vm741_vm1, %v13855_v61 }
 0xb54   : > { %v15366_v45 = vpop.f32.mrf.mxu0 }
 0xb55   : > { %v13792_v27 = vadd.f32 %v15366_v45, %v14428_v59 }
 0xb56   : > { %v13786_v18 = vpop.f32.mrf.mxu0 }
 0xb57   : > { %v13858_v17 = vadd.f32 %v13792_v27, %v21826_v49  ;;  %v13787_v54 = vadd.f32 %v14428_v59, %v13786_v18 }
 0xb59   : > { %13874 = vst.msk [vmem:[%s16097_s1 + $0x18] sm:$0xff] %vm741_vm1, %v13858_v17  ;;  %v13857_v16 = vadd.f32 %v13787_v54, %v21830_v58 }
 0xb5b   : > { %13873 = vst.msk [vmem:[%s16097_s1 + $0x10] sm:$0xff] %vm741_vm1, %v13857_v16 }
 0xb6a   : > { %v15369_v20 = vpop.f32.mrf.mxu0 }
 0xb6b   : > { %v13802_v6 = vadd.f32 %v15369_v20, %v14428_v59 }
 0xb6c   : > { %v13796_v53 = vpop.f32.mrf.mxu0 }
 0xb6d   : > { %v13860_v40 = vadd.f32 %v13802_v6, %v21838_v56  ;;  %v13797_v31 = vadd.f32 %v14428_v59, %v13796_v53 }
 0xb6f   : > { %13876 = vst.msk [vmem:[%s16097_s1 + $0x28] sm:$0xff] %vm741_vm1, %v13860_v40  ;;  %v13859_v49 = vadd.f32 %v13797_v31, %v21842_v15 }
 0xb71   : > { %13875 = vst.msk [vmem:[%s16097_s1 + $0x20] sm:$0xff] %vm741_vm1, %v13859_v49 }
 0xb7b   : > { %v15372_v32 = vpop.f32.mrf.mxu1 }
 0xb7c   : > { %v13812_v0 = vadd.f32 %v15372_v32, %v14428_v59 }
 0xb7d   : > { %v13806_v58 = vpop.f32.mrf.mxu1 }
 0xb7e   : > { %v13862_v26 = vadd.f32 %v13812_v0, %v21850_v8  ;;  %v13807_v10 = vadd.f32 %v14428_v59, %v13806_v58 }
 0xb80   : > { %13878 = vst.msk [vmem:[%s16097_s1 + $0x38] sm:$0xff] %vm741_vm1, %v13862_v26  ;;  %v13861_v56 = vadd.f32 %v13807_v10, %v21854_v4 }
 0xb82   : > { %13877 = vst.msk [vmem:[%s16097_s1 + $0x30] sm:$0xff] %vm741_vm1, %v13861_v56 }
 0xb87   : > { %v15375_v63 = vpop.f32.mrf.mxu1 }
 0xb88   : > { %v13822_v37 = vadd.f32 %v15375_v63, %v14428_v59 }
 0xb89   : > { %v13816_v15 = vpop.f32.mrf.mxu1 }
 0xb8a   : > { %v13864_v52 = vadd.f32 %v13822_v37, %v21862_v43  ;;  %v13817_v55 = vadd.f32 %v14428_v59, %v13816_v15 }
 0xb8c   : > { %13880 = vst.msk [vmem:[%s16097_s1 + $0x48] sm:$0xff] %vm741_vm1, %v13864_v52  ;;  %v13863_v8 = vadd.f32 %v13817_v55, %v21866_v48 }
 0xb8e   : > { %13879 = vst.msk [vmem:[%s16097_s1 + $0x40] sm:$0xff] %vm741_vm1, %v13863_v8 }
 0xb93   : > { %v15378_v23 = vpop.f32.mrf.mxu1 }
 0xb94   : > { %v13832_v28 = vadd.f32 %v15378_v23, %v14428_v59 }
 0xb95   : > { %v13826_v4 = vpop.f32.mrf.mxu1 }
 0xb96   : > { %v13866_v44 = vadd.f32 %v13832_v28, %v21874_v41  ;;  %v13827_v42 = vadd.f32 %v14428_v59, %v13826_v4 }
 0xb98   : > { %13882 = vst.msk [vmem:[%s16097_s1 + $0x58] sm:$0xff] %vm741_vm1, %v13866_v44  ;;  %v13865_v43 = vadd.f32 %v13827_v42, %v21878_v35 }
 0xb9a   : > { %13881 = vst.msk [vmem:[%s16097_s1 + $0x50] sm:$0xff] %vm741_vm1, %v13865_v43 }
 0xb9f   : > { %v15381_v57 = vpop.f32.mrf.mxu1 }
 0xba0   : > { %v13842_v2 = vadd.f32 %v15381_v57, %v14428_v59 }
 0xba1   : > { %v13836_v48 = vpop.f32.mrf.mxu1 }
 0xba2   : > { %v13868_v14 = vadd.f32 %v13842_v2, %v21886_v21  ;;  %v13837_v29 = vadd.f32 %v14428_v59, %v13836_v48 }
 0xba4   : > { %13884 = vst.msk [vmem:[%s16097_s1 + $0x68] sm:$0xff] %vm741_vm1, %v13868_v14  ;;  %v13867_v30 = vadd.f32 %v13837_v29, %v21890_v39 }
 0xba6   : > { %13883 = vst.msk [vmem:[%s16097_s1 + $0x60] sm:$0xff] %vm741_vm1, %v13867_v30 }
 0xbab   : > { %v15384_v41 = vpop.f32.mrf.mxu1 }
 0xbac   : > { %v13852_v22 = vadd.f32 %v15384_v41, %v14428_v59 }
 0xbad   : > { %v13846_v5 = vpop.f32.mrf.mxu1 }
 0xbae   : > { %v13870_v35 = vadd.f32 %v13852_v22, %v21898_v62  ;;  %v13847_v47 = vadd.f32 %v14428_v59, %v13846_v5 }
 0xbb0   : > { %13886 = vst.msk [vmem:[%s16097_s1 + $0x78] sm:$0xff] %vm741_vm1, %v13870_v35  ;;  %v13869_v7 = vadd.f32 %v13847_v47, %v21902_v3 }
 0xbb2   : > { %13885 = vst.msk [vmem:[%s16097_s1 + $0x70] sm:$0xff] %vm741_vm1, %v13869_v7 }
 0xbb3 PF: > { %s23350_s7 = sld [smem:[#allocation5_spill]] }
 0xbb4   : > { %s23351_s29 = sld [smem:[#allocation3_spill]] }
 0xbb5   : > { %s23352_s30 = sld [smem:[#allocation4_spill]] }
 0xbb6   : > { %s23353_s15 = sld [smem:[#allocation6_spill]] }
 0xbb7   : > { %s23354_s16 = sld [smem:[#allocation7_spill]] }
 0xbb9   : > { %s24_s17 = sadd.s32 1, %s23350_s7  }
 0xbba   : > { %p21_p8 = scmp.ge.s32.totalorder %s24_s17, 6  }
 0xbbc   :  { %23 = sbr.rel (!%p21_p8) target bundleno = 10 (0xa), region = 149 }

</bundles_post_ra>
